<compile_context>
chip_gen: v6e
topology: v6e:2x2x1
jax: 0.10.0
libtpu: 0.0.40
codegen_flags: <defaults>
</compile_context>

<pallas_src>
import functools

import jax
import jax.numpy as jnp
from jax.experimental import pallas as pl
from jax.experimental.pallas import tpu as pltpu

C_IN = 128
C_MID = 256
EPS = 1e-5
HALO = 16   # zero-halo rows each side of the padded bf16 activation buffers; 16 keeps the
            # (16,128)-tiled bf16 interior stores aligned (only 3 rows are needed for k=7/pad=3).


def _split_f32(v):
    """Split an f32 array into (hi, lo) bf16 parts with v ~= hi + lo (~16-bit effective mantissa)."""
    hi = v.astype(jnp.bfloat16)
    lo = (v - hi.astype(jnp.float32)).astype(jnp.bfloat16)
    return hi, lo


def _conv_bn_layer(src_ref, w_hi_ref, w_cross_ref, *, N, L, Cin, Cout, K, p, relu):
    """Conv1d(pad=p, no bias) + fresh training-mode BatchNorm1d (+ optional ReLU).

    src_ref : (N, L + 2*HALO, >= 2*Cin) bf16 buffer.  Halo rows are zero; interior rows
              [HALO, HALO+L) hold the layer input as [hi | lo] bf16 planes in lanes [0, 2*Cin).
    Conv per tap = 2 bf16 matmuls with f32 accumulation (3-pass / HIGH-precision equivalent):
        Xhi @ Whi                      (Cin deep)
      + [Xhi | Xlo] @ [[Wlo],[Whi]]    (2*Cin deep  ->  Xhi@Wlo + Xlo@Whi)
    Returns the normalized (optionally ReLU'd) activation as an (N*L, Cout) f32 value.
    """
    m = N * L
    acc = None
    for k in range(K):
        start = HALO + (k - p)
        # bf16 [hi | lo] slab for this tap (rows are intentionally halo-shifted).
        sl = src_ref[:, start:start + L, :2 * Cin].reshape(m, 2 * Cin)
        for operand, w_ref in ((sl[:, :Cin], w_hi_ref), (sl, w_cross_ref)):
            part = jnp.dot(operand, w_ref[k], preferred_element_type=jnp.float32)
            acc = part if acc is None else acc + part

    # Training-mode BatchNorm1d: batch statistics over (N, L) per channel, biased variance,
    # weight=1 / bias=0.  Single pass over the f32 conv accumulator.
    inv_m = 1.0 / float(m)
    mean = jnp.sum(acc, axis=0, keepdims=True) * inv_m          # (1, Cout)
    ex2 = jnp.sum(acc * acc, axis=0, keepdims=True) * inv_m     # E[y^2]
    var = jnp.maximum(ex2 - mean * mean, 0.0)
    y = (acc - mean) * jax.lax.rsqrt(var + EPS)
    if relu:
        y = jnp.maximum(y, 0.0)
    return y


def _store_hi_lo(dst_ref, y, *, N, L, Cout):
    """Fused hi/lo split + store of a layer output into the next layer's padded bf16 buffer."""
    hi, lo = _split_f32(y.reshape(N, L, Cout))
    dst_ref[:, HALO:HALO + L, :Cout] = hi
    dst_ref[:, HALO:HALO + L, Cout:2 * Cout] = lo


def _block_kernel(x_ref, w1h_ref, w1c_ref, w2h_ref, w2c_ref, w3h_ref, w3c_ref,
                  out_ref, buf_a, buf_b, *, N, L):
    lo_r, hi_r = HALO, HALO + L
    zeros_halo = jnp.zeros((N, HALO, 2 * C_MID), jnp.bfloat16)

    # Zero the halo rows of both padded buffers once; interiors are fully overwritten by each
    # layer before being read, so no per-layer zero-fill is needed.
    buf_a[:, :HALO, :] = zeros_halo
    buf_a[:, hi_r:, :] = zeros_halo
    buf_b[:, :HALO, :] = zeros_halo
    buf_b[:, hi_r:, :] = zeros_halo

    # Stage x as bf16 hi/lo planes (layer 1 reads only lanes [0, 256)).
    xhi, xlo = _split_f32(x_ref[...])
    buf_a[:, lo_r:hi_r, :C_IN] = xhi
    buf_a[:, lo_r:hi_r, C_IN:2 * C_IN] = xlo

    # layer 1: 128 -> 256, k=7, pad=3, relu          (buf_a -> buf_b)
    y1 = _conv_bn_layer(buf_a, w1h_ref, w1c_ref, N=N, L=L, Cin=C_IN, Cout=C_MID,
                        K=7, p=3, relu=True)
    _store_hi_lo(buf_b, y1, N=N, L=L, Cout=C_MID)

    # layer 2: 256 -> 256, k=5, pad=2, relu          (buf_b -> buf_a)
    y2 = _conv_bn_layer(buf_b, w2h_ref, w2c_ref, N=N, L=L, Cin=C_MID, Cout=C_MID,
                        K=5, p=2, relu=True)
    _store_hi_lo(buf_a, y2, N=N, L=L, Cout=C_MID)

    # layer 3: 256 -> 128, k=3, pad=1, no relu; fuse residual + final relu into the output store.
    y3 = _conv_bn_layer(buf_a, w3h_ref, w3c_ref, N=N, L=L, Cin=C_MID, Cout=C_IN,
                        K=3, p=1, relu=False)
    out_ref[...] = jnp.maximum(y3.reshape(N, L, C_IN) + 0.2 * x_ref[...], 0.0)


def _prep_weight(w):
    """PyTorch (Cout, Cin, K) -> bf16 (K, Cin, Cout) 'hi' and (K, 2*Cin, Cout) '[lo; hi]' cross."""
    wk = jnp.transpose(w, (2, 1, 0)).astype(jnp.float32)
    hi, lo = _split_f32(wk)
    cross = jnp.concatenate([lo, hi], axis=1)
    return hi, cross


def _vmem_limit_bytes():
    """Generation-aware scoped-VMEM limit: physical capacity minus headroom for compiler temps."""
    try:
        cap = int(pltpu.get_tpu_info().vmem_capacity_bytes)
    except Exception:
        cap = 64 * 1024 * 1024      # conservative fallback: v7x per-core physical VMEM
    return max(cap - 8 * 1024 * 1024, 32 * 1024 * 1024)


def block_forward(x_ncl, params):
    """x_ncl: (N, 128, L) float32, PyTorch NCL convention.  Returns (N, 128, L)."""
    w1, b1, w2, b2, w3, b3 = params
    # Conv biases are cancelled exactly by the fresh training-mode BatchNorm's batch-mean
    # subtraction, so they never enter the kernel.
    del b1, b2, b3
    N, C, L = x_ncl.shape
    assert C == C_IN and L % 8 == 0   # L % 16 == 0 is the fully-aligned fast path

    x = jnp.transpose(x_ncl, (0, 2, 1)).astype(jnp.float32)       # NLC
    w1h, w1c = _prep_weight(w1)
    w2h, w2c = _prep_weight(w2)
    w3h, w3c = _prep_weight(w3)
    inputs = (x, w1h, w1c, w2h, w2c, w3h, w3c)

    vmem_limit = _vmem_limit_bytes()
    rows = L + 2 * HALO
    need = (2 * N * rows * (2 * C_MID) * 2                        # two bf16 ping/pong buffers
            + sum(2 * a.size * a.dtype.itemsize for a in inputs)  # input blocks (x2 buffering)
            + 2 * N * L * C_IN * 4                                # output block
            + 4 * N * L * C_MID * 4                               # f32 conv-acc spill headroom
            + (2 << 20))
    assert need <= vmem_limit, (
        f"activation set ~{need >> 20} MiB exceeds the VMEM budget ({vmem_limit >> 20} MiB); "
        "reduce N*L or switch to the tiled two-pass variant (see TODO at top of file)")

    kernel = functools.partial(_block_kernel, N=N, L=L)
    out = pl.pallas_call(
        kernel,
        out_shape=jax.ShapeDtypeStruct((N, L, C_IN), jnp.float32),
        grid=(1,),
        in_specs=[
            pl.BlockSpec((N, L, C_IN), lambda i: (0, 0, 0)),
            pl.BlockSpec((7, C_IN, C_MID), lambda i: (0, 0, 0)),
            pl.BlockSpec((7, 2 * C_IN, C_MID), lambda i: (0, 0, 0)),
            pl.BlockSpec((5, C_MID, C_MID), lambda i: (0, 0, 0)),
            pl.BlockSpec((5, 2 * C_MID, C_MID), lambda i: (0, 0, 0)),
            pl.BlockSpec((3, C_MID, C_IN), lambda i: (0, 0, 0)),
            pl.BlockSpec((3, 2 * C_MID, C_IN), lambda i: (0, 0, 0)),
        ],
        out_specs=pl.BlockSpec((N, L, C_IN), lambda i: (0, 0, 0)),
        scratch_shapes=[
            pltpu.VMEM((N, rows, 2 * C_MID), jnp.bfloat16),   # padded ping buffer [hi|lo]
            pltpu.VMEM((N, rows, 2 * C_MID), jnp.bfloat16),   # padded pong buffer [hi|lo]
        ],
        compiler_params=pltpu.CompilerParams(
            dimension_semantics=("arbitrary",),
            vmem_limit_bytes=vmem_limit,
        ),
    )(*inputs)
    return jnp.transpose(out, (0, 2, 1))                          # back to NCL


# ---------------- deterministic parameter init + pure-JAX reference ----------------

def make_params(key):
    ks = jax.random.split(key, 6)

    def init(k, shape, fan_in):
        return jax.random.normal(k, shape, jnp.float32) / jnp.sqrt(float(fan_in))

    w1 = init(ks[0], (256, 128, 7), 128 * 7)
    b1 = init(ks[1], (256,), 128 * 7)
    w2 = init(ks[2], (256, 256, 5), 256 * 5)
    b2 = init(ks[3], (256,), 256 * 5)
    w3 = init(ks[4], (128, 256, 3), 256 * 3)
    b3 = init(ks[5], (128,), 256 * 3)
    return (w1, b1, w2, b2, w3, b3)


def _conv1d_ref(x, w, b, p):
    y = jax.lax.conv_general_dilated(x, w, window_strides=(1,), padding=[(p, p)],
                                     dimension_numbers=("NCH", "OIH", "NCH"),
                                     precision=jax.lax.Precision.HIGHEST)
    return y + b[None, :, None]


def _bn_ref(y):
    mean = jnp.mean(y, axis=(0, 2), keepdims=True)
    var = jnp.mean((y - mean) ** 2, axis=(0, 2), keepdims=True)
    return (y - mean) / jnp.sqrt(var + EPS)


def block_ref(x, params):
    w1, b1, w2, b2, w3, b3 = params
    h = jax.nn.relu(_bn_ref(_conv1d_ref(x, w1, b1, 3)))
    h = jax.nn.relu(_bn_ref(_conv1d_ref(h, w2, b2, 2)))
    h = _bn_ref(_conv1d_ref(h, w3, b3, 1))
    return jax.nn.relu(h + 0.2 * x)


if __name__ == "__main__":
    key = jax.random.PRNGKey(0)
    kx, kp = jax.random.split(key)
    N, L = 2, 16                              # channels fixed at 128 by the module
    x = jax.random.normal(kx, (N, C_IN, L), jnp.float32)
    params = make_params(kp)

    out = block_forward(x, params)
    out = jax.block_until_ready(out)
    assert out.shape == (N, C_IN, L)

    ref = block_ref(x, params)
    max_err = float(jnp.max(jnp.abs(out - ref)))
    assert max_err < 1e-3, f"mismatch vs reference: {max_err}"
    print("KERNEL_OK")
</pallas_src>

<mosaic_0001>
module attributes {stable_mosaic.version = 11 : i64} {
  func.func @_block_kernel(%arg0: i32, %arg1: memref<2x16x128xf32, #tpu.memory_space<vmem>>, %arg2: memref<7x128x256xbf16, #tpu.memory_space<vmem>>, %arg3: memref<7x256x256xbf16, #tpu.memory_space<vmem>>, %arg4: memref<5x256x256xbf16, #tpu.memory_space<vmem>>, %arg5: memref<5x512x256xbf16, #tpu.memory_space<vmem>>, %arg6: memref<3x256x128xbf16, #tpu.memory_space<vmem>>, %arg7: memref<3x512x128xbf16, #tpu.memory_space<vmem>>, %arg8: memref<2x16x128xf32, #tpu.memory_space<vmem>>, %arg9: memref<2x48x512xbf16, #tpu.memory_space<vmem>>, %arg10: memref<2x48x512xbf16, #tpu.memory_space<vmem>>) attributes {dimension_semantics = [#tpu.dimension_semantics<arbitrary>], iteration_bounds = array<i64: 1>, scalar_prefetch = 0 : i64, scratch_operands = 2 : i64, tpu.core_type = #tpu.core_type<tc>, window_params = [{pipeline_mode = #tpu.pipeline_mode<synchronous>, transform_indices = @transform_0, window_bounds = array<i64: 2, 16, 128>}, {pipeline_mode = #tpu.pipeline_mode<synchronous>, transform_indices = @transform_1, window_bounds = array<i64: 7, 128, 256>}, {pipeline_mode = #tpu.pipeline_mode<synchronous>, transform_indices = @transform_2, window_bounds = array<i64: 7, 256, 256>}, {pipeline_mode = #tpu.pipeline_mode<synchronous>, transform_indices = @transform_3, window_bounds = array<i64: 5, 256, 256>}, {pipeline_mode = #tpu.pipeline_mode<synchronous>, transform_indices = @transform_4, window_bounds = array<i64: 5, 512, 256>}, {pipeline_mode = #tpu.pipeline_mode<synchronous>, transform_indices = @transform_5, window_bounds = array<i64: 3, 256, 128>}, {pipeline_mode = #tpu.pipeline_mode<synchronous>, transform_indices = @transform_6, window_bounds = array<i64: 3, 512, 128>}, {pipeline_mode = #tpu.pipeline_mode<synchronous>, transform_indices = @transform_7, window_bounds = array<i64: 2, 16, 128>}]} {
    %cst = arith.constant 0.000000e+00 : bf16
    %0 = vector.broadcast %cst : bf16 to vector<2x16x512xbf16>
    %c0 = arith.constant 0 : index
    %c0_0 = arith.constant 0 : index
    %c0_1 = arith.constant 0 : index
    %1 = vector.load %arg9[%c0, %c0_0, %c0_1] : memref<2x48x512xbf16, #tpu.memory_space<vmem>>, vector<2x16x512xbf16>
    tpu.vector_store %arg9[%c0, %c0_0, %c0_1], %0 {strides = array<i32>} : memref<2x48x512xbf16, #tpu.memory_space<vmem>>, vector<2x16x512xbf16>,
    %c0_2 = arith.constant 0 : index
    %c32 = arith.constant 32 : index
    %c0_3 = arith.constant 0 : index
    %2 = vector.load %arg9[%c0_2, %c32, %c0_3] : memref<2x48x512xbf16, #tpu.memory_space<vmem>>, vector<2x16x512xbf16>
    tpu.vector_store %arg9[%c0_2, %c32, %c0_3], %0 {strides = array<i32>} : memref<2x48x512xbf16, #tpu.memory_space<vmem>>, vector<2x16x512xbf16>,
    %c0_4 = arith.constant 0 : index
    %c0_5 = arith.constant 0 : index
    %c0_6 = arith.constant 0 : index
    %3 = vector.load %arg10[%c0_4, %c0_5, %c0_6] : memref<2x48x512xbf16, #tpu.memory_space<vmem>>, vector<2x16x512xbf16>
    tpu.vector_store %arg10[%c0_4, %c0_5, %c0_6], %0 {strides = array<i32>} : memref<2x48x512xbf16, #tpu.memory_space<vmem>>, vector<2x16x512xbf16>,
    %c0_7 = arith.constant 0 : index
    %c32_8 = arith.constant 32 : index
    %c0_9 = arith.constant 0 : index
    %4 = vector.load %arg10[%c0_7, %c32_8, %c0_9] : memref<2x48x512xbf16, #tpu.memory_space<vmem>>, vector<2x16x512xbf16>
    tpu.vector_store %arg10[%c0_7, %c32_8, %c0_9], %0 {strides = array<i32>} : memref<2x48x512xbf16, #tpu.memory_space<vmem>>, vector<2x16x512xbf16>,
    %c0_10 = arith.constant 0 : index
    %c0_11 = arith.constant 0 : index
    %c0_12 = arith.constant 0 : index
    %5 = vector.load %arg1[%c0_10, %c0_11, %c0_12] : memref<2x16x128xf32, #tpu.memory_space<vmem>>, vector<2x16x128xf32>
    %6 = arith.truncf %5 : vector<2x16x128xf32> to vector<2x16x128xbf16>
    %7 = arith.extf %6 : vector<2x16x128xbf16> to vector<2x16x128xf32>
    %8 = arith.subf %5, %7 : vector<2x16x128xf32>
    %9 = arith.truncf %8 : vector<2x16x128xf32> to vector<2x16x128xbf16>
    %c0_13 = arith.constant 0 : index
    %c16 = arith.constant 16 : index
    %c0_14 = arith.constant 0 : index
    %10 = vector.load %arg9[%c0_13, %c16, %c0_14] : memref<2x48x512xbf16, #tpu.memory_space<vmem>>, vector<2x16x128xbf16>
    tpu.vector_store %arg9[%c0_13, %c16, %c0_14], %6 {strides = array<i32>} : memref<2x48x512xbf16, #tpu.memory_space<vmem>>, vector<2x16x128xbf16>,
    %c0_15 = arith.constant 0 : index
    %c16_16 = arith.constant 16 : index
    %c128 = arith.constant 128 : index
    %11 = vector.load %arg9[%c0_15, %c16_16, %c128] : memref<2x48x512xbf16, #tpu.memory_space<vmem>>, vector<2x16x128xbf16>
    tpu.vector_store %arg9[%c0_15, %c16_16, %c128], %9 {strides = array<i32>} : memref<2x48x512xbf16, #tpu.memory_space<vmem>>, vector<2x16x128xbf16>,
    %c0_17 = arith.constant 0 : index
    %c13 = arith.constant 13 : index
    %c0_18 = arith.constant 0 : index
    %12 = vector.load %arg9[%c0_17, %c13, %c0_18] : memref<2x48x512xbf16, #tpu.memory_space<vmem>>, vector<2x16x256xbf16>
    %13 = vector.shape_cast %12 : vector<2x16x256xbf16> to vector<32x256xbf16>
    %14 = vector.extract_strided_slice %13 {offsets = [0, 0], sizes = [32, 128], strides = [1, 1]} : vector<32x256xbf16> to vector<32x128xbf16>
    %c0_19 = arith.constant 0 : index
    %c0_20 = arith.constant 0 : index
    %c0_21 = arith.constant 0 : index
    %15 = vector.load %arg2[%c0_19, %c0_20, %c0_21] : memref<7x128x256xbf16, #tpu.memory_space<vmem>>, vector<1x128x256xbf16>
    %16 = vector.shape_cast %15 : vector<1x128x256xbf16> to vector<128x256xbf16>
    %cst_22 = arith.constant dense<0.000000e+00> : vector<32x256xf32>
    %17 = tpu.matmul %14, %16, %cst_22 {dimension_numbers = #tpu.dot_dimension_numbers<[1], [0], [0], [1], [0, 0, 1, 1], [], []>} : vector<32x128xbf16>, vector<128x256xbf16>, vector<32x256xf32> -> vector<32x256xf32>
    %c0_23 = arith.constant 0 : index
    %c0_24 = arith.constant 0 : index
    %c0_25 = arith.constant 0 : index
    %18 = vector.load %arg3[%c0_23, %c0_24, %c0_25] : memref<7x256x256xbf16, #tpu.memory_space<vmem>>, vector<1x256x256xbf16>
    %19 = vector.shape_cast %18 : vector<1x256x256xbf16> to vector<256x256xbf16>
    %cst_26 = arith.constant dense<0.000000e+00> : vector<32x256xf32>
    %20 = tpu.matmul %13, %19, %cst_26 {dimension_numbers = #tpu.dot_dimension_numbers<[1], [0], [0], [1], [0, 0, 1, 1], [], []>} : vector<32x256xbf16>, vector<256x256xbf16>, vector<32x256xf32> -> vector<32x256xf32>
    %21 = arith.addf %17, %20 : vector<32x256xf32>
    %c0_27 = arith.constant 0 : index
    %c14 = arith.constant 14 : index
    %c0_28 = arith.constant 0 : index
    %22 = vector.load %arg9[%c0_27, %c14, %c0_28] : memref<2x48x512xbf16, #tpu.memory_space<vmem>>, vector<2x16x256xbf16>
    %23 = vector.shape_cast %22 : vector<2x16x256xbf16> to vector<32x256xbf16>
    %24 = vector.extract_strided_slice %23 {offsets = [0, 0], sizes = [32, 128], strides = [1, 1]} : vector<32x256xbf16> to vector<32x128xbf16>
    %c1 = arith.constant 1 : index
    %c0_29 = arith.constant 0 : index
    %c0_30 = arith.constant 0 : index
    %25 = vector.load %arg2[%c1, %c0_29, %c0_30] : memref<7x128x256xbf16, #tpu.memory_space<vmem>>, vector<1x128x256xbf16>
    %26 = vector.shape_cast %25 : vector<1x128x256xbf16> to vector<128x256xbf16>
    %cst_31 = arith.constant dense<0.000000e+00> : vector<32x256xf32>
    %27 = tpu.matmul %24, %26, %cst_31 {dimension_numbers = #tpu.dot_dimension_numbers<[1], [0], [0], [1], [0, 0, 1, 1], [], []>} : vector<32x128xbf16>, vector<128x256xbf16>, vector<32x256xf32> -> vector<32x256xf32>
    %28 = arith.addf %21, %27 : vector<32x256xf32>
    %c1_32 = arith.constant 1 : index
    %c0_33 = arith.constant 0 : index
    %c0_34 = arith.constant 0 : index
    %29 = vector.load %arg3[%c1_32, %c0_33, %c0_34] : memref<7x256x256xbf16, #tpu.memory_space<vmem>>, vector<1x256x256xbf16>
    %30 = vector.shape_cast %29 : vector<1x256x256xbf16> to vector<256x256xbf16>
    %cst_35 = arith.constant dense<0.000000e+00> : vector<32x256xf32>
    %31 = tpu.matmul %23, %30, %cst_35 {dimension_numbers = #tpu.dot_dimension_numbers<[1], [0], [0], [1], [0, 0, 1, 1], [], []>} : vector<32x256xbf16>, vector<256x256xbf16>, vector<32x256xf32> -> vector<32x256xf32>
    %32 = arith.addf %28, %31 : vector<32x256xf32>
    %c0_36 = arith.constant 0 : index
    %c15 = arith.constant 15 : index
    %c0_37 = arith.constant 0 : index
    %33 = vector.load %arg9[%c0_36, %c15, %c0_37] : memref<2x48x512xbf16, #tpu.memory_space<vmem>>, vector<2x16x256xbf16>
    %34 = vector.shape_cast %33 : vector<2x16x256xbf16> to vector<32x256xbf16>
    %35 = vector.extract_strided_slice %34 {offsets = [0, 0], sizes = [32, 128], strides = [1, 1]} : vector<32x256xbf16> to vector<32x128xbf16>
    %c2 = arith.constant 2 : index
    %c0_38 = arith.constant 0 : index
    %c0_39 = arith.constant 0 : index
    %36 = vector.load %arg2[%c2, %c0_38, %c0_39] : memref<7x128x256xbf16, #tpu.memory_space<vmem>>, vector<1x128x256xbf16>
    %37 = vector.shape_cast %36 : vector<1x128x256xbf16> to vector<128x256xbf16>
    %cst_40 = arith.constant dense<0.000000e+00> : vector<32x256xf32>
    %38 = tpu.matmul %35, %37, %cst_40 {dimension_numbers = #tpu.dot_dimension_numbers<[1], [0], [0], [1], [0, 0, 1, 1], [], []>} : vector<32x128xbf16>, vector<128x256xbf16>, vector<32x256xf32> -> vector<32x256xf32>
    %39 = arith.addf %32, %38 : vector<32x256xf32>
    %c2_41 = arith.constant 2 : index
    %c0_42 = arith.constant 0 : index
    %c0_43 = arith.constant 0 : index
    %40 = vector.load %arg3[%c2_41, %c0_42, %c0_43] : memref<7x256x256xbf16, #tpu.memory_space<vmem>>, vector<1x256x256xbf16>
    %41 = vector.shape_cast %40 : vector<1x256x256xbf16> to vector<256x256xbf16>
    %cst_44 = arith.constant dense<0.000000e+00> : vector<32x256xf32>
    %42 = tpu.matmul %34, %41, %cst_44 {dimension_numbers = #tpu.dot_dimension_numbers<[1], [0], [0], [1], [0, 0, 1, 1], [], []>} : vector<32x256xbf16>, vector<256x256xbf16>, vector<32x256xf32> -> vector<32x256xf32>
    %43 = arith.addf %39, %42 : vector<32x256xf32>
    %c0_45 = arith.constant 0 : index
    %c16_46 = arith.constant 16 : index
    %c0_47 = arith.constant 0 : index
    %44 = vector.load %arg9[%c0_45, %c16_46, %c0_47] : memref<2x48x512xbf16, #tpu.memory_space<vmem>>, vector<2x16x256xbf16>
    %45 = vector.shape_cast %44 : vector<2x16x256xbf16> to vector<32x256xbf16>
    %46 = vector.extract_strided_slice %45 {offsets = [0, 0], sizes = [32, 128], strides = [1, 1]} : vector<32x256xbf16> to vector<32x128xbf16>
    %c3 = arith.constant 3 : index
    %c0_48 = arith.constant 0 : index
    %c0_49 = arith.constant 0 : index
    %47 = vector.load %arg2[%c3, %c0_48, %c0_49] : memref<7x128x256xbf16, #tpu.memory_space<vmem>>, vector<1x128x256xbf16>
    %48 = vector.shape_cast %47 : vector<1x128x256xbf16> to vector<128x256xbf16>
    %cst_50 = arith.constant dense<0.000000e+00> : vector<32x256xf32>
    %49 = tpu.matmul %46, %48, %cst_50 {dimension_numbers = #tpu.dot_dimension_numbers<[1], [0], [0], [1], [0, 0, 1, 1], [], []>} : vector<32x128xbf16>, vector<128x256xbf16>, vector<32x256xf32> -> vector<32x256xf32>
    %50 = arith.addf %43, %49 : vector<32x256xf32>
    %c3_51 = arith.constant 3 : index
    %c0_52 = arith.constant 0 : index
    %c0_53 = arith.constant 0 : index
    %51 = vector.load %arg3[%c3_51, %c0_52, %c0_53] : memref<7x256x256xbf16, #tpu.memory_space<vmem>>, vector<1x256x256xbf16>
    %52 = vector.shape_cast %51 : vector<1x256x256xbf16> to vector<256x256xbf16>
    %cst_54 = arith.constant dense<0.000000e+00> : vector<32x256xf32>
    %53 = tpu.matmul %45, %52, %cst_54 {dimension_numbers = #tpu.dot_dimension_numbers<[1], [0], [0], [1], [0, 0, 1, 1], [], []>} : vector<32x256xbf16>, vector<256x256xbf16>, vector<32x256xf32> -> vector<32x256xf32>
    %54 = arith.addf %50, %53 : vector<32x256xf32>
    %c0_55 = arith.constant 0 : index
    %c17 = arith.constant 17 : index
    %c0_56 = arith.constant 0 : index
    %55 = vector.load %arg9[%c0_55, %c17, %c0_56] : memref<2x48x512xbf16, #tpu.memory_space<vmem>>, vector<2x16x256xbf16>
    %56 = vector.shape_cast %55 : vector<2x16x256xbf16> to vector<32x256xbf16>
    %57 = vector.extract_strided_slice %56 {offsets = [0, 0], sizes = [32, 128], strides = [1, 1]} : vector<32x256xbf16> to vector<32x128xbf16>
    %c4 = arith.constant 4 : index
    %c0_57 = arith.constant 0 : index
    %c0_58 = arith.constant 0 : index
    %58 = vector.load %arg2[%c4, %c0_57, %c0_58] : memref<7x128x256xbf16, #tpu.memory_space<vmem>>, vector<1x128x256xbf16>
    %59 = vector.shape_cast %58 : vector<1x128x256xbf16> to vector<128x256xbf16>
    %cst_59 = arith.constant dense<0.000000e+00> : vector<32x256xf32>
    %60 = tpu.matmul %57, %59, %cst_59 {dimension_numbers = #tpu.dot_dimension_numbers<[1], [0], [0], [1], [0, 0, 1, 1], [], []>} : vector<32x128xbf16>, vector<128x256xbf16>, vector<32x256xf32> -> vector<32x256xf32>
    %61 = arith.addf %54, %60 : vector<32x256xf32>
    %c4_60 = arith.constant 4 : index
    %c0_61 = arith.constant 0 : index
    %c0_62 = arith.constant 0 : index
    %62 = vector.load %arg3[%c4_60, %c0_61, %c0_62] : memref<7x256x256xbf16, #tpu.memory_space<vmem>>, vector<1x256x256xbf16>
    %63 = vector.shape_cast %62 : vector<1x256x256xbf16> to vector<256x256xbf16>
    %cst_63 = arith.constant dense<0.000000e+00> : vector<32x256xf32>
    %64 = tpu.matmul %56, %63, %cst_63 {dimension_numbers = #tpu.dot_dimension_numbers<[1], [0], [0], [1], [0, 0, 1, 1], [], []>} : vector<32x256xbf16>, vector<256x256xbf16>, vector<32x256xf32> -> vector<32x256xf32>
    %65 = arith.addf %61, %64 : vector<32x256xf32>
    %c0_64 = arith.constant 0 : index
    %c18 = arith.constant 18 : index
    %c0_65 = arith.constant 0 : index
    %66 = vector.load %arg9[%c0_64, %c18, %c0_65] : memref<2x48x512xbf16, #tpu.memory_space<vmem>>, vector<2x16x256xbf16>
    %67 = vector.shape_cast %66 : vector<2x16x256xbf16> to vector<32x256xbf16>
    %68 = vector.extract_strided_slice %67 {offsets = [0, 0], sizes = [32, 128], strides = [1, 1]} : vector<32x256xbf16> to vector<32x128xbf16>
    %c5 = arith.constant 5 : index
    %c0_66 = arith.constant 0 : index
    %c0_67 = arith.constant 0 : index
    %69 = vector.load %arg2[%c5, %c0_66, %c0_67] : memref<7x128x256xbf16, #tpu.memory_space<vmem>>, vector<1x128x256xbf16>
    %70 = vector.shape_cast %69 : vector<1x128x256xbf16> to vector<128x256xbf16>
    %cst_68 = arith.constant dense<0.000000e+00> : vector<32x256xf32>
    %71 = tpu.matmul %68, %70, %cst_68 {dimension_numbers = #tpu.dot_dimension_numbers<[1], [0], [0], [1], [0, 0, 1, 1], [], []>} : vector<32x128xbf16>, vector<128x256xbf16>, vector<32x256xf32> -> vector<32x256xf32>
    %72 = arith.addf %65, %71 : vector<32x256xf32>
    %c5_69 = arith.constant 5 : index
    %c0_70 = arith.constant 0 : index
    %c0_71 = arith.constant 0 : index
    %73 = vector.load %arg3[%c5_69, %c0_70, %c0_71] : memref<7x256x256xbf16, #tpu.memory_space<vmem>>, vector<1x256x256xbf16>
    %74 = vector.shape_cast %73 : vector<1x256x256xbf16> to vector<256x256xbf16>
    %cst_72 = arith.constant dense<0.000000e+00> : vector<32x256xf32>
    %75 = tpu.matmul %67, %74, %cst_72 {dimension_numbers = #tpu.dot_dimension_numbers<[1], [0], [0], [1], [0, 0, 1, 1], [], []>} : vector<32x256xbf16>, vector<256x256xbf16>, vector<32x256xf32> -> vector<32x256xf32>
    %76 = arith.addf %72, %75 : vector<32x256xf32>
    %c0_73 = arith.constant 0 : index
    %c19 = arith.constant 19 : index
    %c0_74 = arith.constant 0 : index
    %77 = vector.load %arg9[%c0_73, %c19, %c0_74] : memref<2x48x512xbf16, #tpu.memory_space<vmem>>, vector<2x16x256xbf16>
    %78 = vector.shape_cast %77 : vector<2x16x256xbf16> to vector<32x256xbf16>
    %79 = vector.extract_strided_slice %78 {offsets = [0, 0], sizes = [32, 128], strides = [1, 1]} : vector<32x256xbf16> to vector<32x128xbf16>
    %c6 = arith.constant 6 : index
    %c0_75 = arith.constant 0 : index
    %c0_76 = arith.constant 0 : index
    %80 = vector.load %arg2[%c6, %c0_75, %c0_76] : memref<7x128x256xbf16, #tpu.memory_space<vmem>>, vector<1x128x256xbf16>
    %81 = vector.shape_cast %80 : vector<1x128x256xbf16> to vector<128x256xbf16>
    %cst_77 = arith.constant dense<0.000000e+00> : vector<32x256xf32>
    %82 = tpu.matmul %79, %81, %cst_77 {dimension_numbers = #tpu.dot_dimension_numbers<[1], [0], [0], [1], [0, 0, 1, 1], [], []>} : vector<32x128xbf16>, vector<128x256xbf16>, vector<32x256xf32> -> vector<32x256xf32>
    %83 = arith.addf %76, %82 : vector<32x256xf32>
    %c6_78 = arith.constant 6 : index
    %c0_79 = arith.constant 0 : index
    %c0_80 = arith.constant 0 : index
    %84 = vector.load %arg3[%c6_78, %c0_79, %c0_80] : memref<7x256x256xbf16, #tpu.memory_space<vmem>>, vector<1x256x256xbf16>
    %85 = vector.shape_cast %84 : vector<1x256x256xbf16> to vector<256x256xbf16>
    %cst_81 = arith.constant dense<0.000000e+00> : vector<32x256xf32>
    %86 = tpu.matmul %78, %85, %cst_81 {dimension_numbers = #tpu.dot_dimension_numbers<[1], [0], [0], [1], [0, 0, 1, 1], [], []>} : vector<32x256xbf16>, vector<256x256xbf16>, vector<32x256xf32> -> vector<32x256xf32>
    %87 = arith.addf %83, %86 : vector<32x256xf32>
    %cst_82 = arith.constant dense<0.000000e+00> : vector<256xf32>
    %88 = vector.multi_reduction <add>, %87, %cst_82 [0] : vector<32x256xf32> to vector<256xf32>
    %89 = vector.shape_cast %88 : vector<256xf32> to vector<1x256xf32>
    %cst_83 = arith.constant 3.125000e-02 : f32
    %90 = vector.broadcast %cst_83 : f32 to vector<1x256xf32>
    %91 = arith.mulf %89, %90 : vector<1x256xf32>
    %92 = arith.mulf %87, %87 : vector<32x256xf32>
    %cst_84 = arith.constant dense<0.000000e+00> : vector<256xf32>
    %93 = vector.multi_reduction <add>, %92, %cst_84 [0] : vector<32x256xf32> to vector<256xf32>
    %94 = vector.shape_cast %93 : vector<256xf32> to vector<1x256xf32>
    %cst_85 = arith.constant 3.125000e-02 : f32
    %95 = vector.broadcast %cst_85 : f32 to vector<1x256xf32>
    %96 = arith.mulf %94, %95 : vector<1x256xf32>
    %97 = arith.mulf %91, %91 : vector<1x256xf32>
    %98 = arith.subf %96, %97 : vector<1x256xf32>
    %cst_86 = arith.constant 0.000000e+00 : f32
    %99 = vector.broadcast %cst_86 : f32 to vector<1x256xf32>
    %100 = arith.maximumf %98, %99 : vector<1x256xf32>
    %101 = vector.broadcast %91 : vector<1x256xf32> to vector<32x256xf32>
    %102 = arith.subf %87, %101 : vector<32x256xf32>
    %cst_87 = arith.constant 9.99999974E-6 : f32
    %103 = vector.broadcast %cst_87 : f32 to vector<1x256xf32>
    %104 = arith.addf %100, %103 : vector<1x256xf32>
    %105 = math.rsqrt %104 : vector<1x256xf32>
    %106 = vector.broadcast %105 : vector<1x256xf32> to vector<32x256xf32>
    %107 = arith.mulf %102, %106 : vector<32x256xf32>
    %cst_88 = arith.constant 0.000000e+00 : f32
    %108 = vector.broadcast %cst_88 : f32 to vector<32x256xf32>
    %109 = arith.maximumf %107, %108 : vector<32x256xf32>
    %110 = vector.shape_cast %109 : vector<32x256xf32> to vector<2x16x256xf32>
    %111 = arith.truncf %110 : vector<2x16x256xf32> to vector<2x16x256xbf16>
    %112 = arith.extf %111 : vector<2x16x256xbf16> to vector<2x16x256xf32>
    %113 = arith.subf %110, %112 : vector<2x16x256xf32>
    %114 = arith.truncf %113 : vector<2x16x256xf32> to vector<2x16x256xbf16>
    %c0_89 = arith.constant 0 : index
    %c16_90 = arith.constant 16 : index
    %c0_91 = arith.constant 0 : index
    %115 = vector.load %arg10[%c0_89, %c16_90, %c0_91] : memref<2x48x512xbf16, #tpu.memory_space<vmem>>, vector<2x16x256xbf16>
    tpu.vector_store %arg10[%c0_89, %c16_90, %c0_91], %111 {strides = array<i32>} : memref<2x48x512xbf16, #tpu.memory_space<vmem>>, vector<2x16x256xbf16>,
    %c0_92 = arith.constant 0 : index
    %c16_93 = arith.constant 16 : index
    %c256 = arith.constant 256 : index
    %116 = vector.load %arg10[%c0_92, %c16_93, %c256] : memref<2x48x512xbf16, #tpu.memory_space<vmem>>, vector<2x16x256xbf16>
    tpu.vector_store %arg10[%c0_92, %c16_93, %c256], %114 {strides = array<i32>} : memref<2x48x512xbf16, #tpu.memory_space<vmem>>, vector<2x16x256xbf16>,
    %c0_94 = arith.constant 0 : index
    %c14_95 = arith.constant 14 : index
    %c0_96 = arith.constant 0 : index
    %117 = vector.load %arg10[%c0_94, %c14_95, %c0_96] : memref<2x48x512xbf16, #tpu.memory_space<vmem>>, vector<2x16x512xbf16>
    %118 = vector.shape_cast %117 : vector<2x16x512xbf16> to vector<32x512xbf16>
    %119 = vector.extract_strided_slice %118 {offsets = [0, 0], sizes = [32, 256], strides = [1, 1]} : vector<32x512xbf16> to vector<32x256xbf16>
    %c0_97 = arith.constant 0 : index
    %c0_98 = arith.constant 0 : index
    %c0_99 = arith.constant 0 : index
    %120 = vector.load %arg4[%c0_97, %c0_98, %c0_99] : memref<5x256x256xbf16, #tpu.memory_space<vmem>>, vector<1x256x256xbf16>
    %121 = vector.shape_cast %120 : vector<1x256x256xbf16> to vector<256x256xbf16>
    %cst_100 = arith.constant dense<0.000000e+00> : vector<32x256xf32>
    %122 = tpu.matmul %119, %121, %cst_100 {dimension_numbers = #tpu.dot_dimension_numbers<[1], [0], [0], [1], [0, 0, 1, 1], [], []>} : vector<32x256xbf16>, vector<256x256xbf16>, vector<32x256xf32> -> vector<32x256xf32>
    %c0_101 = arith.constant 0 : index
    %c0_102 = arith.constant 0 : index
    %c0_103 = arith.constant 0 : index
    %123 = vector.load %arg5[%c0_101, %c0_102, %c0_103] : memref<5x512x256xbf16, #tpu.memory_space<vmem>>, vector<1x512x256xbf16>
    %124 = vector.shape_cast %123 : vector<1x512x256xbf16> to vector<512x256xbf16>
    %cst_104 = arith.constant dense<0.000000e+00> : vector<32x256xf32>
    %125 = tpu.matmul %118, %124, %cst_104 {dimension_numbers = #tpu.dot_dimension_numbers<[1], [0], [0], [1], [0, 0, 1, 1], [], []>} : vector<32x512xbf16>, vector<512x256xbf16>, vector<32x256xf32> -> vector<32x256xf32>
    %126 = arith.addf %122, %125 : vector<32x256xf32>
    %c0_105 = arith.constant 0 : index
    %c15_106 = arith.constant 15 : index
    %c0_107 = arith.constant 0 : index
    %127 = vector.load %arg10[%c0_105, %c15_106, %c0_107] : memref<2x48x512xbf16, #tpu.memory_space<vmem>>, vector<2x16x512xbf16>
    %128 = vector.shape_cast %127 : vector<2x16x512xbf16> to vector<32x512xbf16>
    %129 = vector.extract_strided_slice %128 {offsets = [0, 0], sizes = [32, 256], strides = [1, 1]} : vector<32x512xbf16> to vector<32x256xbf16>
    %c1_108 = arith.constant 1 : index
    %c0_109 = arith.constant 0 : index
    %c0_110 = arith.constant 0 : index
    %130 = vector.load %arg4[%c1_108, %c0_109, %c0_110] : memref<5x256x256xbf16, #tpu.memory_space<vmem>>, vector<1x256x256xbf16>
    %131 = vector.shape_cast %130 : vector<1x256x256xbf16> to vector<256x256xbf16>
    %cst_111 = arith.constant dense<0.000000e+00> : vector<32x256xf32>
    %132 = tpu.matmul %129, %131, %cst_111 {dimension_numbers = #tpu.dot_dimension_numbers<[1], [0], [0], [1], [0, 0, 1, 1], [], []>} : vector<32x256xbf16>, vector<256x256xbf16>, vector<32x256xf32> -> vector<32x256xf32>
    %133 = arith.addf %126, %132 : vector<32x256xf32>
    %c1_112 = arith.constant 1 : index
    %c0_113 = arith.constant 0 : index
    %c0_114 = arith.constant 0 : index
    %134 = vector.load %arg5[%c1_112, %c0_113, %c0_114] : memref<5x512x256xbf16, #tpu.memory_space<vmem>>, vector<1x512x256xbf16>
    %135 = vector.shape_cast %134 : vector<1x512x256xbf16> to vector<512x256xbf16>
    %cst_115 = arith.constant dense<0.000000e+00> : vector<32x256xf32>
    %136 = tpu.matmul %128, %135, %cst_115 {dimension_numbers = #tpu.dot_dimension_numbers<[1], [0], [0], [1], [0, 0, 1, 1], [], []>} : vector<32x512xbf16>, vector<512x256xbf16>, vector<32x256xf32> -> vector<32x256xf32>
    %137 = arith.addf %133, %136 : vector<32x256xf32>
    %c0_116 = arith.constant 0 : index
    %c16_117 = arith.constant 16 : index
    %c0_118 = arith.constant 0 : index
    %138 = vector.load %arg10[%c0_116, %c16_117, %c0_118] : memref<2x48x512xbf16, #tpu.memory_space<vmem>>, vector<2x16x512xbf16>
    %139 = vector.shape_cast %138 : vector<2x16x512xbf16> to vector<32x512xbf16>
    %140 = vector.extract_strided_slice %139 {offsets = [0, 0], sizes = [32, 256], strides = [1, 1]} : vector<32x512xbf16> to vector<32x256xbf16>
    %c2_119 = arith.constant 2 : index
    %c0_120 = arith.constant 0 : index
    %c0_121 = arith.constant 0 : index
    %141 = vector.load %arg4[%c2_119, %c0_120, %c0_121] : memref<5x256x256xbf16, #tpu.memory_space<vmem>>, vector<1x256x256xbf16>
    %142 = vector.shape_cast %141 : vector<1x256x256xbf16> to vector<256x256xbf16>
    %cst_122 = arith.constant dense<0.000000e+00> : vector<32x256xf32>
    %143 = tpu.matmul %140, %142, %cst_122 {dimension_numbers = #tpu.dot_dimension_numbers<[1], [0], [0], [1], [0, 0, 1, 1], [], []>} : vector<32x256xbf16>, vector<256x256xbf16>, vector<32x256xf32> -> vector<32x256xf32>
    %144 = arith.addf %137, %143 : vector<32x256xf32>
    %c2_123 = arith.constant 2 : index
    %c0_124 = arith.constant 0 : index
    %c0_125 = arith.constant 0 : index
    %145 = vector.load %arg5[%c2_123, %c0_124, %c0_125] : memref<5x512x256xbf16, #tpu.memory_space<vmem>>, vector<1x512x256xbf16>
    %146 = vector.shape_cast %145 : vector<1x512x256xbf16> to vector<512x256xbf16>
    %cst_126 = arith.constant dense<0.000000e+00> : vector<32x256xf32>
    %147 = tpu.matmul %139, %146, %cst_126 {dimension_numbers = #tpu.dot_dimension_numbers<[1], [0], [0], [1], [0, 0, 1, 1], [], []>} : vector<32x512xbf16>, vector<512x256xbf16>, vector<32x256xf32> -> vector<32x256xf32>
    %148 = arith.addf %144, %147 : vector<32x256xf32>
    %c0_127 = arith.constant 0 : index
    %c17_128 = arith.constant 17 : index
    %c0_129 = arith.constant 0 : index
    %149 = vector.load %arg10[%c0_127, %c17_128, %c0_129] : memref<2x48x512xbf16, #tpu.memory_space<vmem>>, vector<2x16x512xbf16>
    %150 = vector.shape_cast %149 : vector<2x16x512xbf16> to vector<32x512xbf16>
    %151 = vector.extract_strided_slice %150 {offsets = [0, 0], sizes = [32, 256], strides = [1, 1]} : vector<32x512xbf16> to vector<32x256xbf16>
    %c3_130 = arith.constant 3 : index
    %c0_131 = arith.constant 0 : index
    %c0_132 = arith.constant 0 : index
    %152 = vector.load %arg4[%c3_130, %c0_131, %c0_132] : memref<5x256x256xbf16, #tpu.memory_space<vmem>>, vector<1x256x256xbf16>
    %153 = vector.shape_cast %152 : vector<1x256x256xbf16> to vector<256x256xbf16>
    %cst_133 = arith.constant dense<0.000000e+00> : vector<32x256xf32>
    %154 = tpu.matmul %151, %153, %cst_133 {dimension_numbers = #tpu.dot_dimension_numbers<[1], [0], [0], [1], [0, 0, 1, 1], [], []>} : vector<32x256xbf16>, vector<256x256xbf16>, vector<32x256xf32> -> vector<32x256xf32>
    %155 = arith.addf %148, %154 : vector<32x256xf32>
    %c3_134 = arith.constant 3 : index
    %c0_135 = arith.constant 0 : index
    %c0_136 = arith.constant 0 : index
    %156 = vector.load %arg5[%c3_134, %c0_135, %c0_136] : memref<5x512x256xbf16, #tpu.memory_space<vmem>>, vector<1x512x256xbf16>
    %157 = vector.shape_cast %156 : vector<1x512x256xbf16> to vector<512x256xbf16>
    %cst_137 = arith.constant dense<0.000000e+00> : vector<32x256xf32>
    %158 = tpu.matmul %150, %157, %cst_137 {dimension_numbers = #tpu.dot_dimension_numbers<[1], [0], [0], [1], [0, 0, 1, 1], [], []>} : vector<32x512xbf16>, vector<512x256xbf16>, vector<32x256xf32> -> vector<32x256xf32>
    %159 = arith.addf %155, %158 : vector<32x256xf32>
    %c0_138 = arith.constant 0 : index
    %c18_139 = arith.constant 18 : index
    %c0_140 = arith.constant 0 : index
    %160 = vector.load %arg10[%c0_138, %c18_139, %c0_140] : memref<2x48x512xbf16, #tpu.memory_space<vmem>>, vector<2x16x512xbf16>
    %161 = vector.shape_cast %160 : vector<2x16x512xbf16> to vector<32x512xbf16>
    %162 = vector.extract_strided_slice %161 {offsets = [0, 0], sizes = [32, 256], strides = [1, 1]} : vector<32x512xbf16> to vector<32x256xbf16>
    %c4_141 = arith.constant 4 : index
    %c0_142 = arith.constant 0 : index
    %c0_143 = arith.constant 0 : index
    %163 = vector.load %arg4[%c4_141, %c0_142, %c0_143] : memref<5x256x256xbf16, #tpu.memory_space<vmem>>, vector<1x256x256xbf16>
    %164 = vector.shape_cast %163 : vector<1x256x256xbf16> to vector<256x256xbf16>
    %cst_144 = arith.constant dense<0.000000e+00> : vector<32x256xf32>
    %165 = tpu.matmul %162, %164, %cst_144 {dimension_numbers = #tpu.dot_dimension_numbers<[1], [0], [0], [1], [0, 0, 1, 1], [], []>} : vector<32x256xbf16>, vector<256x256xbf16>, vector<32x256xf32> -> vector<32x256xf32>
    %166 = arith.addf %159, %165 : vector<32x256xf32>
    %c4_145 = arith.constant 4 : index
    %c0_146 = arith.constant 0 : index
    %c0_147 = arith.constant 0 : index
    %167 = vector.load %arg5[%c4_145, %c0_146, %c0_147] : memref<5x512x256xbf16, #tpu.memory_space<vmem>>, vector<1x512x256xbf16>
    %168 = vector.shape_cast %167 : vector<1x512x256xbf16> to vector<512x256xbf16>
    %cst_148 = arith.constant dense<0.000000e+00> : vector<32x256xf32>
    %169 = tpu.matmul %161, %168, %cst_148 {dimension_numbers = #tpu.dot_dimension_numbers<[1], [0], [0], [1], [0, 0, 1, 1], [], []>} : vector<32x512xbf16>, vector<512x256xbf16>, vector<32x256xf32> -> vector<32x256xf32>
    %170 = arith.addf %166, %169 : vector<32x256xf32>
    %cst_149 = arith.constant dense<0.000000e+00> : vector<256xf32>
    %171 = vector.multi_reduction <add>, %170, %cst_149 [0] : vector<32x256xf32> to vector<256xf32>
    %172 = vector.shape_cast %171 : vector<256xf32> to vector<1x256xf32>
    %cst_150 = arith.constant 3.125000e-02 : f32
    %173 = vector.broadcast %cst_150 : f32 to vector<1x256xf32>
    %174 = arith.mulf %172, %173 : vector<1x256xf32>
    %175 = arith.mulf %170, %170 : vector<32x256xf32>
    %cst_151 = arith.constant dense<0.000000e+00> : vector<256xf32>
    %176 = vector.multi_reduction <add>, %175, %cst_151 [0] : vector<32x256xf32> to vector<256xf32>
    %177 = vector.shape_cast %176 : vector<256xf32> to vector<1x256xf32>
    %cst_152 = arith.constant 3.125000e-02 : f32
    %178 = vector.broadcast %cst_152 : f32 to vector<1x256xf32>
    %179 = arith.mulf %177, %178 : vector<1x256xf32>
    %180 = arith.mulf %174, %174 : vector<1x256xf32>
    %181 = arith.subf %179, %180 : vector<1x256xf32>
    %cst_153 = arith.constant 0.000000e+00 : f32
    %182 = vector.broadcast %cst_153 : f32 to vector<1x256xf32>
    %183 = arith.maximumf %181, %182 : vector<1x256xf32>
    %184 = vector.broadcast %174 : vector<1x256xf32> to vector<32x256xf32>
    %185 = arith.subf %170, %184 : vector<32x256xf32>
    %cst_154 = arith.constant 9.99999974E-6 : f32
    %186 = vector.broadcast %cst_154 : f32 to vector<1x256xf32>
    %187 = arith.addf %183, %186 : vector<1x256xf32>
    %188 = math.rsqrt %187 : vector<1x256xf32>
    %189 = vector.broadcast %188 : vector<1x256xf32> to vector<32x256xf32>
    %190 = arith.mulf %185, %189 : vector<32x256xf32>
    %cst_155 = arith.constant 0.000000e+00 : f32
    %191 = vector.broadcast %cst_155 : f32 to vector<32x256xf32>
    %192 = arith.maximumf %190, %191 : vector<32x256xf32>
    %193 = vector.shape_cast %192 : vector<32x256xf32> to vector<2x16x256xf32>
    %194 = arith.truncf %193 : vector<2x16x256xf32> to vector<2x16x256xbf16>
    %195 = arith.extf %194 : vector<2x16x256xbf16> to vector<2x16x256xf32>
    %196 = arith.subf %193, %195 : vector<2x16x256xf32>
    %197 = arith.truncf %196 : vector<2x16x256xf32> to vector<2x16x256xbf16>
    %c0_156 = arith.constant 0 : index
    %c16_157 = arith.constant 16 : index
    %c0_158 = arith.constant 0 : index
    %198 = vector.load %arg9[%c0_156, %c16_157, %c0_158] : memref<2x48x512xbf16, #tpu.memory_space<vmem>>, vector<2x16x256xbf16>
    tpu.vector_store %arg9[%c0_156, %c16_157, %c0_158], %194 {strides = array<i32>} : memref<2x48x512xbf16, #tpu.memory_space<vmem>>, vector<2x16x256xbf16>,
    %c0_159 = arith.constant 0 : index
    %c16_160 = arith.constant 16 : index
    %c256_161 = arith.constant 256 : index
    %199 = vector.load %arg9[%c0_159, %c16_160, %c256_161] : memref<2x48x512xbf16, #tpu.memory_space<vmem>>, vector<2x16x256xbf16>
    tpu.vector_store %arg9[%c0_159, %c16_160, %c256_161], %197 {strides = array<i32>} : memref<2x48x512xbf16, #tpu.memory_space<vmem>>, vector<2x16x256xbf16>,
    %c0_162 = arith.constant 0 : index
    %c15_163 = arith.constant 15 : index
    %c0_164 = arith.constant 0 : index
    %200 = vector.load %arg9[%c0_162, %c15_163, %c0_164] : memref<2x48x512xbf16, #tpu.memory_space<vmem>>, vector<2x16x512xbf16>
    %201 = vector.shape_cast %200 : vector<2x16x512xbf16> to vector<32x512xbf16>
    %202 = vector.extract_strided_slice %201 {offsets = [0, 0], sizes = [32, 256], strides = [1, 1]} : vector<32x512xbf16> to vector<32x256xbf16>
    %c0_165 = arith.constant 0 : index
    %c0_166 = arith.constant 0 : index
    %c0_167 = arith.constant 0 : index
    %203 = vector.load %arg6[%c0_165, %c0_166, %c0_167] : memref<3x256x128xbf16, #tpu.memory_space<vmem>>, vector<1x256x128xbf16>
    %204 = vector.shape_cast %203 : vector<1x256x128xbf16> to vector<256x128xbf16>
    %cst_168 = arith.constant dense<0.000000e+00> : vector<32x128xf32>
    %205 = tpu.matmul %202, %204, %cst_168 {dimension_numbers = #tpu.dot_dimension_numbers<[1], [0], [0], [1], [0, 0, 1, 1], [], []>} : vector<32x256xbf16>, vector<256x128xbf16>, vector<32x128xf32> -> vector<32x128xf32>
    %c0_169 = arith.constant 0 : index
    %c0_170 = arith.constant 0 : index
    %c0_171 = arith.constant 0 : index
    %206 = vector.load %arg7[%c0_169, %c0_170, %c0_171] : memref<3x512x128xbf16, #tpu.memory_space<vmem>>, vector<1x512x128xbf16>
    %207 = vector.shape_cast %206 : vector<1x512x128xbf16> to vector<512x128xbf16>
    %cst_172 = arith.constant dense<0.000000e+00> : vector<32x128xf32>
    %208 = tpu.matmul %201, %207, %cst_172 {dimension_numbers = #tpu.dot_dimension_numbers<[1], [0], [0], [1], [0, 0, 1, 1], [], []>} : vector<32x512xbf16>, vector<512x128xbf16>, vector<32x128xf32> -> vector<32x128xf32>
    %209 = arith.addf %205, %208 : vector<32x128xf32>
    %c0_173 = arith.constant 0 : index
    %c16_174 = arith.constant 16 : index
    %c0_175 = arith.constant 0 : index
    %210 = vector.load %arg9[%c0_173, %c16_174, %c0_175] : memref<2x48x512xbf16, #tpu.memory_space<vmem>>, vector<2x16x512xbf16>
    %211 = vector.shape_cast %210 : vector<2x16x512xbf16> to vector<32x512xbf16>
    %212 = vector.extract_strided_slice %211 {offsets = [0, 0], sizes = [32, 256], strides = [1, 1]} : vector<32x512xbf16> to vector<32x256xbf16>
    %c1_176 = arith.constant 1 : index
    %c0_177 = arith.constant 0 : index
    %c0_178 = arith.constant 0 : index
    %213 = vector.load %arg6[%c1_176, %c0_177, %c0_178] : memref<3x256x128xbf16, #tpu.memory_space<vmem>>, vector<1x256x128xbf16>
    %214 = vector.shape_cast %213 : vector<1x256x128xbf16> to vector<256x128xbf16>
    %cst_179 = arith.constant dense<0.000000e+00> : vector<32x128xf32>
    %215 = tpu.matmul %212, %214, %cst_179 {dimension_numbers = #tpu.dot_dimension_numbers<[1], [0], [0], [1], [0, 0, 1, 1], [], []>} : vector<32x256xbf16>, vector<256x128xbf16>, vector<32x128xf32> -> vector<32x128xf32>
    %216 = arith.addf %209, %215 : vector<32x128xf32>
    %c1_180 = arith.constant 1 : index
    %c0_181 = arith.constant 0 : index
    %c0_182 = arith.constant 0 : index
    %217 = vector.load %arg7[%c1_180, %c0_181, %c0_182] : memref<3x512x128xbf16, #tpu.memory_space<vmem>>, vector<1x512x128xbf16>
    %218 = vector.shape_cast %217 : vector<1x512x128xbf16> to vector<512x128xbf16>
    %cst_183 = arith.constant dense<0.000000e+00> : vector<32x128xf32>
    %219 = tpu.matmul %211, %218, %cst_183 {dimension_numbers = #tpu.dot_dimension_numbers<[1], [0], [0], [1], [0, 0, 1, 1], [], []>} : vector<32x512xbf16>, vector<512x128xbf16>, vector<32x128xf32> -> vector<32x128xf32>
    %220 = arith.addf %216, %219 : vector<32x128xf32>
    %c0_184 = arith.constant 0 : index
    %c17_185 = arith.constant 17 : index
    %c0_186 = arith.constant 0 : index
    %221 = vector.load %arg9[%c0_184, %c17_185, %c0_186] : memref<2x48x512xbf16, #tpu.memory_space<vmem>>, vector<2x16x512xbf16>
    %222 = vector.shape_cast %221 : vector<2x16x512xbf16> to vector<32x512xbf16>
    %223 = vector.extract_strided_slice %222 {offsets = [0, 0], sizes = [32, 256], strides = [1, 1]} : vector<32x512xbf16> to vector<32x256xbf16>
    %c2_187 = arith.constant 2 : index
    %c0_188 = arith.constant 0 : index
    %c0_189 = arith.constant 0 : index
    %224 = vector.load %arg6[%c2_187, %c0_188, %c0_189] : memref<3x256x128xbf16, #tpu.memory_space<vmem>>, vector<1x256x128xbf16>
    %225 = vector.shape_cast %224 : vector<1x256x128xbf16> to vector<256x128xbf16>
    %cst_190 = arith.constant dense<0.000000e+00> : vector<32x128xf32>
    %226 = tpu.matmul %223, %225, %cst_190 {dimension_numbers = #tpu.dot_dimension_numbers<[1], [0], [0], [1], [0, 0, 1, 1], [], []>} : vector<32x256xbf16>, vector<256x128xbf16>, vector<32x128xf32> -> vector<32x128xf32>
    %227 = arith.addf %220, %226 : vector<32x128xf32>
    %c2_191 = arith.constant 2 : index
    %c0_192 = arith.constant 0 : index
    %c0_193 = arith.constant 0 : index
    %228 = vector.load %arg7[%c2_191, %c0_192, %c0_193] : memref<3x512x128xbf16, #tpu.memory_space<vmem>>, vector<1x512x128xbf16>
    %229 = vector.shape_cast %228 : vector<1x512x128xbf16> to vector<512x128xbf16>
    %cst_194 = arith.constant dense<0.000000e+00> : vector<32x128xf32>
    %230 = tpu.matmul %222, %229, %cst_194 {dimension_numbers = #tpu.dot_dimension_numbers<[1], [0], [0], [1], [0, 0, 1, 1], [], []>} : vector<32x512xbf16>, vector<512x128xbf16>, vector<32x128xf32> -> vector<32x128xf32>
    %231 = arith.addf %227, %230 : vector<32x128xf32>
    %cst_195 = arith.constant dense<0.000000e+00> : vector<128xf32>
    %232 = vector.multi_reduction <add>, %231, %cst_195 [0] : vector<32x128xf32> to vector<128xf32>
    %233 = vector.shape_cast %232 : vector<128xf32> to vector<1x128xf32>
    %cst_196 = arith.constant 3.125000e-02 : f32
    %234 = vector.broadcast %cst_196 : f32 to vector<1x128xf32>
    %235 = arith.mulf %233, %234 : vector<1x128xf32>
    %236 = arith.mulf %231, %231 : vector<32x128xf32>
    %cst_197 = arith.constant dense<0.000000e+00> : vector<128xf32>
    %237 = vector.multi_reduction <add>, %236, %cst_197 [0] : vector<32x128xf32> to vector<128xf32>
    %238 = vector.shape_cast %237 : vector<128xf32> to vector<1x128xf32>
    %cst_198 = arith.constant 3.125000e-02 : f32
    %239 = vector.broadcast %cst_198 : f32 to vector<1x128xf32>
    %240 = arith.mulf %238, %239 : vector<1x128xf32>
    %241 = arith.mulf %235, %235 : vector<1x128xf32>
    %242 = arith.subf %240, %241 : vector<1x128xf32>
    %cst_199 = arith.constant 0.000000e+00 : f32
    %243 = vector.broadcast %cst_199 : f32 to vector<1x128xf32>
    %244 = arith.maximumf %242, %243 : vector<1x128xf32>
    %245 = vector.broadcast %235 : vector<1x128xf32> to vector<32x128xf32>
    %246 = arith.subf %231, %245 : vector<32x128xf32>
    %cst_200 = arith.constant 9.99999974E-6 : f32
    %247 = vector.broadcast %cst_200 : f32 to vector<1x128xf32>
    %248 = arith.addf %244, %247 : vector<1x128xf32>
    %249 = math.rsqrt %248 : vector<1x128xf32>
    %250 = vector.broadcast %249 : vector<1x128xf32> to vector<32x128xf32>
    %251 = arith.mulf %246, %250 : vector<32x128xf32>
    %252 = vector.shape_cast %251 : vector<32x128xf32> to vector<2x16x128xf32>
    %c0_201 = arith.constant 0 : index
    %c0_202 = arith.constant 0 : index
    %c0_203 = arith.constant 0 : index
    %253 = vector.load %arg1[%c0_201, %c0_202, %c0_203] : memref<2x16x128xf32, #tpu.memory_space<vmem>>, vector<2x16x128xf32>
    %cst_204 = arith.constant 2.000000e-01 : f32
    %254 = vector.broadcast %cst_204 : f32 to vector<2x16x128xf32>
    %255 = arith.mulf %254, %253 : vector<2x16x128xf32>
    %256 = arith.addf %252, %255 : vector<2x16x128xf32>
    %cst_205 = arith.constant 0.000000e+00 : f32
    %257 = vector.broadcast %cst_205 : f32 to vector<2x16x128xf32>
    %258 = arith.maximumf %256, %257 : vector<2x16x128xf32>
    %c0_206 = arith.constant 0 : index
    %c0_207 = arith.constant 0 : index
    %c0_208 = arith.constant 0 : index
    %259 = vector.load %arg8[%c0_206, %c0_207, %c0_208] : memref<2x16x128xf32, #tpu.memory_space<vmem>>, vector<2x16x128xf32>
    tpu.vector_store %arg8[%c0_206, %c0_207, %c0_208], %258 {strides = array<i32>} : memref<2x16x128xf32, #tpu.memory_space<vmem>>, vector<2x16x128xf32>,
    return
  }
  func.func @transform_0(%arg0: i32) -> (i32, i32, i32) {
    %c0_i32 = arith.constant 0 : i32
    %c0_i32_0 = arith.constant 0 : i32
    %c0_i32_1 = arith.constant 0 : i32
    %c0_i32_2 = arith.constant 0 : i32
    return %c0_i32, %c0_i32_0, %c0_i32_1 : i32, i32, i32
  }
  func.func @transform_1(%arg0: i32) -> (i32, i32, i32) {
    %c0_i32 = arith.constant 0 : i32
    %c0_i32_0 = arith.constant 0 : i32
    %c0_i32_1 = arith.constant 0 : i32
    %c0_i32_2 = arith.constant 0 : i32
    return %c0_i32, %c0_i32_0, %c0_i32_1 : i32, i32, i32
  }
  func.func @transform_2(%arg0: i32) -> (i32, i32, i32) {
    %c0_i32 = arith.constant 0 : i32
    %c0_i32_0 = arith.constant 0 : i32
    %c0_i32_1 = arith.constant 0 : i32
    %c0_i32_2 = arith.constant 0 : i32
    return %c0_i32, %c0_i32_0, %c0_i32_1 : i32, i32, i32
  }
  func.func @transform_3(%arg0: i32) -> (i32, i32, i32) {
    %c0_i32 = arith.constant 0 : i32
    %c0_i32_0 = arith.constant 0 : i32
    %c0_i32_1 = arith.constant 0 : i32
    %c0_i32_2 = arith.constant 0 : i32
    return %c0_i32, %c0_i32_0, %c0_i32_1 : i32, i32, i32
  }
  func.func @transform_4(%arg0: i32) -> (i32, i32, i32) {
    %c0_i32 = arith.constant 0 : i32
    %c0_i32_0 = arith.constant 0 : i32
    %c0_i32_1 = arith.constant 0 : i32
    %c0_i32_2 = arith.constant 0 : i32
    return %c0_i32, %c0_i32_0, %c0_i32_1 : i32, i32, i32
  }
  func.func @transform_5(%arg0: i32) -> (i32, i32, i32) {
    %c0_i32 = arith.constant 0 : i32
    %c0_i32_0 = arith.constant 0 : i32
    %c0_i32_1 = arith.constant 0 : i32
    %c0_i32_2 = arith.constant 0 : i32
    return %c0_i32, %c0_i32_0, %c0_i32_1 : i32, i32, i32
  }
  func.func @transform_6(%arg0: i32) -> (i32, i32, i32) {
    %c0_i32 = arith.constant 0 : i32
    %c0_i32_0 = arith.constant 0 : i32
    %c0_i32_1 = arith.constant 0 : i32
    %c0_i32_2 = arith.constant 0 : i32
    return %c0_i32, %c0_i32_0, %c0_i32_1 : i32, i32, i32
  }
  func.func @transform_7(%arg0: i32) -> (i32, i32, i32) {
    %c0_i32 = arith.constant 0 : i32
    %c0_i32_0 = arith.constant 0 : i32
    %c0_i32_1 = arith.constant 0 : i32
    %c0_i32_2 = arith.constant 0 : i32
    return %c0_i32, %c0_i32_0, %c0_i32_1 : i32, i32, i32
  }
}

</mosaic_0001>

<bundles_post_ra>
// kernel: tpu_custom_call.1
= control target key start
LH: loop header
LB: loop body
LE: loop exit
PB: predicated region body
PF: predicated region fallthrough
CT: control target
= control target key end

     0   :  { %12 = vsyncpa [#allocation5], 0  ;;  %s14369_s0 = inlined_call_operand.hbm [shape: f32[2,16,128], index: 0, kind: input, shape index: {}]   ;;  %s14370_s1 = inlined_call_operand.hbm [shape: bf16[7,128,256], index: 1, kind: input, shape index: {}]   ;;  %s14371_s2 = inlined_call_operand.hbm [shape: bf16[7,256,256], index: 2, kind: input, shape index: {}]   ;;  %s14372_s3 = inlined_call_operand.hbm [shape: bf16[5,256,256], index: 3, kind: input, shape index: {}]   ;;  %s14373_s4 = inlined_call_operand.hbm [shape: bf16[5,512,256], index: 4, kind: input, shape index: {}]   ;;  %s14374_s5 = inlined_call_operand.hbm [shape: bf16[3,256,128], index: 5, kind: input, shape index: {}]   ;;  %s14375_s6 = inlined_call_operand.hbm [shape: bf16[3,512,128], index: 6, kind: input, shape index: {}]   ;;  %s14376_s7 = inlined_call_operand.hbm [shape: f32[2,16,128], index: 7, kind: output, shape index: {}]  }
   0x1   :  { %13 = vsyncpa [#allocation8], 0 }
   0x2   :  { %14 = vsyncpa [#allocation11], 0 }
   0x3   :  { %15 = vsyncpa [#allocation14], 0 }
   0x4   :  { %16 = vsyncpa [#allocation6], 0  ;;  %s12929_s24 = smov [#allocation7]   ;;  %s12930_s26 = smov [#allocation10]  }
   0x5   :  { %s34_s25 = sshll.u32 %s12929_s24, 4  ;;  %s58_s27 = sshll.u32 %s12930_s26, 4  ;;  %s35_s25 = int_to_ptr.vmem [resolvable:$true] %s34_s25  ;;  %s59_s27 = int_to_ptr.vmem [resolvable:$true] %s58_s27 }
   0x6   :  { %s12767_s28 = scalar_lea.vmem %s35_s25, 14336  ;;  %p12772_p1 = scmp.lt.s32.totalorder %s35_s25, %s35_s25 }
   0x7   :  { %p12768_p0 = scmp.ne.s32.totalorder %s35_s25, %s12767_s28  ;;  %p12773_p2 = scmp.lt.s32.totalorder %s12767_s28, %s12767_s28 }
   0x9   :  { %p12774_p3 = por %p12773_p2, %p12772_p1 }
   0xb   :  { %p12775_p4 = pnand %p12774_p3, %p12768_p0 }
   0xd   :  { %12778 = shalt.err (!%p12775_p4)
}
   0xe   :  { %s12931_s29 = smov 128   ;;  %s12932_s30 = smov 8  }
   0xf   :  { %40 = dma.hbm_to_vmem [thread:$0]  %s14370_s1, 14336, %s35_s25, [#allocation8], %s12931_s29, %s12931_s29, %s12932_s30  }
  0x10   :  { %s12787_s10 = scalar_lea.vmem %s59_s27, 20480  ;;  %p12792_p6 = scmp.lt.s32.totalorder %s59_s27, %s59_s27 }
  0x11   :  { %p12788_p5 = scmp.ne.s32.totalorder %s59_s27, %s12787_s10  ;;  %p12793_p7 = scmp.lt.s32.totalorder %s12787_s10, %s12787_s10 }
  0x13   :  { %p12794_p8 = por %p12793_p7, %p12792_p6 }
  0x15   :  { %p12795_p9 = pnand %p12794_p8, %p12788_p5 }
  0x17   :  { %12798 = shalt.err (!%p12795_p9)
}
  0x18   :  { %64 = dma.hbm_to_vmem [thread:$0]  %s14372_s3, 20480, %s59_s27, [#allocation11], %s12931_s29, %s12931_s29, %s12932_s30  }
  0x19   :  { %s12933_s13 = smov [#allocation13]  }
  0x1a   :  { %s82_s14 = sshll.u32 %s12933_s13, 4  ;;  %s83_s14 = int_to_ptr.vmem [resolvable:$true] %s82_s14 }
  0x1b   :  { %s12807_s15 = scalar_lea.vmem %s83_s14, 6144  ;;  %p12812_p11 = scmp.lt.s32.totalorder %s83_s14, %s83_s14 }
  0x1c   :  { %p12808_p10 = scmp.ne.s32.totalorder %s83_s14, %s12807_s15  ;;  %p12813_p12 = scmp.lt.s32.totalorder %s12807_s15, %s12807_s15 }
  0x1e   :  { %p12814_p13 = por %p12813_p12, %p12812_p11 }
  0x20   :  { %p12815_p0 = pnand %p12814_p13, %p12808_p10 }
  0x22   :  { %12818 = shalt.err (!%p12815_p0)
}
  0x23   :  { %s12934_s1 = smov 64   ;;  %s12935_s16 = smov 4  }
  0x24   :  { %88 = dma.hbm_to_vmem [thread:$0]  %s14374_s5, 6144, %s83_s14, [#allocation14], %s12934_s1, %s12934_s1, %s12935_s16  }
  0x25   :  { %s12936_s3 = smov [#allocation4]   ;;  %s12937_s20 = smov [#allocation9]  }
  0x26   :  { %s22_s19 = sshll.u32 %s12936_s3, 4  ;;  %s46_s21 = sshll.u32 %s12937_s20, 4  ;;  %s23_s19 = int_to_ptr.vmem [resolvable:$true] %s22_s19  ;;  %s47_s21 = int_to_ptr.vmem [resolvable:$true] %s46_s21 }
  0x27   :  { %s12827_s22 = scalar_lea.vmem %s23_s19, 512  ;;  %p12832_p2 = scmp.lt.s32.totalorder %s23_s19, %s23_s19 }
  0x28   :  { %p12828_p1 = scmp.ne.s32.totalorder %s23_s19, %s12827_s22  ;;  %p12833_p3 = scmp.lt.s32.totalorder %s12827_s22, %s12827_s22 }
  0x2a   :  { %p12834_p4 = por %p12833_p3, %p12832_p2 }
  0x2c   :  { %p12835_p5 = pnand %p12834_p4, %p12828_p1 }
  0x2e   :  { %12838 = shalt.err (!%p12835_p5)
}
  0x2f   :  { %28 = dma.hbm_to_vmem [thread:$0]  %s14369_s0, 512, %s23_s19, [#allocation5], %s12931_s29, %s12931_s29, %s12932_s30  }
  0x30   :  { %s12847_s5 = scalar_lea.vmem %s47_s21, 28672  ;;  %p12852_p7 = scmp.lt.s32.totalorder %s47_s21, %s47_s21 }
  0x31   :  { %p12848_p6 = scmp.ne.s32.totalorder %s47_s21, %s12847_s5  ;;  %p12853_p8 = scmp.lt.s32.totalorder %s12847_s5, %s12847_s5 }
  0x33   :  { %p12854_p9 = por %p12853_p8, %p12852_p7 }
  0x35   :  { %p12855_p10 = pnand %p12854_p9, %p12848_p6 }
  0x37   :  { %12858 = shalt.err (!%p12855_p10)
}
  0x38   :  { %52 = dma.hbm_to_vmem [thread:$0]  %s14371_s2, 28672, %s47_s21, [#allocation8], %s12931_s29, %s12931_s29, %s12932_s30  }
  0x39   :  { %s12938_s27 = smov [#allocation12]   ;;  %s12939_s8 = smov [#allocation15]  }
  0x3a   :  { %s70_s28 = sshll.u32 %s12938_s27, 4  ;;  %s94_s0 = sshll.u32 %s12939_s8, 4  ;;  %s71_s28 = int_to_ptr.vmem [resolvable:$true] %s70_s28  ;;  %s95_s0 = int_to_ptr.vmem [resolvable:$true] %s94_s0 }
  0x3b   :  { %s12867_s9 = scalar_lea.vmem %s71_s28, 40960  ;;  %p12872_p12 = scmp.lt.s32.totalorder %s71_s28, %s71_s28 }
  0x3c   :  { %p12868_p11 = scmp.ne.s32.totalorder %s71_s28, %s12867_s9  ;;  %p12873_p13 = scmp.lt.s32.totalorder %s12867_s9, %s12867_s9 }
  0x3e   :  { %p12874_p0 = por %p12873_p13, %p12872_p12 }
  0x40   :  { %p12875_p1 = pnand %p12874_p0, %p12868_p11 }
  0x42   :  { %12878 = shalt.err (!%p12875_p1)
}
  0x43   :  { %76 = dma.hbm_to_vmem [thread:$0]  %s14373_s4, 40960, %s71_s28, [#allocation11], %s12931_s29, %s12931_s29, %s12932_s30  }
  0x44   :  { %s12887_s2 = scalar_lea.vmem %s95_s0, 12288  ;;  %p12892_p3 = scmp.lt.s32.totalorder %s95_s0, %s95_s0 }
  0x45   :  { %p12888_p2 = scmp.ne.s32.totalorder %s95_s0, %s12887_s2  ;;  %p12893_p4 = scmp.lt.s32.totalorder %s12887_s2, %s12887_s2 }
  0x47   :  { %p12894_p5 = por %p12893_p4, %p12892_p3 }
  0x49   :  { %p12895_p6 = pnand %p12894_p5, %p12888_p2 }
  0x4b   :  { %12898 = shalt.err (!%p12895_p6)
}
  0x4c   :  { %100 = dma.hbm_to_vmem [thread:$0]  %s14375_s6, 12288, %s95_s0, [#allocation14], %s12934_s1, %s12934_s1, %s12935_s16  }
  0x4d   :  { %12919 = dma.done.wait [#allocation5], 512  }
  0x4e   :  { %12920 = vsyncadd [#allocation5], 4294966784 }
  0x4f   :  { %12921 = dma.done.wait [#allocation8], 43008  }
  0x50   :  { %12922 = vsyncadd [#allocation8], 4294924288 }
  0x51   :  { %12923 = dma.done.wait [#allocation11], 61440  }
  0x52   :  { %12924 = vsyncadd [#allocation11], 4294905856 }
  0x53   :  { %12925 = dma.done.wait [#allocation14], 18432  }
  0x54   :  { %12926 = vsyncadd [#allocation14], 4294948864  ;;  %v12940_v0 = vmov 0   ;;  %v11353_v1 = vld [vmem:[#allocation9 + $0x74] ss:$8 sps:$4 sm:$0xff]   ;;  %v155_v27 = vld [vmem:[#allocation4] sm:$0xff] }
  0x55   :  { %123 = vst [vmem:[#allocation2] sm:$0xff] %v12940_v0  ;;  %661 = vmatprep.mubr.bf16.mxu1 %v12940_v0  ;;  %125 = vst [vmem:[#allocation2 + $0x10] sm:$0xff] %v12940_v0  ;;  %v11355_v2 = vld [vmem:[#allocation7 + $0x74] ss:$8 sps:$4 sm:$0xff]   ;;  %496 = vmatprep.subr.bf16.mxu0 %v11353_v1  ;;  %v11357_v3 = vld [vmem:[#allocation9 + $0x70] ss:$8 sps:$4 sm:$0xff]   ;;  %v11064_v31 = vpack.c.bf16 %v155_v27, %v155_v27 }
  0x56   :  { %126 = vst [vmem:[#allocation2 + $0x18] sm:$0xff] %v12940_v0  ;;  %129 = vst [vmem:[#allocation2 + $0x70] sm:$0xff] %v12940_v0  ;;  %v11358_v4 = vld [vmem:[#allocation7 + $0x70] ss:$8 sps:$4 sm:$0xff]   ;;  %629 = vmatprep.subr.bf16.mxu1 %v11355_v2  ;;  %v11359_v5 = vld [vmem:[#allocation9 + $0x64] ss:$8 sps:$4 sm:$0xff]   ;;  %497 = vmatpush1.bf16.msra.mxu0 %v11357_v3 }
  0x57   :  { %130 = vst [vmem:[#allocation2 + $0x78] sm:$0xff] %v12940_v0  ;;  %131 = vst [vmem:[#allocation2 + $0x40] sm:$0xff] %v12940_v0  ;;  %630 = vmatpush1.bf16.msra.mxu1 %v11358_v4  ;;  %v11361_v6 = vld [vmem:[#allocation7 + $0x64] ss:$8 sps:$4 sm:$0xff]   ;;  %v11363_v7 = vld [vmem:[#allocation9 + $0x60] ss:$8 sps:$4 sm:$0xff]   ;;  %498 = vmatprep.subr.bf16.mxu0 %v11359_v5 }
  0x58   :  { %132 = vst [vmem:[#allocation2 + $0x48] sm:$0xff] %v12940_v0  ;;  %135 = vst [vmem:[#allocation2 + $0xa0] sm:$0xff] %v12940_v0  ;;  %v11364_v8 = vld [vmem:[#allocation7 + $0x60] ss:$8 sps:$4 sm:$0xff]   ;;  %631 = vmatprep.subr.bf16.mxu1 %v11361_v6  ;;  %v11365_v9 = vld [vmem:[#allocation9 + $0x54] ss:$8 sps:$4 sm:$0xff]  }
  0x59   :  { %136 = vst [vmem:[#allocation2 + $0xa8] sm:$0xff] %v12940_v0  ;;  %141 = vst [vmem:[#allocation3 + $0x10] sm:$0xff] %v12940_v0  ;;  %v11367_v10 = vld [vmem:[#allocation7 + $0x54] ss:$8 sps:$4 sm:$0xff]   ;;  %v11369_v11 = vld [vmem:[#allocation9 + $0x50] ss:$8 sps:$4 sm:$0xff]  }
  0x5a   :  { %142 = vst [vmem:[#allocation3 + $0x48] sm:$0xff] %v12940_v0  ;;  %145 = vst [vmem:[#allocation3 + $0x40] sm:$0xff] %v12940_v0  ;;  %v11370_v12 = vld [vmem:[#allocation7 + $0x50] ss:$8 sps:$4 sm:$0xff]   ;;  %499 = vmatpush1.bf16.msra.mxu0 %v11363_v7  ;;  %v11371_v13 = vld [vmem:[#allocation9 + $0x44] ss:$8 sps:$4 sm:$0xff]  }
  0x5b   :  { %146 = vst [vmem:[#allocation3 + $0xb8] sm:$0xff] %v12940_v0  ;;  %147 = vst [vmem:[#allocation3 + $0x30] sm:$0xff] %v12940_v0  ;;  %632 = vmatpush1.bf16.msra.mxu1 %v11364_v8  ;;  %500 = vmatprep.subr.bf16.mxu0 %v11365_v9  ;;  %v11373_v14 = vld [vmem:[#allocation7 + $0x44] ss:$8 sps:$4 sm:$0xff]   ;;  %v11375_v15 = vld [vmem:[#allocation9 + $0x40] ss:$8 sps:$4 sm:$0xff]  }
  0x5c   :  { %148 = vst [vmem:[#allocation3 + $0x80] sm:$0xff] %v12940_v0  ;;  %151 = vst [vmem:[#allocation3 + $0x78] sm:$0xff] %v12940_v0  ;;  %633 = vmatprep.subr.bf16.mxu1 %v11367_v10  ;;  %v11376_v16 = vld [vmem:[#allocation7 + $0x40] ss:$8 sps:$4 sm:$0xff]   ;;  %v11377_v17 = vld [vmem:[#allocation9 + $0x34] ss:$8 sps:$4 sm:$0xff]  }
  0x5d   :  { %152 = vst [vmem:[#allocation3 + $0x50] sm:$0xff] %v12940_v0  ;;  %v11379_v18 = vld [vmem:[#allocation7 + $0x34] ss:$8 sps:$4 sm:$0xff]   ;;  %v11381_v19 = vld [vmem:[#allocation9 + $0x30] ss:$8 sps:$4 sm:$0xff]   ;;  %v156_v28 = vld [vmem:[#allocation4 + $0x8] sm:$0xff] }
  0x5e   :  { %501 = vmatpush1.bf16.msra.mxu0 %v11369_v11  ;;  %v11382_v20 = vld [vmem:[#allocation7 + $0x30] ss:$8 sps:$4 sm:$0xff]   ;;  %v11383_v21 = vld [vmem:[#allocation9 + $0x24] ss:$8 sps:$4 sm:$0xff]   ;;  %v11387_v23 = vld [vmem:[#allocation9 + $0x20] ss:$8 sps:$4 sm:$0xff]   ;;  %v159_v30 = vpack.c.bf16 %v156_v28, %v155_v27  ;;  %v11065_v32 = vpack.c.bf16 %v156_v28, %v156_v28 }
  0x5f   :  { %634 = vmatpush1.bf16.msra.mxu1 %v11370_v12  ;;  %502 = vmatprep.subr.bf16.mxu0 %v11371_v13  ;;  %v11385_v22 = vld [vmem:[#allocation7 + $0x24] ss:$8 sps:$4 sm:$0xff]   ;;  %v11388_v24 = vld [vmem:[#allocation7 + $0x20] ss:$8 sps:$4 sm:$0xff]   ;;  %v11389_v25 = vld [vmem:[#allocation9 + $0x14] ss:$8 sps:$4 sm:$0xff]  }
  0x60   :  { %635 = vmatprep.subr.bf16.mxu1 %v11373_v14  ;;  %v11391_v26 = vld [vmem:[#allocation7 + $0x14] ss:$8 sps:$4 sm:$0xff]   ;;  %v11393_v29 = vld [vmem:[#allocation9 + $0x10] ss:$8 sps:$4 sm:$0xff]   ;;  %v11395_v34 = vld [vmem:[#allocation9 + $0x4] ss:$8 sps:$4 sm:$0xff]   ;;  %v161_v36 = vunpack.c.l.bf16 %v159_v30  ;;  %v162_v37 = vunpack.c.h.bf16 %v159_v30 }
  0x61   :  { %v11394_v33 = vld [vmem:[#allocation7 + $0x10] ss:$8 sps:$4 sm:$0xff]   ;;  %v11397_v35 = vld [vmem:[#allocation7 + $0x4] ss:$8 sps:$4 sm:$0xff]   ;;  %185 = vst [vmem:[#allocation2 + $0x20] sm:$0xf] %v11064_v31 }
  0x62   :  { %503 = vmatpush1.bf16.msra.mxu0 %v11375_v15  ;;  %186 = vst [vmem:[#allocation2 + $0x30] sm:$0xf] %v11065_v32  ;;  %v207_v38 = vld [vmem:[#allocation2 + $0x10] sm:$0xcc]  ;;  %v11399_v39 = vld [vmem:[#allocation9] ss:$8 sps:$4 sm:$0xff]   ;;  %v165_v41 = vsub.f32 %v155_v27, %v161_v36  ;;  %v166_v42 = vsub.f32 %v156_v28, %v162_v37 }
  0x63   :  { %636 = vmatpush1.bf16.msra.mxu1 %v11376_v16  ;;  %504 = vmatprep.subr.bf16.mxu0 %v11377_v17  ;;  %v11400_v40 = vld [vmem:[#allocation7] ss:$8 sps:$4 sm:$0xff]   ;;  %v11401_v43 = vld [vmem:[#allocation9 + $0xf4] ss:$8 sps:$4 sm:$0xff]   ;;  %v217_v44 = vshrl.u32 %v207_v38, 16  ;;  %v220_v45 = vshll.u32 %v207_v38, 16 }
  0x64   :  { %637 = vmatprep.subr.bf16.mxu1 %v11379_v18  ;;  %v11068_v46 = vpack.c.bf16 %v165_v41, %v165_v41  ;;  %v11069_v47 = vpack.c.bf16 %v166_v42, %v166_v42  ;;  %v11405_v48 = vld [vmem:[#allocation7 + $0xf4] ss:$8 sps:$4 sm:$0xff]   ;;  %v11406_v51 = vld [vmem:[#allocation9 + $0xf0] ss:$8 sps:$4 sm:$0xff]   ;;  %v11407_v52 = vld [vmem:[#allocation9 + $0xe4] ss:$8 sps:$4 sm:$0xff]  }
  0x65   :  { %v219_v49 = vrot.slane %v217_v44, 6  ;;  %v222_v50 = vrot.slane %v220_v45, 7  ;;  %v11412_v54 = vld [vmem:[#allocation9 + $0xe0] ss:$8 sps:$4 sm:$0xff]   ;;  %v157_v55 = vld [vmem:[#allocation4 + $0x10] sm:$0xff]  ;;  %v158_v56 = vld [vmem:[#allocation4 + $0x18] sm:$0xff] }
  0x66   :  { %505 = vmatpush1.bf16.msra.mxu0 %v11381_v19  ;;  %203 = vst [vmem:[#allocation2 + $0x24] sm:$0xf] %v11068_v46  ;;  %204 = vst [vmem:[#allocation2 + $0x34] sm:$0xf] %v11069_v47  ;;  %vm213_vm0 = vsmask.f32 1280  ;;  %v160_v58 = vpack.c.bf16 %v158_v56, %v157_v55  ;;  %v11066_v59 = vpack.c.bf16 %v157_v55, %v157_v55  ;;  %v11067_v60 = vpack.c.bf16 %v158_v56, %v158_v56 }
  0x67   :  { %638 = vmatpush1.bf16.msra.mxu1 %v11382_v20  ;;  %506 = vmatprep.subr.bf16.mxu0 %v11383_v21  ;;  %v223_v53 = vor.u32 %v222_v50, %v219_v49  ;;  %v11413_v57 = vld [vmem:[#allocation9 + $0xd4] ss:$8 sps:$4 sm:$0xff]   ;;  %vm214_vm1 = vsmask.f32 5392  ;;  %v11418_v5 = vld [vmem:[#allocation9 + $0xd0] ss:$8 sps:$4 sm:$0xff]  }
  0x68   :  { %639 = vmatprep.subr.bf16.mxu1 %v11385_v22  ;;  %187 = vst [vmem:[#allocation2 + $0x80] sm:$0xf] %v11066_v59  ;;  %188 = vst [vmem:[#allocation2 + $0x90] sm:$0xf] %v11067_v60  ;;  %v163_v6 = vunpack.c.l.bf16 %v160_v58  ;;  %v164_v7 = vunpack.c.h.bf16 %v160_v58  ;;  %v210_v8 = vld [vmem:[#allocation2 + $0x70] sm:$0xcc] }
  0x69   :  { %v224_v4 = vrot.slane %v223_v53, 4  ;;  %v11419_v13 = vld [vmem:[#allocation9 + $0xc4] ss:$8 sps:$4 sm:$0xff]   ;;  %vm13052_vm2 = vmor %vm213_vm0, %vm214_vm1  ;;  %v245_v20 = vshrl.u32 %v210_v8, 16  ;;  %v248_v21 = vshll.u32 %v210_v8, 16  ;;  %vm690_vm3 = vcmask 1040384  }
  0x6a   :  { %507 = vmatpush1.bf16.msra.mxu0 %v11387_v23  ;;  %v167_v16 = vsub.f32 %v157_v55, %v163_v6  ;;  %v168_v17 = vsub.f32 %v158_v56, %v164_v7  ;;  %v11424_v23 = vld [vmem:[#allocation9 + $0xc0] ss:$8 sps:$4 sm:$0xff]   ;;  %v11425_v28 = vld [vmem:[#allocation9 + $0xb4] ss:$8 sps:$4 sm:$0xff]   ;;  %v11403_v30 = vld [vmem:[#allocation7 + $0xf0] ss:$8 sps:$4 sm:$0xff]  }
  0x6b   :  { %640 = vmatpush1.bf16.msra.mxu1 %v11388_v24  ;;  %508 = vmatprep.subr.bf16.mxu0 %v11389_v25  ;;  %v247_v31 = vrot.slane %v245_v20, 6  ;;  %v250_v32 = vrot.slane %v248_v21, 7  ;;  %v11431_v37 = vld [vmem:[#allocation9 + $0xa4] ss:$8 sps:$4 sm:$0xff]   ;;  %v11409_v38 = vld [vmem:[#allocation7 + $0xe0] ss:$8 sps:$4 sm:$0xff]  }
  0x6c   :  { %641 = vmatprep.subr.bf16.mxu1 %v11391_v26  ;;  %v11070_v24 = vpack.c.bf16 %v167_v16, %v167_v16  ;;  %v11071_v25 = vpack.c.bf16 %v168_v17, %v168_v17  ;;  %v11436_v41 = vld [vmem:[#allocation9 + $0xa0] ss:$8 sps:$4 sm:$0xff]   ;;  %v11437_v42 = vld [vmem:[#allocation9 + $0x94] ss:$8 sps:$4 sm:$0xff]   ;;  %v11415_v45 = vld [vmem:[#allocation7 + $0xd0] ss:$8 sps:$4 sm:$0xff]  }
  0x6d   :  { %v13042_v61 = vld [vmem:[#allocation2 + $0x20] sm:$0xff]  ;;  %v13044_v62 = vld [vmem:[#allocation2 + $0x30] sm:$0x77]  ;;  %vm691_vm4 = vcmask 1044484   ;;  %v14389_v21 = vmov 0  ;;  %vm2525_vm12 = vcmask 1042432  }
  0x6e   :  { %509 = vmatpush1.bf16.msra.mxu0 %v11393_v29  ;;  %v226_v63 = vshrl.u32 %v13042_v61, 16  ;;  %v229_v1 = vshll.u32 %v13042_v61, 16  ;;  %v236_v2 = vshrl.u32 %v13044_v62, 16  ;;  %v239_v3 = vshll.u32 %v13044_v62, 16  ;;  %205 = vst [vmem:[#allocation2 + $0x84] sm:$0xf] %v11070_v24  ;;  %vm13089_vm5 = vmor %vm690_vm3, %vm691_vm4 }
  0x6f   :  { %642 = vmatpush1.bf16.msra.mxu1 %v11394_v33  ;;  %510 = vmatprep.subr.bf16.mxu0 %v11395_v34  ;;  %206 = vst [vmem:[#allocation2 + $0x94] sm:$0xf] %v11071_v25  ;;  %v11411_v34 = vld [vmem:[#allocation7 + $0xe4] ss:$8 sps:$4 sm:$0xff]   ;;  %v11442_v56 = vld [vmem:[#allocation9 + $0x90] ss:$8 sps:$4 sm:$0xff]  }
  0x70   :  { %643 = vmatprep.subr.bf16.mxu1 %v11397_v35  ;;  %v228_v9 = vrot.slane %v226_v63, 6  ;;  %v231_v10 = vrot.slane %v229_v1, 7  ;;  %v238_v11 = vrot.slane %v236_v2, 6  ;;  %v241_v12 = vrot.slane %v239_v3, 7  ;;  %v11430_v35 = vld [vmem:[#allocation9 + $0xb0] ss:$8 sps:$4 sm:$0xff]  }
  0x71   :  { %v13056_v15 = vrot.slane %v226_v63, 7  ;;  %v11423_v50 = vld [vmem:[#allocation7 + $0xc4] ss:$8 sps:$4 sm:$0xff]   ;;  %v11421_v58 = vld [vmem:[#allocation7 + $0xc0] ss:$8 sps:$4 sm:$0xff]   ;;  %v14390_v21 = vsel %vm13089_vm5, 4294967295, %v14389_v21 }
  0x72   :  { %511 = vmatpush1.bf16.msra.mxu0 %v11399_v39  ;;  %v232_v18 = vor.u32 %v231_v10, %v228_v9  ;;  %v242_v19 = vor.u32 %v241_v12, %v238_v11  ;;  %v11417_v39 = vld [vmem:[#allocation7 + $0xd4] ss:$8 sps:$4 sm:$0xff]   ;;  %v11448_v3 = vld [vmem:[#allocation9 + $0x80] ss:$8 sps:$4 sm:$0xff]   ;;  %v11435_v8 = vld [vmem:[#allocation7 + $0xa4] ss:$8 sps:$4 sm:$0xff]  }
  0x73   :  { %644 = vmatpush1.bf16.msra.mxu1 %v11400_v40  ;;  %512 = vmatprep.subr.bf16.mxu0 %v11401_v43  ;;  %v13059_v22 = vor.u32 %v13056_v15, %v229_v1  ;;  %v251_v40 = vor.u32 %v250_v32, %v247_v31  ;;  %v11429_v63 = vld [vmem:[#allocation7 + $0xb4] ss:$8 sps:$4 sm:$0xff]   ;;  %v695_v9 = vrot.slane %v13042_v61, 7  ;;  %v11449_v10 = vld [vmem:[#allocation9 + $0x170] ss:$8 sps:$4 sm:$0xff]   ;;  %v698_v61 = vrot.slane %v13044_v62, 7 }
  0x74   :  { %812 = vmatprep.subr.bf16.mxu1 %v11405_v48  ;;  %v233_v26 = vsel %vm13052_vm2, %v224_v4, %v232_v18  ;;  %v234_v27 = vrot.slane %v232_v18, 4  ;;  %v11451_v4 = vld [vmem:[#allocation9 + $0x174] ss:$8 sps:$4 sm:$0xff]   ;;  %v11457_v12 = vld [vmem:[#allocation9 + $0x164] ss:$8 sps:$4 sm:$0xff]   ;;  %14391 = vst [vmem:[#allocation22_spill] sm:$0xff] %v14390_v21 }
  0x75   :  { %v13069_v43 = vld [vmem:[#allocation2 + $0x80] sm:$0xff]  ;;  %v682_v11 = vld [vmem:[#allocation2 + $0x10] sm:$0x88]  ;;  %v697_v17 = vrot.slane %v695_v9, 4  ;;  %vm1137_vm6 = vsmask.f32 256 }
  0x76   :  { %513 = vmatpush2.bf16.msra.mxu0 %v11406_v51  ;;  %v243_v29 = vsel %vm13052_vm2, %v234_v27, %v242_v19  ;;  %v13071_v44 = vld [vmem:[#allocation2 + $0x90] sm:$0x77]  ;;  %v254_v46 = vshrl.u32 %v13069_v43, 16  ;;  %v257_v47 = vshll.u32 %v13069_v43, 16  ;;  %v252_v51 = vrot.slane %v251_v40, 4  ;;  %s12941_s4 = smov [#allocation16]  }
  0x77   :  { %514 = vmatprep.subr.bf16.mxu0 %v11407_v52  ;;  %v13065_v33 = vcombine.low %v233_v26, %v243_v29  ;;  %v9975_v36 = vcombine.high %v233_v26, %v243_v29  ;;  %v264_v48 = vshrl.u32 %v13071_v44, 16  ;;  %v267_v49 = vshll.u32 %v13071_v44, 16  ;;  %v11433_v16 = vld [vmem:[#allocation7 + $0xa0] ss:$8 sps:$4 sm:$0xff]   ;;  %v11441_v14 = vld [vmem:[#allocation7 + $0x94] ss:$8 sps:$4 sm:$0xff]  }
  0x78   :  { %v256_v52 = vrot.slane %v254_v46, 6  ;;  %v259_v53 = vrot.slane %v257_v47, 7  ;;  %v10026_v18 = vrot.slane %v682_v11, 11  ;;  %v11455_v19 = vld [vmem:[#allocation9 + $0x160] ss:$8 sps:$4 sm:$0xff]   ;;  %v1141_v20 = vshrl.u32 %v682_v11, 16 }
  0x79   :  { %662 = vmatmul.mubr.bf16.vlgmr.msra.gmra.mxu1 %v13065_v33  ;;  %528 = vmatprep.mubr.bf16.mxu0 %v9975_v36  ;;  %v269_v55 = vrot.slane %v267_v49, 7  ;;  %v11439_v24 = vld [vmem:[#allocation7 + $0x90] ss:$8 sps:$4 sm:$0xff]   ;;  %v11447_v25 = vld [vmem:[#allocation7 + $0x84] ss:$8 sps:$4 sm:$0xff]   ;;  %v699_v26 = vsel %vm13089_vm5, %v697_v17, %v698_v61  ;;  %v1148_v36 = vrot.slane %v13056_v15, 4 }
  0x7a   :  { %515 = vmatpush2.bf16.msra.mxu0 %v11412_v54  ;;  %813 = vmatpush1.bf16.msra.mxu1 %v11403_v30  ;;  %v266_v54 = vrot.slane %v264_v48, 6  ;;  %v260_v59 = vor.u32 %v259_v53, %v256_v52  ;;  %vm1138_vm7 = vsmask.f32 4368  ;;  %v696_v62 = vsel %vm13089_vm5, %v10026_v18, %v695_v9  ;;  %v11461_v27 = vld [vmem:[#allocation9 + $0x150] ss:$8 sps:$4 sm:$0xff]   ;;  %s9951_s6 = sshll.u32 %s12941_s4, 4  ;;  %s9952_s6 = int_to_ptr.vmem [resolvable:$true] %s9951_s6 }
  0x7b   :  { %516 = vmatprep.subr.bf16.mxu0 %v11413_v57  ;;  %671 = vmatprep.mubr.bf16.mxu1 %v12940_v0  ;;  %v11443_v57 = vld [vmem:[#allocation9 + $0x84] ss:$8 sps:$4 sm:$0xff]   ;;  %v10080_v29 = vrot.slane %v1141_v20, 11  ;;  %vm13106_vm8 = vmor %vm1137_vm6, %vm1138_vm7  ;;  %v13113_v40 = vld [vmem:[#allocation2 + $0x70] sm:$0x88]  ;;  %v13121_v48 = vcombine.low %v696_v62, %v699_v26  ;;  %v705_v52 = vrot.slane %v13071_v44, 7  ;;  %p12904_p8 = scmp.lt.s32.totalorder %s9952_s6, %s9952_s6 }
  0x7c   :  { %814 = vmatprep.subr.bf16.mxu1 %v11411_v34  ;;  %v270_v60 = vor.u32 %v269_v55, %v266_v54  ;;  %v261_v1 = vsel %vm13052_vm2, %v252_v51, %v260_v59  ;;  %v262_v2 = vrot.slane %v260_v59, 4  ;;  %v11469_v30 = vld [vmem:[#allocation9 + $0x144] ss:$8 sps:$4 sm:$0xff]   ;;  %v11445_v34 = vld [vmem:[#allocation7 + $0x80] ss:$8 sps:$4 sm:$0xff]   ;;  %v13151_v61 = vld [vmem:[#allocation2 + $0x90] sm:$0xff] }
  0x7d   :  { %v11452_v49 = vld [vmem:[#allocation7 + $0x170] ss:$8 sps:$4 sm:$0xff]   ;;  %v11460_v54 = vld [vmem:[#allocation7 + $0x164] ss:$8 sps:$4 sm:$0xff]   ;;  %v11458_v44 = vld [vmem:[#allocation7 + $0x160] ss:$8 sps:$4 sm:$0xff]  }
  0x7e   :  { %517 = vmatpush2.bf16.msra.mxu0 %v11418_v5  ;;  %815 = vmatpush1.bf16.msra.mxu1 %v11409_v38  ;;  %v11427_v5 = vld [vmem:[#allocation7 + $0xb0] ss:$8 sps:$4 sm:$0xff]   ;;  %v271_v6 = vsel %vm13052_vm2, %v262_v2, %v270_v60  ;;  %v702_v38 = vrot.slane %v13069_v43, 7  ;;  %v11466_v60 = vld [vmem:[#allocation7 + $0x154] ss:$8 sps:$4 sm:$0xff]   ;;  %v13154_v20 = vshrl.u32 %v13151_v61, 16 }
  0x7f   :  { %518 = vmatprep.subr.bf16.mxu0 %v11419_v13  ;;  %816 = vmatprep.subr.bf16.mxu1 %v11417_v39  ;;  %v9976_v7 = vcombine.low %v261_v1, %v271_v6  ;;  %v9977_v13 = vcombine.high %v261_v1, %v271_v6  ;;  %v11487_v1 = vld [vmem:[#allocation9 + $0x114] ss:$8 sps:$4 sm:$0xff]   ;;  %v11493_v6 = vld [vmem:[#allocation9 + $0x104] ss:$8 sps:$4 sm:$0xff]   ;;  %v11491_v9 = vld [vmem:[#allocation9 + $0x100] ss:$8 sps:$4 sm:$0xff]  }
  0x80   :  { %v704_v51 = vrot.slane %v702_v38, 4  ;;  %v11476_v11 = vld [vmem:[#allocation7 + $0x130] ss:$8 sps:$4 sm:$0xff]   ;;  %v11490_v17 = vld [vmem:[#allocation7 + $0x114] ss:$8 sps:$4 sm:$0xff]   ;;  %vm2526_vm13 = vcmask 1046532  }
  0x81   :  { %672 = vmatmul.mubr.bf16.gmra.mxu1 %v9976_v7  ;;  %v11511_v18 = vld [vmem:[#allocation9 + $0x1d4] ss:$8 sps:$4 sm:$0xff]   ;;  %vm2038_vm9 = vsmask.f32 3328  ;;  %vm2039_vm10 = vsmask.f32 7440  ;;  %vm13248_vm14 = vmor %vm2525_vm12, %vm2526_vm13 }
  0x82   :  { %519 = vmatpush2.bf16.msra.mxu0 %v11424_v23  ;;  %817 = vmatpush1.bf16.msra.mxu1 %v11415_v45  ;;  %v11463_v23 = vld [vmem:[#allocation9 + $0x154] ss:$8 sps:$4 sm:$0xff]   ;;  %v13118_v45 = vsel %vm13106_vm8, %v10080_v29, %v13059_v22  ;;  %v11473_v22 = vld [vmem:[#allocation9 + $0x130] ss:$8 sps:$4 sm:$0xff]   ;;  %v13143_v59 = vsel %vm13089_vm5, %v704_v51, %v705_v52  ;;  %v1169_v29 = vrot.slane %v13154_v20, 7  ;;  %vm13216_vm11 = vmor %vm2038_vm9, %vm2039_vm10  ;;  %s12899_s14 = scalar_lea.vmem %s9952_s6, 512 }
  0x83   :  { %520 = vmatprep.subr.bf16.mxu0 %v11425_v28  ;;  %818 = vmatprep.subr.bf16.mxu1 %v11423_v50  ;;  %v13097_v28 = vld [vmem:[#allocation2 + $0x30] sm:$0xff]  ;;  %v10027_v50 = vrot.slane %v13113_v40, 11  ;;  %vm2972_vm15 = vsmask.f32 2304  ;;  %vm2973_vm0 = vsmask.f32 6416  ;;  %p12900_p7 = scmp.ne.s32.totalorder %s9952_s6, %s12899_s14  ;;  %p12905_p9 = scmp.lt.s32.totalorder %s12899_s14, %s12899_s14 }
  0x84   :  { %844 = vmatprep.mubr.bf16.mxu1 %v12940_v0  ;;  %v13100_v31 = vshrl.u32 %v13097_v28, 16  ;;  %v13103_v32 = vshll.u32 %v13097_v28, 16  ;;  %v11514_v52 = vld [vmem:[#allocation9 + $0x254] ss:$8 sps:$4 sm:$0xff]   ;;  %vm13321_vm1 = vmor %vm2972_vm15, %vm2973_vm0 }
  0x85   :  { %p12906_p10 = por %p12905_p9, %p12904_p8 }
  0x86   :  { %521 = vmatpush2.bf16.msra.mxu0 %v11430_v35  ;;  %819 = vmatpush1.bf16.msra.mxu1 %v11421_v58  ;;  %v14392_v35 = vmov 0  ;;  %v1152_v39 = vrot.slane %v13100_v31, 7  ;;  %v13139_v58 = vsel %vm13089_vm5, %v10027_v50, %v702_v38  ;;  %v13167_v50 = vld [vmem:[#allocation2] sm:$0xff] }
  0x87   :  { %522 = vmatprep.subr.bf16.mxu0 %v11431_v37  ;;  %820 = vmatprep.subr.bf16.mxu1 %v11429_v63  ;;  %v14393_v35 = vsel %vm13106_vm8, 4294967295, %v14392_v35  ;;  %v11454_v37 = vld [vmem:[#allocation7 + $0x174] ss:$8 sps:$4 sm:$0xff]   ;;  %v11479_v63 = vld [vmem:[#allocation9 + $0x120] ss:$8 sps:$4 sm:$0xff]   ;;  %v13147_v2 = vcombine.low %v13139_v58, %v13143_v59  ;;  %p12907_p11 = pnand %p12906_p10, %p12900_p7 }
  0x88   :  { %14394 = vst [vmem:[#allocation23_spill] sm:$0xff] %v14393_v35  ;;  %v1155_v15 = vor.u32 %v13103_v32, %v1152_v39 }
  0x8a   :  { %523 = vmatpush2.bf16.msra.mxu0 %v11436_v41  ;;  %821 = vmatpush1.bf16.msra.mxu1 %v11427_v5  ;;  %v11467_v41 = vld [vmem:[#allocation9 + $0x140] ss:$8 sps:$4 sm:$0xff]   ;;  %v13127_v53 = vsel %vm13106_vm8, %v1148_v36, %v1155_v15  ;;  %v11485_v5 = vld [vmem:[#allocation9 + $0x110] ss:$8 sps:$4 sm:$0xff]   ;;  %v11523_v36 = vld [vmem:[#allocation9 + $0x1b4] ss:$8 sps:$4 sm:$0xff]  }
  0x8b   :  { %524 = vmatprep.subr.bf16.mxu0 %v11437_v42  ;;  %822 = vmatprep.subr.bf16.mxu1 %v11435_v8  ;;  %v11475_v42 = vld [vmem:[#allocation9 + $0x134] ss:$8 sps:$4 sm:$0xff]   ;;  %v13131_v55 = vcombine.low %v13118_v45, %v13127_v53  ;;  %v11529_v15 = vld [vmem:[#allocation9 + $0x1a4] ss:$8 sps:$4 sm:$0xff]  }
  0x8c   :  { %v11478_v8 = vld [vmem:[#allocation7 + $0x134] ss:$8 sps:$4 sm:$0xff]  }
  0x8e   :  { %525 = vmatpush2.bf16.msra.mxu0 %v11442_v56  ;;  %823 = vmatpush1.bf16.msra.mxu1 %v11433_v16  ;;  %v10100_v56 = vcombine.high %v13118_v45, %v13127_v53  ;;  %v11505_v16 = vld [vmem:[#allocation9 + $0x1e4] ss:$8 sps:$4 sm:$0xff]   ;;  %v11530_v45 = vld [vmem:[#allocation9 + $0x220] ss:$8 sps:$4 sm:$0xff]   ;;  %v11538_v53 = vld [vmem:[#allocation9 + $0x214] ss:$8 sps:$4 sm:$0xff]  }
  0x8f   :  { %526 = vmatprep.subr.bf16.mxu0 %v11443_v57  ;;  %824 = vmatprep.subr.bf16.mxu1 %v11441_v14  ;;  %v11481_v57 = vld [vmem:[#allocation9 + $0x124] ss:$8 sps:$4 sm:$0xff]   ;;  %v11482_v14 = vld [vmem:[#allocation7 + $0x120] ss:$8 sps:$4 sm:$0xff]  }
  0x92   :  { %527 = vmatpush2.bf16.msra.mxu0 %v11448_v3  ;;  %825 = vmatpush1.bf16.msra.mxu1 %v11439_v24  ;;  %v11464_v3 = vld [vmem:[#allocation7 + $0x150] ss:$8 sps:$4 sm:$0xff]  }
  0x93   :  { %1074 = vmatprep.subr.bf16.mxu0 %v11451_v4  ;;  %826 = vmatprep.subr.bf16.mxu1 %v11447_v25  ;;  %v11472_v4 = vld [vmem:[#allocation7 + $0x144] ss:$8 sps:$4 sm:$0xff]   ;;  %v11509_v24 = vld [vmem:[#allocation9 + $0x1d0] ss:$8 sps:$4 sm:$0xff]  }
  0x94   :  { %v11517_v25 = vld [vmem:[#allocation9 + $0x1c4] ss:$8 sps:$4 sm:$0xff]  }
  0x95   :  { %529 = vmatmul.mubr.bf16.vlgmr.msra.gmra.mxu0 %v13065_v33  ;;  %v10046_v33 = vcombine.high %v696_v62, %v699_v26  ;;  %v1158_v62 = vshrl.u32 %v13113_v40, 16  ;;  %v11494_v26 = vld [vmem:[#allocation7 + $0x100] ss:$8 sps:$4 sm:$0xff]  }
  0x96   :  { %1075 = vmatpush1.bf16.msra.mxu0 %v11449_v10  ;;  %538 = vmatprep.mubr.bf16.mxu0 %v9977_v13  ;;  %v11499_v10 = vld [vmem:[#allocation9 + $0x1f4] ss:$8 sps:$4 sm:$0xff]   ;;  %v11497_v13 = vld [vmem:[#allocation9 + $0x1f0] ss:$8 sps:$4 sm:$0xff]  }
  0x97   :  { %1076 = vmatprep.subr.bf16.mxu0 %v11457_v12  ;;  %827 = vmatpush1.bf16.msra.mxu1 %v11445_v34  ;;  %v11484_v12 = vld [vmem:[#allocation7 + $0x124] ss:$8 sps:$4 sm:$0xff]   ;;  %v11515_v34 = vld [vmem:[#allocation9 + $0x1c0] ss:$8 sps:$4 sm:$0xff]   ;;  %v10081_v38 = vrot.slane %v1158_v62, 11 }
  0x98   :  { %1279 = vmatprep.subr.bf16.mxu1 %v11454_v37  ;;  %v11500_v37 = vld [vmem:[#allocation9 + $0x270] ss:$8 sps:$4 sm:$0xff]   ;;  %v11578_v62 = vld [vmem:[#allocation7 + $0x1a0] ss:$8 sps:$4 sm:$0xff]  }
  0x9a   :  { %1077 = vmatpush1.bf16.msra.mxu0 %v11455_v19  ;;  %845 = vmatmul.mubr.bf16.vlgmr.msra.gmra.mxu1 %v13121_v48  ;;  %v11488_v19 = vld [vmem:[#allocation7 + $0x110] ss:$8 sps:$4 sm:$0xff]  }
  0x9b   :  { %1078 = vmatprep.subr.bf16.mxu0 %v11463_v23  ;;  %1280 = vmatpush1.bf16.msra.mxu1 %v11452_v49  ;;  %v11496_v23 = vld [vmem:[#allocation7 + $0x104] ss:$8 sps:$4 sm:$0xff]   ;;  %v11506_v49 = vld [vmem:[#allocation9 + $0x260] ss:$8 sps:$4 sm:$0xff]  }
  0x9c   :  { %854 = vmatprep.mubr.bf16.mxu1 %v12940_v0  ;;  %1281 = vmatprep.subr.bf16.mxu1 %v11460_v54  ;;  %v11527_v54 = vld [vmem:[#allocation9 + $0x1a0] ss:$8 sps:$4 sm:$0xff]  }
  0x9d   :  { %539 = vmatmul.mubr.bf16.gmra.mxu0 %v9976_v7  ;;  %v11470_v7 = vld [vmem:[#allocation7 + $0x140] ss:$8 sps:$4 sm:$0xff]  }
  0x9e   :  { %1079 = vmatpush1.bf16.msra.mxu0 %v11461_v27  ;;  %1106 = vmatprep.mubr.bf16.mxu0 %v10046_v33  ;;  %v1162_v27 = vrot.slane %v254_v46, 7  ;;  %v11502_v33 = vld [vmem:[#allocation9 + $0x274] ss:$8 sps:$4 sm:$0xff]  }
  0x9f   :  { %1080 = vmatprep.subr.bf16.mxu0 %v11469_v30  ;;  %1282 = vmatpush1.bf16.msra.mxu1 %v11458_v44  ;;  %v13161_v30 = vshll.u32 %v13151_v61, 16  ;;  %v11512_v44 = vld [vmem:[#allocation9 + $0x250] ss:$8 sps:$4 sm:$0xff]  }
  0xa0   :  { %1283 = vmatprep.subr.bf16.mxu1 %v11466_v60  ;;  %v1163_v39 = vor.u32 %v1162_v27, %v257_v47  ;;  %v1165_v40 = vrot.slane %v1162_v27, 4  ;;  %v11520_v60 = vld [vmem:[#allocation9 + $0x244] ss:$8 sps:$4 sm:$0xff]   ;;  %v11557_v27 = vld [vmem:[#allocation9 + $0x2d0] ss:$8 sps:$4 sm:$0xff]  }
  0xa1   :  { %v1172_v46 = vor.u32 %v13161_v30, %v1169_v29  ;;  %v11565_v29 = vld [vmem:[#allocation9 + $0x2c4] ss:$8 sps:$4 sm:$0xff]  }
  0xa2   :  { %1081 = vmatpush1.bf16.msra.mxu0 %v11467_v41  ;;  %855 = vmatmul.mubr.bf16.gmra.mxu1 %v13147_v2  ;;  %v11508_v41 = vld [vmem:[#allocation9 + $0x264] ss:$8 sps:$4 sm:$0xff]   ;;  %v13172_v47 = vsel %vm13106_vm8, %v10081_v38, %v1163_v39  ;;  %v11590_v38 = vld [vmem:[#allocation7 + $0x180] ss:$8 sps:$4 sm:$0xff]   ;;  %v11595_v39 = vld [vmem:[#allocation9 + $0x374] ss:$8 sps:$4 sm:$0xff]  }
  0xa3   :  { %1082 = vmatprep.subr.bf16.mxu0 %v11475_v42  ;;  %1284 = vmatpush1.bf16.msra.mxu1 %v11464_v3  ;;  %v11521_v42 = vld [vmem:[#allocation9 + $0x1b0] ss:$8 sps:$4 sm:$0xff]   ;;  %v13176_v51 = vsel %vm13106_vm8, %v1165_v40, %v1172_v46  ;;  %v11518_v3 = vld [vmem:[#allocation9 + $0x240] ss:$8 sps:$4 sm:$0xff]  }
  0xa4   :  { %1311 = vmatprep.mubr.bf16.mxu1 %v12940_v0  ;;  %1285 = vmatprep.subr.bf16.mxu1 %v11472_v4  ;;  %v11503_v0 = vld [vmem:[#allocation9 + $0x1e0] ss:$8 sps:$4 sm:$0xff]   ;;  %v11526_v4 = vld [vmem:[#allocation9 + $0x234] ss:$8 sps:$4 sm:$0xff]   ;;  %v11569_v40 = vld [vmem:[#allocation9 + $0x2b0] ss:$8 sps:$4 sm:$0xff]  }
  0xa5   :  { %v12736_v46 = vld [vmem:[#allocation2 + $0x20] sm:$0xff] }
  0xa6   :  { %1083 = vmatpush1.bf16.msra.mxu0 %v11473_v22  ;;  %v11535_v22 = vld [vmem:[#allocation9 + $0x194] ss:$8 sps:$4 sm:$0xff]  }
  0xa7   :  { %1084 = vmatprep.subr.bf16.mxu0 %v11481_v57  ;;  %1286 = vmatpush1.bf16.msra.mxu1 %v11470_v7  ;;  %v13180_v57 = vcombine.low %v13172_v47, %v13176_v51  ;;  %v11524_v7 = vld [vmem:[#allocation9 + $0x230] ss:$8 sps:$4 sm:$0xff]  }
  0xa8   :  { %1287 = vmatprep.subr.bf16.mxu1 %v11478_v8  ;;  %v11532_v8 = vld [vmem:[#allocation9 + $0x224] ss:$8 sps:$4 sm:$0xff]  }
  0xaa   :  { %1085 = vmatpush1.bf16.msra.mxu0 %v11479_v63  ;;  %v11533_v63 = vld [vmem:[#allocation9 + $0x190] ss:$8 sps:$4 sm:$0xff]  }
  0xab   :  { %1086 = vmatprep.subr.bf16.mxu0 %v11487_v1  ;;  %1288 = vmatpush1.bf16.msra.mxu1 %v11476_v11  ;;  %v11541_v1 = vld [vmem:[#allocation9 + $0x184] ss:$8 sps:$4 sm:$0xff]   ;;  %v10047_v11 = vcombine.high %v13139_v58, %v13143_v59  ;;  %v11542_v58 = vld [vmem:[#allocation9 + $0x200] ss:$8 sps:$4 sm:$0xff]  }
  0xac   :  { %1289 = vmatprep.subr.bf16.mxu1 %v11484_v12  ;;  %v11562_v12 = vld [vmem:[#allocation7 + $0x1d4] ss:$8 sps:$4 sm:$0xff]   ;;  %v11566_v59 = vld [vmem:[#allocation7 + $0x1c0] ss:$8 sps:$4 sm:$0xff]  }
  0xae   :  { %1087 = vmatpush1.bf16.msra.mxu0 %v11485_v5  ;;  %v11539_v5 = vld [vmem:[#allocation9 + $0x180] ss:$8 sps:$4 sm:$0xff]  }
  0xaf   :  { %1088 = vmatprep.subr.bf16.mxu0 %v11493_v6  ;;  %1290 = vmatpush1.bf16.msra.mxu1 %v11482_v14  ;;  %v11550_v6 = vld [vmem:[#allocation7 + $0x1f4] ss:$8 sps:$4 sm:$0xff]   ;;  %v11560_v14 = vld [vmem:[#allocation7 + $0x1d0] ss:$8 sps:$4 sm:$0xff]  }
  0xb0   :  { %1291 = vmatprep.subr.bf16.mxu1 %v11490_v17  ;;  %v11568_v17 = vld [vmem:[#allocation7 + $0x1c4] ss:$8 sps:$4 sm:$0xff]  }
  0xb2   :  { %1089 = vmatpush1.bf16.msra.mxu0 %v11491_v9  ;;  %v11548_v9 = vld [vmem:[#allocation7 + $0x1f0] ss:$8 sps:$4 sm:$0xff]  }
  0xb3   :  { %1090 = vmatprep.subr.bf16.mxu0 %v11499_v10  ;;  %1292 = vmatpush1.bf16.msra.mxu1 %v11488_v19  ;;  %v11556_v10 = vld [vmem:[#allocation7 + $0x1e4] ss:$8 sps:$4 sm:$0xff]  }
  0xb4   :  { %1293 = vmatprep.subr.bf16.mxu1 %v11496_v23  ;;  %v11553_v19 = vld [vmem:[#allocation9 + $0x2e4] ss:$8 sps:$4 sm:$0xff]   ;;  %v11572_v23 = vld [vmem:[#allocation7 + $0x1b0] ss:$8 sps:$4 sm:$0xff]  }
  0xb6   :  { %1091 = vmatpush2.bf16.msra.mxu0 %v11497_v13  ;;  %v11536_v13 = vld [vmem:[#allocation9 + $0x210] ss:$8 sps:$4 sm:$0xff]  }
  0xb7   :  { %1092 = vmatprep.subr.bf16.mxu0 %v11505_v16  ;;  %1294 = vmatpush1.bf16.msra.mxu1 %v11494_v26  ;;  %v11544_v16 = vld [vmem:[#allocation9 + $0x204] ss:$8 sps:$4 sm:$0xff]   ;;  %v11586_v26 = vld [vmem:[#allocation7 + $0x194] ss:$8 sps:$4 sm:$0xff]  }
  0xb8   :  { %1541 = vmatprep.subr.bf16.mxu1 %v11502_v33  ;;  %v11584_v33 = vld [vmem:[#allocation7 + $0x190] ss:$8 sps:$4 sm:$0xff]  }
  0xba   :  { %1093 = vmatpush2.bf16.msra.mxu0 %v11503_v0  ;;  %1312 = vmatmul.mubr.bf16.vlgmr.msra.gmra.mxu1 %v13131_v55  ;;  %v11574_v0 = vld [vmem:[#allocation7 + $0x1b4] ss:$8 sps:$4 sm:$0xff]  }
  0xbb   :  { %1094 = vmatprep.subr.bf16.mxu0 %v11511_v18  ;;  %1542 = vmatpush1.bf16.msra.mxu1 %v11500_v37  ;;  %v11545_v18 = vld [vmem:[#allocation9 + $0x2f0] ss:$8 sps:$4 sm:$0xff]   ;;  %v11571_v37 = vld [vmem:[#allocation9 + $0x2b4] ss:$8 sps:$4 sm:$0xff]  }
  0xbc   :  { %1321 = vmatprep.mubr.bf16.mxu1 %v13167_v50  ;;  %1543 = vmatprep.subr.bf16.mxu1 %v11508_v41  ;;  %v13192_v41 = vcombine.low %v12736_v46, %v13097_v28 }
  0xbe   :  { %1095 = vmatpush2.bf16.msra.mxu0 %v11509_v24  ;;  %v11580_v24 = vld [vmem:[#allocation7 + $0x1a4] ss:$8 sps:$4 sm:$0xff]  }
  0xbf   :  { %1096 = vmatprep.subr.bf16.mxu0 %v11517_v25  ;;  %1544 = vmatpush1.bf16.msra.mxu1 %v11506_v49  ;;  %v11551_v25 = vld [vmem:[#allocation9 + $0x2e0] ss:$8 sps:$4 sm:$0xff]   ;;  %v11602_v49 = vld [vmem:[#allocation9 + $0x364] ss:$8 sps:$4 sm:$0xff]  }
  0xc0   :  { %1545 = vmatprep.subr.bf16.mxu1 %v11514_v52  ;;  %v11575_v52 = vld [vmem:[#allocation9 + $0x2a0] ss:$8 sps:$4 sm:$0xff]  }
  0xc2   :  { %1097 = vmatpush2.bf16.msra.mxu0 %v11515_v34  ;;  %1322 = vmatmul.mubr.bf16.gmra.mxu1 %v13180_v57  ;;  %v11592_v34 = vld [vmem:[#allocation7 + $0x184] ss:$8 sps:$4 sm:$0xff]  }
  0xc3   :  { %1098 = vmatprep.subr.bf16.mxu0 %v11523_v36  ;;  %1546 = vmatpush1.bf16.msra.mxu1 %v11512_v44  ;;  %v11563_v36 = vld [vmem:[#allocation9 + $0x2c0] ss:$8 sps:$4 sm:$0xff]   ;;  %v11608_v44 = vld [vmem:[#allocation9 + $0x354] ss:$8 sps:$4 sm:$0xff]  }
  0xc4   :  { %1573 = vmatprep.mubr.bf16.mxu1 %v10100_v56  ;;  %1547 = vmatprep.subr.bf16.mxu1 %v11520_v60  ;;  %v11554_v56 = vld [vmem:[#allocation7 + $0x1e0] ss:$8 sps:$4 sm:$0xff]   ;;  %v11581_v60 = vld [vmem:[#allocation9 + $0x290] ss:$8 sps:$4 sm:$0xff]  }
  0xc6   :  { %1099 = vmatpush2.bf16.msra.mxu0 %v11521_v42  ;;  %v11577_v42 = vld [vmem:[#allocation9 + $0x2a4] ss:$8 sps:$4 sm:$0xff]  }
  0xc7   :  { %1100 = vmatprep.subr.bf16.mxu0 %v11529_v15  ;;  %1548 = vmatpush1.bf16.msra.mxu1 %v11518_v3  ;;  %v11593_v15 = vld [vmem:[#allocation9 + $0x370] ss:$8 sps:$4 sm:$0xff]  }
  0xc8   :  { %1549 = vmatprep.subr.bf16.mxu1 %v11526_v4  ;;  %v11606_v3 = vld [vmem:[#allocation9 + $0x350] ss:$8 sps:$4 sm:$0xff]   ;;  %v11615_v4 = vld [vmem:[#allocation9 + $0x344] ss:$8 sps:$4 sm:$0xff]  }
  0xca   :  { %1101 = vmatpush2.bf16.msra.mxu0 %v11527_v54  ;;  %v11583_v54 = vld [vmem:[#allocation9 + $0x294] ss:$8 sps:$4 sm:$0xff]  }
  0xcb   :  { %1102 = vmatprep.subr.bf16.mxu0 %v11535_v22  ;;  %1550 = vmatpush1.bf16.msra.mxu1 %v11524_v7  ;;  %v11600_v22 = vld [vmem:[#allocation9 + $0x360] ss:$8 sps:$4 sm:$0xff]   ;;  %v11598_v7 = vld [vmem:[#allocation7 + $0x274] ss:$8 sps:$4 sm:$0xff]  }
  0xcc   :  { %1551 = vmatprep.subr.bf16.mxu1 %v11532_v8  ;;  %v11613_v8 = vld [vmem:[#allocation9 + $0x340] ss:$8 sps:$4 sm:$0xff]  }
  0xce   :  { %1103 = vmatpush2.bf16.msra.mxu0 %v11533_v63  ;;  %v13198_v63 = vcombine.low %v13069_v43, %v13151_v61  ;;  %v11596_v43 = vld [vmem:[#allocation7 + $0x270] ss:$8 sps:$4 sm:$0xff]  }
  0xcf   :  { %1104 = vmatprep.subr.bf16.mxu0 %v11541_v1  ;;  %1552 = vmatpush1.bf16.msra.mxu1 %v11530_v45  ;;  %v11589_v1 = vld [vmem:[#allocation9 + $0x284] ss:$8 sps:$4 sm:$0xff]  }
  0xd0   :  { %1553 = vmatprep.subr.bf16.mxu1 %v11538_v53  ;;  %v11627_v45 = vld [vmem:[#allocation9 + $0x324] ss:$8 sps:$4 sm:$0xff]   ;;  %v11603_v53 = vld [vmem:[#allocation7 + $0x260] ss:$8 sps:$4 sm:$0xff]  }
  0xd2   :  { %1105 = vmatpush2.bf16.msra.mxu0 %v11539_v5  ;;  %v10152_v5 = vcombine.high %v12736_v46, %v13097_v28  ;;  %v11619_v28 = vld [vmem:[#allocation9 + $0x330] ss:$8 sps:$4 sm:$0xff]  }
  0xd3   :  { %1709 = vmatprep.subr.bf16.mxu0 %v11550_v6  ;;  %1554 = vmatpush1.bf16.msra.mxu1 %v11536_v13  ;;  %v11587_v6 = vld [vmem:[#allocation9 + $0x280] ss:$8 sps:$4 sm:$0xff]   ;;  %v11633_v13 = vld [vmem:[#allocation9 + $0x314] ss:$8 sps:$4 sm:$0xff]  }
  0xd4   :  { %1555 = vmatprep.subr.bf16.mxu1 %v11544_v16  ;;  %v11609_v16 = vld [vmem:[#allocation7 + $0x250] ss:$8 sps:$4 sm:$0xff]  }
  0xd5   :  { %1107 = vmatmul.mubr.bf16.vlgmr.msra.gmra.mxu0 %v13121_v48  ;;  %v11547_v48 = vld [vmem:[#allocation9 + $0x2f4] ss:$8 sps:$4 sm:$0xff]  }
  0xd6   :  { %1710 = vmatpush1.bf16.msra.mxu0 %v11548_v9  ;;  %1116 = vmatprep.mubr.bf16.mxu0 %v10047_v11  ;;  %v11621_v9 = vld [vmem:[#allocation9 + $0x334] ss:$8 sps:$4 sm:$0xff]   ;;  %v11605_v11 = vld [vmem:[#allocation7 + $0x264] ss:$8 sps:$4 sm:$0xff]  }
  0xd7   :  { %1711 = vmatprep.subr.bf16.mxu0 %v11556_v10  ;;  %1556 = vmatpush1.bf16.msra.mxu1 %v11542_v58  ;;  %v10101_v10 = vcombine.high %v13172_v47, %v13176_v51  ;;  %v11618_v47 = vld [vmem:[#allocation7 + $0x244] ss:$8 sps:$4 sm:$0xff]   ;;  %v11631_v51 = vld [vmem:[#allocation9 + $0x310] ss:$8 sps:$4 sm:$0xff]  }
  0xd8   :  { %1557 = vmatprep.subr.bf16.mxu1 %v11547_v48 }
  0xda   :  { %1712 = vmatpush1.bf16.msra.mxu0 %v11554_v56  ;;  %v11611_v56 = vld [vmem:[#allocation7 + $0x254] ss:$8 sps:$4 sm:$0xff]  }
  0xdb   :  { %1713 = vmatprep.subr.bf16.mxu0 %v11562_v12  ;;  %1558 = vmatpush2.bf16.msra.mxu1 %v11545_v18  ;;  %v11625_v12 = vld [vmem:[#allocation9 + $0x320] ss:$8 sps:$4 sm:$0xff]  }
  0xdc   :  { %1559 = vmatprep.subr.bf16.mxu1 %v11553_v19  ;;  %v11637_v18 = vld [vmem:[#allocation9 + $0x300] ss:$8 sps:$4 sm:$0xff]   ;;  %v2057_v19 = vrot.slane %v13100_v31, 4 }
  0xdd   :  { %1117 = vmatmul.mubr.bf16.gmra.mxu0 %v13147_v2  ;;  %v11559_v2 = vld [vmem:[#allocation9 + $0x2d4] ss:$8 sps:$4 sm:$0xff]  }
  0xde   :  { %1714 = vmatpush1.bf16.msra.mxu0 %v11560_v14  ;;  %1741 = vmatprep.mubr.bf16.mxu0 %v13167_v50  ;;  %v2032_v14 = vld [vmem:[#allocation2 + $0x20] sm:$0xff] }
  0xdf   :  { %1715 = vmatprep.subr.bf16.mxu0 %v11568_v17  ;;  %1560 = vmatpush2.bf16.msra.mxu1 %v11551_v25  ;;  %v11639_v17 = vld [vmem:[#allocation9 + $0x304] ss:$8 sps:$4 sm:$0xff]   ;;  %v2042_v58 = vshrl.u32 %v2032_v14, 16  ;;  %v2045_v48 = vshll.u32 %v2032_v14, 16 }
  0xe0   :  { %1561 = vmatprep.subr.bf16.mxu1 %v11559_v2  ;;  %v11630_v25 = vld [vmem:[#allocation7 + $0x224] ss:$8 sps:$4 sm:$0xff]   ;;  %v11643_v2 = vld [vmem:[#allocation9 + $0x3f0] ss:$8 sps:$4 sm:$0xff]  }
  0xe1   :  { %v11654_v14 = vld [vmem:[#allocation9 + $0x464] ss:$8 sps:$4 sm:$0xff]  }
  0xe2   :  { %1716 = vmatpush1.bf16.msra.mxu0 %v11566_v59  ;;  %v2053_v59 = vrot.slane %v13103_v32, 5 }
  0xe3   :  { %1717 = vmatprep.subr.bf16.mxu0 %v11574_v0  ;;  %1562 = vmatpush2.bf16.msra.mxu1 %v11557_v27  ;;  %v11624_v0 = vld [vmem:[#allocation7 + $0x234] ss:$8 sps:$4 sm:$0xff]  }
  0xe4   :  { %1563 = vmatprep.subr.bf16.mxu1 %v11565_v29  ;;  %v2058_v27 = vor.u32 %v2057_v19, %v2053_v59  ;;  %v2035_v29 = vld [vmem:[#allocation2 + $0x80] sm:$0xff]  ;;  %v11681_v19 = vld [vmem:[#allocation9 + $0x394] ss:$8 sps:$4 sm:$0xff]  }
  0xe6   :  { %1718 = vmatpush1.bf16.msra.mxu0 %v11572_v23  ;;  %v11622_v23 = vld [vmem:[#allocation7 + $0x230] ss:$8 sps:$4 sm:$0xff]   ;;  %v2059_v46 = vrot.slane %v2058_v27, 4  ;;  %v11664_v27 = vld [vmem:[#allocation9 + $0x440] ss:$8 sps:$4 sm:$0xff]  }
  0xe7   :  { %1719 = vmatprep.subr.bf16.mxu0 %v11580_v24  ;;  %1564 = vmatpush2.bf16.msra.mxu1 %v11563_v36  ;;  %v11645_v24 = vld [vmem:[#allocation9 + $0x3f4] ss:$8 sps:$4 sm:$0xff]  }
  0xe8   :  { %1565 = vmatprep.subr.bf16.mxu1 %v11571_v37  ;;  %v11636_v37 = vld [vmem:[#allocation7 + $0x214] ss:$8 sps:$4 sm:$0xff]  }
  0xea   :  { %1720 = vmatpush1.bf16.msra.mxu0 %v11578_v62  ;;  %v2044_v62 = vrot.slane %v2042_v58, 4  ;;  %v11652_v58 = vld [vmem:[#allocation9 + $0x460] ss:$8 sps:$4 sm:$0xff]  }
  0xeb   :  { %1721 = vmatprep.subr.bf16.mxu0 %v11586_v26  ;;  %1566 = vmatpush2.bf16.msra.mxu1 %v11569_v40  ;;  %v2047_v26 = vrot.slane %v2045_v48, 5  ;;  %v2069_v40 = vshll.u32 %v2035_v29, 16 }
  0xec   :  { %1567 = vmatprep.subr.bf16.mxu1 %v11577_v42  ;;  %v11649_v42 = vld [vmem:[#allocation9 + $0x3e0] ss:$8 sps:$4 sm:$0xff]  }
  0xee   :  { %1722 = vmatpush1.bf16.msra.mxu0 %v11584_v33  ;;  %v11651_v33 = vld [vmem:[#allocation9 + $0x3e4] ss:$8 sps:$4 sm:$0xff]  }
  0xef   :  { %1723 = vmatprep.subr.bf16.mxu0 %v11592_v34  ;;  %1568 = vmatpush2.bf16.msra.mxu1 %v11575_v52  ;;  %v11628_v34 = vld [vmem:[#allocation7 + $0x220] ss:$8 sps:$4 sm:$0xff]   ;;  %v2081_v52 = vrot.slane %v13154_v20, 4 }
  0xf0   :  { %1569 = vmatprep.subr.bf16.mxu1 %v11583_v54  ;;  %v11634_v54 = vld [vmem:[#allocation7 + $0x210] ss:$8 sps:$4 sm:$0xff]  }
  0xf2   :  { %1724 = vmatpush1.bf16.msra.mxu0 %v11590_v38  ;;  %v2048_v38 = vor.u32 %v2047_v26, %v2044_v62  ;;  %v11679_v62 = vld [vmem:[#allocation9 + $0x390] ss:$8 sps:$4 sm:$0xff]   ;;  %v11687_v26 = vld [vmem:[#allocation9 + $0x384] ss:$8 sps:$4 sm:$0xff]  }
  0xf3   :  { %1971 = vmatprep.subr.bf16.mxu0 %v11595_v39  ;;  %1570 = vmatpush2.bf16.msra.mxu1 %v11581_v60  ;;  %v2066_v39 = vshrl.u32 %v2035_v29, 16  ;;  %v14395_v60 = vmov 0  ;;  %v11672_v29 = vld [vmem:[#allocation9 + $0x434] ss:$8 sps:$4 sm:$0xff]  }
  0xf4   :  { %1571 = vmatprep.subr.bf16.mxu1 %v11589_v1  ;;  %v14396_v60 = vsel %vm13216_vm11, 4294967295, %v14395_v60  ;;  %v2049_v1 = vrot.slane %v2048_v38, 4  ;;  %v11695_v38 = vld [vmem:[#allocation7 + $0x2f0] ss:$8 sps:$4 sm:$0xff]  }
  0xf5   :  { %1742 = vmatmul.mubr.bf16.vlgmr.msra.gmra.mxu0 %v13192_v41  ;;  %14397 = vst [vmem:[#allocation24_spill] sm:$0xff] %v14396_v60 }
  0xf6   :  { %1972 = vmatpush1.bf16.msra.mxu0 %v11593_v15  ;;  %1751 = vmatprep.mubr.bf16.mxu0 %v13167_v50  ;;  %v11657_v15 = vld [vmem:[#allocation9 + $0x3d4] ss:$8 sps:$4 sm:$0xff]  }
  0xf7   :  { %1973 = vmatprep.subr.bf16.mxu0 %v11602_v49  ;;  %1572 = vmatpush2.bf16.msra.mxu1 %v11587_v6  ;;  %v2077_v49 = vrot.slane %v13161_v30, 5  ;;  %v13220_v6 = vld [vmem:[#allocation2 + $0xa0] sm:$0x11] }
  0xf8   :  { %2194 = vmatprep.subr.bf16.mxu1 %v11598_v7  ;;  %v11663_v7 = vld [vmem:[#allocation9 + $0x3c4] ss:$8 sps:$4 sm:$0xff]  }
  0xfa   :  { %1974 = vmatpush1.bf16.msra.mxu0 %v11600_v22  ;;  %1574 = vmatmul.mubr.bf16.vlgmr.msra.gmra.mxu1 %v13131_v55  ;;  %v11616_v55 = vld [vmem:[#allocation7 + $0x240] ss:$8 sps:$4 sm:$0xff]   ;;  %v11642_v22 = vld [vmem:[#allocation7 + $0x204] ss:$8 sps:$4 sm:$0xff]  }
  0xfb   :  { %1975 = vmatprep.subr.bf16.mxu0 %v11608_v44  ;;  %2195 = vmatpush1.bf16.msra.mxu1 %v11596_v43  ;;  %v2054_v43 = vsel %vm13216_vm11, %v2049_v1, %v2053_v59  ;;  %v11716_v1 = vld [vmem:[#allocation7 + $0x2c4] ss:$8 sps:$4 sm:$0xff]  }
  0xfc   :  { %1583 = vmatprep.mubr.bf16.mxu1 %v10101_v10  ;;  %2196 = vmatprep.subr.bf16.mxu1 %v11605_v11 }
  0xfd   :  { %1752 = vmatmul.mubr.bf16.gmra.mxu0 %v13198_v63 }
  0xfe   :  { %1976 = vmatpush1.bf16.msra.mxu0 %v11606_v3  ;;  %2003 = vmatprep.mubr.bf16.mxu0 %v10152_v5  ;;  %v11655_v3 = vld [vmem:[#allocation9 + $0x3d0] ss:$8 sps:$4 sm:$0xff]   ;;  %v2071_v5 = vrot.slane %v2069_v40, 5  ;;  %v12737_v40 = vld [vmem:[#allocation2 + $0x80] sm:$0xff] }
  0xff   :  { %1977 = vmatprep.subr.bf16.mxu0 %v11615_v4  ;;  %2197 = vmatpush1.bf16.msra.mxu1 %v11603_v53  ;;  %v2068_v4 = vrot.slane %v2066_v39, 4  ;;  %v11661_v53 = vld [vmem:[#allocation9 + $0x3c0] ss:$8 sps:$4 sm:$0xff]   ;;  %v11703_v39 = vld [vmem:[#allocation7 + $0x2e4] ss:$8 sps:$4 sm:$0xff]  }
 0x100   :  { %2198 = vmatprep.subr.bf16.mxu1 %v11611_v56  ;;  %v11669_v56 = vld [vmem:[#allocation9 + $0x3b4] ss:$8 sps:$4 sm:$0xff]  }
 0x101   :  { %v2072_v11 = vor.u32 %v2071_v5, %v2068_v4  ;;  %v11722_v4 = vld [vmem:[#allocation7 + $0x2b4] ss:$8 sps:$4 sm:$0xff]   ;;  %v11692_v5 = vld [vmem:[#allocation9 + $0x4f0] ss:$8 sps:$4 sm:$0xff]  }
 0x102   :  { %1978 = vmatpush1.bf16.msra.mxu0 %v11613_v8  ;;  %1584 = vmatmul.mubr.bf16.gmra.mxu1 %v13180_v57  ;;  %v13209_v57 = vld [vmem:[#allocation2 + $0x40] sm:$0x11]  ;;  %v2082_v8 = vor.u32 %v2081_v52, %v2077_v49  ;;  %v11710_v52 = vld [vmem:[#allocation7 + $0x2d4] ss:$8 sps:$4 sm:$0xff]  }
 0x103   :  { %1979 = vmatprep.subr.bf16.mxu0 %v11621_v9  ;;  %2199 = vmatpush1.bf16.msra.mxu1 %v11609_v16  ;;  %v2061_v36 = vshll.u32 %v13209_v57, 16  ;;  %v11640_v9 = vld [vmem:[#allocation7 + $0x200] ss:$8 sps:$4 sm:$0xff]   ;;  %v11646_v16 = vld [vmem:[#allocation9 + $0x470] ss:$8 sps:$4 sm:$0xff]  }
 0x104   :  { %2226 = vmatprep.mubr.bf16.mxu1 %v13167_v50  ;;  %2200 = vmatprep.subr.bf16.mxu1 %v11618_v47  ;;  %v2073_v47 = vrot.slane %v2072_v11, 4  ;;  %v11726_v11 = vld [vmem:[#allocation7 + $0x2a0] ss:$8 sps:$4 sm:$0xff]  }
 0x105   :  { %v2063_v44 = vrot.slane %v2061_v36, 5  ;;  %v11670_v36 = vld [vmem:[#allocation9 + $0x430] ss:$8 sps:$4 sm:$0xff]  }
 0x106   :  { %1980 = vmatpush1.bf16.msra.mxu0 %v11619_v28  ;;  %v2085_v28 = vshll.u32 %v13220_v6, 16  ;;  %v13233_v48 = vsel %vm13216_vm11, %v2073_v47, %v2077_v49  ;;  %v11701_v49 = vld [vmem:[#allocation7 + $0x2e0] ss:$8 sps:$4 sm:$0xff]   ;;  %v11732_v47 = vld [vmem:[#allocation7 + $0x290] ss:$8 sps:$4 sm:$0xff]  }
 0x107   :  { %1981 = vmatprep.subr.bf16.mxu0 %v11627_v45  ;;  %2201 = vmatpush1.bf16.msra.mxu1 %v11616_v55  ;;  %v2064_v10 = vsel %vm13216_vm11, %v2059_v46, %v2063_v44  ;;  %v11648_v45 = vld [vmem:[#allocation9 + $0x474] ss:$8 sps:$4 sm:$0xff]   ;;  %v11675_v55 = vld [vmem:[#allocation9 + $0x3a4] ss:$8 sps:$4 sm:$0xff]   ;;  %v10153_v46 = vcombine.high %v12737_v40, %v13151_v61  ;;  %v11708_v44 = vld [vmem:[#allocation7 + $0x2d0] ss:$8 sps:$4 sm:$0xff]  }
 0x108   :  { %2202 = vmatprep.subr.bf16.mxu1 %v11624_v0  ;;  %v11660_v0 = vld [vmem:[#allocation9 + $0x454] ss:$8 sps:$4 sm:$0xff]   ;;  %v11688_v61 = vld [vmem:[#allocation9 + $0x400] ss:$8 sps:$4 sm:$0xff]   ;;  %v2540_v40 = vrot.slane %v13220_v6, 5 }
 0x10a   :  { %1982 = vmatpush1.bf16.msra.mxu0 %v11625_v12  ;;  %v13227_v12 = vcombine.low %v2054_v43, %v2064_v10 }
 0x10b   :  { %1983 = vmatprep.subr.bf16.mxu0 %v11633_v13  ;;  %2203 = vmatpush1.bf16.msra.mxu1 %v11622_v23  ;;  %v2083_v13 = vrot.slane %v2082_v8, 4  ;;  %v11720_v8 = vld [vmem:[#allocation7 + $0x2b0] ss:$8 sps:$4 sm:$0xff]  }
 0x10c   :  { %2204 = vmatprep.subr.bf16.mxu1 %v11630_v25  ;;  %v10204_v25 = vcombine.high %v2054_v43, %v2064_v10  ;;  %v11698_v43 = vld [vmem:[#allocation9 + $0x4e0] ss:$8 sps:$4 sm:$0xff]   ;;  %v11707_v10 = vld [vmem:[#allocation9 + $0x4d4] ss:$8 sps:$4 sm:$0xff]  }
 0x10e   :  { %1984 = vmatpush1.bf16.msra.mxu0 %v11631_v51  ;;  %v2087_v51 = vrot.slane %v2085_v28, 5  ;;  %v11734_v28 = vld [vmem:[#allocation7 + $0x294] ss:$8 sps:$4 sm:$0xff]  }
 0x10f   :  { %1985 = vmatprep.subr.bf16.mxu0 %v11639_v17  ;;  %2205 = vmatpush1.bf16.msra.mxu1 %v11628_v34  ;;  %v11667_v17 = vld [vmem:[#allocation9 + $0x3b0] ss:$8 sps:$4 sm:$0xff]   ;;  %v11697_v34 = vld [vmem:[#allocation7 + $0x2f4] ss:$8 sps:$4 sm:$0xff]  }
 0x110   :  { %2206 = vmatprep.subr.bf16.mxu1 %v11636_v37  ;;  %v13237_v59 = vsel %vm13216_vm11, %v2083_v13, %v2087_v51  ;;  %v11678_v37 = vld [vmem:[#allocation9 + $0x424] ss:$8 sps:$4 sm:$0xff]  }
 0x111   :  { %v13241_v23 = vcombine.low %v13233_v48, %v13237_v59  ;;  %v11740_v51 = vld [vmem:[#allocation7 + $0x284] ss:$8 sps:$4 sm:$0xff]  }
 0x112   :  { %1986 = vmatpush1.bf16.msra.mxu0 %v11637_v18  ;;  %v11673_v18 = vld [vmem:[#allocation9 + $0x3a0] ss:$8 sps:$4 sm:$0xff]  }
 0x113   :  { %1987 = vmatprep.subr.bf16.mxu0 %v11645_v24  ;;  %2207 = vmatpush1.bf16.msra.mxu1 %v11634_v54  ;;  %v11658_v24 = vld [vmem:[#allocation9 + $0x450] ss:$8 sps:$4 sm:$0xff]  }
 0x114   :  { %2208 = vmatprep.subr.bf16.mxu1 %v11642_v22  ;;  %v11682_v54 = vld [vmem:[#allocation9 + $0x410] ss:$8 sps:$4 sm:$0xff]   ;;  %v11690_v22 = vld [vmem:[#allocation9 + $0x404] ss:$8 sps:$4 sm:$0xff]  }
 0x116   :  { %1988 = vmatpush2.bf16.msra.mxu0 %v11643_v2  ;;  %v11666_v2 = vld [vmem:[#allocation9 + $0x444] ss:$8 sps:$4 sm:$0xff]  }
 0x117   :  { %1989 = vmatprep.subr.bf16.mxu0 %v11651_v33  ;;  %2209 = vmatpush1.bf16.msra.mxu1 %v11640_v9  ;;  %v11685_v33 = vld [vmem:[#allocation9 + $0x380] ss:$8 sps:$4 sm:$0xff]   ;;  %v11728_v9 = vld [vmem:[#allocation7 + $0x2a4] ss:$8 sps:$4 sm:$0xff]  }
 0x118   :  { %2456 = vmatprep.subr.bf16.mxu1 %v11648_v45  ;;  %v13252_v45 = vld [vmem:[#allocation2 + $0x20] sm:$0xee] }
 0x11a   :  { %1990 = vmatpush2.bf16.msra.mxu0 %v11649_v42  ;;  %2227 = vmatmul.mubr.bf16.vlgmr.msra.gmra.mxu1 %v13227_v12  ;;  %v11676_v42 = vld [vmem:[#allocation9 + $0x420] ss:$8 sps:$4 sm:$0xff]  }
 0x11b   :  { %1991 = vmatprep.subr.bf16.mxu0 %v11657_v15  ;;  %2457 = vmatpush1.bf16.msra.mxu1 %v11646_v16  ;;  %v11684_v15 = vld [vmem:[#allocation9 + $0x414] ss:$8 sps:$4 sm:$0xff]   ;;  %v11713_v16 = vld [vmem:[#allocation9 + $0x4c4] ss:$8 sps:$4 sm:$0xff]  }
 0x11c   :  { %2236 = vmatprep.mubr.bf16.mxu1 %v13167_v50  ;;  %2458 = vmatprep.subr.bf16.mxu1 %v11654_v14  ;;  %v10238_v14 = vrot.slane %v13252_v45, 9 }
 0x11e   :  { %1992 = vmatpush2.bf16.msra.mxu0 %v11655_v3  ;;  %v11694_v3 = vld [vmem:[#allocation9 + $0x4f4] ss:$8 sps:$4 sm:$0xff]  }
 0x11f   :  { %1993 = vmatprep.subr.bf16.mxu0 %v11663_v7  ;;  %2459 = vmatpush1.bf16.msra.mxu1 %v11652_v58  ;;  %v11700_v7 = vld [vmem:[#allocation9 + $0x4e4] ss:$8 sps:$4 sm:$0xff]   ;;  %v11711_v58 = vld [vmem:[#allocation9 + $0x4c0] ss:$8 sps:$4 sm:$0xff]  }
 0x120   :  { %2460 = vmatprep.subr.bf16.mxu1 %v11660_v0 }
 0x122   :  { %1994 = vmatpush2.bf16.msra.mxu0 %v11661_v53  ;;  %2237 = vmatmul.mubr.bf16.gmra.mxu1 %v13241_v23 }
 0x123   :  { %1995 = vmatprep.subr.bf16.mxu0 %v11669_v56  ;;  %2461 = vmatpush1.bf16.msra.mxu1 %v11658_v24  ;;  %v11705_v56 = vld [vmem:[#allocation9 + $0x4d0] ss:$8 sps:$4 sm:$0xff]   ;;  %v11743_v24 = vld [vmem:[#allocation9 + $0x574] ss:$8 sps:$4 sm:$0xff]  }
 0x124   :  { %2488 = vmatprep.mubr.bf16.mxu1 %v10204_v25  ;;  %2462 = vmatprep.subr.bf16.mxu1 %v11666_v2  ;;  %v13256_v25 = vld [vmem:[#allocation2 + $0x80] sm:$0xee] }
 0x126   :  { %1996 = vmatpush2.bf16.msra.mxu0 %v11667_v17 }
 0x127   :  { %1997 = vmatprep.subr.bf16.mxu0 %v11675_v55  ;;  %2463 = vmatpush1.bf16.msra.mxu1 %v11664_v27  ;;  %v2533_v55 = vrot.slane %v13209_v57, 5  ;;  %v12739_v57 = vld [vmem:[#allocation2 + $0x90] sm:$0xff] }
 0x128   :  { %2464 = vmatprep.subr.bf16.mxu1 %v11672_v29  ;;  %v11717_v27 = vld [vmem:[#allocation9 + $0x4b0] ss:$8 sps:$4 sm:$0xff]  }
 0x12a   :  { %1998 = vmatpush2.bf16.msra.mxu0 %v11673_v18  ;;  %v11719_v18 = vld [vmem:[#allocation9 + $0x4b4] ss:$8 sps:$4 sm:$0xff]  }
 0x12b   :  { %1999 = vmatprep.subr.bf16.mxu0 %v11681_v19  ;;  %2465 = vmatpush1.bf16.msra.mxu1 %v11670_v36  ;;  %v11738_v19 = vld [vmem:[#allocation7 + $0x280] ss:$8 sps:$4 sm:$0xff]  }
 0x12c   :  { %2466 = vmatprep.subr.bf16.mxu1 %v11678_v37  ;;  %v11749_v37 = vld [vmem:[#allocation9 + $0x564] ss:$8 sps:$4 sm:$0xff]  }
 0x12e   :  { %2000 = vmatpush2.bf16.msra.mxu0 %v11679_v62 }
 0x12f   :  { %2001 = vmatprep.subr.bf16.mxu0 %v11687_v26  ;;  %2467 = vmatpush1.bf16.msra.mxu1 %v11676_v42  ;;  %v2537_v26 = vrot.slane %v12739_v57, 5  ;;  %v11771_v57 = vld [vmem:[#allocation9 + $0x520] ss:$8 sps:$4 sm:$0xff]  }
 0x130   :  { %2468 = vmatprep.subr.bf16.mxu1 %v11684_v15  ;;  %v11731_v15 = vld [vmem:[#allocation9 + $0x494] ss:$8 sps:$4 sm:$0xff]  }
 0x132   :  { %2002 = vmatpush2.bf16.msra.mxu0 %v11685_v33  ;;  %v11725_v33 = vld [vmem:[#allocation9 + $0x4a4] ss:$8 sps:$4 sm:$0xff]  }
 0x133   :  { %2647 = vmatprep.subr.bf16.mxu0 %v11697_v34  ;;  %2469 = vmatpush1.bf16.msra.mxu1 %v11682_v54  ;;  %v11741_v34 = vld [vmem:[#allocation9 + $0x570] ss:$8 sps:$4 sm:$0xff]   ;;  %v11755_v54 = vld [vmem:[#allocation9 + $0x554] ss:$8 sps:$4 sm:$0xff]  }
 0x134   :  { %2470 = vmatprep.subr.bf16.mxu1 %v11690_v22 }
 0x135   :  { %2004 = vmatmul.mubr.bf16.vlgmr.msra.gmra.mxu0 %v13192_v41  ;;  %v11714_v41 = vld [vmem:[#allocation7 + $0x2c0] ss:$8 sps:$4 sm:$0xff]  }
 0x136   :  { %2648 = vmatpush1.bf16.msra.mxu0 %v11695_v38  ;;  %2013 = vmatprep.mubr.bf16.mxu0 %v10153_v46  ;;  %v10239_v38 = vrot.slane %v13256_v25, 9  ;;  %v11723_v46 = vld [vmem:[#allocation9 + $0x4a0] ss:$8 sps:$4 sm:$0xff]  }
 0x137   :  { %2649 = vmatprep.subr.bf16.mxu0 %v11703_v39  ;;  %2471 = vmatpush1.bf16.msra.mxu1 %v11688_v61  ;;  %v2539_v39 = vrot.slane %v2537_v26, 4  ;;  %v11729_v61 = vld [vmem:[#allocation9 + $0x490] ss:$8 sps:$4 sm:$0xff]  }
 0x138   :  { %2472 = vmatprep.subr.bf16.mxu1 %v11694_v3 }
 0x139   :  { %v663_v13 = vpop.f32.mrf.mxu1  ;;  %v13281_v6 = vsel %vm13248_vm14, %v2539_v39, %v2540_v40 }
 0x13a   :  { %2650 = vmatpush1.bf16.msra.mxu0 %v11701_v49  ;;  %v11747_v49 = vld [vmem:[#allocation9 + $0x560] ss:$8 sps:$4 sm:$0xff]  }
 0x13b   :  { %2651 = vmatprep.subr.bf16.mxu0 %v11710_v52  ;;  %2473 = vmatpush2.bf16.msra.mxu1 %v11692_v5  ;;  %v665_v0 = vpop.f32.mrf.mxu1 }
 0x13c   :  { %2474 = vmatprep.subr.bf16.mxu1 %v11700_v7  ;;  %v11753_v7 = vld [vmem:[#allocation9 + $0x550] ss:$8 sps:$4 sm:$0xff]  }
 0x13d   :  { %2014 = vmatmul.mubr.bf16.gmra.mxu0 %v13198_v63  ;;  %v14398_v63 = vmov 0  ;;  %v667_v29 = vpop.f32.mrf.mxu1 }
 0x13e   :  { %2652 = vmatpush1.bf16.msra.mxu0 %v11708_v44  ;;  %2679 = vmatprep.mubr.bf16.mxu0 %v13167_v50  ;;  %v14399_v63 = vsel %vm13248_vm14, 4294967295, %v14398_v63  ;;  %v12738_v50 = vld [vmem:[#allocation2 + $0x30] sm:$0xff] }
 0x13f   :  { %2653 = vmatprep.subr.bf16.mxu0 %v11716_v1  ;;  %14400 = vst [vmem:[#allocation25_spill] sm:$0xff] %v14399_v63  ;;  %v2530_v53 = vrot.slane %v12738_v50, 5  ;;  %2475 = vmatpush2.bf16.msra.mxu1 %v11698_v43  ;;  %v13272_v42 = vpop.f32.mrf.mxu1  ;;  %v13277_v1 = vsel %vm13248_vm14, %v10239_v38, %v2537_v26  ;;  %v11761_v43 = vld [vmem:[#allocation9 + $0x544] ss:$8 sps:$4 sm:$0xff]   ;;  %v11777_v38 = vld [vmem:[#allocation9 + $0x510] ss:$8 sps:$4 sm:$0xff]  }
 0x140   :  { %2476 = vmatprep.subr.bf16.mxu1 %v11707_v10  ;;  %v11959_v63 = vld [vmem:[#allocation12 + $0x184] ss:$8 sps:$4 sm:$0xff]  }
 0x141   :  { %v2532_v17 = vrot.slane %v2530_v53, 4  ;;  %v13260_v2 = vsel %vm13248_vm14, %v10238_v14, %v2530_v53  ;;  %v673_v22 = vpop.f32.mrf.mxu1 }
 0x142   :  { %2654 = vmatpush1.bf16.msra.mxu0 %v11714_v41  ;;  %v13283_v41 = vld [vmem:[#allocation2] sm:$0xff] }
 0x143   :  { %2655 = vmatprep.subr.bf16.mxu0 %v11722_v4  ;;  %2477 = vmatpush2.bf16.msra.mxu1 %v11705_v56  ;;  %v13264_v62 = vsel %vm13248_vm14, %v2532_v17, %v2533_v55  ;;  %v11737_v4 = vld [vmem:[#allocation9 + $0x484] ss:$8 sps:$4 sm:$0xff]   ;;  %v675_v10 = vpop.f32.mrf.mxu1  ;;  %v11746_v56 = vld [vmem:[#allocation7 + $0x374] ss:$8 sps:$4 sm:$0xff]   ;;  %v11744_v17 = vld [vmem:[#allocation7 + $0x370] ss:$8 sps:$4 sm:$0xff]  }
 0x144   :  { %2478 = vmatprep.subr.bf16.mxu1 %v11713_v16  ;;  %v13268_v36 = vcombine.low %v13260_v2, %v13264_v62  ;;  %v10258_v53 = vcombine.high %v13260_v2, %v13264_v62  ;;  %v11752_v55 = vld [vmem:[#allocation7 + $0x364] ss:$8 sps:$4 sm:$0xff]   ;;  %v11758_v62 = vld [vmem:[#allocation7 + $0x354] ss:$8 sps:$4 sm:$0xff]  }
 0x146   :  { %2656 = vmatpush1.bf16.msra.mxu0 %v11720_v8 }
 0x147   :  { %2657 = vmatprep.subr.bf16.mxu0 %v11728_v9  ;;  %2479 = vmatpush2.bf16.msra.mxu1 %v11711_v58  ;;  %v13288_v9 = vcombine.low %v13277_v1, %v13281_v6  ;;  %v11765_v58 = vld [vmem:[#allocation9 + $0x530] ss:$8 sps:$4 sm:$0xff]  }
 0x148   :  { %2480 = vmatprep.subr.bf16.mxu1 %v11719_v18  ;;  %v11773_v18 = vld [vmem:[#allocation9 + $0x524] ss:$8 sps:$4 sm:$0xff]  }
 0x14a   :  { %2658 = vmatpush1.bf16.msra.mxu0 %v11726_v11 }
 0x14b   :  { %2659 = vmatprep.subr.bf16.mxu0 %v11734_v28  ;;  %2481 = vmatpush2.bf16.msra.mxu1 %v11717_v27  ;;  %v11735_v28 = vld [vmem:[#allocation9 + $0x480] ss:$8 sps:$4 sm:$0xff]   ;;  %v11779_v27 = vld [vmem:[#allocation9 + $0x514] ss:$8 sps:$4 sm:$0xff]  }
 0x14c   :  { %2482 = vmatprep.subr.bf16.mxu1 %v11725_v33  ;;  %v11756_v33 = vld [vmem:[#allocation7 + $0x350] ss:$8 sps:$4 sm:$0xff]  }
 0x14e   :  { %2660 = vmatpush1.bf16.msra.mxu0 %v11732_v47  ;;  %v11767_v47 = vld [vmem:[#allocation9 + $0x534] ss:$8 sps:$4 sm:$0xff]  }
 0x14f   :  { %2661 = vmatprep.subr.bf16.mxu0 %v11740_v51  ;;  %2483 = vmatpush2.bf16.msra.mxu1 %v11723_v46  ;;  %v677_v51 = vpop.f32.mrf.mxu1 }
 0x150   :  { %2484 = vmatprep.subr.bf16.mxu1 %v11731_v15  ;;  %v2970_v15 = vld [vmem:[#allocation2 + $0x40] sm:$0x33] }
 0x152   :  { %2662 = vmatpush1.bf16.msra.mxu0 %v11738_v19  ;;  %v13297_v19 = vpop.f32.mrf.mxu1 }
 0x153   :  { %2909 = vmatprep.subr.bf16.mxu0 %v11743_v24  ;;  %2485 = vmatpush2.bf16.msra.mxu1 %v11729_v61  ;;  %v11750_v24 = vld [vmem:[#allocation7 + $0x360] ss:$8 sps:$4 sm:$0xff]   ;;  %v11770_v61 = vld [vmem:[#allocation7 + $0x334] ss:$8 sps:$4 sm:$0xff]  }
 0x154   :  { %2486 = vmatprep.subr.bf16.mxu1 %v11737_v4 }
 0x155   :  { %v530_v52 = vpop.f32.mrf.mxu0  ;;  %2680 = vmatmul.mubr.bf16.vlgmr.msra.gmra.mxu0 %v13268_v36 }
 0x156   :  { %v664_v44 = vadd.f32 %v663_v13, %v530_v52  ;;  %2910 = vmatpush1.bf16.msra.mxu0 %v11741_v34  ;;  %2689 = vmatprep.mubr.bf16.mxu0 %v13283_v41  ;;  %v11759_v13 = vld [vmem:[#allocation9 + $0x540] ss:$8 sps:$4 sm:$0xff]  }
 0x157   :  { %v532_v3 = vpop.f32.mrf.mxu0  ;;  %2911 = vmatprep.subr.bf16.mxu0 %v11749_v37  ;;  %2487 = vmatpush2.bf16.msra.mxu1 %v11735_v28  ;;  %v11764_v37 = vld [vmem:[#allocation7 + $0x344] ss:$8 sps:$4 sm:$0xff]   ;;  %v11762_v52 = vld [vmem:[#allocation7 + $0x340] ss:$8 sps:$4 sm:$0xff]  }
 0x158   :  { %v666_v5 = vadd.f32 %v665_v0, %v532_v3  ;;  %v10205_v0 = vcombine.high %v13233_v48, %v13237_v59  ;;  %3126 = vmatprep.subr.bf16.mxu1 %v11746_v56  ;;  %v11783_v3 = vld [vmem:[#allocation9 + $0x500] ss:$8 sps:$4 sm:$0xff]  }
 0x159   :  { %v534_v8 = vpop.f32.mrf.mxu0 }
 0x15a   :  { %v668_v11 = vadd.f32 %v667_v29, %v534_v8  ;;  %2912 = vmatpush1.bf16.msra.mxu0 %v11747_v49  ;;  %v846_v2 = vpop.f32.mrf.mxu1  ;;  %2489 = vmatmul.mubr.bf16.vlgmr.msra.gmra.mxu1 %v13227_v12  ;;  %v11785_v12 = vld [vmem:[#allocation9 + $0x504] ss:$8 sps:$4 sm:$0xff]   ;;  %v2984_v8 = vrot.slane %v13100_v31, 5 }
 0x15b   :  { %v13290_v50 = vpop.f32.mrf.mxu0  ;;  %2913 = vmatprep.subr.bf16.mxu0 %v11755_v54  ;;  %v13300_v26 = vadd.f32 %v846_v2, %v664_v44  ;;  %3127 = vmatpush1.bf16.msra.mxu1 %v11744_v17  ;;  %v2976_v54 = vshrl.u32 %v13252_v45, 16  ;;  %v2971_v2 = vld [vmem:[#allocation2 + $0xa0] sm:$0x33] }
 0x15c   :  { %2498 = vmatprep.mubr.bf16.mxu1 %v10205_v0  ;;  %v848_v29 = vpop.f32.mrf.mxu1  ;;  %3128 = vmatprep.subr.bf16.mxu1 %v11752_v55  ;;  %v11782_v0 = vld [vmem:[#allocation7 + $0x314] ss:$8 sps:$4 sm:$0xff]  }
 0x15d   :  { %v540_v16 = vpop.f32.mrf.mxu0  ;;  %2690 = vmatmul.mubr.bf16.gmra.mxu0 %v13288_v9  ;;  %v13302_v59 = vadd.f32 %v848_v29, %v666_v5  ;;  %v11780_v29 = vld [vmem:[#allocation7 + $0x310] ss:$8 sps:$4 sm:$0xff]  }
 0x15e   :  { %v674_v14 = vadd.f32 %v673_v22, %v540_v16  ;;  %2914 = vmatpush1.bf16.msra.mxu0 %v11753_v7  ;;  %2941 = vmatprep.mubr.bf16.mxu0 %v10258_v53  ;;  %v850_v34 = vpop.f32.mrf.mxu1  ;;  %v2979_v22 = vshll.u32 %v13252_v45, 16  ;;  %v11791_v7 = vld [vmem:[#allocation9 + $0x5f4] ss:$8 sps:$4 sm:$0xff]   ;;  %v2985_v45 = vrot.slane %v13103_v32, 6  ;;  %v2990_v53 = vshrl.u32 %v2970_v15, 16 }
 0x15f   :  { %2915 = vmatprep.subr.bf16.mxu0 %v11761_v43  ;;  %v542_v48 = vpop.f32.mrf.mxu0  ;;  %v13304_v39 = vadd.f32 %v850_v34, %v668_v11  ;;  %3129 = vmatpush1.bf16.msra.mxu1 %v11750_v24  ;;  %v2978_v11 = vrot.slane %v2976_v54, 5  ;;  %v11789_v16 = vld [vmem:[#allocation9 + $0x5f0] ss:$8 sps:$4 sm:$0xff]   ;;  %v11797_v32 = vld [vmem:[#allocation9 + $0x5e4] ss:$8 sps:$4 sm:$0xff]   ;;  %v3016_v54 = vshll.u32 %v2971_v2, 16 }
 0x160   :  { %v13306_v40 = vpop.f32.mrf.mxu1  ;;  %3130 = vmatprep.subr.bf16.mxu1 %v11758_v62  ;;  %v676_v49 = vadd.f32 %v675_v10, %v542_v48  ;;  %v11768_v10 = vld [vmem:[#allocation7 + $0x330] ss:$8 sps:$4 sm:$0xff]   ;;  %v2981_v28 = vrot.slane %v2979_v22, 6  ;;  %v2986_v55 = vor.u32 %v2985_v45, %v2984_v8  ;;  %v11795_v24 = vld [vmem:[#allocation9 + $0x5e0] ss:$8 sps:$4 sm:$0xff]   ;;  %v2999_v62 = vshrl.u32 %v13256_v25, 16 }
 0x161   :  { %v544_v46 = vpop.f32.mrf.mxu0  ;;  %v11788_v34 = vld [vmem:[#allocation7 + $0x304] ss:$8 sps:$4 sm:$0xff]   ;;  %v11786_v22 = vld [vmem:[#allocation7 + $0x300] ss:$8 sps:$4 sm:$0xff]   ;;  %v11792_v45 = vld [vmem:[#allocation9 + $0x670] ss:$8 sps:$4 sm:$0xff]  }
 0x162   :  { %2916 = vmatpush1.bf16.msra.mxu0 %v11759_v13  ;;  %2499 = vmatmul.mubr.bf16.gmra.mxu1 %v13241_v23  ;;  %v856_v44 = vpop.f32.mrf.mxu1  ;;  %v678_v5 = vadd.f32 %v677_v51, %v544_v46  ;;  %v11776_v13 = vld [vmem:[#allocation7 + $0x324] ss:$8 sps:$4 sm:$0xff]   ;;  %v2982_v17 = vor.u32 %v2981_v28, %v2978_v11  ;;  %v11813_v28 = vld [vmem:[#allocation9 + $0x5b0] ss:$8 sps:$4 sm:$0xff]  }
 0x163   :  { %2917 = vmatprep.subr.bf16.mxu0 %v11767_v47  ;;  %3131 = vmatpush1.bf16.msra.mxu1 %v11756_v33  ;;  %v13311_v4 = vadd.f32 %v856_v44, %v674_v14  ;;  %v2993_v47 = vshll.u32 %v2970_v15, 16  ;;  %v11774_v14 = vld [vmem:[#allocation7 + $0x320] ss:$8 sps:$4 sm:$0xff]   ;;  %v2988_v33 = vrot.slane %v2986_v55, 4  ;;  %v3007_v15 = vrot.slane %v13154_v20, 5 }
 0x164   :  { %3158 = vmatprep.mubr.bf16.mxu1 %v13283_v41  ;;  %v858_v43 = vpop.f32.mrf.mxu1  ;;  %3132 = vmatprep.subr.bf16.mxu1 %v11764_v37  ;;  %v2983_v48 = vrot.slane %v2982_v17, 4  ;;  %v11815_v20 = vld [vmem:[#allocation9 + $0x5b4] ss:$8 sps:$4 sm:$0xff]   ;;  %v11800_v11 = vld [vmem:[#allocation9 + $0x664] ss:$8 sps:$4 sm:$0xff]  }
 0x165   :  { %v13316_v23 = vadd.f32 %v858_v43, %v676_v49  ;;  %v11809_v49 = vld [vmem:[#allocation9 + $0x5c4] ss:$8 sps:$4 sm:$0xff]   ;;  %v11827_v17 = vld [vmem:[#allocation9 + $0x594] ss:$8 sps:$4 sm:$0xff]  }
 0x166   :  { %2918 = vmatpush1.bf16.msra.mxu0 %v11765_v58  ;;  %v860_v56 = vpop.f32.mrf.mxu1  ;;  %v2992_v58 = vrot.slane %v2990_v53, 5  ;;  %v2987_v44 = vsel %vm13321_vm1, %v2983_v48, %v2986_v55  ;;  %v11821_v53 = vld [vmem:[#allocation9 + $0x5a4] ss:$8 sps:$4 sm:$0xff]   ;;  %v11831_v48 = vld [vmem:[#allocation9 + $0x580] ss:$8 sps:$4 sm:$0xff]  }
 0x167   :  { %2919 = vmatprep.subr.bf16.mxu0 %v11773_v18  ;;  %3133 = vmatpush1.bf16.msra.mxu1 %v11762_v52  ;;  %v13318_v51 = vadd.f32 %v860_v56, %v678_v5  ;;  %v2995_v18 = vrot.slane %v2993_v47, 6  ;;  %v3008_v52 = vrot.slane %v13161_v30, 6  ;;  %v11807_v5 = vld [vmem:[#allocation9 + $0x5c0] ss:$8 sps:$4 sm:$0xff]   ;;  %v3018_v30 = vrot.slane %v3016_v54, 6 }
 0x168   :  { %3134 = vmatprep.subr.bf16.mxu1 %v11770_v61  ;;  %v11798_v47 = vld [vmem:[#allocation9 + $0x660] ss:$8 sps:$4 sm:$0xff]  }
 0x169   :  { %v2996_v37 = vor.u32 %v2995_v18, %v2992_v58  ;;  %v3009_v8 = vor.u32 %v3008_v52, %v3007_v15  ;;  %v11812_v18 = vld [vmem:[#allocation9 + $0x644] ss:$8 sps:$4 sm:$0xff]   ;;  %v11822_v15 = vld [vmem:[#allocation9 + $0x620] ss:$8 sps:$4 sm:$0xff]  }
 0x16a   :  { %2920 = vmatpush1.bf16.msra.mxu0 %v11771_v57  ;;  %v3002_v57 = vshll.u32 %v13256_v25, 16  ;;  %v3013_v25 = vshrl.u32 %v2971_v2, 16 }
 0x16b   :  { %2921 = vmatprep.subr.bf16.mxu0 %v11779_v27  ;;  %3135 = vmatpush1.bf16.msra.mxu1 %v11768_v10  ;;  %v11803_v27 = vld [vmem:[#allocation9 + $0x5d4] ss:$8 sps:$4 sm:$0xff]   ;;  %v2997_v61 = vsel %vm13321_vm1, %v2988_v33, %v2996_v37  ;;  %v11824_v37 = vld [vmem:[#allocation9 + $0x624] ss:$8 sps:$4 sm:$0xff]  }
 0x16c   :  { %3136 = vmatprep.subr.bf16.mxu1 %v11776_v13  ;;  %v3004_v46 = vrot.slane %v3002_v57, 6  ;;  %v3015_v43 = vrot.slane %v3013_v25, 5  ;;  %v13333_v10 = vcombine.low %v2987_v44, %v2997_v61  ;;  %v3011_v13 = vrot.slane %v3009_v8, 4 }
 0x16d   :  { %v10310_v57 = vcombine.high %v2987_v44, %v2997_v61  ;;  %v11836_v61 = vld [vmem:[#allocation9 + $0x604] ss:$8 sps:$4 sm:$0xff]  }
 0x16e   :  { %2922 = vmatpush1.bf16.msra.mxu0 %v11777_v38  ;;  %v11801_v38 = vld [vmem:[#allocation9 + $0x5d0] ss:$8 sps:$4 sm:$0xff]  }
 0x16f   :  { %2923 = vmatprep.subr.bf16.mxu0 %v11785_v12  ;;  %v3001_v12 = vrot.slane %v2999_v62, 5  ;;  %3137 = vmatpush1.bf16.msra.mxu1 %v11774_v14  ;;  %v11819_v14 = vld [vmem:[#allocation9 + $0x5a0] ss:$8 sps:$4 sm:$0xff]   ;;  %v13349_v62 = vpop.f32.mrf.mxu1 }
 0x170   :  { %3138 = vmatprep.subr.bf16.mxu1 %v11782_v0  ;;  %v11804_v0 = vld [vmem:[#allocation9 + $0x650] ss:$8 sps:$4 sm:$0xff]  }
 0x172   :  { %2924 = vmatpush1.bf16.msra.mxu0 %v11783_v3  ;;  %v11794_v3 = vld [vmem:[#allocation9 + $0x674] ss:$8 sps:$4 sm:$0xff]  }
 0x173   :  { %2925 = vmatprep.subr.bf16.mxu0 %v11791_v7  ;;  %3139 = vmatpush1.bf16.msra.mxu1 %v11780_v29  ;;  %v3005_v7 = vor.u32 %v3004_v46, %v3001_v12  ;;  %v11818_v29 = vld [vmem:[#allocation9 + $0x634] ss:$8 sps:$4 sm:$0xff]   ;;  %v13354_v12 = vpop.f32.mrf.mxu0 }
 0x174   :  { %3140 = vmatprep.subr.bf16.mxu1 %v11788_v34  ;;  %v11816_v34 = vld [vmem:[#allocation9 + $0x630] ss:$8 sps:$4 sm:$0xff]  }
 0x175   :  { %v3006_v56 = vrot.slane %v3005_v7, 4  ;;  %v11834_v7 = vld [vmem:[#allocation9 + $0x600] ss:$8 sps:$4 sm:$0xff]  }
 0x176   :  { %2926 = vmatpush2.bf16.msra.mxu0 %v11789_v16  ;;  %v3019_v16 = vor.u32 %v3018_v30, %v3015_v43 }
 0x177   :  { %2927 = vmatprep.subr.bf16.mxu0 %v11797_v32  ;;  %3141 = vmatpush1.bf16.msra.mxu1 %v11786_v22  ;;  %v11806_v32 = vld [vmem:[#allocation9 + $0x654] ss:$8 sps:$4 sm:$0xff]   ;;  %v13339_v55 = vsel %vm13321_vm1, %v3006_v56, %v3009_v8  ;;  %v11828_v22 = vld [vmem:[#allocation9 + $0x610] ss:$8 sps:$4 sm:$0xff]  }
 0x178   :  { %3388 = vmatprep.subr.bf16.mxu1 %v11794_v3  ;;  %v13343_v58 = vsel %vm13321_vm1, %v3011_v13, %v3019_v16  ;;  %v11839_v8 = vld [vmem:[#allocation9 + $0x6f4] ss:$8 sps:$4 sm:$0xff]  }
 0x179   :  { %v13347_v2 = vcombine.low %v13339_v55, %v13343_v58 }
 0x17a   :  { %2928 = vmatpush2.bf16.msra.mxu0 %v11795_v24  ;;  %3159 = vmatmul.mubr.bf16.vlgmr.msra.gmra.mxu1 %v13333_v10  ;;  %v11825_v24 = vld [vmem:[#allocation9 + $0x590] ss:$8 sps:$4 sm:$0xff]   ;;  %v1313_v31 = vpop.f32.mrf.mxu1 }
 0x17b   :  { %2929 = vmatprep.subr.bf16.mxu0 %v11803_v27  ;;  %3389 = vmatpush1.bf16.msra.mxu1 %v11792_v45  ;;  %v11810_v27 = vld [vmem:[#allocation9 + $0x640] ss:$8 sps:$4 sm:$0xff]  }
 0x17c   :  { %3168 = vmatprep.mubr.bf16.mxu1 %v13283_v41  ;;  %3390 = vmatprep.subr.bf16.mxu1 %v11800_v11  ;;  %v11833_v41 = vld [vmem:[#allocation9 + $0x584] ss:$8 sps:$4 sm:$0xff]   ;;  %v1315_v33 = vpop.f32.mrf.mxu1  ;;  %v11837_v11 = vld [vmem:[#allocation9 + $0x6f0] ss:$8 sps:$4 sm:$0xff]  }
 0x17e   :  { %2930 = vmatpush2.bf16.msra.mxu0 %v11801_v38  ;;  %v10259_v38 = vcombine.high %v13277_v1, %v13281_v6  ;;  %v1317_v46 = vpop.f32.mrf.mxu1 }
 0x17f   :  { %2931 = vmatprep.subr.bf16.mxu0 %v11809_v49  ;;  %3391 = vmatpush1.bf16.msra.mxu1 %v11798_v47  ;;  %v11830_v49 = vld [vmem:[#allocation9 + $0x614] ss:$8 sps:$4 sm:$0xff]  }
 0x180   :  { %3392 = vmatprep.subr.bf16.mxu1 %v11806_v32  ;;  %v13358_v54 = vpop.f32.mrf.mxu1 }
 0x182   :  { %2932 = vmatpush2.bf16.msra.mxu0 %v11807_v5  ;;  %3169 = vmatmul.mubr.bf16.gmra.mxu1 %v13347_v2  ;;  %v1323_v5 = vpop.f32.mrf.mxu1 }
 0x183   :  { %2933 = vmatprep.subr.bf16.mxu0 %v11815_v20  ;;  %3393 = vmatpush1.bf16.msra.mxu1 %v11804_v0  ;;  %v11848_v0 = vld [vmem:[#allocation9 + $0x6c4] ss:$8 sps:$4 sm:$0xff]  }
 0x184   :  { %3420 = vmatprep.mubr.bf16.mxu1 %v10310_v57  ;;  %3394 = vmatprep.subr.bf16.mxu1 %v11812_v18  ;;  %v11851_v18 = vld [vmem:[#allocation9 + $0x6b4] ss:$8 sps:$4 sm:$0xff]  }
 0x185   :  { %v11857_v57 = vld [vmem:[#allocation9 + $0x694] ss:$8 sps:$4 sm:$0xff]  }
 0x186   :  { %2934 = vmatpush2.bf16.msra.mxu0 %v11813_v28 }
 0x187   :  { %2935 = vmatprep.subr.bf16.mxu0 %v11821_v53  ;;  %3395 = vmatpush1.bf16.msra.mxu1 %v11810_v27  ;;  %v11842_v53 = vld [vmem:[#allocation9 + $0x6e4] ss:$8 sps:$4 sm:$0xff]  }
 0x188   :  { %3396 = vmatprep.subr.bf16.mxu1 %v11818_v29  ;;  %v11860_v27 = vld [vmem:[#allocation9 + $0x684] ss:$8 sps:$4 sm:$0xff]   ;;  %v11858_v29 = vld [vmem:[#allocation9 + $0x680] ss:$8 sps:$4 sm:$0xff]  }
 0x18a   :  { %2936 = vmatpush2.bf16.msra.mxu0 %v11819_v14  ;;  %v11845_v14 = vld [vmem:[#allocation9 + $0x6d4] ss:$8 sps:$4 sm:$0xff]  }
 0x18b   :  { %2937 = vmatprep.subr.bf16.mxu0 %v11827_v17  ;;  %3397 = vmatpush1.bf16.msra.mxu1 %v11816_v34 }
 0x18c   :  { %3398 = vmatprep.subr.bf16.mxu1 %v11824_v37  ;;  %v11861_v37 = vld [vmem:[#allocation12 + $0x70] ss:$8 sps:$4 sm:$0xff]  }
 0x18e   :  { %2938 = vmatpush2.bf16.msra.mxu0 %v11825_v24  ;;  %v11849_v24 = vld [vmem:[#allocation9 + $0x6b0] ss:$8 sps:$4 sm:$0xff]  }
 0x18f   :  { %2939 = vmatprep.subr.bf16.mxu0 %v11833_v41  ;;  %3399 = vmatpush1.bf16.msra.mxu1 %v11822_v15  ;;  %v11854_v41 = vld [vmem:[#allocation9 + $0x6a4] ss:$8 sps:$4 sm:$0xff]  }
 0x190   :  { %3400 = vmatprep.subr.bf16.mxu1 %v11830_v49 }
 0x192   :  { %2940 = vmatpush2.bf16.msra.mxu0 %v11831_v48  ;;  %v10311_v48 = vcombine.high %v13339_v55, %v13343_v58  ;;  %v11866_v55 = vld [vmem:[#allocation12 + $0x64] ss:$8 sps:$4 sm:$0xff]   ;;  %v11864_v58 = vld [vmem:[#allocation12 + $0x60] ss:$8 sps:$4 sm:$0xff]  }
 0x193   :  { %3401 = vmatpush1.bf16.msra.mxu1 %v11828_v22  ;;  %v11872_v22 = vld [vmem:[#allocation12 + $0x54] ss:$8 sps:$4 sm:$0xff]  }
 0x194   :  { %3402 = vmatprep.subr.bf16.mxu1 %v11836_v61  ;;  %v11875_v61 = vld [vmem:[#allocation12 + $0x164] ss:$8 sps:$4 sm:$0xff]  }
 0x195   :  { %v1108_v52 = vpop.f32.mrf.mxu0  ;;  %2942 = vmatmul.mubr.bf16.vlgmr.msra.gmra.mxu0 %v13268_v36 }
 0x196   :  { %v1127_v25 = vadd.f32 %v1108_v52, %v13300_v26  ;;  %2951 = vmatprep.mubr.bf16.mxu0 %v10259_v38 }
 0x197   :  { %v1110_v44 = vpop.f32.mrf.mxu0  ;;  %3403 = vmatpush1.bf16.msra.mxu1 %v11834_v7  ;;  %v11876_v7 = vld [vmem:[#allocation12 + $0x40] ss:$8 sps:$4 sm:$0xff]  }
 0x198   :  { %v1128_v1 = vadd.f32 %v1110_v44, %v13302_v59  ;;  %v13361_v6 = vadd.f32 %v1313_v31, %v1127_v25  ;;  %v1325_v59 = vpop.f32.mrf.mxu1  ;;  %3404 = vmatprep.subr.bf16.mxu1 %v11839_v8  ;;  %v11855_v31 = vld [vmem:[#allocation9 + $0x690] ss:$8 sps:$4 sm:$0xff]   ;;  %v11881_v8 = vld [vmem:[#allocation12 + $0x154] ss:$8 sps:$4 sm:$0xff]  }
 0x199   :  { %v1112_v3 = vpop.f32.mrf.mxu0  ;;  %v11870_v44 = vld [vmem:[#allocation12 + $0x50] ss:$8 sps:$4 sm:$0xff]  }
 0x19a   :  { %v1129_v20 = vadd.f32 %v1112_v3, %v13304_v39  ;;  %v13364_v36 = vadd.f32 %v1315_v33, %v1128_v1  ;;  %v1327_v16 = vpop.f32.mrf.mxu1  ;;  %v11863_v33 = vld [vmem:[#allocation12 + $0x74] ss:$8 sps:$4 sm:$0xff]   ;;  %v11873_v3 = vld [vmem:[#allocation12 + $0x160] ss:$8 sps:$4 sm:$0xff]  }
 0x19b   :  { %v13366_v26 = vpop.f32.mrf.mxu0  ;;  %3405 = vmatpush2.bf16.msra.mxu1 %v11837_v11  ;;  %4103 = vmatprep.subr.bf16.mxu0 %v11863_v33  ;;  %v11884_v11 = vld [vmem:[#allocation12 + $0x34] ss:$8 sps:$4 sm:$0xff]  }
 0x19c   :  { %v13368_v43 = vadd.f32 %v1317_v46, %v1129_v20  ;;  %3406 = vmatprep.subr.bf16.mxu1 %v11842_v53  ;;  %v13384_v34 = vpop.f32.mrf.mxu1  ;;  %4104 = vmatpush1.bf16.msra.mxu0 %v11861_v37  ;;  %v11878_v20 = vld [vmem:[#allocation12 + $0x44] ss:$8 sps:$4 sm:$0xff]   ;;  %v11905_v33 = vld [vmem:[#allocation12 + $0x114] ss:$8 sps:$4 sm:$0xff]  }
 0x19d   :  { %v1118_v30 = vpop.f32.mrf.mxu0  ;;  %2952 = vmatmul.mubr.bf16.gmra.mxu0 %v13288_v9  ;;  %v11840_v9 = vld [vmem:[#allocation9 + $0x6e0] ss:$8 sps:$4 sm:$0xff]   ;;  %4105 = vmatprep.subr.bf16.mxu0 %v11866_v55  ;;  %v11887_v53 = vld [vmem:[#allocation12 + $0x144] ss:$8 sps:$4 sm:$0xff]   ;;  %v11903_v55 = vld [vmem:[#allocation12 + $0x110] ss:$8 sps:$4 sm:$0xff]  }
 0x19e   :  { %v1131_v45 = vadd.f32 %v1118_v30, %v13311_v4  ;;  %v11843_v4 = vld [vmem:[#allocation9 + $0x6d0] ss:$8 sps:$4 sm:$0xff]  }
 0x19f   :  { %v1120_v28 = vpop.f32.mrf.mxu0  ;;  %3407 = vmatpush2.bf16.msra.mxu1 %v11840_v9  ;;  %v11888_v9 = vld [vmem:[#allocation12 + $0x20] ss:$8 sps:$4 sm:$0xff]  }
 0x1a0   :  { %v1132_v39 = vadd.f32 %v1120_v28, %v13316_v23  ;;  %v13373_v56 = vadd.f32 %v1323_v5, %v1131_v45  ;;  %3408 = vmatprep.subr.bf16.mxu1 %v11845_v14  ;;  %v11846_v23 = vld [vmem:[#allocation9 + $0x6c0] ss:$8 sps:$4 sm:$0xff]   ;;  %4106 = vmatpush1.bf16.msra.mxu0 %v11864_v58  ;;  %v11882_v28 = vld [vmem:[#allocation12 + $0x30] ss:$8 sps:$4 sm:$0xff]   ;;  %v11893_v14 = vld [vmem:[#allocation12 + $0x134] ss:$8 sps:$4 sm:$0xff]  }
 0x1a1   :  { %v1122_v13 = vpop.f32.mrf.mxu0  ;;  %4107 = vmatprep.subr.bf16.mxu0 %v11872_v22  ;;  %v11908_v58 = vld [vmem:[#allocation12 + $0xf4] ss:$8 sps:$4 sm:$0xff]  }
 0x1a2   :  { %v1133_v47 = vadd.f32 %v1122_v13, %v13318_v51  ;;  %v13376_v32 = vadd.f32 %v1325_v59, %v1132_v39  ;;  %v11852_v51 = vld [vmem:[#allocation9 + $0x6a0] ss:$8 sps:$4 sm:$0xff]   ;;  %v11879_v59 = vld [vmem:[#allocation12 + $0x150] ss:$8 sps:$4 sm:$0xff]  }
 0x1a3   :  { %3409 = vmatpush2.bf16.msra.mxu1 %v11843_v4  ;;  %v13388_v46 = vpop.f32.mrf.mxu0  ;;  %v11885_v13 = vld [vmem:[#allocation12 + $0x140] ss:$8 sps:$4 sm:$0xff]  }
 0x1a4   :  { %v13378_v17 = vadd.f32 %v1327_v16, %v1133_v47  ;;  %3410 = vmatprep.subr.bf16.mxu1 %v11848_v0  ;;  %4108 = vmatpush1.bf16.msra.mxu0 %v11870_v44  ;;  %v11890_v47 = vld [vmem:[#allocation12 + $0x24] ss:$8 sps:$4 sm:$0xff]   ;;  %v11891_v0 = vld [vmem:[#allocation12 + $0x130] ss:$8 sps:$4 sm:$0xff]  }
 0x1a5   :  { %4109 = vmatprep.subr.bf16.mxu0 %v11878_v20  ;;  %v11911_v44 = vld [vmem:[#allocation12 + $0x104] ss:$8 sps:$4 sm:$0xff]  }
 0x1a7   :  { %3411 = vmatpush2.bf16.msra.mxu1 %v11846_v23 }
 0x1a8   :  { %3412 = vmatprep.subr.bf16.mxu1 %v11851_v18  ;;  %4110 = vmatpush1.bf16.msra.mxu0 %v11876_v7  ;;  %v11896_v18 = vld [vmem:[#allocation12 + $0x14] ss:$8 sps:$4 sm:$0xff]   ;;  %v11912_v7 = vld [vmem:[#allocation12 + $0xe0] ss:$8 sps:$4 sm:$0xff]  }
 0x1a9   :  { %4111 = vmatprep.subr.bf16.mxu0 %v11884_v11  ;;  %v11915_v11 = vld [vmem:[#allocation12 + $0x1f0] ss:$8 sps:$4 sm:$0xff]  }
 0x1ab   :  { %3413 = vmatpush2.bf16.msra.mxu1 %v11849_v24  ;;  %v11894_v24 = vld [vmem:[#allocation12 + $0x10] ss:$8 sps:$4 sm:$0xff]  }
 0x1ac   :  { %3414 = vmatprep.subr.bf16.mxu1 %v11854_v41  ;;  %4112 = vmatpush1.bf16.msra.mxu0 %v11882_v28  ;;  %v11899_v41 = vld [vmem:[#allocation12 + $0x124] ss:$8 sps:$4 sm:$0xff]   ;;  %v11920_v28 = vld [vmem:[#allocation12 + $0xd4] ss:$8 sps:$4 sm:$0xff]  }
 0x1ad   :  { %4113 = vmatprep.subr.bf16.mxu0 %v11890_v47 }
 0x1af   :  { %3415 = vmatpush2.bf16.msra.mxu1 %v11852_v51 }
 0x1b0   :  { %3416 = vmatprep.subr.bf16.mxu1 %v11857_v57  ;;  %4114 = vmatpush1.bf16.msra.mxu0 %v11888_v9  ;;  %v11897_v57 = vld [vmem:[#allocation12 + $0x120] ss:$8 sps:$4 sm:$0xff]   ;;  %v11923_v9 = vld [vmem:[#allocation12 + $0x1e4] ss:$8 sps:$4 sm:$0xff]  }
 0x1b1   :  { %4115 = vmatprep.subr.bf16.mxu0 %v11896_v18  ;;  %v11926_v18 = vld [vmem:[#allocation12 + $0xc4] ss:$8 sps:$4 sm:$0xff]  }
 0x1b3   :  { %3417 = vmatpush2.bf16.msra.mxu1 %v11855_v31 }
 0x1b4   :  { %3418 = vmatprep.subr.bf16.mxu1 %v11860_v27  ;;  %4116 = vmatpush1.bf16.msra.mxu0 %v11894_v24  ;;  %v11902_v27 = vld [vmem:[#allocation12 + $0x4] ss:$8 sps:$4 sm:$0xff]  }
 0x1b5   :  { %v13390_v15 = vpop.f32.mrf.mxu0  ;;  %4117 = vmatprep.subr.bf16.mxu0 %v11902_v27  ;;  %v11927_v27 = vld [vmem:[#allocation12 + $0x1d0] ss:$8 sps:$4 sm:$0xff]  }
 0x1b7   :  { %3419 = vmatpush2.bf16.msra.mxu1 %v11858_v29  ;;  %v13394_v52 = vpop.f32.mrf.mxu0  ;;  %v11900_v29 = vld [vmem:[#allocation12] ss:$8 sps:$4 sm:$0xff]  }
 0x1b8   :  { %4118 = vmatpush1.bf16.msra.mxu0 %v11900_v29 }
 0x1b9   :  { %v13398_v1 = vpop.f32.mrf.mxu0  ;;  %4119 = vmatprep.subr.bf16.mxu0 %v11908_v58  ;;  %v11930_v58 = vld [vmem:[#allocation12 + $0xb0] ss:$8 sps:$4 sm:$0xff]  }
 0x1ba   :  { %3421 = vmatmul.mubr.bf16.vlgmr.msra.gmra.mxu1 %v13333_v10  ;;  %v13386_v38 = vpop.f32.mrf.mxu1  ;;  %v11869_v10 = vld [vmem:[#allocation12 + $0x174] ss:$8 sps:$4 sm:$0xff]  }
 0x1bb   :  { %3430 = vmatprep.mubr.bf16.mxu1 %v10311_v48  ;;  %4156 = vmatprep.subr.bf16.mxu1 %v11869_v10  ;;  %v13402_v30 = vpop.f32.mrf.mxu0 }
 0x1bc   :  { %v13392_v49 = vpop.f32.mrf.mxu1 }
 0x1bd   :  { %v13406_v39 = vpop.f32.mrf.mxu0 }
 0x1be   :  { %v13396_v25 = vpop.f32.mrf.mxu1 }
 0x1bf   :  { %v13410_v4 = vpop.f32.mrf.mxu0 }
 0x1c0   :  { %v13400_v5 = vpop.f32.mrf.mxu1 }
 0x1c1   :  { %v13414_v51 = vpop.f32.mrf.mxu0 }
 0x1c2   :  { %3431 = vmatmul.mubr.bf16.gmra.mxu1 %v13347_v2  ;;  %v11867_v2 = vld [vmem:[#allocation12 + $0x170] ss:$8 sps:$4 sm:$0xff]   ;;  %v13404_v45 = vpop.f32.mrf.mxu1 }
 0x1c3   :  { %4157 = vmatpush1.bf16.msra.mxu1 %v11867_v2  ;;  %v13420_v37 = vpop.f32.mrf.mxu0  ;;  %v11906_v2 = vld [vmem:[#allocation12 + $0xf0] ss:$8 sps:$4 sm:$0xff]  }
 0x1c4   :  { %4158 = vmatprep.subr.bf16.mxu1 %v11875_v61  ;;  %v13408_v16 = vpop.f32.mrf.mxu1  ;;  %4120 = vmatpush2.bf16.msra.mxu0 %v11906_v2  ;;  %v11909_v61 = vld [vmem:[#allocation12 + $0x100] ss:$8 sps:$4 sm:$0xff]   ;;  %v11935_v2 = vld [vmem:[#allocation12 + $0x1c4] ss:$8 sps:$4 sm:$0xff]  }
 0x1c6   :  { %v13412_v23 = vpop.f32.mrf.mxu1 }
 0x1c7   :  { %4159 = vmatpush1.bf16.msra.mxu1 %v11873_v3  ;;  %v11914_v3 = vld [vmem:[#allocation12 + $0xe4] ss:$8 sps:$4 sm:$0xff]  }
 0x1c8   :  { %4160 = vmatprep.subr.bf16.mxu1 %v11881_v8  ;;  %v13416_v31 = vpop.f32.mrf.mxu1  ;;  %4121 = vmatprep.subr.bf16.mxu0 %v11914_v3  ;;  %v11938_v3 = vld [vmem:[#allocation12 + $0xa4] ss:$8 sps:$4 sm:$0xff]  }
 0x1c9   :  { %4122 = vmatpush2.bf16.msra.mxu0 %v11912_v7 }
 0x1ca   :  { %4123 = vmatprep.subr.bf16.mxu0 %v11920_v28  ;;  %v11939_v28 = vld [vmem:[#allocation12 + $0x1b0] ss:$8 sps:$4 sm:$0xff]  }
 0x1cb   :  { %4161 = vmatpush1.bf16.msra.mxu1 %v11879_v59  ;;  %v11917_v59 = vld [vmem:[#allocation12 + $0x1f4] ss:$8 sps:$4 sm:$0xff]  }
 0x1cc   :  { %4162 = vmatprep.subr.bf16.mxu1 %v11887_v53 }
 0x1cf   :  { %4163 = vmatpush1.bf16.msra.mxu1 %v11885_v13  ;;  %v11918_v13 = vld [vmem:[#allocation12 + $0xd0] ss:$8 sps:$4 sm:$0xff]  }
 0x1d0   :  { %4164 = vmatprep.subr.bf16.mxu1 %v11893_v14  ;;  %4124 = vmatpush2.bf16.msra.mxu0 %v11918_v13  ;;  %v11921_v14 = vld [vmem:[#allocation12 + $0x1e0] ss:$8 sps:$4 sm:$0xff]  }
 0x1d1   :  { %4125 = vmatprep.subr.bf16.mxu0 %v11926_v18 }
 0x1d3   :  { %4165 = vmatpush1.bf16.msra.mxu1 %v11891_v0 }
 0x1d4   :  { %4166 = vmatprep.subr.bf16.mxu1 %v11899_v41  ;;  %v11924_v41 = vld [vmem:[#allocation12 + $0xc0] ss:$8 sps:$4 sm:$0xff]  }
 0x1d5   :  { %4126 = vmatpush2.bf16.msra.mxu0 %v11924_v41  ;;  %v11945_v41 = vld [vmem:[#allocation12 + $0x1a0] ss:$8 sps:$4 sm:$0xff]  }
 0x1d7   :  { %4167 = vmatpush1.bf16.msra.mxu1 %v11897_v57  ;;  %v11929_v57 = vld [vmem:[#allocation12 + $0x1d4] ss:$8 sps:$4 sm:$0xff]  }
 0x1d8   :  { %4168 = vmatprep.subr.bf16.mxu1 %v11905_v33  ;;  %v11932_v33 = vld [vmem:[#allocation12 + $0xb4] ss:$8 sps:$4 sm:$0xff]  }
 0x1d9   :  { %4127 = vmatprep.subr.bf16.mxu0 %v11932_v33 }
 0x1da   :  { %v13418_v48 = vpop.f32.mrf.mxu1  ;;  %4128 = vmatpush2.bf16.msra.mxu0 %v11930_v58  ;;  %v11953_v58 = vld [vmem:[#allocation12 + $0x194] ss:$8 sps:$4 sm:$0xff]  }
 0x1db   :  { %4169 = vmatpush1.bf16.msra.mxu1 %v11903_v55  ;;  %4129 = vmatprep.subr.bf16.mxu0 %v11938_v3 }
 0x1dc   :  { %v13424_v22 = vpop.f32.mrf.mxu1  ;;  %4170 = vmatprep.subr.bf16.mxu1 %v11911_v44  ;;  %v11933_v44 = vld [vmem:[#allocation12 + $0x1c0] ss:$8 sps:$4 sm:$0xff]  }
 0x1de   :  { %v13428_v8 = vpop.f32.mrf.mxu1 }
 0x1df   :  { %4171 = vmatpush1.bf16.msra.mxu1 %v11909_v61 }
 0x1e0   :  { %4172 = vmatprep.subr.bf16.mxu1 %v11917_v59  ;;  %v13432_v47 = vpop.f32.mrf.mxu1  ;;  %v11936_v59 = vld [vmem:[#allocation12 + $0xa0] ss:$8 sps:$4 sm:$0xff]  }
 0x1e1   :  { %4130 = vmatpush2.bf16.msra.mxu0 %v11936_v59 }
 0x1e2   :  { %v13434_v0 = vpop.f32.mrf.mxu1 }
 0x1e3   :  { %4173 = vmatpush2.bf16.msra.mxu1 %v11915_v11  ;;  %v11941_v11 = vld [vmem:[#allocation12 + $0x1b4] ss:$8 sps:$4 sm:$0xff]  }
 0x1e4   :  { %4174 = vmatprep.subr.bf16.mxu1 %v11923_v9  ;;  %v13438_v29 = vpop.f32.mrf.mxu1  ;;  %v11942_v9 = vld [vmem:[#allocation12 + $0x90] ss:$8 sps:$4 sm:$0xff]  }
 0x1e6   :  { %v13442_v61 = vpop.f32.mrf.mxu1 }
 0x1e7   :  { %4175 = vmatpush2.bf16.msra.mxu1 %v11921_v14  ;;  %v11944_v14 = vld [vmem:[#allocation12 + $0x94] ss:$8 sps:$4 sm:$0xff]  }
 0x1e8   :  { %4176 = vmatprep.subr.bf16.mxu1 %v11929_v57  ;;  %v13446_v13 = vpop.f32.mrf.mxu1  ;;  %v11947_v57 = vld [vmem:[#allocation12 + $0x1a4] ss:$8 sps:$4 sm:$0xff]   ;;  %4131 = vmatprep.subr.bf16.mxu0 %v11944_v14  ;;  %v11957_v14 = vld [vmem:[#allocation12 + $0x180] ss:$8 sps:$4 sm:$0xff]  }
 0x1e9   :  { %14403 = vst [vmem:[#allocation26_spill] sm:$0xff] %v13446_v13  ;;  %4132 = vmatpush2.bf16.msra.mxu0 %v11942_v9 }
 0x1eb   :  { %4177 = vmatpush2.bf16.msra.mxu1 %v11927_v27  ;;  %v11950_v27 = vld [vmem:[#allocation12 + $0x84] ss:$8 sps:$4 sm:$0xff]  }
 0x1ec   :  { %4178 = vmatprep.subr.bf16.mxu1 %v11935_v2  ;;  %v11948_v2 = vld [vmem:[#allocation12 + $0x80] ss:$8 sps:$4 sm:$0xff]   ;;  %4133 = vmatprep.subr.bf16.mxu0 %v11950_v27 }
 0x1ed   :  { %4134 = vmatpush2.bf16.msra.mxu0 %v11948_v2 }
 0x1ef   :  { %4179 = vmatpush2.bf16.msra.mxu1 %v11933_v44  ;;  %v11951_v44 = vld [vmem:[#allocation12 + $0x190] ss:$8 sps:$4 sm:$0xff]  }
 0x1f0   :  { %4180 = vmatprep.subr.bf16.mxu1 %v11941_v11 }
 0x1f3   :  { %4181 = vmatpush2.bf16.msra.mxu1 %v11939_v28  ;;  %v11956_v28 = vld [vmem:[#allocation10 + $0x74] ss:$8 sps:$4 sm:$0xff]  }
 0x1f4   :  { %4182 = vmatprep.subr.bf16.mxu1 %v11947_v57  ;;  %4369 = vmatprep.subr.bf16.mxu0 %v11956_v28  ;;  %v11965_v57 = vld [vmem:[#allocation10 + $0x174] ss:$8 sps:$4 sm:$0xff]  }
 0x1f5   :  { %v13422_v10 = vpop.f32.mrf.mxu0 }
 0x1f7   :  { %v13426_v20 = vpop.f32.mrf.mxu0  ;;  %4183 = vmatpush2.bf16.msra.mxu1 %v11945_v41 }
 0x1f8   :  { %4184 = vmatprep.subr.bf16.mxu1 %v11953_v58 }
 0x1f9   :  { %v13430_v53 = vpop.f32.mrf.mxu0 }
 0x1fb   :  { %v13436_v24 = vpop.f32.mrf.mxu0  ;;  %4185 = vmatpush2.bf16.msra.mxu1 %v11951_v44 }
 0x1fc   :  { %4186 = vmatprep.subr.bf16.mxu1 %v11959_v63 }
 0x1fd   :  { %v13440_v55 = vpop.f32.mrf.mxu0 }
 0x1ff   :  { %v13444_v7 = vpop.f32.mrf.mxu0  ;;  %4187 = vmatpush2.bf16.msra.mxu1 %v11957_v14  ;;  %v670_v14 = vadd.f32 %v13272_v42, %v13290_v50  ;;  %v1596_v50 = vadd.f32 %v13396_v25, %v13368_v43 }
 0x200   :  { %4723 = vmatprep.subr.bf16.mxu1 %v11965_v57 }
 0x201   :  { %v13448_v18 = vpop.f32.mrf.mxu0  ;;  %v1764_v43 = vadd.f32 %v13398_v1, %v1596_v50 }
 0x203   :  { %v13452_v3 = vpop.f32.mrf.mxu0 }
 0x215   :  { %v13456_v11 = vpop.f32.mrf.mxu0 }
 0x217   :  { %v13458_v9 = vpop.f32.mrf.mxu0 }
 0x218   :  { %14404 = vst [vmem:[#allocation27_spill] sm:$0xff] %v13458_v9  ;;  %v868_v9 = vadd.f32 %v13306_v40, %v670_v14 }
 0x219   :  { %v13462_v41 = vpop.f32.mrf.mxu0 }
 0x21a   :  { %v13450_v33 = vpop.f32.mrf.mxu1 }
 0x21b   :  { %v13466_v35 = vpop.f32.mrf.mxu0 }
 0x21c   :  { %v13454_v59 = vpop.f32.mrf.mxu1  ;;  %14405 = vst [vmem:[#allocation28_spill] sm:$0xff] %v13466_v35 }
 0x21d   :  { %v13470_v44 = vpop.f32.mrf.mxu0 }
 0x21e   :  { %v2494_v60 = vpop.f32.mrf.mxu1  ;;  %14407 = vst [vmem:[#allocation30_spill] sm:$0xff] %v13470_v44  ;;  %v1130_v44 = vadd.f32 %v13366_v26, %v868_v9  ;;  %v1595_v26 = vadd.f32 %v13392_v49, %v13364_v36  ;;  %v1600_v49 = vadd.f32 %v13412_v23, %v13378_v17 }
 0x21f   :  { %v13474_v21 = vpop.f32.mrf.mxu0 }
 0x220   :  { %v13460_v27 = vpop.f32.mrf.mxu1  ;;  %14409 = vst [vmem:[#allocation32_spill] sm:$0xff] %v13474_v21  ;;  %v680_v21 = vadd.f32 %v13297_v19, %v13354_v12  ;;  %v1335_v40 = vadd.f32 %v13358_v54, %v1130_v44  ;;  %v1768_v17 = vadd.f32 %v13414_v51, %v1600_v49 }
 0x221   :  { %v13480_v13 = vpop.f32.mrf.mxu0 }
 0x222   :  { %v13464_v58 = vpop.f32.mrf.mxu1  ;;  %v1597_v19 = vadd.f32 %v13400_v5, %v1335_v40 }
 0x223   :  { %v13485_v35 = vpop.f32.mrf.mxu0  ;;  %v14413_v40 = vld [vmem:[#allocation28_spill] sm:$0xff] }
 0x224   :  { %v13468_v2 = vpop.f32.mrf.mxu1  ;;  %14411 = vst [vmem:[#allocation34_spill] sm:$0xff] %v13485_v35  ;;  %v872_v35 = vadd.f32 %v13349_v62, %v680_v21  ;;  %v1763_v21 = vadd.f32 %v13394_v52, %v1595_v26  ;;  %v1765_v36 = vadd.f32 %v13402_v30, %v1597_v19  ;;  %v14415_v19 = vld [vmem:[#allocation26_spill] sm:$0xff] }
 0x225   :  { %14406 = vst [vmem:[#allocation29_spill] sm:$0xff] %v13468_v2 }
 0x226   :  { %v13472_v28 = vpop.f32.mrf.mxu1  ;;  %v1134_v12 = vadd.f32 %v13388_v46, %v872_v35  ;;  %v2026_v35 = vadd.f32 %v13430_v53, %v1764_v43  ;;  %v2025_v1 = vadd.f32 %v13426_v20, %v1763_v21  ;;  %v2027_v52 = vadd.f32 %v13436_v24, %v1765_v36 }
 0x227   :  { %14408 = vst [vmem:[#allocation31_spill] sm:$0xff] %v13472_v28 }
 0x228   :  { %v13476_v63 = vpop.f32.mrf.mxu1  ;;  %v2248_v23 = vadd.f32 %v13424_v22, %v2025_v1 }
 0x229   :  { %14410 = vst [vmem:[#allocation33_spill] sm:$0xff] %v13476_v63  ;;  %v1594_v63 = vadd.f32 %v13386_v38, %v13361_v6  ;;  %v1598_v6 = vadd.f32 %v13404_v45, %v13373_v56  ;;  %v1339_v56 = vadd.f32 %v13384_v34, %v1134_v12  ;;  %v14416_v12 = vld [vmem:[#allocation30_spill] sm:$0xff] }
 0x22b   :  { %v1762_v9 = vadd.f32 %v13390_v15, %v1594_v63  ;;  %v1599_v15 = vadd.f32 %v13408_v16, %v13376_v32  ;;  %v1766_v46 = vadd.f32 %v13406_v39, %v1598_v6  ;;  %v1601_v30 = vadd.f32 %v13416_v31, %v1339_v56  ;;  %v14419_v56 = vld [vmem:[#allocation32_spill] sm:$0xff] }
 0x22c   :  { %v2249_v39 = vadd.f32 %v13428_v8, %v2026_v35 }
 0x22d   :  { %v2024_v54 = vadd.f32 %v13422_v10, %v1762_v9  ;;  %v2028_v32 = vadd.f32 %v13440_v55, %v1766_v46  ;;  %v1767_v10 = vadd.f32 %v13410_v4, %v1599_v15  ;;  %v1769_v31 = vadd.f32 %v13420_v37, %v1601_v30 }
 0x22e   :  { %v2511_v53 = vadd.f32 %v2494_v60, %v2249_v39  ;;  %v2030_v4 = vadd.f32 %v13448_v18, %v1768_v17  ;;  %v14412_v18 = vld [vmem:[#allocation27_spill] sm:$0xff] }
 0x22f   :  { %v2247_v5 = vadd.f32 %v13418_v48, %v2024_v54  ;;  %v2029_v20 = vadd.f32 %v13444_v7, %v1767_v10  ;;  %v2250_v48 = vadd.f32 %v13432_v47, %v2027_v52  ;;  %v2251_v55 = vadd.f32 %v13434_v0, %v2028_v32  ;;  %v14417_v6 = vld [vmem:[#allocation31_spill] sm:$0xff]  ;;  %v14420_v32 = vld [vmem:[#allocation34_spill] sm:$0xff] }
 0x230   :  { %v2031_v22 = vadd.f32 %v13452_v3, %v1769_v31  ;;  %v2702_v7 = vadd.f32 %v13462_v41, %v2511_v53  ;;  %v2253_v0 = vadd.f32 %v13442_v61, %v2030_v4  ;;  %v14418_v21 = vld [vmem:[#allocation33_spill] sm:$0xff] }
 0x231   :  { %v2509_v34 = vadd.f32 %v13450_v33, %v2247_v5  ;;  %v2510_v33 = vadd.f32 %v13454_v59, %v2248_v23  ;;  %v2512_v51 = vadd.f32 %v13460_v27, %v2250_v48  ;;  %v2513_v60 = vadd.f32 %v13464_v58, %v2251_v55 }
 0x232   :  { %v2252_v47 = vadd.f32 %v13438_v29, %v2029_v20  ;;  %v2254_v3 = vadd.f32 %v14415_v19, %v2031_v22  ;;  %v2515_v29 = vadd.f32 %v14417_v6, %v2253_v0 }
 0x233   :  { %v2700_v8 = vadd.f32 %v13456_v11, %v2509_v34  ;;  %v2701_v50 = vadd.f32 %v14412_v18, %v2510_v33  ;;  %v2703_v26 = vadd.f32 %v14413_v40, %v2512_v51  ;;  %v14414_v11 = vld [vmem:[#allocation29_spill] sm:$0xff]  ;;  %v2704_v58 = vadd.f32 %v14416_v12, %v2513_v60 }
 0x234   :  { %v2514_v9 = vadd.f32 %v14414_v11, %v2252_v47  ;;  %v2516_v36 = vadd.f32 %v14418_v21, %v2254_v3  ;;  %v2706_v1 = vadd.f32 %v13480_v13, %v2515_v29 }
 0x236   :  { %v2705_v46 = vadd.f32 %v14419_v56, %v2514_v9  ;;  %v2707_v10 = vadd.f32 %v14420_v32, %v2516_v36 }
 0x23a   :  { %v13482_v57 = vpop.f32.mrf.mxu1 }
 0x23c   :  { %v13487_v2 = vpop.f32.mrf.mxu1 }
 0x23e   :  { %v13494_v42 = vpop.f32.mrf.mxu1 }
 0x240   :  { %v13507_v38 = vpop.f32.mrf.mxu1 }
 0x242   :  { %v13512_v62 = vpop.f32.mrf.mxu1 }
 0x244   :  { %v3172_v16 = vpop.f32.mrf.mxu1 }
 0x246   :  { %v3174_v44 = vpop.f32.mrf.mxu1 }
 0x248   :  { %v3176_v59 = vpop.f32.mrf.mxu1 }
 0x255   :  { %v2943_v28 = vpop.f32.mrf.mxu0 }
 0x256   :  { %v2962_v37 = vadd.f32 %v2943_v28, %v2700_v8 }
 0x257   :  { %v2945_v14 = vpop.f32.mrf.mxu0 }
 0x258   :  { %v2963_v43 = vadd.f32 %v2945_v14, %v2701_v50  ;;  %v3179_v61 = vadd.f32 %v13482_v57, %v2962_v37 }
 0x259   :  { %v2947_v25 = vpop.f32.mrf.mxu0 }
 0x25a   :  { %v2964_v27 = vadd.f32 %v2947_v25, %v2702_v7  ;;  %v3180_v52 = vadd.f32 %v13487_v2, %v2963_v43 }
 0x25b   :  { %v2949_v45 = vpop.f32.mrf.mxu0 }
 0x25c   :  { %v2965_v28 = vadd.f32 %v2949_v45, %v2703_v26  ;;  %v3181_v25 = vadd.f32 %v13494_v42, %v2964_v27 }
 0x25d   :  { %v2953_v24 = vpop.f32.mrf.mxu0 }
 0x25e   :  { %v2966_v15 = vadd.f32 %v2953_v24, %v2704_v58  ;;  %v3182_v57 = vadd.f32 %v13507_v38, %v2965_v28 }
 0x25f   :  { %v2955_v63 = vpop.f32.mrf.mxu0 }
 0x260   :  { %v2967_v5 = vadd.f32 %v2955_v63, %v2705_v46  ;;  %v3183_v34 = vadd.f32 %v13512_v62, %v2966_v15 }
 0x261   :  { %v2957_v54 = vpop.f32.mrf.mxu0 }
 0x262   :  { %v2968_v39 = vadd.f32 %v2957_v54, %v2706_v1  ;;  %v3184_v48 = vadd.f32 %v3172_v16, %v2967_v5 }
 0x263   :  { %v2959_v45 = vpop.f32.mrf.mxu0 }
 0x264   :  { %v2969_v38 = vadd.f32 %v2959_v45, %v2707_v10  ;;  %v3185_v55 = vadd.f32 %v3174_v44, %v2968_v39 }
 0x266   :  { %v3186_v60 = vadd.f32 %v3176_v59, %v2969_v38 }
 0x27a   :  { %v3422_v41 = vpop.f32.mrf.mxu1 }
 0x27b   :  { %v13554_v49 = vadd.f32 %v3422_v41, %v3179_v61 }
 0x27c   :  { %v3424_v35 = vpop.f32.mrf.mxu1 }
 0x27d   :  { %v13564_v17 = vadd.f32 %v3424_v35, %v3180_v52  ;;  %v3469_v13 = vmul.f32 %v13554_v49, %v13554_v49 }
 0x27e   :  { %v3426_v14 = vpop.f32.mrf.mxu1 }
 0x27f   :  { %v13559_v30 = vadd.f32 %v3426_v14, %v3181_v25  ;;  %v3470_v4 = vmul.f32 %v13564_v17, %v13564_v17 }
 0x280   :  { %v3428_v23 = vpop.f32.mrf.mxu1 }
 0x281   :  { %v3449_v2 = vadd.f32 %v13559_v30, %v13554_v49  ;;  %v3471_v42 = vmul.f32 %v13559_v30, %v13559_v30  ;;  %v13572_v20 = vadd.f32 %v3428_v23, %v3182_v57 }
 0x282   :  { %v3432_v53 = vpop.f32.mrf.mxu1 }
 0x283   :  { %v3477_v24 = vadd.f32 %v3471_v42, %v3469_v13  ;;  %v3472_v62 = vmul.f32 %v13572_v20, %v13572_v20  ;;  %v13576_v31 = vadd.f32 %v3432_v53, %v3183_v34  ;;  %v3458_v8 = vadd.f32 %v13572_v20, %v13564_v17 }
 0x284   :  { %v3434_v33 = vpop.f32.mrf.mxu1 }
 0x285   :  { %v3450_v51 = vadd.f32 %v3449_v2, %v13576_v31  ;;  %v3473_v22 = vmul.f32 %v13576_v31, %v13576_v31  ;;  %v13585_v16 = vadd.f32 %v3434_v33, %v3184_v48  ;;  %v3486_v47 = vadd.f32 %v3472_v62, %v3470_v4 }
 0x286   :  { %v3436_v7 = vpop.f32.mrf.mxu1 }
 0x287   :  { %v3478_v37 = vadd.f32 %v3477_v24, %v3473_v22  ;;  %v3459_v44 = vadd.f32 %v3458_v8, %v13585_v16  ;;  %v3474_v63 = vmul.f32 %v13585_v16, %v13585_v16  ;;  %v13590_v0 = vadd.f32 %v3436_v7, %v3185_v55  ;;  %v13609_v22 = vld [vmem:[#allocation3 + $0x40] sm:$0x88] }
 0x288   :  { %v3438_v18 = vpop.f32.mrf.mxu1 }
 0x289   :  { %v3487_v50 = vadd.f32 %v3486_v47, %v3474_v63  ;;  %v3451_v40 = vadd.f32 %v3450_v51, %v13590_v0  ;;  %v3475_v26 = vmul.f32 %v13590_v0, %v13590_v0  ;;  %v13595_v11 = vadd.f32 %v3438_v18, %v3186_v60  ;;  %v13611_v60 = vld [vmem:[#allocation3 + $0x48] sm:$0x88] }
 0x28a   :  { %v4471_v47 = vshrl.u32 %v13609_v22, 16 }
 0x28b   :  { %v3452_v59 = vrot.slane %v3451_v40, 4  ;;  %v3479_v9 = vadd.f32 %v3478_v37, %v3475_v26  ;;  %v3460_v27 = vadd.f32 %v3459_v44, %v13595_v11  ;;  %v3476_v19 = vmul.f32 %v13595_v11, %v13595_v11 }
 0x28c   :  { %v10354_v37 = vrot.slane %v13609_v22, 11  ;;  %v10353_v44 = vrot.slane %v13611_v60, 11 }
 0x28d   :  { %v3453_v3 = vadd.f32 %v3452_v59, %v3451_v40  ;;  %v3480_v12 = vrot.slane %v3479_v9, 4  ;;  %v3461_v58 = vrot.slane %v3460_v27, 4  ;;  %v3488_v6 = vadd.f32 %v3487_v50, %v3476_v19 }
 0x28f   :  { %v3454_v29 = vrot.slane %v3453_v3, 2  ;;  %v3481_v43 = vadd.f32 %v3480_v12, %v3479_v9  ;;  %v3462_v41 = vadd.f32 %v3461_v58, %v3460_v27  ;;  %v3489_v28 = vrot.slane %v3488_v6, 4 }
 0x290   :  { %v13624_v27 = vrot.slane %v4471_v47, 11 }
 0x291   :  { %v3455_v54 = vadd.f32 %v3454_v29, %v3453_v3  ;;  %v3482_v61 = vrot.slane %v3481_v43, 2  ;;  %v3463_v21 = vrot.slane %v3462_v41, 2  ;;  %v3490_v36 = vadd.f32 %v3489_v28, %v3488_v6 }
 0x293   :  { %v3456_v15 = vrot.slane %v3455_v54, 1  ;;  %v3483_v35 = vadd.f32 %v3482_v61, %v3481_v43  ;;  %v3464_v56 = vadd.f32 %v3463_v21, %v3462_v41  ;;  %v3491_v46 = vrot.slane %v3490_v36, 2 }
 0x295   :  { %v3457_v25 = vadd.f32 %v3456_v15, %v3455_v54  ;;  %v3484_v1 = vrot.slane %v3483_v35, 1  ;;  %v3465_v52 = vrot.slane %v3464_v56, 1  ;;  %v3492_v14 = vadd.f32 %v3491_v46, %v3490_v36 }
 0x297   :  { %v3467_v5 = vmul.f32 0.03125, %v3457_v25  ;;  %v3485_v45 = vadd.f32 %v3484_v1, %v3483_v35  ;;  %v3466_v57 = vadd.f32 %v3465_v52, %v3464_v56  ;;  %v3493_v32 = vrot.slane %v3492_v14, 1 }
 0x299   :  { %v3495_v10 = vmul.f32 0.03125, %v3485_v45  ;;  %v3497_v34 = vmul.f32 %v3467_v5, %v3467_v5  ;;  %v3503_v39 = vsub.f32 %v13554_v49, %v3467_v5  ;;  %v3505_v23 = vsub.f32 %v13559_v30, %v3467_v5  ;;  %v13606_v30 = vld [vmem:[#allocation3 + $0x10] sm:$0x88] }
 0x29a   :  { %v3507_v13 = vsub.f32 %v13576_v31, %v3467_v5  ;;  %v3509_v2 = vsub.f32 %v13590_v0, %v3467_v5  ;;  %v3468_v42 = vmul.f32 0.03125, %v3466_v57  ;;  %v3494_v38 = vadd.f32 %v3493_v32, %v3492_v14 }
 0x29b   :  { %v3499_v53 = vsub.f32 %v3495_v10, %v3497_v34  ;;  %v4427_v31 = vshrl.u32 %v13606_v30, 16 }
 0x29c   :  { %v3496_v48 = vmul.f32 0.03125, %v3494_v38  ;;  %v3498_v24 = vmul.f32 %v3468_v42, %v3468_v42  ;;  %v3504_v62 = vsub.f32 %v13564_v17, %v3468_v42  ;;  %v3508_v4 = vsub.f32 %v13585_v16, %v3468_v42  ;;  %v13614_v17 = vld [vmem:[#allocation3 + $0xb8] sm:$0x88] }
 0x29d   :  { %v3501_v55 = vmax.f32 %v3499_v53, 0.0  ;;  %v10352_v16 = vrot.slane %v13606_v30, 11  ;;  %v13619_v63 = vrot.slane %v4427_v31, 11  ;;  %v3506_v26 = vsub.f32 %v13572_v20, %v3468_v42 }
 0x29e   :  { %v3500_v33 = vsub.f32 %v3496_v48, %v3498_v24  ;;  %v3510_v59 = vsub.f32 %v13595_v11, %v3468_v42  ;;  %v10355_v9 = vrot.slane %v13614_v17, 11  ;;  %v4440_v20 = vshrl.u32 %v13611_v60, 16 }
 0x29f   :  { %v3511_v8 = vadd.f32 1e-05, %v3501_v55  ;;  %v4484_v11 = vshrl.u32 %v13614_v17, 16 }
 0x2a0   :  { %v3502_v51 = vmax.f32 %v3500_v33, 0.0 }
 0x2a1   :  { %12725 = vrsqrt.f32 %v3511_v8 }
 0x2a2   :  { %v3512_v49 = vadd.f32 1e-05, %v3502_v51  ;;  %v13647_v51 = vrot.slane %v4440_v20, 11 }
 0x2a4   :  { %12727 = vrsqrt.f32 %v3512_v49  ;;  %v13649_v49 = vrot.slane %v4484_v11, 11 }
 0x2ae   :  { %v12726_v7 = vpop.eup %12725 }
 0x2af   :  { %v3515_v0 = vmul.f32 %v12726_v7, %v3503_v39  ;;  %v3517_v18 = vmul.f32 %v12726_v7, %v3505_v23  ;;  %v3519_v50 = vmul.f32 %v12726_v7, %v3507_v13  ;;  %v3521_v40 = vmul.f32 %v12726_v7, %v3509_v2 }
 0x2b1   :  { %v12728_v19 = vpop.eup %12727  ;;  %v3523_v3 = vmax.f32 %v3515_v0, 0.0  ;;  %v3525_v12 = vmax.f32 %v3517_v18, 0.0  ;;  %v3527_v58 = vmax.f32 %v3519_v50, 0.0  ;;  %v3529_v6 = vmax.f32 %v3521_v40, 0.0 }
 0x2b2   :  { %v3516_v29 = vmul.f32 %v12728_v19, %v3504_v62  ;;  %v3518_v43 = vmul.f32 %v12728_v19, %v3506_v26  ;;  %v3520_v41 = vmul.f32 %v12728_v19, %v3508_v4  ;;  %v3522_v28 = vmul.f32 %v12728_v19, %v3510_v59 }
 0x2b3   :  { %v13626_v54 = vpack.c.bf16 %v3525_v12, %v3523_v3  ;;  %v13628_v61 = vpack.c.bf16 %v3529_v6, %v3527_v58 }
 0x2b4   :  { %v3524_v21 = vmax.f32 %v3516_v29, 0.0  ;;  %v3526_v36 = vmax.f32 %v3518_v43, 0.0  ;;  %v3528_v15 = vmax.f32 %v3520_v41, 0.0  ;;  %v3530_v35 = vmax.f32 %v3522_v28, 0.0 }
 0x2b5   :  { %v3535_v56 = vunpack.c.l.bf16 %v13626_v54  ;;  %v3537_v46 = vunpack.c.h.bf16 %v13626_v54  ;;  %v3539_v25 = vunpack.c.l.bf16 %v13628_v61  ;;  %v3541_v1 = vunpack.c.h.bf16 %v13628_v61 }
 0x2b6   :  { %v13636_v52 = vpack.c.bf16 %v3526_v36, %v3524_v21  ;;  %v13638_v14 = vpack.c.bf16 %v3530_v35, %v3528_v15  ;;  %v11072_v5 = vpack.c.bf16 %v3524_v21, %v3523_v3  ;;  %v13640_v45 = vpack.c.bf16 %v3526_v36, %v3525_v12 }
 0x2b7   :  { %v3543_v57 = vsub.f32 %v3523_v3, %v3535_v56  ;;  %v3545_v32 = vsub.f32 %v3525_v12, %v3537_v46  ;;  %v3547_v10 = vsub.f32 %v3527_v58, %v3539_v25  ;;  %v3549_v34 = vsub.f32 %v3529_v6, %v3541_v1  ;;  %v11954_v1 = vld [vmem:[#allocation10 + $0x70] ss:$8 sps:$4 sm:$0xff]  }
 0x2b8   :  { %v3536_v39 = vunpack.c.l.bf16 %v13636_v52  ;;  %v3538_v23 = vunpack.c.h.bf16 %v13636_v52  ;;  %v3540_v13 = vunpack.c.l.bf16 %v13638_v14  ;;  %v3542_v2 = vunpack.c.h.bf16 %v13638_v14  ;;  %3575 = vst [vmem:[#allocation3 + $0x38] sm:$0xff] %v11072_v5  ;;  %3576 = vst [vmem:[#allocation3 + $0xa8] sm:$0xff] %v13640_v45 }
 0x2b9   :  { %v11074_v42 = vpack.c.bf16 %v3528_v15, %v3527_v58  ;;  %v11075_v38 = vpack.c.bf16 %v3530_v35, %v3529_v6  ;;  %v3629_v53 = vrot.slane %v11072_v5, 7  ;;  %v4432_v48 = vshrl.u32 %v11072_v5, 16 }
 0x2ba   :  { %v3544_v24 = vsub.f32 %v3524_v21, %v3536_v39  ;;  %v3546_v62 = vsub.f32 %v3526_v36, %v3538_v23  ;;  %v3548_v55 = vsub.f32 %v3528_v15, %v3540_v13  ;;  %v3550_v4 = vsub.f32 %v3530_v35, %v3542_v2 }
 0x2bb   :  { %3577 = vst [vmem:[#allocation3 + $0x70] sm:$0xff] %v11074_v42  ;;  %3578 = vst [vmem:[#allocation3 + $0x58] sm:$0xff] %v11075_v38  ;;  %v3643_v33 = vrot.slane %v11074_v42, 7  ;;  %v4434_v8 = vrot.slane %v4432_v48, 7  ;;  %v3630_v50 = vsel %vm13089_vm5, %v10352_v16, %v3629_v53  ;;  %v3635_v40 = vrot.slane %v3629_v53, 4 }
 0x2bc   :  { %v13651_v31 = vpack.c.bf16 %v3544_v24, %v3543_v57  ;;  %v11077_v47 = vpack.c.bf16 %v3546_v62, %v3545_v32  ;;  %v13653_v7 = vpack.c.bf16 %v3548_v55, %v3547_v10  ;;  %v11079_v0 = vpack.c.bf16 %v3550_v4, %v3549_v34  ;;  %v11960_v24 = vld [vmem:[#allocation10 + $0x60] ss:$8 sps:$4 sm:$0xff]  }
 0x2bd   :  { %v13663_v26 = vsel %vm13089_vm5, %v10354_v37, %v3643_v33  ;;  %v3649_v59 = vrot.slane %v3643_v33, 4  ;;  %v4435_v3 = vshll.u32 %v11072_v5, 16  ;;  %v4454_v16 = vshrl.u32 %v13640_v45, 16 }
 0x2be   :  { %3599 = vst [vmem:[#allocation3 + $0x20] sm:$0xff] %v13651_v31  ;;  %3600 = vst [vmem:[#allocation3 + $0x98] sm:$0xff] %v11077_v47  ;;  %v3633_v19 = vrot.slane %v13651_v31, 7  ;;  %v3647_v30 = vrot.slane %v13653_v7, 7  ;;  %v4452_v22 = vrot.slane %v4434_v8, 4  ;;  %v4457_v58 = vshll.u32 %v13640_v45, 16 }
 0x2bf   :  { %3601 = vst [vmem:[#allocation3 + $0x60] sm:$0xff] %v13653_v7  ;;  %3602 = vst [vmem:[#allocation3 + $0x8] sm:$0xff] %v11079_v0  ;;  %v3607_v12 = vld [vmem:[#allocation3 + $0xa8] sm:$0x77]  ;;  %v4476_v37 = vshrl.u32 %v11074_v42, 16  ;;  %v4498_v6 = vshrl.u32 %v11075_v38, 16  ;;  %v4437_v41 = vor.u32 %v4435_v3, %v4434_v8 }
 0x2c0   :  { %v3636_v29 = vrot.slane %v3607_v12, 7  ;;  %v13675_v43 = vsel %vm13089_vm5, %v10353_v44, %v3633_v19  ;;  %v4479_v28 = vshll.u32 %v11074_v42, 16  ;;  %v3638_v20 = vrot.slane %v3633_v19, 4  ;;  %v11962_v45 = vld [vmem:[#allocation10 + $0x64] ss:$8 sps:$4 sm:$0xff]  }
 0x2c1   :  { %v13681_v11 = vsel %vm13089_vm5, %v10355_v9, %v3647_v30  ;;  %v4456_v21 = vrot.slane %v4454_v16, 7  ;;  %v4478_v36 = vrot.slane %v4476_v37, 7  ;;  %v4500_v60 = vrot.slane %v4498_v6, 7  ;;  %v11963_v3 = vld [vmem:[#allocation10 + $0x170] ss:$8 sps:$4 sm:$0xff]  }
 0x2c2   :  { %v3637_v15 = vsel %vm13089_vm5, %v3635_v40, %v3636_v29  ;;  %v3613_v35 = vld [vmem:[#allocation3 + $0x58] sm:$0x77]  ;;  %v4501_v56 = vshll.u32 %v11075_v38, 16  ;;  %v4445_v44 = vshrl.u32 %v13651_v31, 16  ;;  %v4438_v57 = vsel %vm13106_vm8, %v13619_v63, %v4437_v41 }
 0x2c3   :  { %v13686_v46 = vcombine.low %v3630_v50, %v3637_v15  ;;  %v13688_v25 = vcombine.high %v3630_v50, %v3637_v15  ;;  %v3650_v17 = vrot.slane %v3613_v35, 7  ;;  %v4459_v5 = vor.u32 %v4457_v58, %v4456_v21  ;;  %v11968_v50 = vld [vmem:[#allocation10 + $0x54] ss:$8 sps:$4 sm:$0xff]   ;;  %v11966_v29 = vld [vmem:[#allocation10 + $0x50] ss:$8 sps:$4 sm:$0xff]  }
 0x2c4   :  { %v4481_v32 = vor.u32 %v4479_v28, %v4478_v36  ;;  %v4496_v10 = vrot.slane %v4478_v36, 4  ;;  %v4503_v34 = vor.u32 %v4501_v56, %v4500_v60  ;;  %v3652_v2 = vrot.slane %v3647_v30, 4  ;;  %v11969_v15 = vld [vmem:[#allocation10 + $0x160] ss:$8 sps:$4 sm:$0xff]  }
 0x2c5   :  { %4135 = vmatprep.mubr.bf16.mxu0 %v13688_v25  ;;  %v3651_v39 = vsel %vm13089_vm5, %v3649_v59, %v3650_v17  ;;  %v3608_v23 = vld [vmem:[#allocation3 + $0x98] sm:$0x77]  ;;  %v4460_v42 = vsel %vm13106_vm8, %v4452_v22, %v4459_v5  ;;  %v4447_v48 = vrot.slane %v4445_v44, 7  ;;  %v4448_v59 = vshll.u32 %v13651_v31, 16  ;;  %v11971_v22 = vld [vmem:[#allocation10 + $0x164] ss:$8 sps:$4 sm:$0xff]  }
 0x2c6   :  { %v3614_v13 = vld [vmem:[#allocation3 + $0x8] sm:$0x77]  ;;  %4136 = vmatmul.mubr.bf16.vlgmr.msra.gmra.mxu0 %v13686_v46  ;;  %v13700_v38 = vcombine.high %v13663_v26, %v3651_v39  ;;  %v3639_v63 = vrot.slane %v3608_v23, 7  ;;  %v13702_v62 = vcombine.low %v4438_v57, %v4460_v42  ;;  %v13704_v55 = vcombine.high %v4438_v57, %v4460_v42  ;;  %v13711_v8 = vld [vmem:[#allocation3 + $0x98] sm:$0xff] }
 0x2c7   :  { %v3653_v53 = vrot.slane %v3614_v13, 7  ;;  %4370 = vmatpush1.bf16.msra.mxu0 %v11954_v1  ;;  %v4482_v4 = vsel %vm13106_vm8, %v13624_v27, %v4481_v32  ;;  %v4504_v33 = vsel %vm13106_vm8, %v4496_v10, %v4503_v34  ;;  %v13721_v27 = vld [vmem:[#allocation3 + $0x8] sm:$0xff]  ;;  %v13727_v12 = vcombine.low %v13663_v26, %v3651_v39  ;;  %v11977_v44 = vld [vmem:[#allocation10 + $0x154] ss:$8 sps:$4 sm:$0xff]   ;;  %v11975_v39 = vld [vmem:[#allocation10 + $0x150] ss:$8 sps:$4 sm:$0xff]  }
 0x2c8   :  { %4145 = vmatprep.mubr.bf16.mxu0 %v13700_v38  ;;  %4371 = vmatprep.subr.bf16.mxu0 %v11962_v45  ;;  %v3640_v47 = vsel %vm13089_vm5, %v3638_v20, %v3639_v63  ;;  %v13718_v40 = vcombine.high %v4482_v4, %v4504_v33  ;;  %v13729_v18 = vcombine.low %v4482_v4, %v4504_v33  ;;  %v4463_v37 = vshrl.u32 %v13711_v8, 16  ;;  %v11974_v20 = vld [vmem:[#allocation10 + $0x44] ss:$8 sps:$4 sm:$0xff]   ;;  %v11980_v10 = vld [vmem:[#allocation10 + $0x34] ss:$8 sps:$4 sm:$0xff]  }
 0x2c9   :  { %v3654_v0 = vsel %vm13089_vm5, %v3652_v2, %v3653_v53  ;;  %v10358_v19 = vcombine.low %v13675_v43, %v3640_v47  ;;  %v10359_v30 = vcombine.high %v13675_v43, %v3640_v47  ;;  %v4450_v58 = vor.u32 %v4448_v59, %v4447_v48  ;;  %v11983_v63 = vld [vmem:[#allocation10 + $0x144] ss:$8 sps:$4 sm:$0xff]   ;;  %v11989_v47 = vld [vmem:[#allocation10 + $0x134] ss:$8 sps:$4 sm:$0xff]   ;;  %v11987_v59 = vld [vmem:[#allocation10 + $0x130] ss:$8 sps:$4 sm:$0xff]  }
 0x2ca   :  { %v10363_v16 = vcombine.high %v13681_v11, %v3654_v0  ;;  %v4466_v6 = vshll.u32 %v13711_v8, 16  ;;  %v4489_v41 = vshrl.u32 %v13653_v7, 16  ;;  %v4492_v43 = vshll.u32 %v13653_v7, 16  ;;  %v11986_v4 = vld [vmem:[#allocation10 + $0x24] ss:$8 sps:$4 sm:$0xff]  }
 0x2cb   :  { %4372 = vmatpush1.bf16.msra.mxu0 %v11960_v24  ;;  %4188 = vmatprep.mubr.bf16.mxu1 %v10359_v30  ;;  %v4507_v28 = vshrl.u32 %v13721_v27, 16  ;;  %v4510_v26 = vshll.u32 %v13721_v27, 16  ;;  %v13740_v21 = vsel %vm13106_vm8, %v13647_v51, %v4450_v58  ;;  %v4465_v36 = vrot.slane %v4463_v37, 7  ;;  %v11972_v51 = vld [vmem:[#allocation10 + $0x40] ss:$8 sps:$4 sm:$0xff]  }
 0x2cc   :  { %4189 = vmatmul.mubr.bf16.vlgmr.msra.gmra.mxu1 %v10358_v19  ;;  %4373 = vmatprep.subr.bf16.mxu0 %v11968_v50  ;;  %v4491_v35 = vrot.slane %v4489_v41, 7  ;;  %v10605_v56 = vcombine.high %v13651_v31, %v13711_v8  ;;  %v4461_v1 = vrot.slane %v4447_v48, 4  ;;  %v10604_v5 = vcombine.low %v13651_v31, %v13711_v8  ;;  %v11978_v24 = vld [vmem:[#allocation10 + $0x30] ss:$8 sps:$4 sm:$0xff]   ;;  %v11992_v50 = vld [vmem:[#allocation10 + $0x14] ss:$8 sps:$4 sm:$0xff]  }
 0x2cd   :  { %4724 = vmatpush1.bf16.msra.mxu1 %v11963_v3  ;;  %4198 = vmatprep.mubr.bf16.mxu1 %v10363_v16  ;;  %v4509_v60 = vrot.slane %v4507_v28, 7  ;;  %v4468_v17 = vor.u32 %v4466_v6, %v4465_v36  ;;  %v10362_v42 = vcombine.low %v13681_v11, %v3654_v0  ;;  %v10606_v33 = vcombine.low %v13653_v7, %v13721_v27  ;;  %v11981_v11 = vld [vmem:[#allocation10 + $0x140] ss:$8 sps:$4 sm:$0xff]   ;;  %v11995_v19 = vld [vmem:[#allocation10 + $0x124] ss:$8 sps:$4 sm:$0xff]   ;;  %v6096_v41 = vld [vmem:[#allocation3 + $0x58] sm:$0xff] }
 0x2ce   :  { %4146 = vmatmul.mubr.bf16.gmra.mxu0 %v13727_v12  ;;  %4725 = vmatprep.subr.bf16.mxu1 %v11971_v22  ;;  %v4494_v45 = vor.u32 %v4492_v43, %v4491_v35  ;;  %v4505_v57 = vrot.slane %v4491_v35, 4  ;;  %v11984_v0 = vld [vmem:[#allocation10 + $0x20] ss:$8 sps:$4 sm:$0xff]   ;;  %v11990_v30 = vld [vmem:[#allocation10 + $0x10] ss:$8 sps:$4 sm:$0xff]  }
 0x2cf   :  { %4374 = vmatpush1.bf16.msra.mxu0 %v11966_v29  ;;  %4401 = vmatprep.mubr.bf16.mxu0 %v13688_v25  ;;  %v4512_v32 = vor.u32 %v4510_v26, %v4509_v60  ;;  %v13750_v34 = vsel %vm13106_vm8, %v4461_v1, %v4468_v17  ;;  %v11998_v3 = vld [vmem:[#allocation10 + $0x4] ss:$8 sps:$4 sm:$0xff]   ;;  %v13775_v16 = vld [vmem:[#allocation3 + $0x30] sm:$0x11]  ;;  %v6098_v22 = vld [vmem:[#allocation3 + $0x78] sm:$0x11] }
 0x2d0   :  { %4375 = vmatprep.subr.bf16.mxu0 %v11974_v20  ;;  %v10500_v23 = vcombine.low %v13740_v21, %v13750_v34  ;;  %v10501_v13 = vcombine.high %v13740_v21, %v13750_v34  ;;  %v13759_v25 = vsel %vm13106_vm8, %v13649_v49, %v4494_v45  ;;  %v10607_v49 = vcombine.high %v13653_v7, %v13721_v27  ;;  %v11993_v58 = vld [vmem:[#allocation10 + $0x120] ss:$8 sps:$4 sm:$0xff]   ;;  %v6981_v6 = vld [vmem:[#allocation3 + $0x38] sm:$0xee]  ;;  %v6983_v43 = vld [vmem:[#allocation3 + $0x70] sm:$0xee] }
 0x2d1   :  { %4726 = vmatpush1.bf16.msra.mxu1 %v11969_v15  ;;  %v13763_v2 = vsel %vm13106_vm8, %v4505_v57, %v4512_v32  ;;  %v13777_v37 = vld [vmem:[#allocation3 + $0xa8] sm:$0xff]  ;;  %v12001_v29 = vld [vmem:[#allocation10 + $0x114] ss:$8 sps:$4 sm:$0xff]   ;;  %v6093_v26 = vld [vmem:[#allocation3 + $0x80] sm:$0x11]  ;;  %v10776_v15 = vrot.slane %v6981_v6, 9 }
 0x2d2   :  { %4727 = vmatprep.subr.bf16.mxu1 %v11977_v44  ;;  %v10503_v53 = vcombine.high %v13759_v25, %v13763_v2  ;;  %v10502_v48 = vcombine.low %v13759_v25, %v13763_v2  ;;  %v11996_v28 = vld [vmem:[#allocation10] ss:$8 sps:$4 sm:$0xff]   ;;  %v11999_v20 = vld [vmem:[#allocation10 + $0x110] ss:$8 sps:$4 sm:$0xff]   ;;  %v12004_v36 = vld [vmem:[#allocation10 + $0xf4] ss:$8 sps:$4 sm:$0xff]  }
 0x2d3   :  { %4376 = vmatpush1.bf16.msra.mxu0 %v11972_v51  ;;  %v6999_v35 = vrot.slane %v13777_v37, 5  ;;  %v6091_v60 = vld [vmem:[#allocation3 + $0x98] sm:$0xff]  ;;  %v7006_v44 = vrot.slane %v13775_v16, 5  ;;  %v10778_v1 = vrot.slane %v6983_v43, 9  ;;  %v7013_v17 = vrot.slane %v6096_v41, 5 }
 0x2d4   :  { %4199 = vmatmul.mubr.bf16.gmra.mxu1 %v10362_v42  ;;  %4377 = vmatprep.subr.bf16.mxu0 %v11980_v10  ;;  %v7020_v51 = vrot.slane %v6098_v22, 5  ;;  %v12007_v45 = vld [vmem:[#allocation10 + $0x104] ss:$8 sps:$4 sm:$0xff]   ;;  %v12002_v32 = vld [vmem:[#allocation10 + $0xf0] ss:$8 sps:$4 sm:$0xff]  }
 0x2d5   :  { %4728 = vmatpush1.bf16.msra.mxu1 %v11975_v39  ;;  %4755 = vmatprep.mubr.bf16.mxu1 %v13704_v55  ;;  %v6982_v57 = vld [vmem:[#allocation3 + $0x20] sm:$0xee]  ;;  %v7005_v10 = vrot.slane %v6999_v35, 4  ;;  %v7019_v39 = vrot.slane %v7013_v17, 4  ;;  %v12167_v21 = vld [vmem:[#allocation12 + $0x450] ss:$8 sps:$4 sm:$0xff]  }
 0x2d6   :  { %4729 = vmatprep.subr.bf16.mxu1 %v11983_v63  ;;  %v12010_v42 = vld [vmem:[#allocation10 + $0xe4] ss:$8 sps:$4 sm:$0xff]   ;;  %v6099_v63 = vld [vmem:[#allocation3 + $0x50] sm:$0x11]  ;;  %v12185_v2 = vld [vmem:[#allocation12 + $0x420] ss:$8 sps:$4 sm:$0xff]  }
 0x2d7   :  { %4378 = vmatpush1.bf16.msra.mxu0 %v11978_v24  ;;  %v6984_v22 = vld [vmem:[#allocation3 + $0x60] sm:$0xee]  ;;  %v12352_v8 = vld [vmem:[#allocation12 + $0x654] ss:$8 sps:$4 sm:$0xff]  }
 0x2d8   :  { %4379 = vmatprep.subr.bf16.mxu0 %v11986_v4  ;;  %v7000_v4 = vsel %vm13248_vm14, %v10776_v15, %v6999_v35  ;;  %v7023_v35 = vrot.slane %v6099_v63, 5  ;;  %v12017_v63 = vld [vmem:[#allocation10 + $0x1e0] ss:$8 sps:$4 sm:$0xff]   ;;  %v12031_v24 = vld [vmem:[#allocation10 + $0x1c4] ss:$8 sps:$4 sm:$0xff]  }
 0x2d9   :  { %4730 = vmatpush1.bf16.msra.mxu1 %v11981_v11  ;;  %v7003_v11 = vrot.slane %v6091_v60, 5  ;;  %v12011_v60 = vld [vmem:[#allocation10 + $0x1f0] ss:$8 sps:$4 sm:$0xff]   ;;  %v12175_v34 = vld [vmem:[#allocation12 + $0x444] ss:$8 sps:$4 sm:$0xff]  }
 0x2da   :  { %4731 = vmatprep.subr.bf16.mxu1 %v11989_v47  ;;  %v7009_v47 = vrot.slane %v6093_v26, 5  ;;  %v12190_v25 = vld [vmem:[#allocation10 + $0x204] ss:$8 sps:$4 sm:$0xff]   ;;  %v12364_v27 = vld [vmem:[#allocation12 + $0x634] ss:$8 sps:$4 sm:$0xff]  }
 0x2db   :  { %4380 = vmatpush1.bf16.msra.mxu0 %v11984_v0  ;;  %v12005_v0 = vld [vmem:[#allocation10 + $0x100] ss:$8 sps:$4 sm:$0xff]   ;;  %v7008_v26 = vrot.slane %v7003_v11, 4 }
 0x2dc   :  { %4381 = vmatprep.subr.bf16.mxu0 %v11992_v50  ;;  %v6097_v50 = vld [vmem:[#allocation3 + $0x8] sm:$0xff] }
 0x2dd   :  { %4732 = vmatpush1.bf16.msra.mxu1 %v11987_v59  ;;  %v7007_v59 = vsel %vm13248_vm14, %v7005_v10, %v7006_v44  ;;  %v7017_v15 = vrot.slane %v6097_v50, 5  ;;  %v12022_v10 = vld [vmem:[#allocation10 + $0xc4] ss:$8 sps:$4 sm:$0xff]   ;;  %v12028_v50 = vld [vmem:[#allocation10 + $0xb4] ss:$8 sps:$4 sm:$0xff]  }
 0x2de   :  { %4733 = vmatprep.subr.bf16.mxu1 %v11995_v19  ;;  %v7014_v19 = vsel %vm13248_vm14, %v10778_v1, %v7013_v17  ;;  %v13789_v6 = vcombine.low %v7000_v4, %v7007_v59  ;;  %v13803_v1 = vsel %vm13248_vm14, %v7008_v26, %v7009_v47  ;;  %v12019_v17 = vld [vmem:[#allocation10 + $0x1e4] ss:$8 sps:$4 sm:$0xff]   ;;  %v12025_v47 = vld [vmem:[#allocation10 + $0x1d4] ss:$8 sps:$4 sm:$0xff]   ;;  %v12035_v26 = vld [vmem:[#allocation10 + $0x1b0] ss:$8 sps:$4 sm:$0xff]  }
 0x2df   :  { %4382 = vmatpush1.bf16.msra.mxu0 %v11990_v30  ;;  %v7021_v30 = vsel %vm13248_vm14, %v7019_v39, %v7020_v51 }
 0x2e0   :  { %4383 = vmatprep.subr.bf16.mxu0 %v11998_v3  ;;  %v10777_v3 = vrot.slane %v6982_v57, 9  ;;  %v13793_v41 = vcombine.high %v7014_v19, %v7021_v30  ;;  %v13795_v43 = vcombine.low %v7014_v19, %v7021_v30  ;;  %v7022_v57 = vrot.slane %v7017_v15, 4  ;;  %v12026_v19 = vld [vmem:[#allocation10 + $0xb0] ss:$8 sps:$4 sm:$0xff]   ;;  %v12034_v30 = vld [vmem:[#allocation10 + $0xa4] ss:$8 sps:$4 sm:$0xff]  }
 0x2e1   :  { %4734 = vmatpush1.bf16.msra.mxu1 %v11993_v58  ;;  %v12013_v58 = vld [vmem:[#allocation10 + $0x1f4] ss:$8 sps:$4 sm:$0xff]  }
 0x2e2   :  { %4735 = vmatprep.subr.bf16.mxu1 %v12001_v29  ;;  %v13791_v29 = vcombine.high %v7000_v4, %v7007_v59  ;;  %v13799_v44 = vsel %vm13248_vm14, %v10777_v3, %v7003_v11  ;;  %v12023_v59 = vld [vmem:[#allocation10 + $0x1d0] ss:$8 sps:$4 sm:$0xff]   ;;  %v12029_v3 = vld [vmem:[#allocation10 + $0x1c0] ss:$8 sps:$4 sm:$0xff]  }
 0x2e3   :  { %4384 = vmatpush1.bf16.msra.mxu0 %v11996_v28  ;;  %v12008_v28 = vld [vmem:[#allocation10 + $0xe0] ss:$8 sps:$4 sm:$0xff]   ;;  %v10816_v51 = vcombine.low %v13799_v44, %v13803_v1 }
 0x2e4   :  { %4385 = vmatprep.subr.bf16.mxu0 %v12004_v36  ;;  %v10779_v36 = vrot.slane %v6984_v22, 9  ;;  %v12037_v22 = vld [vmem:[#allocation10 + $0x1b4] ss:$8 sps:$4 sm:$0xff]  }
 0x2e5   :  { %4736 = vmatpush1.bf16.msra.mxu1 %v11999_v20  ;;  %v12016_v20 = vld [vmem:[#allocation10 + $0xd4] ss:$8 sps:$4 sm:$0xff]  }
 0x2e6   :  { %4737 = vmatprep.subr.bf16.mxu1 %v12007_v45  ;;  %v10817_v45 = vcombine.high %v13799_v44, %v13803_v1  ;;  %v13811_v39 = vsel %vm13248_vm14, %v10779_v36, %v7017_v15  ;;  %v12038_v36 = vld [vmem:[#allocation10 + $0x90] ss:$8 sps:$4 sm:$0xff]   ;;  %v12046_v15 = vld [vmem:[#allocation10 + $0x84] ss:$8 sps:$4 sm:$0xff]  }
 0x2e7   :  { %4386 = vmatpush2.bf16.msra.mxu0 %v12002_v32  ;;  %v12014_v32 = vld [vmem:[#allocation10 + $0xd0] ss:$8 sps:$4 sm:$0xff]  }
 0x2e8   :  { %4387 = vmatprep.subr.bf16.mxu0 %v12010_v42  ;;  %v13815_v42 = vsel %vm13248_vm14, %v7022_v57, %v7023_v35  ;;  %v12041_v35 = vld [vmem:[#allocation10 + $0x1a0] ss:$8 sps:$4 sm:$0xff]   ;;  %v12052_v57 = vld [vmem:[#allocation12 + $0x274] ss:$8 sps:$4 sm:$0xff]  }
 0x2e9   :  { %4738 = vmatpush1.bf16.msra.mxu1 %v12005_v0  ;;  %v10819_v4 = vcombine.high %v13811_v39, %v13815_v42  ;;  %v10818_v11 = vcombine.low %v13811_v39, %v13815_v42  ;;  %v12020_v0 = vld [vmem:[#allocation10 + $0xc0] ss:$8 sps:$4 sm:$0xff]  }
 0x2ea   :  { %4739 = vmatprep.subr.bf16.mxu1 %v12013_v58  ;;  %v12032_v58 = vld [vmem:[#allocation10 + $0xa0] ss:$8 sps:$4 sm:$0xff]  }
 0x2eb   :  { %4388 = vmatpush2.bf16.msra.mxu0 %v12008_v28  ;;  %v12040_v28 = vld [vmem:[#allocation10 + $0x94] ss:$8 sps:$4 sm:$0xff]  }
 0x2ec   :  { %4389 = vmatprep.subr.bf16.mxu0 %v12016_v20  ;;  %v12043_v20 = vld [vmem:[#allocation10 + $0x1a4] ss:$8 sps:$4 sm:$0xff]  }
 0x2ed   :  { %4740 = vmatpush2.bf16.msra.mxu1 %v12011_v60  ;;  %v12049_v60 = vld [vmem:[#allocation10 + $0x194] ss:$8 sps:$4 sm:$0xff]  }
 0x2ee   :  { %4741 = vmatprep.subr.bf16.mxu1 %v12019_v17  ;;  %v12044_v17 = vld [vmem:[#allocation10 + $0x80] ss:$8 sps:$4 sm:$0xff]  }
 0x2ef   :  { %4390 = vmatpush2.bf16.msra.mxu0 %v12014_v32  ;;  %v12047_v32 = vld [vmem:[#allocation10 + $0x190] ss:$8 sps:$4 sm:$0xff]  }
 0x2f0   :  { %4391 = vmatprep.subr.bf16.mxu0 %v12022_v10  ;;  %v12055_v10 = vld [vmem:[#allocation10 + $0x184] ss:$8 sps:$4 sm:$0xff]  }
 0x2f1   :  { %4742 = vmatpush2.bf16.msra.mxu1 %v12017_v63  ;;  %v12050_v63 = vld [vmem:[#allocation12 + $0x270] ss:$8 sps:$4 sm:$0xff]  }
 0x2f2   :  { %4743 = vmatprep.subr.bf16.mxu1 %v12025_v47  ;;  %v12058_v47 = vld [vmem:[#allocation12 + $0x264] ss:$8 sps:$4 sm:$0xff]  }
 0x2f3   :  { %4392 = vmatpush2.bf16.msra.mxu0 %v12020_v0  ;;  %v12053_v0 = vld [vmem:[#allocation10 + $0x180] ss:$8 sps:$4 sm:$0xff]  }
 0x2f4   :  { %4393 = vmatprep.subr.bf16.mxu0 %v12028_v50  ;;  %v12061_v50 = vld [vmem:[#allocation12 + $0x374] ss:$8 sps:$4 sm:$0xff]  }
 0x2f5   :  { %4744 = vmatpush2.bf16.msra.mxu1 %v12023_v59  ;;  %v12056_v59 = vld [vmem:[#allocation12 + $0x260] ss:$8 sps:$4 sm:$0xff]  }
 0x2f6   :  { %4745 = vmatprep.subr.bf16.mxu1 %v12031_v24  ;;  %v12064_v24 = vld [vmem:[#allocation12 + $0x254] ss:$8 sps:$4 sm:$0xff]  }
 0x2f7   :  { %4394 = vmatpush2.bf16.msra.mxu0 %v12026_v19  ;;  %v12059_v19 = vld [vmem:[#allocation12 + $0x370] ss:$8 sps:$4 sm:$0xff]  }
 0x2f8   :  { %4395 = vmatprep.subr.bf16.mxu0 %v12034_v30  ;;  %v12067_v30 = vld [vmem:[#allocation12 + $0x364] ss:$8 sps:$4 sm:$0xff]  }
 0x2f9   :  { %4746 = vmatpush2.bf16.msra.mxu1 %v12029_v3  ;;  %v12062_v3 = vld [vmem:[#allocation12 + $0x250] ss:$8 sps:$4 sm:$0xff]  }
 0x2fa   :  { %4747 = vmatprep.subr.bf16.mxu1 %v12037_v22  ;;  %v12070_v22 = vld [vmem:[#allocation12 + $0x244] ss:$8 sps:$4 sm:$0xff]  }
 0x2fb   :  { %4396 = vmatpush2.bf16.msra.mxu0 %v12032_v58  ;;  %v12068_v58 = vld [vmem:[#allocation12 + $0x240] ss:$8 sps:$4 sm:$0xff]  }
 0x2fc   :  { %4397 = vmatprep.subr.bf16.mxu0 %v12040_v28  ;;  %v12076_v28 = vld [vmem:[#allocation12 + $0x234] ss:$8 sps:$4 sm:$0xff]  }
 0x2fd   :  { %4748 = vmatpush2.bf16.msra.mxu1 %v12035_v26  ;;  %v12071_v26 = vld [vmem:[#allocation12 + $0x350] ss:$8 sps:$4 sm:$0xff]  }
 0x2fe   :  { %4749 = vmatprep.subr.bf16.mxu1 %v12043_v20  ;;  %v12079_v20 = vld [vmem:[#allocation12 + $0x344] ss:$8 sps:$4 sm:$0xff]  }
 0x2ff   :  { %4398 = vmatpush2.bf16.msra.mxu0 %v12038_v36  ;;  %v12074_v36 = vld [vmem:[#allocation12 + $0x230] ss:$8 sps:$4 sm:$0xff]  }
 0x300   :  { %4399 = vmatprep.subr.bf16.mxu0 %v12046_v15  ;;  %v12082_v15 = vld [vmem:[#allocation12 + $0x224] ss:$8 sps:$4 sm:$0xff]  }
 0x301   :  { %4750 = vmatpush2.bf16.msra.mxu1 %v12041_v35  ;;  %v12080_v35 = vld [vmem:[#allocation12 + $0x220] ss:$8 sps:$4 sm:$0xff]  }
 0x302   :  { %4751 = vmatprep.subr.bf16.mxu1 %v12049_v60  ;;  %v12088_v60 = vld [vmem:[#allocation12 + $0x214] ss:$8 sps:$4 sm:$0xff]  }
 0x303   :  { %4400 = vmatpush2.bf16.msra.mxu0 %v12044_v17  ;;  %v12083_v17 = vld [vmem:[#allocation12 + $0x330] ss:$8 sps:$4 sm:$0xff]  }
 0x304   :  { %5185 = vmatprep.subr.bf16.mxu0 %v12052_v57  ;;  %v12091_v57 = vld [vmem:[#allocation12 + $0x324] ss:$8 sps:$4 sm:$0xff]  }
 0x305   :  { %4752 = vmatpush2.bf16.msra.mxu1 %v12047_v32  ;;  %v12086_v32 = vld [vmem:[#allocation12 + $0x210] ss:$8 sps:$4 sm:$0xff]  }
 0x306   :  { %4402 = vmatmul.mubr.bf16.vlgmr.msra.gmra.mxu0 %v13686_v46  ;;  %4753 = vmatprep.subr.bf16.mxu1 %v12055_v10  ;;  %v12065_v46 = vld [vmem:[#allocation12 + $0x360] ss:$8 sps:$4 sm:$0xff]   ;;  %v12094_v10 = vld [vmem:[#allocation12 + $0x204] ss:$8 sps:$4 sm:$0xff]  }
 0x307   :  { %4411 = vmatprep.mubr.bf16.mxu0 %v13700_v38  ;;  %5186 = vmatpush1.bf16.msra.mxu0 %v12050_v63  ;;  %v12073_v38 = vld [vmem:[#allocation12 + $0x354] ss:$8 sps:$4 sm:$0xff]   ;;  %v12089_v63 = vld [vmem:[#allocation12 + $0x320] ss:$8 sps:$4 sm:$0xff]  }
 0x308   :  { %5187 = vmatprep.subr.bf16.mxu0 %v12058_v47  ;;  %v12097_v47 = vld [vmem:[#allocation12 + $0x314] ss:$8 sps:$4 sm:$0xff]  }
 0x309   :  { %4754 = vmatpush2.bf16.msra.mxu1 %v12053_v0  ;;  %v12100_v0 = vld [vmem:[#allocation12 + $0x2f4] ss:$8 sps:$4 sm:$0xff]  }
 0x30a   :  { %5238 = vmatprep.subr.bf16.mxu1 %v12061_v50  ;;  %v12095_v50 = vld [vmem:[#allocation12 + $0x310] ss:$8 sps:$4 sm:$0xff]  }
 0x30b   :  { %5188 = vmatpush1.bf16.msra.mxu0 %v12056_v59  ;;  %v12103_v59 = vld [vmem:[#allocation12 + $0x304] ss:$8 sps:$4 sm:$0xff]  }
 0x30c   :  { %4756 = vmatmul.mubr.bf16.vlgmr.msra.gmra.mxu1 %v13702_v62  ;;  %5189 = vmatprep.subr.bf16.mxu0 %v12064_v24  ;;  %v12098_v24 = vld [vmem:[#allocation12 + $0x2f0] ss:$8 sps:$4 sm:$0xff]  }
 0x30d   :  { %4765 = vmatprep.mubr.bf16.mxu1 %v13718_v40  ;;  %5239 = vmatpush1.bf16.msra.mxu1 %v12059_v19  ;;  %v12106_v19 = vld [vmem:[#allocation12 + $0x2e4] ss:$8 sps:$4 sm:$0xff]  }
 0x30e   :  { %4412 = vmatmul.mubr.bf16.gmra.mxu0 %v13727_v12  ;;  %5240 = vmatprep.subr.bf16.mxu1 %v12067_v30  ;;  %v12077_v12 = vld [vmem:[#allocation12 + $0x340] ss:$8 sps:$4 sm:$0xff]  }
 0x30f   :  { %5190 = vmatpush1.bf16.msra.mxu0 %v12062_v3  ;;  %5217 = vmatprep.mubr.bf16.mxu0 %v13704_v55  ;;  %v12085_v55 = vld [vmem:[#allocation12 + $0x334] ss:$8 sps:$4 sm:$0xff]   ;;  %v12101_v30 = vld [vmem:[#allocation12 + $0x300] ss:$8 sps:$4 sm:$0xff]  }
 0x310   :  { %5191 = vmatprep.subr.bf16.mxu0 %v12070_v22  ;;  %v12109_v3 = vld [vmem:[#allocation12 + $0x3f4] ss:$8 sps:$4 sm:$0xff]   ;;  %v12104_v22 = vld [vmem:[#allocation12 + $0x2e0] ss:$8 sps:$4 sm:$0xff]  }
 0x311   :  { %5241 = vmatpush1.bf16.msra.mxu1 %v12065_v46  ;;  %v12112_v46 = vld [vmem:[#allocation12 + $0x2d4] ss:$8 sps:$4 sm:$0xff]  }
 0x312   :  { %5242 = vmatprep.subr.bf16.mxu1 %v12073_v38  ;;  %v12107_v38 = vld [vmem:[#allocation12 + $0x3f0] ss:$8 sps:$4 sm:$0xff]  }
 0x313   :  { %5192 = vmatpush1.bf16.msra.mxu0 %v12068_v58  ;;  %v12115_v58 = vld [vmem:[#allocation12 + $0x3e4] ss:$8 sps:$4 sm:$0xff]  }
 0x314   :  { %4766 = vmatmul.mubr.bf16.gmra.mxu1 %v13729_v18  ;;  %5193 = vmatprep.subr.bf16.mxu0 %v12076_v28  ;;  %v12110_v28 = vld [vmem:[#allocation12 + $0x2d0] ss:$8 sps:$4 sm:$0xff]  }
 0x315   :  { %5243 = vmatpush1.bf16.msra.mxu1 %v12071_v26  ;;  %5270 = vmatprep.mubr.bf16.mxu1 %v10501_v13  ;;  %v12092_v13 = vld [vmem:[#allocation12 + $0x200] ss:$8 sps:$4 sm:$0xff]   ;;  %v12118_v26 = vld [vmem:[#allocation12 + $0x2c4] ss:$8 sps:$4 sm:$0xff]  }
 0x316   :  { %5244 = vmatprep.subr.bf16.mxu1 %v12079_v20  ;;  %v12113_v20 = vld [vmem:[#allocation12 + $0x3e0] ss:$8 sps:$4 sm:$0xff]  }
 0x317   :  { %5194 = vmatpush1.bf16.msra.mxu0 %v12074_v36  ;;  %v12121_v36 = vld [vmem:[#allocation12 + $0x3d4] ss:$8 sps:$4 sm:$0xff]  }
 0x318   :  { %5195 = vmatprep.subr.bf16.mxu0 %v12082_v15  ;;  %v12116_v15 = vld [vmem:[#allocation12 + $0x2c0] ss:$8 sps:$4 sm:$0xff]  }
 0x319   :  { %5245 = vmatpush1.bf16.msra.mxu1 %v12077_v12  ;;  %v12124_v12 = vld [vmem:[#allocation12 + $0x2b4] ss:$8 sps:$4 sm:$0xff]  }
 0x31a   :  { %5246 = vmatprep.subr.bf16.mxu1 %v12085_v55  ;;  %v12119_v55 = vld [vmem:[#allocation12 + $0x3d0] ss:$8 sps:$4 sm:$0xff]  }
 0x31b   :  { %5196 = vmatpush1.bf16.msra.mxu0 %v12080_v35  ;;  %v12127_v35 = vld [vmem:[#allocation12 + $0x3c4] ss:$8 sps:$4 sm:$0xff]  }
 0x31c   :  { %5197 = vmatprep.subr.bf16.mxu0 %v12088_v60  ;;  %v12122_v60 = vld [vmem:[#allocation12 + $0x2b0] ss:$8 sps:$4 sm:$0xff]  }
 0x31d   :  { %5247 = vmatpush1.bf16.msra.mxu1 %v12083_v17  ;;  %v12130_v17 = vld [vmem:[#allocation12 + $0x2a4] ss:$8 sps:$4 sm:$0xff]  }
 0x31e   :  { %5248 = vmatprep.subr.bf16.mxu1 %v12091_v57  ;;  %v12125_v57 = vld [vmem:[#allocation12 + $0x3c0] ss:$8 sps:$4 sm:$0xff]  }
 0x31f   :  { %5198 = vmatpush1.bf16.msra.mxu0 %v12086_v32  ;;  %v12133_v32 = vld [vmem:[#allocation12 + $0x3b4] ss:$8 sps:$4 sm:$0xff]  }
 0x320   :  { %5199 = vmatprep.subr.bf16.mxu0 %v12094_v10  ;;  %v12128_v10 = vld [vmem:[#allocation12 + $0x2a0] ss:$8 sps:$4 sm:$0xff]  }
 0x321   :  { %5249 = vmatpush1.bf16.msra.mxu1 %v12089_v63  ;;  %v12136_v63 = vld [vmem:[#allocation12 + $0x294] ss:$8 sps:$4 sm:$0xff]  }
 0x322   :  { %5250 = vmatprep.subr.bf16.mxu1 %v12097_v47  ;;  %v12131_v47 = vld [vmem:[#allocation12 + $0x3b0] ss:$8 sps:$4 sm:$0xff]  }
 0x323   :  { %5200 = vmatpush1.bf16.msra.mxu0 %v12092_v13  ;;  %v12139_v13 = vld [vmem:[#allocation12 + $0x3a4] ss:$8 sps:$4 sm:$0xff]  }
 0x324   :  { %5201 = vmatprep.subr.bf16.mxu0 %v12100_v0  ;;  %v12134_v0 = vld [vmem:[#allocation12 + $0x290] ss:$8 sps:$4 sm:$0xff]  }
 0x325   :  { %5251 = vmatpush1.bf16.msra.mxu1 %v12095_v50  ;;  %v12142_v50 = vld [vmem:[#allocation12 + $0x284] ss:$8 sps:$4 sm:$0xff]  }
 0x326   :  { %5252 = vmatprep.subr.bf16.mxu1 %v12103_v59  ;;  %v12137_v59 = vld [vmem:[#allocation12 + $0x3a0] ss:$8 sps:$4 sm:$0xff]  }
 0x327   :  { %5202 = vmatpush2.bf16.msra.mxu0 %v12098_v24  ;;  %v12145_v24 = vld [vmem:[#allocation12 + $0x394] ss:$8 sps:$4 sm:$0xff]  }
 0x328   :  { %5203 = vmatprep.subr.bf16.mxu0 %v12106_v19  ;;  %v12140_v19 = vld [vmem:[#allocation12 + $0x280] ss:$8 sps:$4 sm:$0xff]  }
 0x329   :  { %5253 = vmatpush1.bf16.msra.mxu1 %v12101_v30  ;;  %v12148_v30 = vld [vmem:[#allocation10 + $0x274] ss:$8 sps:$4 sm:$0xff]  }
 0x32a   :  { %5254 = vmatprep.subr.bf16.mxu1 %v12109_v3  ;;  %v12143_v3 = vld [vmem:[#allocation12 + $0x390] ss:$8 sps:$4 sm:$0xff]  }
 0x32b   :  { %5204 = vmatpush2.bf16.msra.mxu0 %v12104_v22  ;;  %v12151_v22 = vld [vmem:[#allocation12 + $0x384] ss:$8 sps:$4 sm:$0xff]  }
 0x32c   :  { %5205 = vmatprep.subr.bf16.mxu0 %v12112_v46  ;;  %v12146_v46 = vld [vmem:[#allocation10 + $0x270] ss:$8 sps:$4 sm:$0xff]  }
 0x32d   :  { %5255 = vmatpush2.bf16.msra.mxu1 %v12107_v38  ;;  %v12154_v38 = vld [vmem:[#allocation10 + $0x264] ss:$8 sps:$4 sm:$0xff]  }
 0x32e   :  { %5256 = vmatprep.subr.bf16.mxu1 %v12115_v58  ;;  %v12149_v58 = vld [vmem:[#allocation12 + $0x380] ss:$8 sps:$4 sm:$0xff]  }
 0x32f   :  { %5206 = vmatpush2.bf16.msra.mxu0 %v12110_v28  ;;  %v12157_v28 = vld [vmem:[#allocation12 + $0x474] ss:$8 sps:$4 sm:$0xff]  }
 0x330   :  { %5207 = vmatprep.subr.bf16.mxu0 %v12118_v26  ;;  %v12152_v26 = vld [vmem:[#allocation10 + $0x260] ss:$8 sps:$4 sm:$0xff]  }
 0x331   :  { %5257 = vmatpush2.bf16.msra.mxu1 %v12113_v20  ;;  %v12160_v20 = vld [vmem:[#allocation10 + $0x254] ss:$8 sps:$4 sm:$0xff]  }
 0x332   :  { %5258 = vmatprep.subr.bf16.mxu1 %v12121_v36  ;;  %v12155_v36 = vld [vmem:[#allocation12 + $0x470] ss:$8 sps:$4 sm:$0xff]  }
 0x333   :  { %5208 = vmatpush2.bf16.msra.mxu0 %v12116_v15  ;;  %v12163_v15 = vld [vmem:[#allocation12 + $0x464] ss:$8 sps:$4 sm:$0xff]  }
 0x334   :  { %5209 = vmatprep.subr.bf16.mxu0 %v12124_v12  ;;  %v12158_v12 = vld [vmem:[#allocation10 + $0x250] ss:$8 sps:$4 sm:$0xff]  }
 0x335   :  { %5259 = vmatpush2.bf16.msra.mxu1 %v12119_v55  ;;  %v12169_v55 = vld [vmem:[#allocation12 + $0x454] ss:$8 sps:$4 sm:$0xff]  }
 0x336   :  { %5260 = vmatprep.subr.bf16.mxu1 %v12127_v35  ;;  %v12164_v35 = vld [vmem:[#allocation10 + $0x240] ss:$8 sps:$4 sm:$0xff]  }
 0x337   :  { %5210 = vmatpush2.bf16.msra.mxu0 %v12122_v60  ;;  %v12172_v60 = vld [vmem:[#allocation10 + $0x234] ss:$8 sps:$4 sm:$0xff]  }
 0x338   :  { %5211 = vmatprep.subr.bf16.mxu0 %v12130_v17  ;;  %v12181_v17 = vld [vmem:[#allocation12 + $0x434] ss:$8 sps:$4 sm:$0xff]  }
 0x339   :  { %5261 = vmatpush2.bf16.msra.mxu1 %v12125_v57  ;;  %v12176_v57 = vld [vmem:[#allocation10 + $0x220] ss:$8 sps:$4 sm:$0xff]  }
 0x33a   :  { %5262 = vmatprep.subr.bf16.mxu1 %v12133_v32  ;;  %v12184_v32 = vld [vmem:[#allocation10 + $0x214] ss:$8 sps:$4 sm:$0xff]  }
 0x33b   :  { %5212 = vmatpush2.bf16.msra.mxu0 %v12128_v10  ;;  %v12179_v10 = vld [vmem:[#allocation12 + $0x430] ss:$8 sps:$4 sm:$0xff]  }
 0x33c   :  { %5213 = vmatprep.subr.bf16.mxu0 %v12136_v63  ;;  %v12187_v63 = vld [vmem:[#allocation12 + $0x424] ss:$8 sps:$4 sm:$0xff]  }
 0x33d   :  { %5263 = vmatpush2.bf16.msra.mxu1 %v12131_v47  ;;  %v12182_v47 = vld [vmem:[#allocation10 + $0x210] ss:$8 sps:$4 sm:$0xff]  }
 0x33e   :  { %5264 = vmatprep.subr.bf16.mxu1 %v12139_v13  ;;  %v12196_v13 = vld [vmem:[#allocation10 + $0x2f4] ss:$8 sps:$4 sm:$0xff]  }
 0x33f   :  { %5214 = vmatpush2.bf16.msra.mxu0 %v12134_v0  ;;  %v12191_v0 = vld [vmem:[#allocation12 + $0x410] ss:$8 sps:$4 sm:$0xff]  }
 0x340   :  { %5215 = vmatprep.subr.bf16.mxu0 %v12142_v50  ;;  %v12199_v50 = vld [vmem:[#allocation12 + $0x404] ss:$8 sps:$4 sm:$0xff]  }
 0x341   :  { %5265 = vmatpush2.bf16.msra.mxu1 %v12137_v59  ;;  %v12194_v59 = vld [vmem:[#allocation10 + $0x2f0] ss:$8 sps:$4 sm:$0xff]  }
 0x342   :  { %5266 = vmatprep.subr.bf16.mxu1 %v12145_v24  ;;  %v12202_v24 = vld [vmem:[#allocation10 + $0x2e4] ss:$8 sps:$4 sm:$0xff]  }
 0x343   :  { %5216 = vmatpush2.bf16.msra.mxu0 %v12140_v19  ;;  %v12197_v19 = vld [vmem:[#allocation12 + $0x400] ss:$8 sps:$4 sm:$0xff]  }
 0x344   :  { %5510 = vmatprep.subr.bf16.mxu0 %v12148_v30  ;;  %v12205_v30 = vld [vmem:[#allocation12 + $0x4f4] ss:$8 sps:$4 sm:$0xff]  }
 0x345   :  { %5267 = vmatpush2.bf16.msra.mxu1 %v12143_v3  ;;  %v12200_v3 = vld [vmem:[#allocation10 + $0x2e0] ss:$8 sps:$4 sm:$0xff]  }
 0x346   :  { %5218 = vmatmul.mubr.bf16.vlgmr.msra.gmra.mxu0 %v13702_v62  ;;  %5268 = vmatprep.subr.bf16.mxu1 %v12151_v22  ;;  %v12166_v62 = vld [vmem:[#allocation10 + $0x244] ss:$8 sps:$4 sm:$0xff]   ;;  %v12208_v22 = vld [vmem:[#allocation10 + $0x2d4] ss:$8 sps:$4 sm:$0xff]  }
 0x347   :  { %5227 = vmatprep.mubr.bf16.mxu0 %v13718_v40  ;;  %5511 = vmatpush1.bf16.msra.mxu0 %v12146_v46  ;;  %v12161_v40 = vld [vmem:[#allocation12 + $0x460] ss:$8 sps:$4 sm:$0xff]   ;;  %v12203_v46 = vld [vmem:[#allocation12 + $0x4f0] ss:$8 sps:$4 sm:$0xff]  }
 0x348   :  { %5512 = vmatprep.subr.bf16.mxu0 %v12154_v38  ;;  %v12211_v38 = vld [vmem:[#allocation12 + $0x4e4] ss:$8 sps:$4 sm:$0xff]  }
 0x349   :  { %5269 = vmatpush2.bf16.msra.mxu1 %v12149_v58  ;;  %v12206_v58 = vld [vmem:[#allocation10 + $0x2d0] ss:$8 sps:$4 sm:$0xff]  }
 0x34a   :  { %5974 = vmatprep.subr.bf16.mxu1 %v12157_v28  ;;  %v12214_v28 = vld [vmem:[#allocation10 + $0x2c4] ss:$8 sps:$4 sm:$0xff]  }
 0x34b   :  { %5513 = vmatpush1.bf16.msra.mxu0 %v12152_v26  ;;  %v12209_v26 = vld [vmem:[#allocation12 + $0x4e0] ss:$8 sps:$4 sm:$0xff]  }
 0x34c   :  { %5271 = vmatmul.mubr.bf16.vlgmr.msra.gmra.mxu1 %v10500_v23  ;;  %5514 = vmatprep.subr.bf16.mxu0 %v12160_v20  ;;  %v12170_v23 = vld [vmem:[#allocation10 + $0x230] ss:$8 sps:$4 sm:$0xff]   ;;  %v12217_v20 = vld [vmem:[#allocation12 + $0x4d4] ss:$8 sps:$4 sm:$0xff]  }
 0x34d   :  { %5280 = vmatprep.mubr.bf16.mxu1 %v10503_v53  ;;  %5975 = vmatpush1.bf16.msra.mxu1 %v12155_v36  ;;  %v12173_v53 = vld [vmem:[#allocation12 + $0x440] ss:$8 sps:$4 sm:$0xff]  }
 0x34e   :  { %5228 = vmatmul.mubr.bf16.gmra.mxu0 %v13729_v18  ;;  %5976 = vmatprep.subr.bf16.mxu1 %v12163_v15  ;;  %v12178_v18 = vld [vmem:[#allocation10 + $0x224] ss:$8 sps:$4 sm:$0xff]   ;;  %v12212_v36 = vld [vmem:[#allocation10 + $0x2c0] ss:$8 sps:$4 sm:$0xff]   ;;  %v12220_v15 = vld [vmem:[#allocation10 + $0x2b4] ss:$8 sps:$4 sm:$0xff]  }
 0x34f   :  { %5515 = vmatpush1.bf16.msra.mxu0 %v12158_v12  ;;  %5542 = vmatprep.mubr.bf16.mxu0 %v13636_v52  ;;  %v12215_v12 = vld [vmem:[#allocation12 + $0x4d0] ss:$8 sps:$4 sm:$0xff]  }
 0x350   :  { %5516 = vmatprep.subr.bf16.mxu0 %v12166_v62  ;;  %v12223_v62 = vld [vmem:[#allocation12 + $0x4c4] ss:$8 sps:$4 sm:$0xff]  }
 0x351   :  { %5977 = vmatpush1.bf16.msra.mxu1 %v12161_v40  ;;  %v12218_v40 = vld [vmem:[#allocation10 + $0x2b0] ss:$8 sps:$4 sm:$0xff]  }
 0x352   :  { %5978 = vmatprep.subr.bf16.mxu1 %v12169_v55  ;;  %v12226_v55 = vld [vmem:[#allocation10 + $0x2a4] ss:$8 sps:$4 sm:$0xff]  }
 0x353   :  { %5517 = vmatpush1.bf16.msra.mxu0 %v12164_v35  ;;  %v12221_v35 = vld [vmem:[#allocation12 + $0x4c0] ss:$8 sps:$4 sm:$0xff]  }
 0x354   :  { %5281 = vmatmul.mubr.bf16.gmra.mxu1 %v10502_v48  ;;  %5518 = vmatprep.subr.bf16.mxu0 %v12172_v60  ;;  %v12193_v48 = vld [vmem:[#allocation12 + $0x414] ss:$8 sps:$4 sm:$0xff]  }
 0x355   :  { %5979 = vmatpush1.bf16.msra.mxu1 %v12167_v21  ;;  %6006 = vmatprep.mubr.bf16.mxu1 %v13636_v52  ;;  %v12188_v52 = vld [vmem:[#allocation10 + $0x200] ss:$8 sps:$4 sm:$0xff]   ;;  %v12229_v60 = vld [vmem:[#allocation12 + $0x4b4] ss:$8 sps:$4 sm:$0xff]  }
 0x356   :  { %5980 = vmatprep.subr.bf16.mxu1 %v12175_v34  ;;  %v12224_v21 = vld [vmem:[#allocation10 + $0x2a0] ss:$8 sps:$4 sm:$0xff]   ;;  %v12232_v34 = vld [vmem:[#allocation10 + $0x294] ss:$8 sps:$4 sm:$0xff]  }
 0x357   :  { %5519 = vmatpush1.bf16.msra.mxu0 %v12170_v23  ;;  %v12227_v23 = vld [vmem:[#allocation12 + $0x4b0] ss:$8 sps:$4 sm:$0xff]  }
 0x358   :  { %5520 = vmatprep.subr.bf16.mxu0 %v12178_v18  ;;  %v12235_v18 = vld [vmem:[#allocation12 + $0x4a4] ss:$8 sps:$4 sm:$0xff]  }
 0x359   :  { %5981 = vmatpush1.bf16.msra.mxu1 %v12173_v53  ;;  %v12230_v53 = vld [vmem:[#allocation10 + $0x290] ss:$8 sps:$4 sm:$0xff]  }
 0x35a   :  { %5982 = vmatprep.subr.bf16.mxu1 %v12181_v17  ;;  %v12238_v17 = vld [vmem:[#allocation10 + $0x284] ss:$8 sps:$4 sm:$0xff]  }
 0x35b   :  { %5521 = vmatpush1.bf16.msra.mxu0 %v12176_v57  ;;  %v12233_v57 = vld [vmem:[#allocation12 + $0x4a0] ss:$8 sps:$4 sm:$0xff]  }
 0x35c   :  { %5522 = vmatprep.subr.bf16.mxu0 %v12184_v32  ;;  %v6088_v32 = vld [vmem:[#allocation3 + $0x38] sm:$0xff] }
 0x35d   :  { %5983 = vmatpush1.bf16.msra.mxu1 %v12179_v10  ;;  %v12241_v10 = vld [vmem:[#allocation12 + $0x494] ss:$8 sps:$4 sm:$0xff]  }
 0x35e   :  { %5984 = vmatprep.subr.bf16.mxu1 %v12187_v63  ;;  %v12236_v63 = vld [vmem:[#allocation10 + $0x280] ss:$8 sps:$4 sm:$0xff]  }
 0x35f   :  { %5523 = vmatpush1.bf16.msra.mxu0 %v12182_v47  ;;  %v12244_v47 = vld [vmem:[#allocation12 + $0x574] ss:$8 sps:$4 sm:$0xff]  }
 0x360   :  { %5524 = vmatprep.subr.bf16.mxu0 %v12190_v25  ;;  %v6101_v25 = vshrl.u32 %v6088_v32, 16 }
 0x361   :  { %5985 = vmatpush1.bf16.msra.mxu1 %v12185_v2  ;;  %v6104_v2 = vshll.u32 %v6088_v32, 16  ;;  %v12260_v32 = vld [vmem:[#allocation12 + $0x540] ss:$8 sps:$4 sm:$0xff]  }
 0x362   :  { %5986 = vmatprep.subr.bf16.mxu1 %v12193_v48  ;;  %v6110_v48 = vshll.u32 %v13777_v37, 16 }
 0x363   :  { %5525 = vmatpush1.bf16.msra.mxu0 %v12188_v52  ;;  %v6128_v52 = vshrl.u32 %v13777_v37, 16  ;;  %v12248_v37 = vld [vmem:[#allocation12 + $0x560] ss:$8 sps:$4 sm:$0xff]  }
 0x364   :  { %5526 = vmatprep.subr.bf16.mxu0 %v12196_v13  ;;  %v12239_v13 = vld [vmem:[#allocation12 + $0x490] ss:$8 sps:$4 sm:$0xff]  }
 0x365   :  { %5987 = vmatpush1.bf16.msra.mxu1 %v12191_v0  ;;  %v12247_v0 = vld [vmem:[#allocation12 + $0x484] ss:$8 sps:$4 sm:$0xff]  }
 0x366   :  { %5988 = vmatprep.subr.bf16.mxu1 %v12199_v50  ;;  %v12242_v50 = vld [vmem:[#allocation12 + $0x570] ss:$8 sps:$4 sm:$0xff]  }
 0x367   :  { %5527 = vmatpush2.bf16.msra.mxu0 %v12194_v59  ;;  %v12250_v59 = vld [vmem:[#allocation12 + $0x564] ss:$8 sps:$4 sm:$0xff]  }
 0x368   :  { %5528 = vmatprep.subr.bf16.mxu0 %v12202_v24  ;;  %v6103_v24 = vrot.slane %v6101_v25, 4  ;;  %v12268_v25 = vld [vmem:[#allocation12 + $0x534] ss:$8 sps:$4 sm:$0xff]  }
 0x369   :  { %5989 = vmatpush1.bf16.msra.mxu1 %v12197_v19  ;;  %v6106_v19 = vrot.slane %v6104_v2, 5 }
 0x36a   :  { %5990 = vmatprep.subr.bf16.mxu1 %v12205_v30  ;;  %v6112_v30 = vrot.slane %v6110_v48, 5  ;;  %v12263_v48 = vld [vmem:[#allocation10 + $0x350] ss:$8 sps:$4 sm:$0xff]  }
 0x36b   :  { %5529 = vmatpush2.bf16.msra.mxu0 %v12200_v3  ;;  %v6130_v3 = vrot.slane %v6128_v52, 4 }
 0x36c   :  { %5530 = vmatprep.subr.bf16.mxu0 %v12208_v22  ;;  %v12245_v22 = vld [vmem:[#allocation12 + $0x480] ss:$8 sps:$4 sm:$0xff]  }
 0x36d   :  { %5991 = vmatpush2.bf16.msra.mxu1 %v12203_v46 }
 0x36e   :  { %5992 = vmatprep.subr.bf16.mxu1 %v12211_v38  ;;  %v12253_v38 = vld [vmem:[#allocation10 + $0x374] ss:$8 sps:$4 sm:$0xff]  }
 0x36f   :  { %5531 = vmatpush2.bf16.msra.mxu0 %v12206_v58 }
 0x370   :  { %5532 = vmatprep.subr.bf16.mxu0 %v12214_v28  ;;  %v12256_v28 = vld [vmem:[#allocation12 + $0x554] ss:$8 sps:$4 sm:$0xff]  }
 0x371   :  { %5993 = vmatpush2.bf16.msra.mxu1 %v12209_v26  ;;  %v6107_v26 = vor.u32 %v6106_v19, %v6103_v24  ;;  %v12274_v19 = vld [vmem:[#allocation12 + $0x524] ss:$8 sps:$4 sm:$0xff]  }
 0x372   :  { %5994 = vmatprep.subr.bf16.mxu1 %v12217_v20  ;;  %v6131_v20 = vor.u32 %v6130_v3, %v6112_v30  ;;  %v12269_v3 = vld [vmem:[#allocation10 + $0x340] ss:$8 sps:$4 sm:$0xff]  }
 0x373   :  { %5533 = vmatpush2.bf16.msra.mxu0 %v12212_v36  ;;  %v6134_v36 = vshll.u32 %v13775_v16, 16  ;;  %v12257_v16 = vld [vmem:[#allocation10 + $0x360] ss:$8 sps:$4 sm:$0xff]  }
 0x374   :  { %5534 = vmatprep.subr.bf16.mxu0 %v12220_v15  ;;  %v12251_v15 = vld [vmem:[#allocation10 + $0x370] ss:$8 sps:$4 sm:$0xff]  }
 0x375   :  { %5995 = vmatpush2.bf16.msra.mxu1 %v12215_v12 }
 0x376   :  { %5996 = vmatprep.subr.bf16.mxu1 %v12223_v62  ;;  %v12259_v62 = vld [vmem:[#allocation10 + $0x364] ss:$8 sps:$4 sm:$0xff]  }
 0x377   :  { %5535 = vmatpush2.bf16.msra.mxu0 %v12218_v40  ;;  %v12254_v40 = vld [vmem:[#allocation12 + $0x550] ss:$8 sps:$4 sm:$0xff]  }
 0x378   :  { %5536 = vmatprep.subr.bf16.mxu0 %v12226_v55 }
 0x379   :  { %5997 = vmatpush2.bf16.msra.mxu1 %v12221_v35 }
 0x37a   :  { %5998 = vmatprep.subr.bf16.mxu1 %v12229_v60  ;;  %v12262_v60 = vld [vmem:[#allocation12 + $0x544] ss:$8 sps:$4 sm:$0xff]  }
 0x37b   :  { %5537 = vmatpush2.bf16.msra.mxu0 %v12224_v21  ;;  %v6108_v21 = vrot.slane %v6107_v26, 4 }
 0x37c   :  { %5538 = vmatprep.subr.bf16.mxu0 %v12232_v34  ;;  %v6132_v34 = vrot.slane %v6131_v20, 4  ;;  %v12275_v20 = vld [vmem:[#allocation10 + $0x330] ss:$8 sps:$4 sm:$0xff]  }
 0x37d   :  { %5999 = vmatpush2.bf16.msra.mxu1 %v12227_v23  ;;  %v6136_v23 = vrot.slane %v6134_v36, 5 }
 0x37e   :  { %6000 = vmatprep.subr.bf16.mxu1 %v12235_v18 }
 0x37f   :  { %5539 = vmatpush2.bf16.msra.mxu0 %v12230_v53 }
 0x380   :  { %5540 = vmatprep.subr.bf16.mxu0 %v12238_v17 }
 0x381   :  { %6001 = vmatpush2.bf16.msra.mxu1 %v12233_v57  ;;  %v12265_v57 = vld [vmem:[#allocation10 + $0x354] ss:$8 sps:$4 sm:$0xff]  }
 0x382   :  { %6002 = vmatprep.subr.bf16.mxu1 %v12241_v10 }
 0x383   :  { %5541 = vmatpush2.bf16.msra.mxu0 %v12236_v63  ;;  %v12617_v63 = vld [vmem:[#allocation13 + $0xf8] sm:$0xff]  }
 0x384   :  { %6027 = vmatprep.subr.bf16.mxu0 %v12244_v47  ;;  %v13866_v47 = vsel %vm13216_vm11, %v6132_v34, %v6136_v23  ;;  %v12292_v34 = vld [vmem:[#allocation12 + $0x5f4] ss:$8 sps:$4 sm:$0xff]   ;;  %v12287_v23 = vld [vmem:[#allocation10 + $0x310] ss:$8 sps:$4 sm:$0xff]  }
 0x385   :  { %6003 = vmatpush2.bf16.msra.mxu1 %v12239_v13 }
 0x386   :  { %5543 = vmatmul.mubr.bf16.vlgmr.msra.gmra.mxu0 %v13626_v54  ;;  %v4137_v46 = vpop.f32.mrf.mxu0  ;;  %6004 = vmatprep.subr.bf16.mxu1 %v12247_v0 }
 0x387   :  { %5552 = vmatprep.mubr.bf16.mxu0 %v13638_v14  ;;  %6028 = vmatpush1.bf16.msra.mxu0 %v12242_v50 }
 0x388   :  { %v4139_v58 = vpop.f32.mrf.mxu0  ;;  %6029 = vmatprep.subr.bf16.mxu0 %v12250_v59  ;;  %v12266_v59 = vld [vmem:[#allocation12 + $0x530] ss:$8 sps:$4 sm:$0xff]  }
 0x389   :  { %6005 = vmatpush2.bf16.msra.mxu1 %v12245_v22 }
 0x38a   :  { %v4141_v12 = vpop.f32.mrf.mxu0  ;;  %6405 = vmatprep.subr.bf16.mxu1 %v12253_v38  ;;  %v12277_v38 = vld [vmem:[#allocation10 + $0x334] ss:$8 sps:$4 sm:$0xff]  }
 0x38b   :  { %6030 = vmatpush1.bf16.msra.mxu0 %v12248_v37 }
 0x38c   :  { %6007 = vmatmul.mubr.bf16.vlgmr.msra.gmra.mxu1 %v13626_v54  ;;  %v4143_v55 = vpop.f32.mrf.mxu0  ;;  %v4190_v35 = vpop.f32.mrf.mxu1  ;;  %6031 = vmatprep.subr.bf16.mxu0 %v12256_v28 }
 0x38d   :  { %v13851_v18 = vadd.f32 %v4190_v35, %v4137_v46  ;;  %6016 = vmatprep.mubr.bf16.mxu1 %v13638_v14  ;;  %6406 = vmatpush1.bf16.msra.mxu1 %v12251_v15  ;;  %v13862_v14 = vsel %vm13216_vm11, %v6108_v21, %v6112_v30  ;;  %v12281_v35 = vld [vmem:[#allocation10 + $0x320] ss:$8 sps:$4 sm:$0xff]  }
 0x38e   :  { %5553 = vmatmul.mubr.bf16.gmra.mxu0 %v13628_v61  ;;  %v4147_v53 = vpop.f32.mrf.mxu0  ;;  %v4192_v17 = vpop.f32.mrf.mxu1  ;;  %6407 = vmatprep.subr.bf16.mxu1 %v12259_v62  ;;  %v13874_v50 = vcombine.high %v13862_v14, %v13866_v47  ;;  %v12284_v21 = vld [vmem:[#allocation12 + $0x500] ss:$8 sps:$4 sm:$0xff]  }
 0x38f   :  { %v13855_v54 = vadd.f32 %v4192_v17, %v4139_v58  ;;  %6032 = vmatpush1.bf16.msra.mxu0 %v12254_v40  ;;  %6059 = vmatprep.mubr.bf16.mxu0 %v10605_v56  ;;  %v12271_v56 = vld [vmem:[#allocation10 + $0x344] ss:$8 sps:$4 sm:$0xff]   ;;  %v12272_v58 = vld [vmem:[#allocation12 + $0x520] ss:$8 sps:$4 sm:$0xff]   ;;  %v12278_v40 = vld [vmem:[#allocation12 + $0x510] ss:$8 sps:$4 sm:$0xff]  }
 0x390   :  { %v4194_v10 = vpop.f32.mrf.mxu1  ;;  %6033 = vmatprep.subr.bf16.mxu0 %v12262_v60  ;;  %v4149_v52 = vpop.f32.mrf.mxu0  ;;  %v12289_v60 = vld [vmem:[#allocation10 + $0x314] ss:$8 sps:$4 sm:$0xff]   ;;  %v12298_v17 = vld [vmem:[#allocation12 + $0x5e4] ss:$8 sps:$4 sm:$0xff]  }
 0x391   :  { %v13868_v2 = vadd.f32 %v4194_v10, %v4141_v12  ;;  %6408 = vmatpush1.bf16.msra.mxu1 %v12257_v16  ;;  %v12283_v12 = vld [vmem:[#allocation10 + $0x324] ss:$8 sps:$4 sm:$0xff]   ;;  %v12296_v10 = vld [vmem:[#allocation12 + $0x5e0] ss:$8 sps:$4 sm:$0xff]  }
 0x392   :  { %v4196_v13 = vpop.f32.mrf.mxu1  ;;  %6409 = vmatprep.subr.bf16.mxu1 %v12265_v57  ;;  %v4151_v22 = vpop.f32.mrf.mxu0  ;;  %v12295_v16 = vld [vmem:[#allocation10 + $0x304] ss:$8 sps:$4 sm:$0xff]   ;;  %v12293_v57 = vld [vmem:[#allocation10 + $0x300] ss:$8 sps:$4 sm:$0xff]  }
 0x393   :  { %v13870_v0 = vadd.f32 %v4196_v13, %v4143_v55  ;;  %6034 = vmatpush1.bf16.msra.mxu0 %v12260_v32  ;;  %v12286_v55 = vld [vmem:[#allocation12 + $0x504] ss:$8 sps:$4 sm:$0xff]   ;;  %v12301_v32 = vld [vmem:[#allocation10 + $0x3f4] ss:$8 sps:$4 sm:$0xff]   ;;  %v12302_v13 = vld [vmem:[#allocation12 + $0x5d0] ss:$8 sps:$4 sm:$0xff]  }
 0x394   :  { %6017 = vmatmul.mubr.bf16.gmra.mxu1 %v13628_v61  ;;  %v4200_v24 = vpop.f32.mrf.mxu1  ;;  %6035 = vmatprep.subr.bf16.mxu0 %v12268_v25  ;;  %v12280_v61 = vld [vmem:[#allocation12 + $0x514] ss:$8 sps:$4 sm:$0xff]   ;;  %v4153_v36 = vpop.f32.mrf.mxu0 }
 0x395   :  { %v13877_v30 = vadd.f32 %v4200_v24, %v4147_v53  ;;  %6410 = vmatpush1.bf16.msra.mxu1 %v12263_v48  ;;  %6437 = vmatprep.mubr.bf16.mxu1 %v13874_v50  ;;  %v12290_v53 = vld [vmem:[#allocation12 + $0x5f0] ss:$8 sps:$4 sm:$0xff]   ;;  %v12304_v25 = vld [vmem:[#allocation12 + $0x5d4] ss:$8 sps:$4 sm:$0xff]  }
 0x396   :  { %v4202_v46 = vpop.f32.mrf.mxu1  ;;  %6411 = vmatprep.subr.bf16.mxu1 %v12271_v56  ;;  %v12299_v48 = vld [vmem:[#allocation10 + $0x3f0] ss:$8 sps:$4 sm:$0xff]   ;;  %v12310_v56 = vld [vmem:[#allocation12 + $0x5c4] ss:$8 sps:$4 sm:$0xff]   ;;  %v12313_v24 = vld [vmem:[#allocation10 + $0x3d4] ss:$8 sps:$4 sm:$0xff]  }
 0x397   :  { %v13880_v37 = vadd.f32 %v4202_v46, %v4149_v52  ;;  %6036 = vmatpush1.bf16.msra.mxu0 %v12266_v59  ;;  %v12307_v52 = vld [vmem:[#allocation10 + $0x3e4] ss:$8 sps:$4 sm:$0xff]   ;;  %v12305_v59 = vld [vmem:[#allocation10 + $0x3e0] ss:$8 sps:$4 sm:$0xff]  }
 0x398   :  { %v4204_v28 = vpop.f32.mrf.mxu1  ;;  %6037 = vmatprep.subr.bf16.mxu0 %v12274_v19  ;;  %v12308_v19 = vld [vmem:[#allocation12 + $0x5c0] ss:$8 sps:$4 sm:$0xff]   ;;  %v12319_v46 = vld [vmem:[#allocation10 + $0x3c4] ss:$8 sps:$4 sm:$0xff]  }
 0x399   :  { %v13882_v26 = vadd.f32 %v4204_v28, %v4151_v22  ;;  %6412 = vmatpush1.bf16.msra.mxu1 %v12269_v3  ;;  %v12316_v3 = vld [vmem:[#allocation12 + $0x5b4] ss:$8 sps:$4 sm:$0xff]   ;;  %v12311_v22 = vld [vmem:[#allocation10 + $0x3d0] ss:$8 sps:$4 sm:$0xff]  }
 0x39a   :  { %v4206_v15 = vpop.f32.mrf.mxu1  ;;  %6413 = vmatprep.subr.bf16.mxu1 %v12277_v38  ;;  %v12314_v38 = vld [vmem:[#allocation12 + $0x5b0] ss:$8 sps:$4 sm:$0xff]  }
 0x39b   :  { %v13884_v62 = vadd.f32 %v4206_v15, %v4153_v36  ;;  %6038 = vmatpush1.bf16.msra.mxu0 %v12272_v58  ;;  %v12322_v58 = vld [vmem:[#allocation12 + $0x5a4] ss:$8 sps:$4 sm:$0xff]   ;;  %v6094_v28 = vld [vmem:[#allocation3 + $0x70] sm:$0xff]  ;;  %v12320_v36 = vld [vmem:[#allocation12 + $0x5a0] ss:$8 sps:$4 sm:$0xff]  }
 0x39c   :  { %6039 = vmatprep.subr.bf16.mxu0 %v12280_v61  ;;  %v12317_v61 = vld [vmem:[#allocation10 + $0x3c0] ss:$8 sps:$4 sm:$0xff]   ;;  %v6149_v15 = vshrl.u32 %v6094_v28, 16 }
 0x39d   :  { %6414 = vmatpush1.bf16.msra.mxu1 %v12275_v20  ;;  %v12325_v20 = vld [vmem:[#allocation10 + $0x3b4] ss:$8 sps:$4 sm:$0xff]  }
 0x39e   :  { %6415 = vmatprep.subr.bf16.mxu1 %v12283_v12  ;;  %v6152_v12 = vshll.u32 %v6094_v28, 16  ;;  %v12335_v28 = vld [vmem:[#allocation10 + $0x390] ss:$8 sps:$4 sm:$0xff]  }
 0x39f   :  { %6040 = vmatpush1.bf16.msra.mxu0 %v12278_v40  ;;  %v12328_v40 = vld [vmem:[#allocation12 + $0x594] ss:$8 sps:$4 sm:$0xff]  }
 0x3a0   :  { %6041 = vmatprep.subr.bf16.mxu0 %v12286_v55  ;;  %v12741_v55 = vld [vmem:[#allocation3 + $0x58] sm:$0xff] }
 0x3a1   :  { %6416 = vmatpush1.bf16.msra.mxu1 %v12281_v35  ;;  %v6158_v35 = vshll.u32 %v12741_v55, 16 }
 0x3a2   :  { %6417 = vmatprep.subr.bf16.mxu1 %v12289_v60  ;;  %v6176_v60 = vshrl.u32 %v12741_v55, 16 }
 0x3a3   :  { %6042 = vmatpush1.bf16.msra.mxu0 %v12284_v21  ;;  %v12323_v21 = vld [vmem:[#allocation10 + $0x3b0] ss:$8 sps:$4 sm:$0xff]  }
 0x3a4   :  { %6043 = vmatprep.subr.bf16.mxu0 %v12292_v34  ;;  %v12331_v34 = vld [vmem:[#allocation10 + $0x3a4] ss:$8 sps:$4 sm:$0xff]  }
 0x3a5   :  { %6418 = vmatpush1.bf16.msra.mxu1 %v12287_v23  ;;  %v12326_v23 = vld [vmem:[#allocation12 + $0x590] ss:$8 sps:$4 sm:$0xff]  }
 0x3a6   :  { %6419 = vmatprep.subr.bf16.mxu1 %v12295_v16  ;;  %v6151_v16 = vrot.slane %v6149_v15, 4 }
 0x3a7   :  { %6044 = vmatpush2.bf16.msra.mxu0 %v12290_v53  ;;  %v6154_v53 = vrot.slane %v6152_v12, 5 }
 0x3a8   :  { %6045 = vmatprep.subr.bf16.mxu0 %v12298_v17  ;;  %v12334_v17 = vld [vmem:[#allocation12 + $0x584] ss:$8 sps:$4 sm:$0xff]  }
 0x3a9   :  { %6420 = vmatpush1.bf16.msra.mxu1 %v12293_v57  ;;  %v6160_v57 = vrot.slane %v6158_v35, 5 }
 0x3aa   :  { %6421 = vmatprep.subr.bf16.mxu1 %v12301_v32  ;;  %v6178_v32 = vrot.slane %v6176_v60, 4 }
 0x3ab   :  { %6046 = vmatpush2.bf16.msra.mxu0 %v12296_v10  ;;  %v6089_v10 = vld [vmem:[#allocation3 + $0x20] sm:$0xff] }
 0x3ac   :  { %6047 = vmatprep.subr.bf16.mxu0 %v12304_v25  ;;  %v12329_v25 = vld [vmem:[#allocation10 + $0x3a0] ss:$8 sps:$4 sm:$0xff]  }
 0x3ad   :  { %6422 = vmatpush2.bf16.msra.mxu1 %v12299_v48  ;;  %v12337_v48 = vld [vmem:[#allocation10 + $0x394] ss:$8 sps:$4 sm:$0xff]  }
 0x3ae   :  { %6423 = vmatprep.subr.bf16.mxu1 %v12307_v52  ;;  %v12332_v52 = vld [vmem:[#allocation12 + $0x580] ss:$8 sps:$4 sm:$0xff]  }
 0x3af   :  { %6048 = vmatpush2.bf16.msra.mxu0 %v12302_v13  ;;  %v6155_v13 = vor.u32 %v6154_v53, %v6151_v16  ;;  %v12349_v16 = vld [vmem:[#allocation12 + $0x774] ss:$8 sps:$4 sm:$0xff]  }
 0x3b0   :  { %6049 = vmatprep.subr.bf16.mxu0 %v12310_v56  ;;  %v12742_v56 = vld [vmem:[#allocation3 + $0x78] sm:$0x11] }
 0x3b1   :  { %6424 = vmatpush2.bf16.msra.mxu1 %v12305_v59  ;;  %v6182_v59 = vshll.u32 %v12742_v56, 16 }
 0x3b2   :  { %6425 = vmatprep.subr.bf16.mxu1 %v12313_v24  ;;  %v6115_v24 = vshrl.u32 %v6089_v10, 16 }
 0x3b3   :  { %6050 = vmatpush2.bf16.msra.mxu0 %v12308_v19  ;;  %v12340_v19 = vld [vmem:[#allocation12 + $0x674] ss:$8 sps:$4 sm:$0xff]   ;;  %v6184_v15 = vrot.slane %v6182_v59, 5  ;;  %v12355_v59 = vld [vmem:[#allocation12 + $0x764] ss:$8 sps:$4 sm:$0xff]  }
 0x3b4   :  { %6051 = vmatprep.subr.bf16.mxu0 %v12316_v3  ;;  %v6179_v3 = vor.u32 %v6178_v32, %v6160_v57  ;;  %v6117_v12 = vrot.slane %v6115_v24, 4  ;;  %v12744_v32 = vld [vmem:[#allocation3 + $0x80] sm:$0x11] }
 0x3b5   :  { %6426 = vmatpush2.bf16.msra.mxu1 %v12311_v22  ;;  %v6118_v22 = vshll.u32 %v6089_v10, 16  ;;  %v6144_v10 = vshll.u32 %v12744_v32, 16 }
 0x3b6   :  { %6427 = vmatprep.subr.bf16.mxu1 %v12319_v46  ;;  %v12743_v46 = vld [vmem:[#allocation3 + $0x98] sm:$0xff]  ;;  %v6180_v55 = vrot.slane %v6179_v3, 4 }
 0x3b7   :  { %6052 = vmatpush2.bf16.msra.mxu0 %v12314_v38  ;;  %v6124_v38 = vshll.u32 %v12743_v46, 16  ;;  %v6120_v35 = vrot.slane %v6118_v22, 5 }
 0x3b8   :  { %6053 = vmatprep.subr.bf16.mxu0 %v12322_v58  ;;  %v6138_v58 = vshrl.u32 %v12743_v46, 16  ;;  %v6185_v31 = vsel %vm13216_vm11, %v6180_v55, %v6184_v15 }
 0x3b9   :  { %6428 = vmatpush2.bf16.msra.mxu1 %v12317_v61  ;;  %v12343_v61 = vld [vmem:[#allocation10 + $0x384] ss:$8 sps:$4 sm:$0xff]   ;;  %v6126_v60 = vrot.slane %v6124_v38, 5 }
 0x3ba   :  { %6429 = vmatprep.subr.bf16.mxu1 %v12325_v20  ;;  %v12338_v20 = vld [vmem:[#allocation12 + $0x670] ss:$8 sps:$4 sm:$0xff]  }
 0x3bb   :  { %6054 = vmatpush2.bf16.msra.mxu0 %v12320_v36  ;;  %v6156_v36 = vrot.slane %v6155_v13, 4  ;;  %v12347_v13 = vld [vmem:[#allocation12 + $0x770] ss:$8 sps:$4 sm:$0xff]  }
 0x3bc   :  { %6055 = vmatprep.subr.bf16.mxu0 %v12328_v40  ;;  %v12346_v40 = vld [vmem:[#allocation12 + $0x664] ss:$8 sps:$4 sm:$0xff]  }
 0x3bd   :  { %6430 = vmatpush2.bf16.msra.mxu1 %v12323_v21  ;;  %v6140_v21 = vrot.slane %v6138_v58, 4  ;;  %v6146_v58 = vrot.slane %v6144_v10, 5  ;;  %v12370_v10 = vld [vmem:[#allocation12 + $0x624] ss:$8 sps:$4 sm:$0xff]  }
 0x3be   :  { %6431 = vmatprep.subr.bf16.mxu1 %v12331_v34  ;;  %v12341_v34 = vld [vmem:[#allocation10 + $0x380] ss:$8 sps:$4 sm:$0xff]  }
 0x3bf   :  { %6056 = vmatpush2.bf16.msra.mxu0 %v12326_v23 }
 0x3c0   :  { %6057 = vmatprep.subr.bf16.mxu0 %v12334_v17  ;;  %v12344_v17 = vld [vmem:[#allocation12 + $0x660] ss:$8 sps:$4 sm:$0xff]  }
 0x3c1   :  { %6432 = vmatpush2.bf16.msra.mxu1 %v12329_v25 }
 0x3c2   :  { %6433 = vmatprep.subr.bf16.mxu1 %v12337_v48  ;;  %v6161_v48 = vsel %vm13216_vm11, %v6156_v36, %v6160_v57 }
 0x3c3   :  { %6058 = vmatpush2.bf16.msra.mxu0 %v12332_v52  ;;  %v6141_v52 = vor.u32 %v6140_v21, %v6126_v60  ;;  %v13903_v57 = vcombine.high %v6161_v48, %v6185_v31 }
 0x3c4   :  { %6867 = vmatprep.subr.bf16.mxu0 %v12340_v19  ;;  %v12350_v19 = vld [vmem:[#allocation12 + $0x650] ss:$8 sps:$4 sm:$0xff]  }
 0x3c5   :  { %6434 = vmatpush2.bf16.msra.mxu1 %v12335_v28  ;;  %v6142_v38 = vrot.slane %v6141_v52, 4  ;;  %v12368_v52 = vld [vmem:[#allocation12 + $0x620] ss:$8 sps:$4 sm:$0xff]  }
 0x3c6   :  { %v4403_v23 = vpop.f32.mrf.mxu0  ;;  %6060 = vmatmul.mubr.bf16.vlgmr.msra.gmra.mxu0 %v10604_v5  ;;  %6435 = vmatprep.subr.bf16.mxu1 %v12343_v61  ;;  %v6121_v5 = vor.u32 %v6120_v35, %v6117_v12  ;;  %v12359_v35 = vld [vmem:[#allocation12 + $0x750] ss:$8 sps:$4 sm:$0xff]  }
 0x3c7   :  { %v4404_v53 = vadd.f32 %v4403_v23, %v13851_v18  ;;  %6069 = vmatprep.mubr.bf16.mxu0 %v10607_v49  ;;  %6868 = vmatpush1.bf16.msra.mxu0 %v12338_v20  ;;  %v13900_v49 = vcombine.low %v13862_v14, %v13866_v47  ;;  %v12361_v20 = vld [vmem:[#allocation12 + $0x754] ss:$8 sps:$4 sm:$0xff]   ;;  %v13923_v7 = vsel %vm13216_vm11, %v6142_v38, %v6146_v58  ;;  %v12367_v23 = vld [vmem:[#allocation12 + $0x744] ss:$8 sps:$4 sm:$0xff]   ;;  %v12380_v38 = vld [vmem:[#allocation12 + $0x600] ss:$8 sps:$4 sm:$0xff]  }
 0x3c8   :  { %v4405_v25 = vpop.f32.mrf.mxu0  ;;  %6869 = vmatprep.subr.bf16.mxu0 %v12346_v40  ;;  %v6122_v46 = vrot.slane %v6121_v5, 4  ;;  %v12388_v58 = vld [vmem:[#allocation12 + $0x6f4] ss:$8 sps:$4 sm:$0xff]  }
 0x3c9   :  { %v4406_v18 = vadd.f32 %v4405_v25, %v13855_v54  ;;  %6436 = vmatpush2.bf16.msra.mxu1 %v12341_v34  ;;  %v12358_v54 = vld [vmem:[#allocation12 + $0x644] ss:$8 sps:$4 sm:$0xff]   ;;  %v13928_v34 = vcombine.low %v6161_v48, %v6185_v31 }
 0x3ca   :  { %v4407_v56 = vpop.f32.mrf.mxu0  ;;  %6920 = vmatprep.subr.bf16.mxu1 %v12349_v16  ;;  %v13919_v55 = vsel %vm13216_vm11, %v6122_v46, %v6126_v60  ;;  %v12385_v46 = vld [vmem:[#allocation12 + $0x714] ss:$8 sps:$4 sm:$0xff]  }
 0x3cb   :  { %v4408_v24 = vadd.f32 %v4407_v56, %v13868_v2  ;;  %6870 = vmatpush1.bf16.msra.mxu0 %v12344_v17  ;;  %v12353_v2 = vld [vmem:[#allocation12 + $0x760] ss:$8 sps:$4 sm:$0xff]   ;;  %v12362_v17 = vld [vmem:[#allocation12 + $0x630] ss:$8 sps:$4 sm:$0xff]  }
 0x3cc   :  { %v4409_v3 = vpop.f32.mrf.mxu0  ;;  %v4757_v22 = vpop.f32.mrf.mxu1  ;;  %6438 = vmatmul.mubr.bf16.vlgmr.msra.gmra.mxu1 %v13900_v49  ;;  %6871 = vmatprep.subr.bf16.mxu0 %v12352_v8  ;;  %v12373_v8 = vld [vmem:[#allocation12 + $0x734] ss:$8 sps:$4 sm:$0xff]  }
 0x3cd   :  { %v4410_v14 = vadd.f32 %v4409_v3, %v13870_v0  ;;  %v13907_v47 = vadd.f32 %v4757_v22, %v4404_v53  ;;  %6447 = vmatprep.mubr.bf16.mxu1 %v13903_v57  ;;  %6921 = vmatpush1.bf16.msra.mxu1 %v12347_v13  ;;  %v12356_v0 = vld [vmem:[#allocation12 + $0x640] ss:$8 sps:$4 sm:$0xff]   ;;  %v10709_v53 = vcombine.high %v13919_v55, %v13923_v7  ;;  %v12376_v13 = vld [vmem:[#allocation12 + $0x614] ss:$8 sps:$4 sm:$0xff]   ;;  %v12374_v3 = vld [vmem:[#allocation12 + $0x610] ss:$8 sps:$4 sm:$0xff]  }
 0x3ce   :  { %v4413_v28 = vpop.f32.mrf.mxu0  ;;  %v4759_v61 = vpop.f32.mrf.mxu1  ;;  %6070 = vmatmul.mubr.bf16.gmra.mxu0 %v10606_v33  ;;  %6922 = vmatprep.subr.bf16.mxu1 %v12355_v59  ;;  %v12371_v59 = vld [vmem:[#allocation12 + $0x730] ss:$8 sps:$4 sm:$0xff]   ;;  %v12382_v22 = vld [vmem:[#allocation12 + $0x604] ss:$8 sps:$4 sm:$0xff]  }
 0x3cf   :  { %v4414_v36 = vadd.f32 %v4413_v28, %v13877_v30  ;;  %v13914_v15 = vadd.f32 %v4759_v61, %v4406_v18  ;;  %6872 = vmatpush1.bf16.msra.mxu0 %v12350_v19  ;;  %6899 = vmatprep.mubr.bf16.mxu0 %v13874_v50  ;;  %v12386_v28 = vld [vmem:[#allocation12 + $0x6f0] ss:$8 sps:$4 sm:$0xff]   ;;  %v12394_v61 = vld [vmem:[#allocation12 + $0x6e4] ss:$8 sps:$4 sm:$0xff]  }
 0x3d0   :  { %v4415_v12 = vpop.f32.mrf.mxu0  ;;  %v4761_v40 = vpop.f32.mrf.mxu1  ;;  %6873 = vmatprep.subr.bf16.mxu0 %v12358_v54  ;;  %v12377_v54 = vld [vmem:[#allocation12 + $0x720] ss:$8 sps:$4 sm:$0xff]  }
 0x3d1   :  { %v4416_v33 = vadd.f32 %v4415_v12, %v13880_v37  ;;  %v13926_v30 = vadd.f32 %v4761_v40, %v4408_v24  ;;  %6923 = vmatpush1.bf16.msra.mxu1 %v12353_v2  ;;  %v12379_v24 = vld [vmem:[#allocation12 + $0x724] ss:$8 sps:$4 sm:$0xff]   ;;  %v12400_v12 = vld [vmem:[#allocation12 + $0x6d4] ss:$8 sps:$4 sm:$0xff]   ;;  %v12395_v40 = vld [vmem:[#allocation12 + $0x7f0] ss:$8 sps:$4 sm:$0xff]  }
 0x3d2   :  { %v4417_v50 = vpop.f32.mrf.mxu0  ;;  %v4763_v21 = vpop.f32.mrf.mxu1  ;;  %6924 = vmatprep.subr.bf16.mxu1 %v12361_v20  ;;  %v12391_v2 = vld [vmem:[#allocation12 + $0x704] ss:$8 sps:$4 sm:$0xff]   ;;  %v12389_v20 = vld [vmem:[#allocation12 + $0x700] ss:$8 sps:$4 sm:$0xff]  }
 0x3d3   :  { %v4418_v60 = vadd.f32 %v4417_v50, %v13882_v26  ;;  %v13931_v16 = vadd.f32 %v4763_v21, %v4410_v14  ;;  %6874 = vmatpush1.bf16.msra.mxu0 %v12356_v0  ;;  %v12365_v26 = vld [vmem:[#allocation12 + $0x740] ss:$8 sps:$4 sm:$0xff]   ;;  %v12383_v14 = vld [vmem:[#allocation12 + $0x710] ss:$8 sps:$4 sm:$0xff]   ;;  %v12409_v21 = vld [vmem:[#allocation12 + $0x7d4] ss:$8 sps:$4 sm:$0xff]  }
 0x3d4   :  { %v4419_v37 = vpop.f32.mrf.mxu0  ;;  %v4767_v32 = vpop.f32.mrf.mxu1  ;;  %6448 = vmatmul.mubr.bf16.gmra.mxu1 %v13928_v34  ;;  %6875 = vmatprep.subr.bf16.mxu0 %v12364_v27  ;;  %v12392_v0 = vld [vmem:[#allocation12 + $0x6e0] ss:$8 sps:$4 sm:$0xff]   ;;  %v12403_v27 = vld [vmem:[#allocation12 + $0x7e4] ss:$8 sps:$4 sm:$0xff]  }
 0x3d5   :  { %v4420_v25 = vadd.f32 %v4419_v37, %v13884_v62  ;;  %v13937_v48 = vadd.f32 %v4767_v32, %v4414_v36  ;;  %6925 = vmatpush1.bf16.msra.mxu1 %v12359_v35  ;;  %6952 = vmatprep.mubr.bf16.mxu1 %v10709_v53  ;;  %v12397_v36 = vld [vmem:[#allocation12 + $0x7f4] ss:$8 sps:$4 sm:$0xff]   ;;  %v12406_v35 = vld [vmem:[#allocation12 + $0x6c4] ss:$8 sps:$4 sm:$0xff]   ;;  %v12401_v50 = vld [vmem:[#allocation12 + $0x7e0] ss:$8 sps:$4 sm:$0xff]  }
 0x3d6   :  { %v4769_v31 = vpop.f32.mrf.mxu1  ;;  %6926 = vmatprep.subr.bf16.mxu1 %v12367_v23  ;;  %v12404_v23 = vld [vmem:[#allocation12 + $0x6c0] ss:$8 sps:$4 sm:$0xff]   ;;  %v12407_v53 = vld [vmem:[#allocation12 + $0x7d0] ss:$8 sps:$4 sm:$0xff]   ;;  %v12418_v32 = vld [vmem:[#allocation12 + $0x6a4] ss:$8 sps:$4 sm:$0xff]  }
 0x3d7   :  { %v13939_v5 = vadd.f32 %v4769_v31, %v4416_v33  ;;  %6876 = vmatpush1.bf16.msra.mxu0 %v12362_v17  ;;  %v12398_v33 = vld [vmem:[#allocation12 + $0x6d0] ss:$8 sps:$4 sm:$0xff]   ;;  %v12415_v17 = vld [vmem:[#allocation12 + $0x7c4] ss:$8 sps:$4 sm:$0xff]   ;;  %v12416_v31 = vld [vmem:[#allocation12 + $0x6a0] ss:$8 sps:$4 sm:$0xff]  }
 0x3d8   :  { %v4771_v18 = vpop.f32.mrf.mxu1  ;;  %6877 = vmatprep.subr.bf16.mxu0 %v12370_v10  ;;  %v12410_v37 = vld [vmem:[#allocation12 + $0x6b0] ss:$8 sps:$4 sm:$0xff]   ;;  %v12413_v10 = vld [vmem:[#allocation12 + $0x7c0] ss:$8 sps:$4 sm:$0xff]  }
 0x3d9   :  { %v13941_v56 = vadd.f32 %v4771_v18, %v4418_v60  ;;  %6927 = vmatpush1.bf16.msra.mxu1 %v12365_v26  ;;  %v12412_v60 = vld [vmem:[#allocation12 + $0x6b4] ss:$8 sps:$4 sm:$0xff]  }
 0x3da   :  { %v4773_v62 = vpop.f32.mrf.mxu1  ;;  %6928 = vmatprep.subr.bf16.mxu1 %v12373_v8  ;;  %v12421_v26 = vld [vmem:[#allocation12 + $0x7b4] ss:$8 sps:$4 sm:$0xff]  }
 0x3db   :  { %v13943_v19 = vadd.f32 %v4773_v62, %v4420_v25  ;;  %6878 = vmatpush1.bf16.msra.mxu0 %v12368_v52  ;;  %v6095_v25 = vld [vmem:[#allocation3 + $0x60] sm:$0xff]  ;;  %v12424_v8 = vld [vmem:[#allocation12 + $0x694] ss:$8 sps:$4 sm:$0xff]  }
 0x3dc   :  { %6879 = vmatprep.subr.bf16.mxu0 %v12376_v13  ;;  %v6163_v52 = vshrl.u32 %v6095_v25, 16  ;;  %v6166_v18 = vshll.u32 %v6095_v25, 16  ;;  %v12745_v13 = vld [vmem:[#allocation3 + $0x8] sm:$0xff] }
 0x3dd   :  { %6929 = vmatpush1.bf16.msra.mxu1 %v12371_v59  ;;  %v6172_v59 = vshll.u32 %v12745_v13, 16  ;;  %v6186_v62 = vshrl.u32 %v12745_v13, 16  ;;  %v12446_v13 = vld [vmem:[#allocation10 + $0x450] ss:$8 sps:$4 sm:$0xff]  }
 0x3de   :  { %6930 = vmatprep.subr.bf16.mxu1 %v12379_v24  ;;  %v12419_v24 = vld [vmem:[#allocation12 + $0x7b0] ss:$8 sps:$4 sm:$0xff]  }
 0x3df   :  { %6880 = vmatpush1.bf16.msra.mxu0 %v12374_v3  ;;  %v12427_v3 = vld [vmem:[#allocation12 + $0x7a4] ss:$8 sps:$4 sm:$0xff]  }
 0x3e0   :  { %6881 = vmatprep.subr.bf16.mxu0 %v12382_v22  ;;  %v12422_v22 = vld [vmem:[#allocation12 + $0x690] ss:$8 sps:$4 sm:$0xff]  }
 0x3e1   :  { %6931 = vmatpush1.bf16.msra.mxu1 %v12377_v54  ;;  %v12430_v54 = vld [vmem:[#allocation12 + $0x684] ss:$8 sps:$4 sm:$0xff]  }
 0x3e2   :  { %6932 = vmatprep.subr.bf16.mxu1 %v12385_v46  ;;  %v6165_v46 = vrot.slane %v6163_v52, 4 }
 0x3e3   :  { %6882 = vmatpush1.bf16.msra.mxu0 %v12380_v38  ;;  %v6168_v38 = vrot.slane %v6166_v18, 5  ;;  %v12451_v18 = vld [vmem:[#allocation12 + $0x864] ss:$8 sps:$4 sm:$0xff]  }
 0x3e4   :  { %6883 = vmatprep.subr.bf16.mxu0 %v12388_v58  ;;  %v6174_v58 = vrot.slane %v6172_v59, 5 }
 0x3e5   :  { %6933 = vmatpush1.bf16.msra.mxu1 %v12383_v14  ;;  %v6188_v14 = vrot.slane %v6186_v62, 4 }
 0x3e6   :  { %6934 = vmatprep.subr.bf16.mxu1 %v12391_v2  ;;  %v12425_v2 = vld [vmem:[#allocation12 + $0x7a0] ss:$8 sps:$4 sm:$0xff]  }
 0x3e7   :  { %6884 = vmatpush2.bf16.msra.mxu0 %v12386_v28  ;;  %v12433_v28 = vld [vmem:[#allocation12 + $0x794] ss:$8 sps:$4 sm:$0xff]  }
 0x3e8   :  { %6885 = vmatprep.subr.bf16.mxu0 %v12394_v61  ;;  %v12428_v61 = vld [vmem:[#allocation12 + $0x680] ss:$8 sps:$4 sm:$0xff]  }
 0x3e9   :  { %6935 = vmatpush1.bf16.msra.mxu1 %v12389_v20  ;;  %v12436_v20 = vld [vmem:[#allocation10 + $0x474] ss:$8 sps:$4 sm:$0xff]  }
 0x3ea   :  { %6936 = vmatprep.subr.bf16.mxu1 %v12397_v36  ;;  %v6169_v36 = vor.u32 %v6168_v38, %v6165_v46  ;;  %v12452_v38 = vld [vmem:[#allocation10 + $0x440] ss:$8 sps:$4 sm:$0xff]  }
 0x3eb   :  { %6886 = vmatpush2.bf16.msra.mxu0 %v12392_v0  ;;  %v6189_v0 = vor.u32 %v6188_v14, %v6174_v58 }
 0x3ec   :  { %6887 = vmatprep.subr.bf16.mxu0 %v12400_v12  ;;  %v12746_v12 = vld [vmem:[#allocation3 + $0x50] sm:$0x11] }
 0x3ed   :  { %6937 = vmatpush2.bf16.msra.mxu1 %v12395_v40  ;;  %v6192_v40 = vshll.u32 %v12746_v12, 16  ;;  %v12463_v12 = vld [vmem:[#allocation12 + $0x844] ss:$8 sps:$4 sm:$0xff]  }
 0x3ee   :  { %6938 = vmatprep.subr.bf16.mxu1 %v12403_v27  ;;  %v12431_v27 = vld [vmem:[#allocation12 + $0x790] ss:$8 sps:$4 sm:$0xff]  }
 0x3ef   :  { %6888 = vmatpush2.bf16.msra.mxu0 %v12398_v33  ;;  %v12439_v33 = vld [vmem:[#allocation12 + $0x784] ss:$8 sps:$4 sm:$0xff]  }
 0x3f0   :  { %6889 = vmatprep.subr.bf16.mxu0 %v12406_v35  ;;  %v12434_v35 = vld [vmem:[#allocation10 + $0x470] ss:$8 sps:$4 sm:$0xff]  }
 0x3f1   :  { %6939 = vmatpush2.bf16.msra.mxu1 %v12401_v50  ;;  %v12442_v50 = vld [vmem:[#allocation10 + $0x464] ss:$8 sps:$4 sm:$0xff]  }
 0x3f2   :  { %6940 = vmatprep.subr.bf16.mxu1 %v12409_v21  ;;  %v6170_v21 = vrot.slane %v6169_v36, 4 }
 0x3f3   :  { %6890 = vmatpush2.bf16.msra.mxu0 %v12404_v23  ;;  %v6190_v23 = vrot.slane %v6189_v0, 4 }
 0x3f4   :  { %6891 = vmatprep.subr.bf16.mxu0 %v12412_v60  ;;  %v6194_v60 = vrot.slane %v6192_v40, 5  ;;  %v6175_v25 = vsel %vm13216_vm11, %v6170_v21, %v6174_v58 }
 0x3f5   :  { %6941 = vmatpush2.bf16.msra.mxu1 %v12407_v53  ;;  %v12437_v53 = vld [vmem:[#allocation12 + $0x780] ss:$8 sps:$4 sm:$0xff]  }
 0x3f6   :  { %6942 = vmatprep.subr.bf16.mxu1 %v12415_v17 }
 0x3f7   :  { %6892 = vmatpush2.bf16.msra.mxu0 %v12410_v37  ;;  %v12445_v37 = vld [vmem:[#allocation12 + $0x874] ss:$8 sps:$4 sm:$0xff]  }
 0x3f8   :  { %6893 = vmatprep.subr.bf16.mxu0 %v12418_v32  ;;  %v12440_v32 = vld [vmem:[#allocation10 + $0x460] ss:$8 sps:$4 sm:$0xff]  }
 0x3f9   :  { %6943 = vmatpush2.bf16.msra.mxu1 %v12413_v10 }
 0x3fa   :  { %6944 = vmatprep.subr.bf16.mxu1 %v12421_v26  ;;  %v6195_v26 = vsel %vm13216_vm11, %v6190_v23, %v6194_v60 }
 0x3fb   :  { %6894 = vmatpush2.bf16.msra.mxu0 %v12416_v31  ;;  %v12448_v31 = vld [vmem:[#allocation10 + $0x454] ss:$8 sps:$4 sm:$0xff]   ;;  %v10710_v0 = vcombine.low %v6175_v25, %v6195_v26 }
 0x3fc   :  { %6895 = vmatprep.subr.bf16.mxu0 %v12424_v8  ;;  %v12443_v8 = vld [vmem:[#allocation12 + $0x870] ss:$8 sps:$4 sm:$0xff]  }
 0x3fd   :  { %6945 = vmatpush2.bf16.msra.mxu1 %v12419_v24  ;;  %v12454_v24 = vld [vmem:[#allocation10 + $0x444] ss:$8 sps:$4 sm:$0xff]  }
 0x3fe   :  { %6946 = vmatprep.subr.bf16.mxu1 %v12427_v3 }
 0x3ff   :  { %6896 = vmatpush2.bf16.msra.mxu0 %v12422_v22  ;;  %v12449_v22 = vld [vmem:[#allocation12 + $0x860] ss:$8 sps:$4 sm:$0xff]  }
 0x400   :  { %6897 = vmatprep.subr.bf16.mxu0 %v12430_v54 }
 0x401   :  { %6947 = vmatpush2.bf16.msra.mxu1 %v12425_v2  ;;  %v12460_v2 = vld [vmem:[#allocation10 + $0x434] ss:$8 sps:$4 sm:$0xff]  }
 0x402   :  { %6948 = vmatprep.subr.bf16.mxu1 %v12433_v28 }
 0x403   :  { %6898 = vmatpush2.bf16.msra.mxu0 %v12428_v61  ;;  %v12455_v61 = vld [vmem:[#allocation12 + $0x850] ss:$8 sps:$4 sm:$0xff]  }
 0x404   :  { %7234 = vmatprep.subr.bf16.mxu0 %v12436_v20 }
 0x405   :  { %6949 = vmatpush2.bf16.msra.mxu1 %v12431_v27  ;;  %v12458_v27 = vld [vmem:[#allocation10 + $0x430] ss:$8 sps:$4 sm:$0xff]  }
 0x406   :  { %v5219_v17 = vpop.f32.mrf.mxu0  ;;  %6900 = vmatmul.mubr.bf16.vlgmr.msra.gmra.mxu0 %v13900_v49  ;;  %6950 = vmatprep.subr.bf16.mxu1 %v12439_v33  ;;  %v10708_v49 = vcombine.low %v13919_v55, %v13923_v7  ;;  %v12457_v55 = vld [vmem:[#allocation12 + $0x854] ss:$8 sps:$4 sm:$0xff]  }
 0x407   :  { %6909 = vmatprep.mubr.bf16.mxu0 %v13903_v57  ;;  %7235 = vmatpush1.bf16.msra.mxu0 %v12434_v35  ;;  %v10711_v57 = vcombine.high %v6175_v25, %v6195_v26  ;;  %v12466_v35 = vld [vmem:[#allocation10 + $0x424] ss:$8 sps:$4 sm:$0xff]  }
 0x408   :  { %v5221_v10 = vpop.f32.mrf.mxu0  ;;  %7236 = vmatprep.subr.bf16.mxu0 %v12442_v50 }
 0x409   :  { %6951 = vmatpush2.bf16.msra.mxu1 %v12437_v53  ;;  %v12469_v53 = vld [vmem:[#allocation12 + $0x834] ss:$8 sps:$4 sm:$0xff]  }
 0x40a   :  { %v5223_v52 = vpop.f32.mrf.mxu0  ;;  %7696 = vmatprep.subr.bf16.mxu1 %v12445_v37 }
 0x40b   :  { %7237 = vmatpush1.bf16.msra.mxu0 %v12440_v32 }
 0x40c   :  { %v5225_v59 = vpop.f32.mrf.mxu0  ;;  %v5272_v62 = vpop.f32.mrf.mxu1  ;;  %6953 = vmatmul.mubr.bf16.vlgmr.msra.gmra.mxu1 %v10708_v49  ;;  %7238 = vmatprep.subr.bf16.mxu0 %v12448_v31 }
 0x40d   :  { %v5273_v3 = vadd.f32 %v5272_v62, %v5219_v17  ;;  %6962 = vmatprep.mubr.bf16.mxu1 %v10711_v57  ;;  %7697 = vmatpush1.bf16.msra.mxu1 %v12443_v8  ;;  %v12475_v8 = vld [vmem:[#allocation12 + $0x824] ss:$8 sps:$4 sm:$0xff]   ;;  %v12473_v57 = vld [vmem:[#allocation12 + $0x820] ss:$8 sps:$4 sm:$0xff]   ;;  %v12484_v62 = vld [vmem:[#allocation10 + $0x4f4] ss:$8 sps:$4 sm:$0xff]  }
 0x40e   :  { %v5229_v54 = vpop.f32.mrf.mxu0  ;;  %v5274_v46 = vpop.f32.mrf.mxu1  ;;  %6910 = vmatmul.mubr.bf16.gmra.mxu0 %v13928_v34  ;;  %7698 = vmatprep.subr.bf16.mxu1 %v12451_v18 }
 0x40f   :  { %v5275_v7 = vadd.f32 %v5274_v46, %v5221_v10  ;;  %7239 = vmatpush1.bf16.msra.mxu0 %v12446_v13  ;;  %7266 = vmatprep.mubr.bf16.mxu0 %v13791_v29  ;;  %v13956_v58 = vadd.f32 %v5273_v3, %v13907_v47  ;;  %v12472_v10 = vld [vmem:[#allocation10 + $0x414] ss:$8 sps:$4 sm:$0xff]   ;;  %v12487_v3 = vld [vmem:[#allocation12 + $0x804] ss:$8 sps:$4 sm:$0xff]  }
 0x410   :  { %v5276_v14 = vpop.f32.mrf.mxu1  ;;  %7240 = vmatprep.subr.bf16.mxu0 %v12454_v24  ;;  %v5231_v34 = vpop.f32.mrf.mxu0  ;;  %v12479_v24 = vld [vmem:[#allocation12 + $0x810] ss:$8 sps:$4 sm:$0xff]   ;;  %v12493_v46 = vld [vmem:[#allocation12 + $0x8f4] ss:$8 sps:$4 sm:$0xff]  }
 0x411   :  { %v5277_v28 = vadd.f32 %v5276_v14, %v5223_v52  ;;  %7699 = vmatpush1.bf16.msra.mxu1 %v12449_v22  ;;  %v13959_v20 = vadd.f32 %v5275_v7, %v13914_v15  ;;  %v12461_v15 = vld [vmem:[#allocation12 + $0x840] ss:$8 sps:$4 sm:$0xff]   ;;  %v12470_v52 = vld [vmem:[#allocation10 + $0x410] ss:$8 sps:$4 sm:$0xff]   ;;  %v12490_v22 = vld [vmem:[#allocation10 + $0x4e4] ss:$8 sps:$4 sm:$0xff]  }
 0x412   :  { %v5278_v36 = vpop.f32.mrf.mxu1  ;;  %7700 = vmatprep.subr.bf16.mxu1 %v12457_v55  ;;  %v5233_v23 = vpop.f32.mrf.mxu0  ;;  %v12496_v55 = vld [vmem:[#allocation10 + $0x4d4] ss:$8 sps:$4 sm:$0xff]   ;;  %v12491_v7 = vld [vmem:[#allocation12 + $0x8f0] ss:$8 sps:$4 sm:$0xff]  }
 0x413   :  { %v5279_v40 = vadd.f32 %v5278_v36, %v5225_v59  ;;  %7241 = vmatpush1.bf16.msra.mxu0 %v12452_v38  ;;  %v13962_v47 = vadd.f32 %v5277_v28, %v13926_v30  ;;  %v12464_v30 = vld [vmem:[#allocation10 + $0x420] ss:$8 sps:$4 sm:$0xff]   ;;  %v12499_v38 = vld [vmem:[#allocation12 + $0x8e4] ss:$8 sps:$4 sm:$0xff]   ;;  %v12494_v14 = vld [vmem:[#allocation10 + $0x4d0] ss:$8 sps:$4 sm:$0xff]  }
 0x414   :  { %v5282_v33 = vpop.f32.mrf.mxu1  ;;  %6963 = vmatmul.mubr.bf16.gmra.mxu1 %v10710_v0  ;;  %7242 = vmatprep.subr.bf16.mxu0 %v12460_v2  ;;  %v12476_v59 = vld [vmem:[#allocation10 + $0x400] ss:$8 sps:$4 sm:$0xff]   ;;  %v12502_v2 = vld [vmem:[#allocation10 + $0x4c4] ss:$8 sps:$4 sm:$0xff]   ;;  %v12508_v36 = vld [vmem:[#allocation10 + $0x4b4] ss:$8 sps:$4 sm:$0xff]  }
 0x415   :  { %v5283_v50 = vadd.f32 %v5282_v33, %v5229_v54  ;;  %7701 = vmatpush1.bf16.msra.mxu1 %v12455_v61  ;;  %7728 = vmatprep.mubr.bf16.mxu1 %v13791_v29  ;;  %v13966_v21 = vadd.f32 %v5279_v40, %v13931_v16  ;;  %v12467_v29 = vld [vmem:[#allocation12 + $0x830] ss:$8 sps:$4 sm:$0xff]   ;;  %v5235_v16 = vpop.f32.mrf.mxu0  ;;  %v12485_v54 = vld [vmem:[#allocation12 + $0x800] ss:$8 sps:$4 sm:$0xff]   ;;  %v12505_v61 = vld [vmem:[#allocation12 + $0x8d4] ss:$8 sps:$4 sm:$0xff]  }
 0x416   :  { %v5284_v60 = vpop.f32.mrf.mxu1  ;;  %7702 = vmatprep.subr.bf16.mxu1 %v12463_v12  ;;  %v12497_v28 = vld [vmem:[#allocation12 + $0x8e0] ss:$8 sps:$4 sm:$0xff]   ;;  %v12503_v0 = vld [vmem:[#allocation12 + $0x8d0] ss:$8 sps:$4 sm:$0xff]   ;;  %v12511_v12 = vld [vmem:[#allocation12 + $0x8c4] ss:$8 sps:$4 sm:$0xff]  }
 0x417   :  { %v5285_v17 = vadd.f32 %v5284_v60, %v5231_v34  ;;  %7243 = vmatpush1.bf16.msra.mxu0 %v12458_v27  ;;  %v13969_v37 = vadd.f32 %v5283_v50, %v13937_v48  ;;  %v12478_v48 = vld [vmem:[#allocation10 + $0x404] ss:$8 sps:$4 sm:$0xff]   ;;  %v12500_v34 = vld [vmem:[#allocation10 + $0x4c0] ss:$8 sps:$4 sm:$0xff]   ;;  %v12506_v40 = vld [vmem:[#allocation10 + $0x4b0] ss:$8 sps:$4 sm:$0xff]  }
 0x418   :  { %v5286_v32 = vpop.f32.mrf.mxu1  ;;  %7244 = vmatprep.subr.bf16.mxu0 %v12466_v35  ;;  %v12514_v27 = vld [vmem:[#allocation10 + $0x4a4] ss:$8 sps:$4 sm:$0xff]   ;;  %v12509_v33 = vld [vmem:[#allocation12 + $0x8c0] ss:$8 sps:$4 sm:$0xff]   ;;  %v12517_v35 = vld [vmem:[#allocation12 + $0x8b4] ss:$8 sps:$4 sm:$0xff]  }
 0x419   :  { %v5287_v25 = vadd.f32 %v5286_v32, %v5233_v23  ;;  %7703 = vmatpush1.bf16.msra.mxu1 %v12461_v15  ;;  %v13972_v26 = vadd.f32 %v5285_v17, %v13939_v5  ;;  %v12481_v5 = vld [vmem:[#allocation12 + $0x814] ss:$8 sps:$4 sm:$0xff]   ;;  %v12512_v50 = vld [vmem:[#allocation10 + $0x4a0] ss:$8 sps:$4 sm:$0xff]   ;;  %v12515_v23 = vld [vmem:[#allocation12 + $0x8b0] ss:$8 sps:$4 sm:$0xff]  }
 0x41a   :  { %v5288_v31 = vpop.f32.mrf.mxu1  ;;  %7704 = vmatprep.subr.bf16.mxu1 %v12469_v53  ;;  %v12520_v15 = vld [vmem:[#allocation10 + $0x494] ss:$8 sps:$4 sm:$0xff]   ;;  %v12523_v60 = vld [vmem:[#allocation12 + $0x8a4] ss:$8 sps:$4 sm:$0xff]   ;;  %v12518_v53 = vld [vmem:[#allocation10 + $0x490] ss:$8 sps:$4 sm:$0xff]  }
 0x41b   :  { %v5289_v49 = vadd.f32 %v5288_v31, %v5235_v16  ;;  %7245 = vmatpush1.bf16.msra.mxu0 %v12464_v30  ;;  %v13975_v18 = vadd.f32 %v5287_v25, %v13941_v56  ;;  %v12482_v56 = vld [vmem:[#allocation10 + $0x4f0] ss:$8 sps:$4 sm:$0xff]   ;;  %v12526_v17 = vld [vmem:[#allocation10 + $0x484] ss:$8 sps:$4 sm:$0xff]   ;;  %v12521_v30 = vld [vmem:[#allocation12 + $0x8a0] ss:$8 sps:$4 sm:$0xff]  }
 0x41c   :  { %7246 = vmatprep.subr.bf16.mxu0 %v12472_v10  ;;  %v12529_v32 = vld [vmem:[#allocation12 + $0x894] ss:$8 sps:$4 sm:$0xff]   ;;  %v12524_v10 = vld [vmem:[#allocation10 + $0x480] ss:$8 sps:$4 sm:$0xff]   ;;  %v12535_v16 = vld [vmem:[#allocation12 + $0x884] ss:$8 sps:$4 sm:$0xff]  }
 0x41d   :  { %7705 = vmatpush1.bf16.msra.mxu1 %v12467_v29  ;;  %v13978_v13 = vadd.f32 %v5289_v49, %v13943_v19  ;;  %v12488_v19 = vld [vmem:[#allocation10 + $0x4e0] ss:$8 sps:$4 sm:$0xff]   ;;  %v12532_v25 = vld [vmem:[#allocation12 + $0x974] ss:$8 sps:$4 sm:$0xff]   ;;  %v12527_v29 = vld [vmem:[#allocation12 + $0x890] ss:$8 sps:$4 sm:$0xff]  }
 0x41e   :  { %7706 = vmatprep.subr.bf16.mxu1 %v12475_v8  ;;  %v12530_v31 = vld [vmem:[#allocation12 + $0x970] ss:$8 sps:$4 sm:$0xff]   ;;  %v12538_v8 = vld [vmem:[#allocation12 + $0x964] ss:$8 sps:$4 sm:$0xff]   ;;  %v12533_v49 = vld [vmem:[#allocation12 + $0x880] ss:$8 sps:$4 sm:$0xff]  }
 0x41f   :  { %7247 = vmatpush1.bf16.msra.mxu0 %v12470_v52 }
 0x420   :  { %7248 = vmatprep.subr.bf16.mxu0 %v12478_v48 }
 0x421   :  { %7707 = vmatpush1.bf16.msra.mxu1 %v12473_v57  ;;  %v12536_v57 = vld [vmem:[#allocation12 + $0x960] ss:$8 sps:$4 sm:$0xff]  }
 0x422   :  { %7708 = vmatprep.subr.bf16.mxu1 %v12481_v5 }
 0x423   :  { %7249 = vmatpush1.bf16.msra.mxu0 %v12476_v59  ;;  %v12541_v59 = vld [vmem:[#allocation12 + $0x954] ss:$8 sps:$4 sm:$0xff]  }
 0x424   :  { %7250 = vmatprep.subr.bf16.mxu0 %v12484_v62 }
 0x425   :  { %7709 = vmatpush1.bf16.msra.mxu1 %v12479_v24  ;;  %v12539_v24 = vld [vmem:[#allocation12 + $0x950] ss:$8 sps:$4 sm:$0xff]  }
 0x426   :  { %7710 = vmatprep.subr.bf16.mxu1 %v12487_v3  ;;  %v12544_v3 = vld [vmem:[#allocation12 + $0x944] ss:$8 sps:$4 sm:$0xff]  }
 0x427   :  { %7251 = vmatpush2.bf16.msra.mxu0 %v12482_v56  ;;  %v12545_v56 = vld [vmem:[#allocation12 + $0x930] ss:$8 sps:$4 sm:$0xff]  }
 0x428   :  { %7252 = vmatprep.subr.bf16.mxu0 %v12490_v22  ;;  %v12548_v22 = vld [vmem:[#allocation12 + $0x920] ss:$8 sps:$4 sm:$0xff]  }
 0x429   :  { %7711 = vmatpush1.bf16.msra.mxu1 %v12485_v54  ;;  %v12551_v54 = vld [vmem:[#allocation12 + $0x910] ss:$8 sps:$4 sm:$0xff]  }
 0x42a   :  { %7712 = vmatprep.subr.bf16.mxu1 %v12493_v46  ;;  %v12556_v46 = vld [vmem:[#allocation12 + $0x904] ss:$8 sps:$4 sm:$0xff]  }
 0x42b   :  { %7253 = vmatpush2.bf16.msra.mxu0 %v12488_v19  ;;  %v12554_v19 = vld [vmem:[#allocation12 + $0x900] ss:$8 sps:$4 sm:$0xff]  }
 0x42c   :  { %7254 = vmatprep.subr.bf16.mxu0 %v12496_v55  ;;  %v12557_v55 = vld [vmem:[#allocation12 + $0x9f0] ss:$8 sps:$4 sm:$0xff]  }
 0x42d   :  { %7713 = vmatpush2.bf16.msra.mxu1 %v12491_v7  ;;  %v12562_v7 = vld [vmem:[#allocation12 + $0x9e4] ss:$8 sps:$4 sm:$0xff]  }
 0x42e   :  { %7714 = vmatprep.subr.bf16.mxu1 %v12499_v38  ;;  %v12565_v38 = vld [vmem:[#allocation12 + $0x9d4] ss:$8 sps:$4 sm:$0xff]  }
 0x42f   :  { %7255 = vmatpush2.bf16.msra.mxu0 %v12494_v14  ;;  %v12563_v14 = vld [vmem:[#allocation12 + $0x9d0] ss:$8 sps:$4 sm:$0xff]  }
 0x430   :  { %7256 = vmatprep.subr.bf16.mxu0 %v12502_v2  ;;  %v12568_v2 = vld [vmem:[#allocation12 + $0x9c4] ss:$8 sps:$4 sm:$0xff]  }
 0x431   :  { %7715 = vmatpush2.bf16.msra.mxu1 %v12497_v28  ;;  %v12566_v28 = vld [vmem:[#allocation12 + $0x9c0] ss:$8 sps:$4 sm:$0xff]  }
 0x432   :  { %7716 = vmatprep.subr.bf16.mxu1 %v12505_v61  ;;  %v12571_v61 = vld [vmem:[#allocation12 + $0x9b4] ss:$8 sps:$4 sm:$0xff]  }
 0x433   :  { %7257 = vmatpush2.bf16.msra.mxu0 %v12500_v34  ;;  %v12569_v34 = vld [vmem:[#allocation12 + $0x9b0] ss:$8 sps:$4 sm:$0xff]  }
 0x434   :  { %7258 = vmatprep.subr.bf16.mxu0 %v12508_v36  ;;  %v12574_v36 = vld [vmem:[#allocation12 + $0x9a4] ss:$8 sps:$4 sm:$0xff]  }
 0x435   :  { %7717 = vmatpush2.bf16.msra.mxu1 %v12503_v0  ;;  %v12572_v0 = vld [vmem:[#allocation12 + $0x9a0] ss:$8 sps:$4 sm:$0xff]  }
 0x436   :  { %7718 = vmatprep.subr.bf16.mxu1 %v12511_v12  ;;  %v12577_v12 = vld [vmem:[#allocation12 + $0x994] ss:$8 sps:$4 sm:$0xff]  }
 0x437   :  { %7259 = vmatpush2.bf16.msra.mxu0 %v12506_v40  ;;  %v12575_v40 = vld [vmem:[#allocation12 + $0x990] ss:$8 sps:$4 sm:$0xff]  }
 0x438   :  { %7260 = vmatprep.subr.bf16.mxu0 %v12514_v27  ;;  %v12580_v27 = vld [vmem:[#allocation12 + $0x984] ss:$8 sps:$4 sm:$0xff]  }
 0x439   :  { %7719 = vmatpush2.bf16.msra.mxu1 %v12509_v33  ;;  %v12578_v33 = vld [vmem:[#allocation12 + $0x980] ss:$8 sps:$4 sm:$0xff]  }
 0x43a   :  { %7720 = vmatprep.subr.bf16.mxu1 %v12517_v35 }
 0x43b   :  { %7261 = vmatpush2.bf16.msra.mxu0 %v12512_v50 }
 0x43c   :  { %7262 = vmatprep.subr.bf16.mxu0 %v12520_v15 }
 0x43d   :  { %7721 = vmatpush2.bf16.msra.mxu1 %v12515_v23 }
 0x43e   :  { %7722 = vmatprep.subr.bf16.mxu1 %v12523_v60 }
 0x43f   :  { %7263 = vmatpush2.bf16.msra.mxu0 %v12518_v53 }
 0x440   :  { %7264 = vmatprep.subr.bf16.mxu0 %v12526_v17 }
 0x441   :  { %7723 = vmatpush2.bf16.msra.mxu1 %v12521_v30 }
 0x442   :  { %7724 = vmatprep.subr.bf16.mxu1 %v12529_v32 }
 0x443   :  { %7265 = vmatpush2.bf16.msra.mxu0 %v12524_v10 }
 0x444   :  { %7749 = vmatprep.subr.bf16.mxu0 %v12532_v25 }
 0x445   :  { %7725 = vmatpush2.bf16.msra.mxu1 %v12527_v29 }
 0x446   :  { %v5544_v52 = vpop.f32.mrf.mxu0  ;;  %7267 = vmatmul.mubr.bf16.vlgmr.msra.gmra.mxu0 %v13789_v6  ;;  %7726 = vmatprep.subr.bf16.mxu1 %v12535_v16 }
 0x447   :  { %v13982_v48 = vadd.f32 %v5544_v52, %v13956_v58  ;;  %7276 = vmatprep.mubr.bf16.mxu0 %v13793_v41  ;;  %7750 = vmatpush1.bf16.msra.mxu0 %v12530_v31  ;;  %v12542_v58 = vld [vmem:[#allocation12 + $0x940] ss:$8 sps:$4 sm:$0xff]  }
 0x448   :  { %v5546_v5 = vpop.f32.mrf.mxu0  ;;  %7751 = vmatprep.subr.bf16.mxu0 %v12538_v8 }
 0x449   :  { %v13986_v62 = vadd.f32 %v5546_v5, %v13959_v20  ;;  %7727 = vmatpush2.bf16.msra.mxu1 %v12533_v49  ;;  %v12547_v20 = vld [vmem:[#allocation12 + $0x934] ss:$8 sps:$4 sm:$0xff]  }
 0x44a   :  { %v14004_v35 = vpop.f32.mrf.mxu0 }
 0x44b   :  { %7752 = vmatpush1.bf16.msra.mxu0 %v12536_v57 }
 0x44c   :  { %7729 = vmatmul.mubr.bf16.vlgmr.msra.gmra.mxu1 %v13789_v6  ;;  %7753 = vmatprep.subr.bf16.mxu0 %v12541_v59  ;;  %v12550_v6 = vld [vmem:[#allocation12 + $0x924] ss:$8 sps:$4 sm:$0xff]   ;;  %v14006_v50 = vpop.f32.mrf.mxu0  ;;  %v14008_v15 = vpop.f32.mrf.mxu1 }
 0x44d   :  { %7738 = vmatprep.mubr.bf16.mxu1 %v13793_v41  ;;  %v12553_v41 = vld [vmem:[#allocation12 + $0x914] ss:$8 sps:$4 sm:$0xff]  }
 0x44e   :  { %7277 = vmatmul.mubr.bf16.gmra.mxu0 %v13795_v43  ;;  %v14010_v23 = vpop.f32.mrf.mxu0  ;;  %v14012_v60 = vpop.f32.mrf.mxu1 }
 0x44f   :  { %7754 = vmatpush1.bf16.msra.mxu0 %v12539_v24  ;;  %7781 = vmatprep.mubr.bf16.mxu0 %v10817_v45  ;;  %v12559_v45 = vld [vmem:[#allocation12 + $0x9f4] ss:$8 sps:$4 sm:$0xff]  }
 0x450   :  { %7755 = vmatprep.subr.bf16.mxu0 %v12544_v3  ;;  %v14014_v44 = vpop.f32.mrf.mxu0  ;;  %v14016_v1 = vpop.f32.mrf.mxu1  ;;  %v12581_v3 = vld [vmem:[#allocation15 + $0x78] sm:$0xff]  }
 0x451   :  { %11088 = vmatprep.subr.bf16.mxu1 %v12581_v3  ;;  %v12596_v3 = vld [vmem:[#allocation15 + $0x18] sm:$0xff]  }
 0x453   :  { %7756 = vmatpush1.bf16.msra.mxu0 %v12542_v58  ;;  %v12582_v58 = vld [vmem:[#allocation15 + $0x38] sm:$0xff]  }
 0x454   :  { %7739 = vmatmul.mubr.bf16.gmra.mxu1 %v13795_v43  ;;  %7757 = vmatprep.subr.bf16.mxu0 %v12547_v20  ;;  %v12560_v43 = vld [vmem:[#allocation12 + $0x9e0] ss:$8 sps:$4 sm:$0xff]   ;;  %v12583_v20 = vld [vmem:[#allocation15 + $0x70] sm:$0xff]  }
 0x455   :  { %11089 = vmatpush3.bf16.msra.mxu1 %v12582_v58  ;;  %v12599_v58 = vld [vmem:[#allocation15 + $0x50] sm:$0xff]  }
 0x456   :  { %11090 = vmatprep.subr.bf16.mxu1 %v12583_v20  ;;  %v12602_v20 = vld [vmem:[#allocation15 + $0x98] sm:$0xff]  }
 0x457   :  { %7758 = vmatpush1.bf16.msra.mxu0 %v12545_v56  ;;  %v12585_v56 = vld [vmem:[#allocation15 + $0xf8] sm:$0xff]  }
 0x458   :  { %7759 = vmatprep.subr.bf16.mxu0 %v12550_v6  ;;  %v12586_v6 = vld [vmem:[#allocation15 + $0xb8] sm:$0xff]  }
 0x45b   :  { %7760 = vmatpush1.bf16.msra.mxu0 %v12548_v22 }
 0x45c   :  { %7761 = vmatprep.subr.bf16.mxu0 %v12553_v41  ;;  %v12589_v41 = vld [vmem:[#allocation15 + $0xf0] sm:$0xff]  }
 0x45f   :  { %7762 = vmatpush1.bf16.msra.mxu0 %v12551_v54  ;;  %v12584_v54 = vld [vmem:[#allocation15 + $0x30] sm:$0xff]  }
 0x460   :  { %7763 = vmatprep.subr.bf16.mxu0 %v12556_v46  ;;  %11091 = vmatpush3.bf16.msra.mxu1 %v12584_v54  ;;  %v12600_v54 = vld [vmem:[#allocation15 + $0x10] sm:$0xff]  }
 0x463   :  { %7764 = vmatpush1.bf16.msra.mxu0 %v12554_v19  ;;  %v12587_v19 = vld [vmem:[#allocation15 + $0x68] sm:$0xff]  }
 0x464   :  { %7765 = vmatprep.subr.bf16.mxu0 %v12559_v45  ;;  %v12590_v45 = vld [vmem:[#allocation15 + $0xb0] sm:$0xff]   ;;  %11092 = vmatprep.subr.bf16.mxu1 %v12587_v19  ;;  %v12603_v19 = vld [vmem:[#allocation15 + $0x48] sm:$0xff]  }
 0x467   :  { %7766 = vmatpush2.bf16.msra.mxu0 %v12557_v55  ;;  %v12593_v55 = vld [vmem:[#allocation15 + $0xe8] sm:$0xff]  }
 0x468   :  { %7767 = vmatprep.subr.bf16.mxu0 %v12562_v7 }
 0x46b   :  { %7768 = vmatpush2.bf16.msra.mxu0 %v12560_v43  ;;  %v12588_v43 = vld [vmem:[#allocation15 + $0x28] sm:$0xff]  }
 0x46c   :  { %7769 = vmatprep.subr.bf16.mxu0 %v12565_v38  ;;  %11093 = vmatpush3.bf16.msra.mxu1 %v12588_v43 }
 0x46f   :  { %7770 = vmatpush2.bf16.msra.mxu0 %v12563_v14  ;;  %v12591_v14 = vld [vmem:[#allocation15 + $0x60] sm:$0xff]  }
 0x470   :  { %7771 = vmatprep.subr.bf16.mxu0 %v12568_v2  ;;  %v12594_v2 = vld [vmem:[#allocation15 + $0xa8] sm:$0xff]   ;;  %11094 = vmatprep.subr.bf16.mxu1 %v12591_v14 }
 0x473   :  { %7772 = vmatpush2.bf16.msra.mxu0 %v12566_v28  ;;  %v12597_v28 = vld [vmem:[#allocation15 + $0xe0] sm:$0xff]  }
 0x474   :  { %7773 = vmatprep.subr.bf16.mxu0 %v12571_v61 }
 0x477   :  { %7774 = vmatpush2.bf16.msra.mxu0 %v12569_v34  ;;  %v12592_v34 = vld [vmem:[#allocation15 + $0x20] sm:$0xff]  }
 0x478   :  { %7775 = vmatprep.subr.bf16.mxu0 %v12574_v36  ;;  %11095 = vmatpush3.bf16.msra.mxu1 %v12592_v34  ;;  %v12610_v34 = vld [vmem:[#allocation15 + $0x88] sm:$0xff]  }
 0x47b   :  { %7776 = vmatpush2.bf16.msra.mxu0 %v12572_v0  ;;  %v12595_v0 = vld [vmem:[#allocation15 + $0x58] sm:$0xff]  }
 0x47c   :  { %7777 = vmatprep.subr.bf16.mxu0 %v12577_v12  ;;  %v12598_v12 = vld [vmem:[#allocation15 + $0xa0] sm:$0xff]   ;;  %11096 = vmatprep.subr.bf16.mxu1 %v12595_v0 }
 0x47d   :  { %11097 = vmatpush3.bf16.msra.mxu1 %v12596_v3  ;;  %v12613_v0 = vld [vmem:[#allocation15 + $0xc0] sm:$0xff]  }
 0x47e   :  { %11098 = vmatprep.subr.bf16.mxu1 %v12599_v58  ;;  %v12608_v3 = vld [vmem:[#allocation15] sm:$0xff]  }
 0x47f   :  { %7778 = vmatpush2.bf16.msra.mxu0 %v12575_v40  ;;  %v12601_v40 = vld [vmem:[#allocation15 + $0xd8] sm:$0xff]  }
 0x480   :  { %7779 = vmatprep.subr.bf16.mxu0 %v12580_v27 }
 0x481   :  { %11099 = vmatpush3.bf16.msra.mxu1 %v12600_v54 }
 0x482   :  { %11100 = vmatprep.subr.bf16.mxu1 %v12603_v19 }
 0x483   :  { %7780 = vmatpush2.bf16.msra.mxu0 %v12578_v33 }
 0x484   :  { %11116 = vmatprep.subr.bf16.mxu0 %v12585_v56  ;;  %v12605_v56 = vld [vmem:[#allocation15 + $0xd0] sm:$0xff]  }
 0x486   :  { %7782 = vmatmul.mubr.bf16.vlgmr.msra.gmra.mxu0 %v10816_v51  ;;  %v14018_v51 = vpop.f32.mrf.mxu0 }
 0x487   :  { %7791 = vmatprep.mubr.bf16.mxu0 %v10819_v4  ;;  %v14020_v4 = vpop.f32.mrf.mxu1  ;;  %11117 = vmatpush3.bf16.msra.mxu0 %v12586_v6 }
 0x488   :  { %v14022_v39 = vpop.f32.mrf.mxu0  ;;  %11118 = vmatprep.subr.bf16.mxu0 %v12589_v41 }
 0x48a   :  { %v14024_v42 = vpop.f32.mrf.mxu0 }
 0x48b   :  { %11119 = vmatpush3.bf16.msra.mxu0 %v12590_v45  ;;  %v12606_v45 = vld [vmem:[#allocation15 + $0x90] sm:$0xff]  }
 0x48c   :  { %v14028_v53 = vpop.f32.mrf.mxu0  ;;  %11120 = vmatprep.subr.bf16.mxu0 %v12593_v55  ;;  %v12609_v55 = vld [vmem:[#allocation15 + $0xc8] sm:$0xff]  }
 0x48e   :  { %7792 = vmatmul.mubr.bf16.gmra.mxu0 %v10818_v11  ;;  %v14026_v11 = vpop.f32.mrf.mxu1  ;;  %v14032_v30 = vpop.f32.mrf.mxu0 }
 0x48f   :  { %11121 = vmatpush3.bf16.msra.mxu0 %v12594_v2  ;;  %v12604_v2 = vld [vmem:[#allocation15 + $0x8] sm:$0xff]  }
 0x490   :  { %v14030_v17 = vpop.f32.mrf.mxu1  ;;  %v14036_v10 = vpop.f32.mrf.mxu0  ;;  %11122 = vmatprep.subr.bf16.mxu0 %v12597_v28  ;;  %v12607_v28 = vld [vmem:[#allocation15 + $0x40] sm:$0xff]   ;;  %11101 = vmatpush3.bf16.msra.mxu1 %v12604_v2 }
 0x491   :  { %11102 = vmatprep.subr.bf16.mxu1 %v12607_v28 }
 0x492   :  { %v14034_v32 = vpop.f32.mrf.mxu1  ;;  %v14042_v16 = vpop.f32.mrf.mxu0 }
 0x493   :  { %11123 = vmatpush3.bf16.msra.mxu0 %v12598_v12 }
 0x494   :  { %v14038_v25 = vpop.f32.mrf.mxu1  ;;  %v14046_v8 = vpop.f32.mrf.mxu0  ;;  %11124 = vmatprep.subr.bf16.mxu0 %v12601_v40  ;;  %11103 = vmatpush3.bf16.msra.mxu1 %v12608_v3  ;;  %v6064_v3 = vadd.f32 %v14028_v53, %v14012_v60  ;;  %v5566_v60 = vadd.f32 %v14006_v50, %v13966_v21 }
 0x496   :  { %v14040_v29 = vpop.f32.mrf.mxu1  ;;  %v14050_v52 = vpop.f32.mrf.mxu0 }
 0x497   :  { %11125 = vmatpush3.bf16.msra.mxu0 %v12602_v20  ;;  %v12611_v20 = vld [vmem:[#allocation13 + $0x78] sm:$0xff]  }
 0x498   :  { %v14044_v31 = vpop.f32.mrf.mxu1  ;;  %v14054_v5 = vpop.f32.mrf.mxu0  ;;  %11126 = vmatprep.subr.bf16.mxu0 %v12605_v56  ;;  %v12614_v56 = vld [vmem:[#allocation15 + $0x80] sm:$0xff]   ;;  %11144 = vmatprep.subr.bf16.mxu1 %v12611_v20 }
 0x49a   :  { %v14048_v49 = vpop.f32.mrf.mxu1 }
 0x49b   :  { %11127 = vmatpush3.bf16.msra.mxu0 %v12606_v45 }
 0x49c   :  { %v14052_v57 = vpop.f32.mrf.mxu1  ;;  %11128 = vmatprep.subr.bf16.mxu0 %v12609_v55 }
 0x49e   :  { %v14058_v24 = vpop.f32.mrf.mxu1 }
 0x49f   :  { %11129 = vmatpush3.bf16.msra.mxu0 %v12610_v34 }
 0x4a0   :  { %v14062_v46 = vpop.f32.mrf.mxu1  ;;  %11130 = vmatprep.subr.bf16.mxu0 %v12613_v0  ;;  %v6062_v0 = vadd.f32 %v14024_v42, %v14008_v15  ;;  %v5567_v42 = vadd.f32 %v14010_v23, %v13969_v37  ;;  %v5570_v37 = vadd.f32 %v14022_v39, %v13978_v13 }
 0x4a2   :  { %v14066_v38 = vpop.f32.mrf.mxu1 }
 0x4a3   :  { %14425 = vst [vmem:[#allocation27_spill] sm:$0xff] %v14066_v38  ;;  %11131 = vmatpush3.bf16.msra.mxu0 %v12614_v56  ;;  %v6066_v56 = vadd.f32 %v14032_v30, %v14016_v1  ;;  %v5568_v1 = vadd.f32 %v14014_v44, %v13972_v26  ;;  %v6074_v26 = vadd.f32 %v14046_v8, %v14030_v17 }
 0x4a4   :  { %v14070_v36 = vpop.f32.mrf.mxu1  ;;  %11172 = vmatprep.subr.bf16.mxu0 %v12617_v63  ;;  %v6076_v44 = vadd.f32 %v14050_v52, %v14034_v32  ;;  %v6078_v32 = vadd.f32 %v14054_v5, %v14038_v25 }
 0x4a5   :  { %14426 = vst [vmem:[#allocation28_spill] sm:$0xff] %v14070_v36  ;;  %v6085_v52 = vadd.f32 %v6074_v26, %v5568_v1 }
 0x4ac   :  { %v14435_v1 = vld [vmem:[#allocation28_spill] sm:$0xff] }
 0x4c6   :  { %v14056_v59 = vpop.f32.mrf.mxu0 }
 0x4c8   :  { %v14060_v22 = vpop.f32.mrf.mxu0 }
 0x4ca   :  { %v14064_v7 = vpop.f32.mrf.mxu0 }
 0x4cc   :  { %v14068_v61 = vpop.f32.mrf.mxu0  ;;  %v14072_v27 = vpop.f32.mrf.mxu1 }
 0x4cd   :  { %v6955_v15 = vadd.f32 %v14072_v27, %v14056_v59 }
 0x4ce   :  { %v14074_v33 = vpop.f32.mrf.mxu0  ;;  %v6956_v6 = vpop.f32.mrf.mxu1 }
 0x4cf   :  { %v6957_v53 = vadd.f32 %v6956_v6, %v14060_v22 }
 0x4d0   :  { %v14076_v41 = vpop.f32.mrf.mxu0  ;;  %v6958_v43 = vpop.f32.mrf.mxu1 }
 0x4d1   :  { %v6959_v23 = vadd.f32 %v6958_v43, %v14064_v7 }
 0x4d2   :  { %v14078_v14 = vpop.f32.mrf.mxu0  ;;  %v6960_v12 = vpop.f32.mrf.mxu1 }
 0x4d4   :  { %v14080_v40 = vpop.f32.mrf.mxu0  ;;  %v6964_v54 = vpop.f32.mrf.mxu1 }
 0x4d5   :  { %14427 = vst [vmem:[#allocation29_spill] sm:$0xff] %v14080_v40  ;;  %v6965_v17 = vadd.f32 %v6964_v54, %v14074_v33 }
 0x4d6   :  { %v6966_v45 = vpop.f32.mrf.mxu1 }
 0x4d8   :  { %v6968_v9 = vpop.f32.mrf.mxu1 }
 0x4d9   :  { %v6969_v54 = vadd.f32 %v6968_v9, %v14078_v14 }
 0x4da   :  { %v14084_v2 = vpop.f32.mrf.mxu1 }
 0x4db   :  { %14428 = vst [vmem:[#allocation26_spill] sm:$0xff] %v14084_v2  ;;  %v5565_v2 = vadd.f32 %v14004_v35, %v13962_v47  ;;  %v6072_v47 = vadd.f32 %v14042_v16, %v14026_v11  ;;  %v5569_v35 = vadd.f32 %v14018_v51, %v13975_v18  ;;  %v6961_v16 = vadd.f32 %v6960_v12, %v14068_v61 }
 0x4dd   :  { %v6082_v50 = vadd.f32 %v6066_v56, %v5565_v2  ;;  %v6086_v27 = vadd.f32 %v6076_v44, %v5569_v35 }
 0x4e2   :  { %v14433_v56 = vld [vmem:[#allocation26_spill] sm:$0xff] }
 0x506   :  { %v7268_v58 = vpop.f32.mrf.mxu0 }
 0x508   :  { %v7270_v19 = vpop.f32.mrf.mxu0 }
 0x50a   :  { %v7272_v55 = vpop.f32.mrf.mxu0 }
 0x50c   :  { %v14082_v36 = vpop.f32.mrf.mxu0  ;;  %v7730_v40 = vpop.f32.mrf.mxu1 }
 0x50e   :  { %v14086_v28 = vpop.f32.mrf.mxu0  ;;  %v7732_v34 = vpop.f32.mrf.mxu1 }
 0x50f   :  { %14429 = vst [vmem:[#allocation30_spill] sm:$0xff] %v14086_v28  ;;  %v6068_v28 = vadd.f32 %v14036_v10, %v14020_v4  ;;  %v6081_v4 = vadd.f32 %v6064_v3, %v13986_v62  ;;  %v6460_v10 = vadd.f32 %v14048_v49, %v6082_v50  ;;  %v14431_v3 = vld [vmem:[#allocation27_spill] sm:$0xff] }
 0x510   :  { %v14088_v38 = vpop.f32.mrf.mxu0  ;;  %v7734_v63 = vpop.f32.mrf.mxu1 }
 0x511   :  { %14430 = vst [vmem:[#allocation31_spill] sm:$0xff] %v14088_v38  ;;  %v6080_v38 = vadd.f32 %v6062_v0, %v13982_v48  ;;  %v6459_v18 = vadd.f32 %v14044_v31, %v6081_v4  ;;  %v6083_v62 = vadd.f32 %v6068_v28, %v5566_v60  ;;  %v6975_v7 = vadd.f32 %v6959_v23, %v6460_v10 }
 0x512   :  { %v14094_v20 = vpop.f32.mrf.mxu0  ;;  %v7736_v30 = vpop.f32.mrf.mxu1 }
 0x513   :  { %v6458_v48 = vadd.f32 %v14040_v29, %v6080_v38  ;;  %v6084_v29 = vadd.f32 %v6072_v47, %v5567_v42  ;;  %v6461_v39 = vadd.f32 %v14052_v57, %v6083_v62  ;;  %v6974_v59 = vadd.f32 %v6957_v53, %v6459_v18 }
 0x514   :  { %v14118_v21 = vpop.f32.mrf.mxu0  ;;  %v7740_v22 = vpop.f32.mrf.mxu1  ;;  %v6463_v57 = vadd.f32 %v14062_v46, %v6085_v52  ;;  %v7289_v33 = vadd.f32 %v7272_v55, %v6975_v7  ;;  %v6464_v46 = vadd.f32 %v14431_v3, %v6086_v27  ;;  %v14432_v55 = vld [vmem:[#allocation29_spill] sm:$0xff] }
 0x515   :  { %v6973_v51 = vadd.f32 %v6955_v15, %v6458_v48  ;;  %v6462_v49 = vadd.f32 %v14058_v24, %v6084_v29  ;;  %v7288_v6 = vadd.f32 %v7270_v19, %v6974_v59  ;;  %v6976_v12 = vadd.f32 %v6961_v16, %v6461_v39 }
 0x516   :  { %v7742_v5 = vpop.f32.mrf.mxu1  ;;  %v6087_v24 = vadd.f32 %v6078_v32, %v5570_v37  ;;  %v14434_v15 = vld [vmem:[#allocation30_spill] sm:$0xff]  ;;  %v6979_v48 = vadd.f32 %v6969_v54, %v6464_v46 }
 0x517   :  { %v7287_v8 = vadd.f32 %v7268_v58, %v6973_v51  ;;  %v6967_v58 = vadd.f32 %v6966_v45, %v14076_v41  ;;  %v6977_v25 = vadd.f32 %v6965_v17, %v6462_v49  ;;  %v7290_v19 = vadd.f32 %v14082_v36, %v6976_v12 }
 0x518   :  { %v6465_v47 = vadd.f32 %v14435_v1, %v6087_v24  ;;  %v7744_v4 = vpop.f32.mrf.mxu1  ;;  %v14436_v18 = vld [vmem:[#allocation31_spill] sm:$0xff]  ;;  %v7293_v62 = vadd.f32 %v14094_v20, %v6979_v48 }
 0x519   :  { %v7291_v41 = vadd.f32 %v14434_v15, %v6977_v25  ;;  %v6978_v35 = vadd.f32 %v6967_v58, %v6463_v57 }
 0x51a   :  { %v7746_v17 = vpop.f32.mrf.mxu1 }
 0x51b   :  { %v7292_v44 = vadd.f32 %v14436_v18, %v6978_v35 }
 0x546   :  { %v7783_v11 = vpop.f32.mrf.mxu0 }
 0x547   :  { %v7784_v13 = vadd.f32 %v7783_v11, %v7730_v40 }
 0x548   :  { %v7785_v31 = vpop.f32.mrf.mxu0 }
 0x549   :  { %v7786_v38 = vadd.f32 %v7785_v31, %v7732_v34  ;;  %v14135_v61 = vadd.f32 %v7784_v13, %v7287_v8 }
 0x54a   :  { %v7787_v43 = vpop.f32.mrf.mxu0 }
 0x54b   :  { %v7788_v40 = vadd.f32 %v7787_v43, %v7734_v63  ;;  %v14140_v2 = vadd.f32 %v7786_v38, %v7288_v6  ;;  %v6971_v63 = vadd.f32 %v14433_v56, %v14432_v55  ;;  %v7830_v9 = vmul.f32 %v14135_v61, %v14135_v61 }
 0x54c   :  { %v7789_v28 = vpop.f32.mrf.mxu0 }
 0x54d   :  { %v14143_v34 = vadd.f32 %v7788_v40, %v7289_v33  ;;  %v7790_v0 = vadd.f32 %v7789_v28, %v7736_v30  ;;  %v7831_v53 = vmul.f32 %v14140_v2, %v14140_v2  ;;  %v6980_v51 = vadd.f32 %v6971_v63, %v6465_v47 }
 0x54e   :  { %v7793_v14 = vpop.f32.mrf.mxu0 }
 0x54f   :  { %v7810_v45 = vadd.f32 %v14143_v34, %v14135_v61  ;;  %v7832_v36 = vmul.f32 %v14143_v34, %v14143_v34  ;;  %v14155_v60 = vadd.f32 %v7790_v0, %v7290_v19  ;;  %v7794_v42 = vadd.f32 %v7793_v14, %v7740_v22 }
 0x550   :  { %v7795_v30 = vpop.f32.mrf.mxu0  ;;  %v7294_v22 = vadd.f32 %v14118_v21, %v6980_v51 }
 0x551   :  { %v7838_v37 = vadd.f32 %v7832_v36, %v7830_v9  ;;  %v7819_v26 = vadd.f32 %v14155_v60, %v14140_v2  ;;  %v7833_v50 = vmul.f32 %v14155_v60, %v14155_v60  ;;  %v14164_v23 = vadd.f32 %v7794_v42, %v7291_v41 }
 0x552   :  { %v7796_v11 = vadd.f32 %v7795_v30, %v7742_v5  ;;  %v7797_v10 = vpop.f32.mrf.mxu0 }
 0x553   :  { %v7847_v29 = vadd.f32 %v7833_v50, %v7831_v53  ;;  %v7811_v16 = vadd.f32 %v7810_v45, %v14164_v23  ;;  %v7834_v13 = vmul.f32 %v14164_v23, %v14164_v23  ;;  %v7798_v39 = vadd.f32 %v7797_v10, %v7744_v4 }
 0x554   :  { %v14171_v8 = vadd.f32 %v7796_v11, %v7292_v44  ;;  %v7799_v59 = vpop.f32.mrf.mxu0 }
 0x555   :  { %v7839_v31 = vadd.f32 %v7838_v37, %v7834_v13  ;;  %v14174_v32 = vadd.f32 %v7798_v39, %v7293_v62  ;;  %v7800_v20 = vadd.f32 %v7799_v59, %v7746_v17  ;;  %v7964_v39 = vld [vmem:[#allocation2 + $0x10] sm:$0x88]  ;;  %v7965_v59 = vld [vmem:[#allocation2 + $0x18] sm:$0x88] }
 0x556   :  { %v7820_v52 = vadd.f32 %v7819_v26, %v14171_v8  ;;  %v7835_v7 = vmul.f32 %v14171_v8, %v14171_v8  ;;  %v7970_v17 = vld [vmem:[#allocation2 + $0x70] sm:$0x88] }
 0x557   :  { %v7812_v38 = vadd.f32 %v7811_v16, %v14174_v32  ;;  %v7836_v49 = vmul.f32 %v14174_v32, %v14174_v32  ;;  %v14182_v27 = vadd.f32 %v7800_v20, %v7294_v22  ;;  %v7971_v22 = vld [vmem:[#allocation2 + $0x78] sm:$0x88]  ;;  %v7990_v20 = vshrl.u32 %v7965_v59, 16 }
 0x558   :  { %v7848_v6 = vadd.f32 %v7847_v29, %v7835_v7 }
 0x559   :  { %v7813_v43 = vrot.slane %v7812_v38, 4  ;;  %v7840_v57 = vadd.f32 %v7839_v31, %v7836_v49  ;;  %v7821_v21 = vadd.f32 %v7820_v52, %v14182_v27  ;;  %v7837_v33 = vmul.f32 %v14182_v27, %v14182_v27 }
 0x55a   :  { %v7977_v31 = vshrl.u32 %v7964_v39, 16 }
 0x55b   :  { %v7814_v12 = vadd.f32 %v7813_v43, %v7812_v38  ;;  %v7841_v40 = vrot.slane %v7840_v57, 4  ;;  %v7822_v58 = vrot.slane %v7821_v21, 4  ;;  %v7849_v54 = vadd.f32 %v7848_v6, %v7837_v33 }
 0x55c   :  { %v14195_v49 = vrot.slane %v7977_v31, 11 }
 0x55d   :  { %v7815_v25 = vrot.slane %v7814_v12, 2  ;;  %v7842_v5 = vadd.f32 %v7841_v40, %v7840_v57  ;;  %v7823_v28 = vadd.f32 %v7822_v58, %v7821_v21  ;;  %v7850_v24 = vrot.slane %v7849_v54, 4 }
 0x55f   :  { %v7816_v19 = vadd.f32 %v7815_v25, %v7814_v12  ;;  %v7843_v0 = vrot.slane %v7842_v5, 2  ;;  %v7824_v3 = vrot.slane %v7823_v28, 2  ;;  %v7851_v46 = vadd.f32 %v7850_v24, %v7849_v54 }
 0x561   :  { %v7817_v55 = vrot.slane %v7816_v19, 1  ;;  %v7844_v56 = vadd.f32 %v7843_v0, %v7842_v5  ;;  %v7825_v63 = vadd.f32 %v7824_v3, %v7823_v28  ;;  %v7852_v15 = vrot.slane %v7851_v46, 2 }
 0x562   :  { %v14203_v28 = vrot.slane %v7990_v20, 11 }
 0x563   :  { %v7818_v41 = vadd.f32 %v7817_v55, %v7816_v19  ;;  %v7845_v9 = vrot.slane %v7844_v56, 1  ;;  %v7826_v14 = vrot.slane %v7825_v63, 1  ;;  %v7853_v45 = vadd.f32 %v7852_v15, %v7851_v46 }
 0x565   :  { %v7828_v36 = vmul.f32 0.03125, %v7818_v41  ;;  %v7846_v42 = vadd.f32 %v7845_v9, %v7844_v56  ;;  %v7827_v1 = vadd.f32 %v7826_v14, %v7825_v63  ;;  %v7854_v47 = vrot.slane %v7853_v45, 1 }
 0x567   :  { %v7856_v35 = vmul.f32 0.03125, %v7846_v42  ;;  %v7858_v48 = vmul.f32 %v7828_v36, %v7828_v36  ;;  %v7864_v4 = vsub.f32 %v14135_v61, %v7828_v36  ;;  %v7866_v53 = vsub.f32 %v14143_v34, %v7828_v36 }
 0x568   :  { %v7868_v30 = vsub.f32 %v14164_v23, %v7828_v36  ;;  %v7870_v37 = vsub.f32 %v14174_v32, %v7828_v36  ;;  %v7829_v26 = vmul.f32 0.03125, %v7827_v1  ;;  %v7855_v50 = vadd.f32 %v7854_v47, %v7853_v45 }
 0x569   :  { %v7860_v18 = vsub.f32 %v7856_v35, %v7858_v48  ;;  %v8021_v32 = vshrl.u32 %v7970_v17, 16 }
 0x56a   :  { %v7857_v44 = vmul.f32 0.03125, %v7855_v50  ;;  %v7859_v62 = vmul.f32 %v7829_v26, %v7829_v26  ;;  %v7865_v51 = vsub.f32 %v14140_v2, %v7829_v26  ;;  %v7867_v11 = vsub.f32 %v14155_v60, %v7829_v26 }
 0x56b   :  { %v7862_v10 = vmax.f32 %v7860_v18, 0.0  ;;  %v7869_v29 = vsub.f32 %v14171_v8, %v7829_v26  ;;  %v7871_v61 = vsub.f32 %v14182_v27, %v7829_v26  ;;  %v8034_v60 = vshrl.u32 %v7971_v22, 16 }
 0x56c   :  { %v7861_v16 = vsub.f32 %v7857_v44, %v7859_v62  ;;  %v14197_v27 = vrot.slane %v8021_v32, 11 }
 0x56d   :  { %v7872_v34 = vadd.f32 1e-05, %v7862_v10  ;;  %v14205_v24 = vrot.slane %v8034_v60, 11  ;;  %v12624_v60 = vld [vmem:[#allocation13 + $0x20] sm:$0xff]  }
 0x56e   :  { %v7863_v13 = vmax.f32 %v7861_v16, 0.0 }
 0x56f   :  { %12729 = vrsqrt.f32 %v7872_v34 }
 0x570   :  { %v7873_v23 = vadd.f32 1e-05, %v7863_v13 }
 0x572   :  { %12731 = vrsqrt.f32 %v7873_v23 }
 0x57c   :  { %v12730_v2 = vpop.eup %12729 }
 0x57d   :  { %v7876_v52 = vmul.f32 %v12730_v2, %v7864_v4  ;;  %v7878_v7 = vmul.f32 %v12730_v2, %v7866_v53  ;;  %v7880_v8 = vmul.f32 %v12730_v2, %v7868_v30  ;;  %v7882_v38 = vmul.f32 %v12730_v2, %v7870_v37 }
 0x57f   :  { %v12732_v6 = vpop.eup %12731  ;;  %v7884_v43 = vmax.f32 %v7876_v52, 0.0  ;;  %v7886_v57 = vmax.f32 %v7878_v7, 0.0  ;;  %v7888_v21 = vmax.f32 %v7880_v8, 0.0  ;;  %v7890_v33 = vmax.f32 %v7882_v38, 0.0 }
 0x580   :  { %v7877_v12 = vmul.f32 %v12732_v6, %v7865_v51  ;;  %v7879_v40 = vmul.f32 %v12732_v6, %v7867_v11  ;;  %v7881_v58 = vmul.f32 %v12732_v6, %v7869_v29  ;;  %v7883_v54 = vmul.f32 %v12732_v6, %v7871_v61 }
 0x581   :  { %v14199_v25 = vpack.c.bf16 %v7886_v57, %v7884_v43  ;;  %v14201_v5 = vpack.c.bf16 %v7890_v33, %v7888_v21 }
 0x582   :  { %v7885_v19 = vmax.f32 %v7877_v12, 0.0  ;;  %v7887_v0 = vmax.f32 %v7879_v40, 0.0  ;;  %v7889_v3 = vmax.f32 %v7881_v58, 0.0  ;;  %v7891_v46 = vmax.f32 %v7883_v54, 0.0 }
 0x583   :  { %v7896_v55 = vunpack.c.l.bf16 %v14199_v25  ;;  %v7898_v56 = vunpack.c.h.bf16 %v14199_v25  ;;  %v7900_v63 = vunpack.c.l.bf16 %v14201_v5  ;;  %v7902_v15 = vunpack.c.h.bf16 %v14201_v5 }
 0x584   :  { %v14211_v41 = vpack.c.bf16 %v7887_v0, %v7885_v19  ;;  %v14213_v9 = vpack.c.bf16 %v7891_v46, %v7889_v3  ;;  %v11080_v14 = vpack.c.bf16 %v7885_v19, %v7884_v43  ;;  %v11081_v45 = vpack.c.bf16 %v7887_v0, %v7886_v57 }
 0x585   :  { %v14215_v36 = vsub.f32 %v7884_v43, %v7896_v55  ;;  %v14217_v42 = vsub.f32 %v7886_v57, %v7898_v56  ;;  %v14219_v1 = vsub.f32 %v7888_v21, %v7900_v63  ;;  %v14221_v47 = vsub.f32 %v7890_v33, %v7902_v15 }
 0x586   :  { %v7897_v35 = vunpack.c.l.bf16 %v14211_v41  ;;  %v7899_v48 = vunpack.c.h.bf16 %v14211_v41  ;;  %v7901_v4 = vunpack.c.l.bf16 %v14213_v9  ;;  %v7903_v53 = vunpack.c.h.bf16 %v14213_v9  ;;  %7936 = vst [vmem:[#allocation2 + $0x20] sm:$0xff] %v11080_v14  ;;  %7937 = vst [vmem:[#allocation2 + $0x30] sm:$0xff] %v11081_v45 }
 0x587   :  { %v11082_v30 = vpack.c.bf16 %v7889_v3, %v7888_v21  ;;  %v11083_v37 = vpack.c.bf16 %v7891_v46, %v7890_v33  ;;  %v7982_v26 = vshrl.u32 %v11080_v14, 16  ;;  %v7985_v50 = vshll.u32 %v11080_v14, 16 }
 0x588   :  { %v14227_v18 = vsub.f32 %v7885_v19, %v7897_v35  ;;  %v14229_v44 = vsub.f32 %v7887_v0, %v7899_v48  ;;  %v14231_v62 = vsub.f32 %v7889_v3, %v7901_v4  ;;  %v14233_v51 = vsub.f32 %v7891_v46, %v7903_v53  ;;  %v12612_v0 = vld [vmem:[#allocation13 + $0x38] sm:$0xff]   ;;  %v12615_v46 = vld [vmem:[#allocation13 + $0x70] sm:$0xff]  }
 0x589   :  { %7939 = vst [vmem:[#allocation2 + $0x90] sm:$0xff] %v11083_v37  ;;  %7938 = vst [vmem:[#allocation2 + $0x80] sm:$0xff] %v11082_v30  ;;  %v7984_v11 = vrot.slane %v7982_v26, 7  ;;  %v8004_v10 = vshrl.u32 %v11081_v45, 16  ;;  %v8007_v29 = vshll.u32 %v11081_v45, 16  ;;  %v8026_v61 = vshrl.u32 %v11082_v30, 16 }
 0x58a   :  { %v11084_v16 = vpack.c.bf16 %v14227_v18, %v14215_v36  ;;  %v11085_v34 = vpack.c.bf16 %v14229_v44, %v14217_v42  ;;  %v11086_v13 = vpack.c.bf16 %v14231_v62, %v14219_v1  ;;  %v11087_v23 = vpack.c.bf16 %v14233_v51, %v14221_v47 }
 0x58b   :  { %v7987_v39 = vor.u32 %v7985_v50, %v7984_v11  ;;  %v8002_v17 = vrot.slane %v7984_v11, 4  ;;  %v8006_v59 = vrot.slane %v8004_v10, 7  ;;  %v8028_v22 = vrot.slane %v8026_v61, 7  ;;  %v12619_v10 = vld [vmem:[#allocation13 + $0x68] sm:$0xff]  }
 0x58c   :  { %7960 = vst [vmem:[#allocation2 + $0x28] sm:$0xff] %v11084_v16  ;;  %7961 = vst [vmem:[#allocation2 + $0x38] sm:$0xff] %v11085_v34  ;;  %v8029_v31 = vshll.u32 %v11082_v30, 16  ;;  %v8048_v32 = vshrl.u32 %v11083_v37, 16  ;;  %v8051_v2 = vshll.u32 %v11083_v37, 16  ;;  %v7995_v20 = vshrl.u32 %v11084_v16, 16 }
 0x58d   :  { %7962 = vst [vmem:[#allocation2 + $0x88] sm:$0xff] %v11086_v13  ;;  %7963 = vst [vmem:[#allocation2 + $0x98] sm:$0xff] %v11087_v23  ;;  %v7988_v52 = vsel %vm13106_vm8, %v14195_v49, %v7987_v39  ;;  %v8009_v7 = vor.u32 %v8007_v29, %v8006_v59  ;;  %v8046_v8 = vrot.slane %v8028_v22, 4  ;;  %v7998_v38 = vshll.u32 %v11084_v16, 16  ;;  %v12616_v30 = vld [vmem:[#allocation13 + $0x30] sm:$0xff]   ;;  %v12618_v16 = vld [vmem:[#allocation13 + $0xb8] sm:$0xff]  }
 0x58e   :  { %v8031_v6 = vor.u32 %v8029_v31, %v8028_v22  ;;  %v8050_v43 = vrot.slane %v8048_v32, 7  ;;  %v7997_v57 = vrot.slane %v7995_v20, 7  ;;  %v8013_v21 = vshrl.u32 %v11085_v34, 16  ;;  %v12620_v59 = vld [vmem:[#allocation13 + $0x28] sm:$0xff]   ;;  %v12623_v32 = vld [vmem:[#allocation13 + $0x60] sm:$0xff]   ;;  %v12622_v20 = vld [vmem:[#allocation13 + $0xb0] sm:$0xff]  }
 0x58f   :  { %v8010_v33 = vsel %vm13106_vm8, %v8002_v17, %v8009_v7  ;;  %v8016_v12 = vshll.u32 %v11085_v34, 16  ;;  %v8039_v40 = vshrl.u32 %v11086_v13, 16  ;;  %v8042_v58 = vshll.u32 %v11086_v13, 16  ;;  %v12627_v7 = vld [vmem:[#allocation13 + $0x58] sm:$0xff]  }
 0x590   :  { %v14248_v54 = vcombine.low %v7988_v52, %v8010_v33  ;;  %v10897_v19 = vcombine.high %v7988_v52, %v8010_v33  ;;  %v8032_v49 = vsel %vm13106_vm8, %v14197_v27, %v8031_v6  ;;  %v8053_v3 = vor.u32 %v8051_v2, %v8050_v43  ;;  %v12625_v52 = vld [vmem:[#allocation13 + $0xe8] sm:$0xff]   ;;  %v12628_v6 = vld [vmem:[#allocation13 + $0x18] sm:$0xff]   ;;  %v12631_v43 = vld [vmem:[#allocation13 + $0x50] sm:$0xff]  }
 0x591   :  { %v8000_v55 = vor.u32 %v7998_v38, %v7997_v57  ;;  %v8011_v56 = vrot.slane %v7997_v57, 4  ;;  %v8015_v63 = vrot.slane %v8013_v21, 7  ;;  %v8041_v15 = vrot.slane %v8039_v40, 7  ;;  %v12629_v38 = vld [vmem:[#allocation13 + $0xe0] sm:$0xff]   ;;  %v12633_v21 = vld [vmem:[#allocation13 + $0xd8] sm:$0xff]   ;;  %v12632_v33 = vld [vmem:[#allocation13 + $0x10] sm:$0xff]  }
 0x592   :  { %8416 = vmatprep.mubr.bf16.mxu1 %v10897_v19  ;;  %v8054_v14 = vsel %vm13106_vm8, %v8046_v8, %v8053_v3  ;;  %v8057_v45 = vshrl.u32 %v11087_v23, 16  ;;  %v8060_v35 = vshll.u32 %v11087_v23, 16  ;;  %v12755_v13 = vpack.c.bf16 %v14229_v44, %v14227_v18  ;;  %v12626_v8 = vld [vmem:[#allocation13 + $0xa8] sm:$0xff]   ;;  %v12630_v57 = vld [vmem:[#allocation13 + $0xa0] sm:$0xff]   ;;  %v12634_v40 = vld [vmem:[#allocation13 + $0x98] sm:$0xff]  }
 0x593   :  { %8417 = vmatmul.mubr.bf16.vlgmr.msra.gmra.mxu1 %v14248_v54  ;;  %v14256_v48 = vcombine.low %v8032_v49, %v8054_v14  ;;  %v14258_v4 = vcombine.high %v8032_v49, %v8054_v14  ;;  %v8001_v27 = vsel %vm13106_vm8, %v14203_v28, %v8000_v55  ;;  %v8018_v53 = vor.u32 %v8016_v12, %v8015_v63  ;;  %v12635_v12 = vld [vmem:[#allocation13 + $0x48] sm:$0xff]   ;;  %v12638_v49 = vld [vmem:[#allocation13 + $0x90] sm:$0xff]   ;;  %v12643_v55 = vld [vmem:[#allocation15 + $0x178] sm:$0xff]  }
 0x594   :  { %11145 = vmatpush3.bf16.msra.mxu1 %v12612_v0  ;;  %v8044_v37 = vor.u32 %v8042_v58, %v8041_v15  ;;  %v8055_v26 = vrot.slane %v8041_v15, 4  ;;  %v8059_v50 = vrot.slane %v8057_v45, 7  ;;  %v12756_v23 = vpack.c.bf16 %v14217_v42, %v14215_v36  ;;  %v12637_v58 = vld [vmem:[#allocation13 + $0xd0] sm:$0xff]   ;;  %v12639_v0 = vld [vmem:[#allocation13 + $0x40] sm:$0xff]   ;;  %v12641_v3 = vld [vmem:[#allocation13 + $0xc8] sm:$0xff]  }
 0x595   :  { %8424 = vmatprep.mubr.bf16.mxu1 %v14258_v4  ;;  %11146 = vmatprep.subr.bf16.mxu1 %v12615_v46  ;;  %v8019_v11 = vsel %vm13106_vm8, %v8011_v56, %v8018_v53  ;;  %v12757_v39 = vpack.c.bf16 %v14233_v51, %v14231_v62  ;;  %v12758_v2 = vpack.c.bf16 %v14221_v47, %v14219_v1  ;;  %v12640_v46 = vld [vmem:[#allocation13] sm:$0xff]   ;;  %v12642_v56 = vld [vmem:[#allocation13 + $0x88] sm:$0xff]   ;;  %v12644_v15 = vld [vmem:[#allocation15 + $0x138] sm:$0xff]  }
 0x596   :  { %v10898_v29 = vcombine.low %v8001_v27, %v8019_v11  ;;  %v10899_v61 = vcombine.high %v8001_v27, %v8019_v11  ;;  %v8045_v28 = vsel %vm13106_vm8, %v14205_v24, %v8044_v37  ;;  %v8062_v34 = vor.u32 %v8060_v35, %v8059_v50  ;;  %v12621_v24 = vld [vmem:[#allocation13 + $0xf0] sm:$0xff]   ;;  %v12645_v63 = vld [vmem:[#allocation13 + $0xc0] sm:$0xff]   ;;  %v12649_v35 = vld [vmem:[#allocation15 + $0x1f8] sm:$0xff]  }
 0x597   :  { %v12647_v14 = vld [vmem:[#allocation15 + $0x170] sm:$0xff]   ;;  %v12646_v45 = vld [vmem:[#allocation13 + $0x80] sm:$0xff]   ;;  %v12651_v53 = vld [vmem:[#allocation15 + $0x168] sm:$0xff]  }
 0x598   :  { %11147 = vmatpush3.bf16.msra.mxu1 %v12616_v30  ;;  %8465 = vmatprep.mubr.bf16.mxu0 %v10899_v61  ;;  %v8063_v17 = vsel %vm13106_vm8, %v8055_v26, %v8062_v34  ;;  %v12648_v27 = vld [vmem:[#allocation15 + $0x130] sm:$0xff]   ;;  %v12650_v30 = vld [vmem:[#allocation15 + $0x1b8] sm:$0xff]   ;;  %v12652_v26 = vld [vmem:[#allocation15 + $0x128] sm:$0xff]  }
 0x599   :  { %8466 = vmatmul.mubr.bf16.vlgmr.msra.gmra.mxu0 %v10898_v29  ;;  %v10902_v22 = vcombine.low %v8045_v28, %v8063_v17  ;;  %v10903_v31 = vcombine.high %v8045_v28, %v8063_v17  ;;  %11148 = vmatprep.subr.bf16.mxu1 %v12619_v10  ;;  %v12653_v37 = vld [vmem:[#allocation15 + $0x1f0] sm:$0xff]   ;;  %v12655_v50 = vld [vmem:[#allocation15 + $0x160] sm:$0xff]   ;;  %v12659_v10 = vld [vmem:[#allocation15 + $0x158] sm:$0xff]  }
 0x59a   :  { %11173 = vmatpush3.bf16.msra.mxu0 %v12618_v16  ;;  %v12656_v11 = vld [vmem:[#allocation15 + $0x120] sm:$0xff]   ;;  %v12658_v29 = vld [vmem:[#allocation15 + $0x1a8] sm:$0xff]   ;;  %v12660_v16 = vld [vmem:[#allocation15 + $0x118] sm:$0xff]  }
 0x59b   :  { %8473 = vmatprep.mubr.bf16.mxu0 %v10903_v31  ;;  %8425 = vmatmul.mubr.bf16.gmra.mxu1 %v14256_v48  ;;  %v12661_v61 = vld [vmem:[#allocation15 + $0x1e0] sm:$0xff]   ;;  %v12663_v28 = vld [vmem:[#allocation15 + $0x150] sm:$0xff]   ;;  %v12666_v31 = vld [vmem:[#allocation15 + $0x198] sm:$0xff]  }
 0x59c   :  { %11149 = vmatpush3.bf16.msra.mxu1 %v12620_v59  ;;  %8610 = vmatprep.mubr.bf16.mxu1 %v10897_v19  ;;  %v12636_v19 = vld [vmem:[#allocation13 + $0x8] sm:$0xff]   ;;  %v12664_v34 = vld [vmem:[#allocation15 + $0x110] sm:$0xff]   ;;  %v9208_v17 = vld [vmem:[#allocation2 + $0x20] sm:$0xff] }
 0x59d   :  { %11174 = vmatprep.subr.bf16.mxu0 %v12621_v24  ;;  %11150 = vmatprep.subr.bf16.mxu1 %v12623_v32  ;;  %v9210_v59 = vld [vmem:[#allocation2 + $0x30] sm:$0xff]  ;;  %v9221_v32 = vshrl.u32 %v9208_v17, 16  ;;  %v12668_v18 = vld [vmem:[#allocation15 + $0x108] sm:$0xff]   ;;  %v12671_v44 = vld [vmem:[#allocation15 + $0x140] sm:$0xff]  }
 0x59e   :  { %11175 = vmatpush3.bf16.msra.mxu0 %v12622_v20  ;;  %v12669_v24 = vld [vmem:[#allocation15 + $0x1d0] sm:$0xff]   ;;  %v9224_v20 = vshll.u32 %v9208_v17, 16  ;;  %v9214_v36 = vld [vmem:[#allocation2 + $0x80] sm:$0xff]  ;;  %v12698_v1 = vld [vmem:[#allocation15 + $0x218] sm:$0xff]  }
 0x59f   :  { %11176 = vmatprep.subr.bf16.mxu0 %v12625_v52  ;;  %v9230_v52 = vshll.u32 %v9210_v59, 16  ;;  %v9216_v42 = vld [vmem:[#allocation2 + $0x90] sm:$0xff]  ;;  %v12693_v62 = vld [vmem:[#allocation15 + $0x260] sm:$0xff]   ;;  %v9269_v51 = vshrl.u32 %v9214_v36, 16 }
 0x5a0   :  { %11151 = vmatpush3.bf16.msra.mxu1 %v12624_v60  ;;  %v9248_v60 = vshrl.u32 %v9210_v59, 16 }
 0x5a1   :  { %8474 = vmatmul.mubr.bf16.gmra.mxu0 %v10902_v22  ;;  %11152 = vmatprep.subr.bf16.mxu1 %v12627_v7  ;;  %v12667_v22 = vld [vmem:[#allocation15 + $0x148] sm:$0xff]  }
 0x5a2   :  { %11177 = vmatpush3.bf16.msra.mxu0 %v12626_v8  ;;  %8808 = vmatprep.mubr.bf16.mxu0 %v14211_v41  ;;  %v12673_v7 = vld [vmem:[#allocation15 + $0x1c8] sm:$0xff]   ;;  %v9223_v8 = vrot.slane %v9221_v32, 4 }
 0x5a3   :  { %11178 = vmatprep.subr.bf16.mxu0 %v12629_v38  ;;  %v9226_v38 = vrot.slane %v9224_v20, 5  ;;  %v12699_v32 = vld [vmem:[#allocation13 + $0x148] sm:$0xff]  }
 0x5a4   :  { %11153 = vmatpush3.bf16.msra.mxu1 %v12628_v6  ;;  %v9232_v6 = vrot.slane %v9230_v52, 5  ;;  %v12701_v52 = vld [vmem:[#allocation15 + $0x250] sm:$0xff]  }
 0x5a5   :  { %11154 = vmatprep.subr.bf16.mxu1 %v12631_v43  ;;  %v9250_v43 = vrot.slane %v9248_v60, 4 }
 0x5a6   :  { %11179 = vmatpush3.bf16.msra.mxu0 %v12630_v57  ;;  %v12672_v57 = vld [vmem:[#allocation15 + $0x100] sm:$0xff]  }
 0x5a7   :  { %11180 = vmatprep.subr.bf16.mxu0 %v12633_v21  ;;  %v9212_v21 = vld [vmem:[#allocation2 + $0x40] sm:$0x11] }
 0x5a8   :  { %11155 = vmatpush3.bf16.msra.mxu1 %v12632_v33  ;;  %v12675_v33 = vld [vmem:[#allocation13 + $0x178] sm:$0xff]  }
 0x5a9   :  { %11156 = vmatprep.subr.bf16.mxu1 %v12635_v12  ;;  %v12674_v12 = vld [vmem:[#allocation15 + $0x188] sm:$0xff]  }
 0x5aa   :  { %11181 = vmatpush3.bf16.msra.mxu0 %v12634_v40  ;;  %v12677_v40 = vld [vmem:[#allocation15 + $0x1c0] sm:$0xff]  }
 0x5ab   :  { %11182 = vmatprep.subr.bf16.mxu0 %v12637_v58  ;;  %v9227_v58 = vor.u32 %v9226_v38, %v9223_v8  ;;  %v12703_v8 = vld [vmem:[#allocation13 + $0x140] sm:$0xff]   ;;  %v12702_v38 = vld [vmem:[#allocation15 + $0x210] sm:$0xff]  }
 0x5ac   :  { %11157 = vmatpush3.bf16.msra.mxu1 %v12636_v19  ;;  %v9251_v19 = vor.u32 %v9250_v43, %v9232_v6  ;;  %v9213_v43 = vld [vmem:[#allocation2 + $0x48] sm:$0x11] }
 0x5ad   :  { %11158 = vmatprep.subr.bf16.mxu1 %v12639_v0  ;;  %v9254_v0 = vshll.u32 %v9212_v21, 16 }
 0x5ae   :  { %11183 = vmatpush3.bf16.msra.mxu0 %v12638_v49  ;;  %v12676_v49 = vld [vmem:[#allocation13 + $0x138] sm:$0xff]  }
 0x5af   :  { %11184 = vmatprep.subr.bf16.mxu0 %v12641_v3  ;;  %v12679_v3 = vld [vmem:[#allocation13 + $0x170] sm:$0xff]  }
 0x5b0   :  { %11159 = vmatpush3.bf16.msra.mxu1 %v12640_v46  ;;  %v12678_v46 = vld [vmem:[#allocation15 + $0x180] sm:$0xff]  }
 0x5b1   :  { %11200 = vmatprep.subr.bf16.mxu1 %v12643_v55  ;;  %v12681_v55 = vld [vmem:[#allocation15 + $0x278] sm:$0xff]  }
 0x5b2   :  { %11185 = vmatpush3.bf16.msra.mxu0 %v12642_v56  ;;  %v9228_v56 = vrot.slane %v9227_v58, 4 }
 0x5b3   :  { %8611 = vmatmul.mubr.bf16.vlgmr.msra.gmra.mxu1 %v14248_v54  ;;  %11186 = vmatprep.subr.bf16.mxu0 %v12645_v63  ;;  %v12654_v54 = vld [vmem:[#allocation15 + $0x1b0] sm:$0xff]   ;;  %v9252_v63 = vrot.slane %v9251_v19, 4 }
 0x5b4   :  { %8618 = vmatprep.mubr.bf16.mxu1 %v14258_v4  ;;  %11201 = vmatpush3.bf16.msra.mxu1 %v12644_v15  ;;  %v12657_v4 = vld [vmem:[#allocation15 + $0x1e8] sm:$0xff]   ;;  %v9256_v15 = vrot.slane %v9254_v0, 5  ;;  %v12704_v0 = vld [vmem:[#allocation13 + $0x100] sm:$0xff]  }
 0x5b5   :  { %11202 = vmatprep.subr.bf16.mxu1 %v12647_v14  ;;  %v12680_v14 = vld [vmem:[#allocation13 + $0x130] sm:$0xff]  }
 0x5b6   :  { %11187 = vmatpush3.bf16.msra.mxu0 %v12646_v45  ;;  %v12683_v45 = vld [vmem:[#allocation13 + $0x168] sm:$0xff]  }
 0x5b7   :  { %11228 = vmatprep.subr.bf16.mxu0 %v12649_v35  ;;  %v12682_v35 = vld [vmem:[#allocation15 + $0x238] sm:$0xff]  }
 0x5b8   :  { %11203 = vmatpush3.bf16.msra.mxu1 %v12648_v27 }
 0x5b9   :  { %8809 = vmatmul.mubr.bf16.vlgmr.msra.gmra.mxu0 %v14199_v25  ;;  %11204 = vmatprep.subr.bf16.mxu1 %v12651_v53  ;;  %v14295_v53 = vsel %vm13216_vm11, %v9228_v56, %v9232_v6 }
 0x5ba   :  { %8816 = vmatprep.mubr.bf16.mxu0 %v14213_v9  ;;  %11229 = vmatpush3.bf16.msra.mxu0 %v12650_v30  ;;  %v12685_v30 = vld [vmem:[#allocation15 + $0x270] sm:$0xff]  }
 0x5bb   :  { %8619 = vmatmul.mubr.bf16.gmra.mxu1 %v14256_v48  ;;  %11230 = vmatprep.subr.bf16.mxu0 %v12653_v37  ;;  %v12662_v48 = vld [vmem:[#allocation15 + $0x1a0] sm:$0xff]   ;;  %v12684_v37 = vld [vmem:[#allocation13 + $0x128] sm:$0xff]  }
 0x5bc   :  { %11205 = vmatpush3.bf16.msra.mxu1 %v12652_v26  ;;  %9138 = vmatprep.mubr.bf16.mxu1 %v14211_v41  ;;  %v12665_v41 = vld [vmem:[#allocation15 + $0x1d8] sm:$0xff]  }
 0x5bd   :  { %11206 = vmatprep.subr.bf16.mxu1 %v12655_v50  ;;  %v12686_v50 = vld [vmem:[#allocation15 + $0x230] sm:$0xff]  }
 0x5be   :  { %11231 = vmatpush3.bf16.msra.mxu0 %v12654_v54  ;;  %v12689_v54 = vld [vmem:[#allocation15 + $0x268] sm:$0xff]  }
 0x5bf   :  { %11232 = vmatprep.subr.bf16.mxu0 %v12657_v4  ;;  %v12688_v4 = vld [vmem:[#allocation13 + $0x120] sm:$0xff]  }
 0x5c0   :  { %11207 = vmatpush3.bf16.msra.mxu1 %v12656_v11  ;;  %v12690_v11 = vld [vmem:[#allocation15 + $0x228] sm:$0xff]  }
 0x5c1   :  { %8817 = vmatmul.mubr.bf16.gmra.mxu0 %v14201_v5  ;;  %11208 = vmatprep.subr.bf16.mxu1 %v12659_v10  ;;  %v9278_v10 = vshll.u32 %v9216_v42, 16 }
 0x5c2   :  { %11233 = vmatpush3.bf16.msra.mxu0 %v12658_v29  ;;  %9187 = vmatprep.mubr.bf16.mxu0 %v12755_v13  ;;  %v12670_v13 = vld [vmem:[#allocation15 + $0x190] sm:$0xff]   ;;  %v9296_v29 = vshrl.u32 %v9216_v42, 16 }
 0x5c3   :  { %11234 = vmatprep.subr.bf16.mxu0 %v12661_v61  ;;  %v12692_v61 = vld [vmem:[#allocation13 + $0x118] sm:$0xff]   ;;  %v9280_v17 = vrot.slane %v9278_v10, 5 }
 0x5c4   :  { %11209 = vmatpush3.bf16.msra.mxu1 %v12660_v16  ;;  %v12694_v16 = vld [vmem:[#allocation15 + $0x220] sm:$0xff]   ;;  %v9298_v59 = vrot.slane %v9296_v29, 4  ;;  %v9217_v10 = vld [vmem:[#allocation2 + $0x98] sm:$0xff] }
 0x5c5   :  { %11210 = vmatprep.subr.bf16.mxu1 %v12663_v28  ;;  %v9218_v28 = vld [vmem:[#allocation2 + $0xa0] sm:$0x11]  ;;  %v12717_v29 = vld [vmem:[#allocation15 + $0x2d8] sm:$0xff]  }
 0x5c6   :  { %11235 = vmatpush3.bf16.msra.mxu0 %v12662_v48  ;;  %v12697_v48 = vld [vmem:[#allocation15 + $0x258] sm:$0xff]   ;;  %v9302_v47 = vshll.u32 %v9218_v28, 16  ;;  %v9306_v28 = vshrl.u32 %v9217_v10, 16 }
 0x5c7   :  { %11236 = vmatprep.subr.bf16.mxu0 %v12665_v41  ;;  %v9271_v41 = vrot.slane %v9269_v51, 4  ;;  %v12716_v51 = vld [vmem:[#allocation15 + $0x2a0] sm:$0xff]  }
 0x5c8   :  { %11211 = vmatpush3.bf16.msra.mxu1 %v12664_v34  ;;  %v9304_v6 = vrot.slane %v9302_v47, 5 }
 0x5c9   :  { %11212 = vmatprep.subr.bf16.mxu1 %v12667_v22  ;;  %v9209_v22 = vld [vmem:[#allocation2 + $0x28] sm:$0xff] }
 0x5ca   :  { %11237 = vmatpush3.bf16.msra.mxu0 %v12666_v31  ;;  %v12696_v31 = vld [vmem:[#allocation13 + $0x110] sm:$0xff]   ;;  %v9238_v20 = vshll.u32 %v9209_v22, 16 }
 0x5cb   :  { %11238 = vmatprep.subr.bf16.mxu0 %v12669_v24  ;;  %v9211_v24 = vld [vmem:[#allocation2 + $0x38] sm:$0xff] }
 0x5cc   :  { %11213 = vmatpush3.bf16.msra.mxu1 %v12668_v18  ;;  %v9299_v18 = vor.u32 %v9298_v59, %v9280_v17  ;;  %v9240_v21 = vrot.slane %v9238_v20, 5  ;;  %v12722_v20 = vld [vmem:[#allocation15 + $0x288] sm:$0xff]  }
 0x5cd   :  { %11214 = vmatprep.subr.bf16.mxu1 %v12671_v44  ;;  %v9244_v44 = vshll.u32 %v9211_v24, 16 }
 0x5ce   :  { %11239 = vmatpush3.bf16.msra.mxu0 %v12670_v13  ;;  %v9258_v13 = vshrl.u32 %v9211_v24, 16  ;;  %v9219_v24 = vld [vmem:[#allocation2 + $0xa8] sm:$0x11] }
 0x5cf   :  { %11240 = vmatprep.subr.bf16.mxu0 %v12673_v7  ;;  %v12700_v7 = vld [vmem:[#allocation13 + $0x108] sm:$0xff]   ;;  %v9246_v58 = vrot.slane %v9244_v44, 5 }
 0x5d0   :  { %11215 = vmatpush3.bf16.msra.mxu1 %v12672_v57  ;;  %v9260_v19 = vrot.slane %v9258_v13, 4  ;;  %v12724_v13 = vld [vmem:[#allocation15 + $0x280] sm:$0xff]  }
 0x5d1   :  { %11256 = vmatprep.subr.bf16.mxu1 %v12675_v33  ;;  %v12705_v33 = vld [vmem:[#allocation15 + $0x248] sm:$0xff]  }
 0x5d2   :  { %11241 = vmatpush3.bf16.msra.mxu0 %v12674_v12 }
 0x5d3   :  { %9139 = vmatmul.mubr.bf16.vlgmr.msra.gmra.mxu1 %v14199_v25  ;;  %11242 = vmatprep.subr.bf16.mxu0 %v12677_v40  ;;  %v14299_v25 = vsel %vm13216_vm11, %v9252_v63, %v9256_v15  ;;  %v9300_v40 = vrot.slane %v9299_v18, 4  ;;  %v12709_v63 = vld [vmem:[#allocation15 + $0x240] sm:$0xff]  }
 0x5d4   :  { %9146 = vmatprep.mubr.bf16.mxu1 %v14213_v9  ;;  %11257 = vmatpush3.bf16.msra.mxu1 %v12676_v49  ;;  %v12687_v9 = vld [vmem:[#allocation13 + $0x160] sm:$0xff]   ;;  %v11009_v26 = vcombine.high %v14295_v53, %v14299_v25  ;;  %v12707_v49 = vld [vmem:[#allocation15 + $0x2f8] sm:$0xff]  }
 0x5d5   :  { %11258 = vmatprep.subr.bf16.mxu1 %v12679_v3  ;;  %v12706_v3 = vld [vmem:[#allocation15 + $0x208] sm:$0xff]   ;;  %v9305_v56 = vsel %vm13216_vm11, %v9300_v40, %v9304_v6 }
 0x5d6   :  { %11243 = vmatpush3.bf16.msra.mxu0 %v12678_v46  ;;  %v9264_v46 = vshll.u32 %v9213_v43, 16 }
 0x5d7   :  { %11284 = vmatprep.subr.bf16.mxu0 %v12681_v55 }
 0x5d8   :  { %11259 = vmatpush3.bf16.msra.mxu1 %v12680_v14  ;;  %v9261_v14 = vor.u32 %v9260_v19, %v9246_v58 }
 0x5d9   :  { %9188 = vmatmul.mubr.bf16.vlgmr.msra.gmra.mxu0 %v12756_v23  ;;  %11260 = vmatprep.subr.bf16.mxu1 %v12683_v45  ;;  %v12691_v23 = vld [vmem:[#allocation13 + $0x158] sm:$0xff]  }
 0x5da   :  { %9195 = vmatprep.mubr.bf16.mxu0 %v12757_v39  ;;  %11285 = vmatpush3.bf16.msra.mxu0 %v12682_v35  ;;  %v9272_v39 = vshll.u32 %v9214_v36, 16  ;;  %v12708_v45 = vld [vmem:[#allocation15 + $0x2b8] sm:$0xff]   ;;  %v11008_v35 = vcombine.low %v14295_v53, %v14299_v25  ;;  %v12713_v36 = vld [vmem:[#allocation15 + $0x2e8] sm:$0xff]  }
 0x5db   :  { %9147 = vmatmul.mubr.bf16.gmra.mxu1 %v14201_v5  ;;  %11286 = vmatprep.subr.bf16.mxu0 %v12685_v30  ;;  %v12695_v5 = vld [vmem:[#allocation13 + $0x150] sm:$0xff]   ;;  %v12714_v25 = vld [vmem:[#allocation15 + $0x2a8] sm:$0xff]  }
 0x5dc   :  { %11261 = vmatpush3.bf16.msra.mxu1 %v12684_v37  ;;  %9493 = vmatprep.mubr.bf16.mxu1 %v11009_v26  ;;  %v9274_v34 = vrot.slane %v9272_v39, 5  ;;  %v12711_v30 = vld [vmem:[#allocation15 + $0x2f0] sm:$0xff]   ;;  %v9215_v39 = vld [vmem:[#allocation2 + $0x88] sm:$0xff] }
 0x5dd   :  { %11262 = vmatprep.subr.bf16.mxu1 %v12687_v9  ;;  %v12710_v9 = vld [vmem:[#allocation15 + $0x200] sm:$0xff]  }
 0x5de   :  { %11287 = vmatpush3.bf16.msra.mxu0 %v12686_v50  ;;  %v9275_v60 = vor.u32 %v9274_v34, %v9271_v41  ;;  %v9262_v50 = vrot.slane %v9261_v14, 4  ;;  %v12719_v41 = vld [vmem:[#allocation15 + $0x2d0] sm:$0xff]  }
 0x5df   :  { %11288 = vmatprep.subr.bf16.mxu0 %v12689_v54  ;;  %v9266_v54 = vrot.slane %v9264_v46, 5 }
 0x5e0   :  { %11263 = vmatpush3.bf16.msra.mxu1 %v12688_v4  ;;  %v9276_v12 = vrot.slane %v9275_v60, 4  ;;  %v12712_v4 = vld [vmem:[#allocation15 + $0x2b0] sm:$0xff]  }
 0x5e1   :  { %9196 = vmatmul.mubr.bf16.gmra.mxu0 %v12758_v2  ;;  %11264 = vmatprep.subr.bf16.mxu1 %v12691_v23  ;;  %v9235_v2 = vshrl.u32 %v9209_v22, 16  ;;  %v9267_v53 = vsel %vm13216_vm11, %v9262_v50, %v9266_v54  ;;  %v9308_v22 = vrot.slane %v9306_v28, 4 }
 0x5e2   :  { %11289 = vmatpush3.bf16.msra.mxu0 %v12690_v11  ;;  %9819 = vmatprep.mubr.bf16.mxu0 %v11009_v26  ;;  %v9281_v55 = vsel %vm13216_vm11, %v9276_v12, %v9280_v17  ;;  %v12715_v11 = vld [vmem:[#allocation15 + $0x2e0] sm:$0xff]  }
 0x5e3   :  { %11290 = vmatprep.subr.bf16.mxu0 %v12693_v62  ;;  %v9237_v57 = vrot.slane %v9235_v2, 4  ;;  %v11011_v37 = vcombine.high %v9281_v55, %v9305_v56  ;;  %v11010_v23 = vcombine.low %v9281_v55, %v9305_v56  ;;  %v9312_v2 = vshll.u32 %v9219_v24, 16 }
 0x5e4   :  { %11265 = vmatpush3.bf16.msra.mxu1 %v12692_v61  ;;  %v9283_v61 = vshrl.u32 %v9215_v39, 16 }
 0x5e5   :  { %11266 = vmatprep.subr.bf16.mxu1 %v12695_v5  ;;  %v9241_v15 = vor.u32 %v9240_v21, %v9237_v57  ;;  %v9286_v5 = vshll.u32 %v9215_v39, 16  ;;  %v9314_v44 = vrot.slane %v9312_v2, 5 }
 0x5e6   :  { %11291 = vmatpush3.bf16.msra.mxu0 %v12694_v16  ;;  %v9292_v16 = vshll.u32 %v9217_v10, 16  ;;  %v9285_v34 = vrot.slane %v9283_v61, 4 }
 0x5e7   :  { %11292 = vmatprep.subr.bf16.mxu0 %v12697_v48  ;;  %v9242_v26 = vrot.slane %v9241_v15, 4  ;;  %v12718_v48 = vld [vmem:[#allocation15 + $0x298] sm:$0xff]   ;;  %v9288_v17 = vrot.slane %v9286_v5, 5 }
 0x5e8   :  { %11267 = vmatpush3.bf16.msra.mxu1 %v12696_v31  ;;  %v9294_v59 = vrot.slane %v9292_v16, 5  ;;  %v12720_v31 = vld [vmem:[#allocation15 + $0x290] sm:$0xff]  }
 0x5e9   :  { %11268 = vmatprep.subr.bf16.mxu1 %v12699_v32  ;;  %v9247_v42 = vsel %vm13216_vm11, %v9242_v26, %v9246_v58  ;;  %v12721_v32 = vld [vmem:[#allocation15 + $0x2c8] sm:$0xff]  }
 0x5ea   :  { %11293 = vmatpush3.bf16.msra.mxu0 %v12698_v1  ;;  %v11029_v62 = vcombine.high %v9247_v42, %v9267_v53  ;;  %v9289_v1 = vor.u32 %v9288_v17, %v9285_v34  ;;  %v9309_v47 = vor.u32 %v9308_v22, %v9294_v59 }
 0x5eb   :  { %11294 = vmatprep.subr.bf16.mxu0 %v12701_v52  ;;  %v12723_v52 = vld [vmem:[#allocation15 + $0x2c0] sm:$0xff]  }
 0x5ec   :  { %11269 = vmatpush3.bf16.msra.mxu1 %v12700_v7  ;;  %v9290_v60 = vrot.slane %v9289_v1, 4  ;;  %v9310_v18 = vrot.slane %v9309_v47, 4 }
 0x5ed   :  { %11270 = vmatprep.subr.bf16.mxu1 %v12703_v8 }
 0x5ee   :  { %11295 = vmatpush3.bf16.msra.mxu0 %v12702_v38  ;;  %v9295_v7 = vsel %vm13216_vm11, %v9290_v60, %v9294_v59  ;;  %v9315_v8 = vsel %vm13216_vm11, %v9310_v18, %v9314_v44  ;;  %v11028_v38 = vcombine.low %v9247_v42, %v9267_v53 }
 0x5ef   :  { %11296 = vmatprep.subr.bf16.mxu0 %v12705_v33  ;;  %v11031_v6 = vcombine.high %v9295_v7, %v9315_v8  ;;  %v11030_v43 = vcombine.low %v9295_v7, %v9315_v8 }
 0x5f0   :  { %11271 = vmatpush3.bf16.msra.mxu1 %v12704_v0 }
 0x5f1   :  { %11312 = vmatprep.subr.bf16.mxu1 %v12707_v49 }
 0x5f2   :  { %11297 = vmatpush3.bf16.msra.mxu0 %v12706_v3 }
 0x5f3   :  { %9494 = vmatmul.mubr.bf16.vlgmr.msra.gmra.mxu1 %v11008_v35  ;;  %11298 = vmatprep.subr.bf16.mxu0 %v12709_v63 }
 0x5f4   :  { %9501 = vmatprep.mubr.bf16.mxu1 %v11011_v37  ;;  %11313 = vmatpush3.bf16.msra.mxu1 %v12708_v45 }
 0x5f5   :  { %11314 = vmatprep.subr.bf16.mxu1 %v12711_v30 }
 0x5f6   :  { %11299 = vmatpush3.bf16.msra.mxu0 %v12710_v9 }
 0x5f8   :  { %11315 = vmatpush3.bf16.msra.mxu1 %v12712_v4 }
 0x5f9   :  { %9820 = vmatmul.mubr.bf16.vlgmr.msra.gmra.mxu0 %v11008_v35  ;;  %11316 = vmatprep.subr.bf16.mxu1 %v12713_v36 }
 0x5fa   :  { %9827 = vmatprep.mubr.bf16.mxu0 %v11011_v37 }
 0x5fb   :  { %9502 = vmatmul.mubr.bf16.gmra.mxu1 %v11010_v23 }
 0x5fc   :  { %11317 = vmatpush3.bf16.msra.mxu1 %v12714_v25  ;;  %9868 = vmatprep.mubr.bf16.mxu1 %v11029_v62 }
 0x5fd   :  { %11318 = vmatprep.subr.bf16.mxu1 %v12715_v11 }
 0x600   :  { %11319 = vmatpush3.bf16.msra.mxu1 %v12716_v51 }
 0x601   :  { %9828 = vmatmul.mubr.bf16.gmra.mxu0 %v11010_v23  ;;  %11320 = vmatprep.subr.bf16.mxu1 %v12717_v29 }
 0x604   :  { %11321 = vmatpush3.bf16.msra.mxu1 %v12718_v48 }
 0x605   :  { %11322 = vmatprep.subr.bf16.mxu1 %v12719_v41 }
 0x608   :  { %11323 = vmatpush3.bf16.msra.mxu1 %v12720_v31 }
 0x609   :  { %11324 = vmatprep.subr.bf16.mxu1 %v12721_v32 }
 0x60c   :  { %11325 = vmatpush3.bf16.msra.mxu1 %v12722_v20 }
 0x60d   :  { %11326 = vmatprep.subr.bf16.mxu1 %v12723_v52 }
 0x610   :  { %11327 = vmatpush3.bf16.msra.mxu1 %v12724_v13 }
 0x613   :  { %9869 = vmatmul.mubr.bf16.vlgmr.msra.gmra.mxu1 %v11028_v38 }
 0x614   :  { %9876 = vmatprep.mubr.bf16.mxu1 %v11031_v6 }
 0x61b   :  { %9877 = vmatmul.mubr.bf16.gmra.mxu1 %v11030_v43 }
 0x653   :  { %v11104_v57 = vpop.f32.mrf.mxu1 }
 0x655   :  { %v11105_v21 = vpop.f32.mrf.mxu1 }
 0x656   :  { %v14327_v33 = vadd.f32 %v11105_v21, %v11104_v57 }
 0x657   :  { %v11107_v12 = vpop.f32.mrf.mxu1 }
 0x659   :  { %v11108_v40 = vpop.f32.mrf.mxu1  ;;  %v11132_v58 = vpop.f32.mrf.mxu0 }
 0x65a   :  { %v11109_v6 = vadd.f32 %v11108_v40, %v11107_v12 }
 0x65b   :  { %v14329_v19 = vpop.f32.mrf.mxu1  ;;  %v11133_v0 = vpop.f32.mrf.mxu0 }
 0x65c   :  { %14439 = vst [vmem:[#allocation33_spill] sm:$0xff] %v14329_v19  ;;  %v11134_v7 = vadd.f32 %v11133_v0, %v11132_v58 }
 0x65d   :  { %v14331_v49 = vpop.f32.mrf.mxu1  ;;  %v11135_v27 = vpop.f32.mrf.mxu0 }
 0x65e   :  { %14440 = vst [vmem:[#allocation32_spill] sm:$0xff] %v14331_v49 }
 0x65f   :  { %v14333_v3 = vpop.f32.mrf.mxu1  ;;  %v11136_v46 = vpop.f32.mrf.mxu0 }
 0x660   :  { %14441 = vst [vmem:[#allocation34_spill] sm:$0xff] %v14333_v3  ;;  %v11137_v8 = vadd.f32 %v11136_v46, %v11135_v27 }
 0x661   :  { %v14335_v55 = vpop.f32.mrf.mxu1  ;;  %v11138_v56 = vpop.f32.mrf.mxu0 }
 0x662   :  { %14442 = vst [vmem:[#allocation22_spill] sm:$0xff] %v14335_v55 }
 0x663   :  { %v11139_v15 = vpop.f32.mrf.mxu0 }
 0x665   :  { %v11141_v45 = vpop.f32.mrf.mxu0  ;;  %v14451_v0 = vld [vmem:[#allocation32_spill] sm:$0xff] }
 0x667   :  { %v11142_v30 = vpop.f32.mrf.mxu0  ;;  %v14452_v27 = vld [vmem:[#allocation34_spill] sm:$0xff] }
 0x669   :  { %v14453_v46 = vld [vmem:[#allocation22_spill] sm:$0xff] }
 0x66a   :  { %v11115_v12 = vadd.f32 %v14453_v46, %v14452_v27 }
 0x673   :  { %v11160_v63 = vpop.f32.mrf.mxu1 }
 0x675   :  { %v11161_v14 = vpop.f32.mrf.mxu1 }
 0x677   :  { %v11163_v35 = vpop.f32.mrf.mxu1 }
 0x679   :  { %v11164_v37 = vpop.f32.mrf.mxu1  ;;  %v11188_v9 = vpop.f32.mrf.mxu0 }
 0x67a   :  { %v11165_v43 = vadd.f32 %v11164_v37, %v11163_v35 }
 0x67b   :  { %v11166_v26 = vpop.f32.mrf.mxu1  ;;  %v11189_v50 = vpop.f32.mrf.mxu0 }
 0x67c   :  { %v11190_v40 = vadd.f32 %v11189_v50, %v11188_v9 }
 0x67d   :  { %v11167_v54 = vpop.f32.mrf.mxu1  ;;  %v11191_v4 = vpop.f32.mrf.mxu0 }
 0x67e   :  { %v11168_v35 = vadd.f32 %v11167_v54, %v11166_v26 }
 0x67f   :  { %v14337_v36 = vpop.f32.mrf.mxu1  ;;  %v11192_v42 = vpop.f32.mrf.mxu0 }
 0x680   :  { %14443 = vst [vmem:[#allocation25_spill] sm:$0xff] %v14337_v36  ;;  %v11193_v36 = vadd.f32 %v11192_v42, %v11191_v4 }
 0x681   :  { %v14339_v53 = vpop.f32.mrf.mxu1  ;;  %v11194_v25 = vpop.f32.mrf.mxu0 }
 0x682   :  { %14444 = vst [vmem:[#allocation27_spill] sm:$0xff] %v14339_v53  ;;  %v8471_v53 = vadd.f32 %v11137_v8, %v11109_v6 }
 0x683   :  { %v11195_v11 = vpop.f32.mrf.mxu0 }
 0x684   :  { %v8616_v37 = vadd.f32 %v11165_v43, %v8471_v53  ;;  %v11196_v4 = vadd.f32 %v11195_v11, %v11194_v25 }
 0x685   :  { %v14341_v51 = vpop.f32.mrf.mxu0 }
 0x686   :  { %14445 = vst [vmem:[#allocation29_spill] sm:$0xff] %v14341_v51  ;;  %v11162_v51 = vadd.f32 %v11161_v14, %v11160_v63 }
 0x687   :  { %v14343_v10 = vpop.f32.mrf.mxu0  ;;  %v14454_v9 = vld [vmem:[#allocation25_spill] sm:$0xff] }
 0x688   :  { %14446 = vst [vmem:[#allocation26_spill] sm:$0xff] %v14343_v10  ;;  %v11143_v10 = vadd.f32 %v11142_v30, %v11141_v45  ;;  %v8826_v30 = vadd.f32 %v11193_v36, %v8616_v37 }
 0x689   :  { %v14455_v26 = vld [vmem:[#allocation27_spill] sm:$0xff] }
 0x68a   :  { %v8479_v14 = vadd.f32 %v11143_v10, %v11115_v12  ;;  %v11171_v50 = vadd.f32 %v14455_v26, %v14454_v9 }
 0x68f   :  { %v14457_v11 = vld [vmem:[#allocation26_spill] sm:$0xff] }
 0x693   :  { %v11216_v23 = vpop.f32.mrf.mxu1 }
 0x695   :  { %v11217_v62 = vpop.f32.mrf.mxu1 }
 0x697   :  { %v11219_v39 = vpop.f32.mrf.mxu1 }
 0x699   :  { %v11220_v29 = vpop.f32.mrf.mxu1  ;;  %v11244_v61 = vpop.f32.mrf.mxu0 }
 0x69a   :  { %v11221_v55 = vadd.f32 %v11220_v29, %v11219_v39 }
 0x69b   :  { %v11222_v5 = vpop.f32.mrf.mxu1  ;;  %v11245_v16 = vpop.f32.mrf.mxu0 }
 0x69c   :  { %v11246_v3 = vadd.f32 %v11245_v16, %v11244_v61 }
 0x69d   :  { %v11223_v28 = vpop.f32.mrf.mxu1  ;;  %v11247_v48 = vpop.f32.mrf.mxu0 }
 0x69e   :  { %v11224_v39 = vadd.f32 %v11223_v28, %v11222_v5 }
 0x69f   :  { %v14345_v41 = vpop.f32.mrf.mxu1  ;;  %v11248_v34 = vpop.f32.mrf.mxu0 }
 0x6a0   :  { %14447 = vst [vmem:[#allocation30_spill] sm:$0xff] %v14345_v41  ;;  %v11249_v57 = vadd.f32 %v11248_v34, %v11247_v48  ;;  %v11140_v41 = vadd.f32 %v11139_v15, %v11138_v56  ;;  %v11218_v48 = vadd.f32 %v11217_v62, %v11216_v23 }
 0x6a1   :  { %v14347_v17 = vpop.f32.mrf.mxu1  ;;  %v11250_v59 = vpop.f32.mrf.mxu0 }
 0x6a2   :  { %14448 = vst [vmem:[#allocation28_spill] sm:$0xff] %v14347_v17  ;;  %v8468_v17 = vadd.f32 %v11134_v7, %v14327_v33  ;;  %v9193_v33 = vadd.f32 %v11249_v57, %v11221_v55  ;;  %v9190_v42 = vadd.f32 %v11246_v3, %v11218_v48  ;;  %v14456_v3 = vld [vmem:[#allocation29_spill] sm:$0xff] }
 0x6a3   :  { %v11251_v31 = vpop.f32.mrf.mxu0  ;;  %v11199_v5 = vadd.f32 %v14457_v11, %v14456_v3  ;;  %v9926_v11 = vld [vmem:[#allocation4] sm:$0xff] }
 0x6a4   :  { %v11252_v56 = vadd.f32 %v11251_v31, %v11250_v59  ;;  %v8613_v45 = vadd.f32 %v11162_v51, %v8468_v17  ;;  %v9205_v53 = vadd.f32 %v9193_v33, %v8826_v30 }
 0x6a5   :  { %v11253_v32 = vpop.f32.mrf.mxu0 }
 0x6a6   :  { %v8825_v16 = vadd.f32 %v11190_v40, %v8613_v45  ;;  %v9198_v54 = vadd.f32 %v11252_v56, %v11224_v39 }
 0x6a7   :  { %v11254_v47 = vpop.f32.mrf.mxu0  ;;  %v14458_v28 = vld [vmem:[#allocation30_spill] sm:$0xff] }
 0x6a8   :  { %v11255_v55 = vadd.f32 %v11254_v47, %v11253_v32  ;;  %v9204_v59 = vadd.f32 %v9190_v42, %v8825_v16  ;;  %v8624_v47 = vadd.f32 %v11171_v50, %v8479_v14 }
 0x6aa   :  { %v8828_v43 = vadd.f32 %v11199_v5, %v8624_v47  ;;  %v9927_v5 = vld [vmem:[#allocation4 + $0x8] sm:$0xff] }
 0x6b3   :  { %v11272_v22 = vpop.f32.mrf.mxu1 }
 0x6b5   :  { %v11273_v24 = vpop.f32.mrf.mxu1 }
 0x6b6   :  { %v11274_v62 = vadd.f32 %v11273_v24, %v11272_v22 }
 0x6b7   :  { %v11275_v1 = vpop.f32.mrf.mxu1 }
 0x6b9   :  { %v11276_v2 = vpop.f32.mrf.mxu1  ;;  %v11300_v20 = vpop.f32.mrf.mxu0 }
 0x6bb   :  { %v11278_v52 = vpop.f32.mrf.mxu1  ;;  %v11301_v60 = vpop.f32.mrf.mxu0 }
 0x6bc   :  { %v11302_v10 = vadd.f32 %v11301_v60, %v11300_v20  ;;  %v9510_v20 = vadd.f32 %v11274_v62, %v9204_v59  ;;  %v9931_v59 = vmul.f32 0.2, %v9927_v5 }
 0x6bd   :  { %v11279_v18 = vpop.f32.mrf.mxu1  ;;  %v11303_v44 = vpop.f32.mrf.mxu0 }
 0x6bf   :  { %v14349_v13 = vpop.f32.mrf.mxu1  ;;  %v11304_v38 = vpop.f32.mrf.mxu0 }
 0x6c0   :  { %14449 = vst [vmem:[#allocation31_spill] sm:$0xff] %v14349_v13  ;;  %v14450_v13 = vld [vmem:[#allocation33_spill] sm:$0xff]  ;;  %v11305_v51 = vadd.f32 %v11304_v38, %v11303_v44 }
 0x6c1   :  { %v11282_v21 = vpop.f32.mrf.mxu1  ;;  %v11306_v49 = vpop.f32.mrf.mxu0  ;;  %v11112_v58 = vadd.f32 %v14451_v0, %v14450_v13  ;;  %v11277_v13 = vadd.f32 %v11276_v2, %v11275_v1  ;;  %v11280_v2 = vadd.f32 %v11279_v18, %v11278_v52 }
 0x6c3   :  { %v8476_v63 = vadd.f32 %v11140_v41, %v11112_v58  ;;  %v11307_v29 = vpop.f32.mrf.mxu0  ;;  %v14459_v41 = vld [vmem:[#allocation28_spill] sm:$0xff]  ;;  %v9511_v1 = vadd.f32 %v11277_v13, %v9205_v53 }
 0x6c4   :  { %v11227_v17 = vadd.f32 %v14459_v41, %v14458_v28  ;;  %v11308_v60 = vadd.f32 %v11307_v29, %v11306_v49  ;;  %v9928_v28 = vld [vmem:[#allocation4 + $0x10] sm:$0xff]  ;;  %v9929_v41 = vld [vmem:[#allocation4 + $0x18] sm:$0xff] }
 0x6c5   :  { %v8621_v34 = vadd.f32 %v11168_v35, %v8476_v63 }
 0x6c6   :  { %v9201_v6 = vadd.f32 %v11255_v55, %v11227_v17  ;;  %v9930_v17 = vmul.f32 0.2, %v9926_v11 }
 0x6c7   :  { %v8827_v25 = vadd.f32 %v11196_v4, %v8621_v34  ;;  %v14460_v57 = vld [vmem:[#allocation31_spill] sm:$0xff] }
 0x6c8   :  { %v11283_v0 = vadd.f32 %v11282_v21, %v14460_v57  ;;  %v9207_v35 = vadd.f32 %v9201_v6, %v8828_v43 }
 0x6c9   :  { %v9206_v22 = vadd.f32 %v9198_v54, %v8827_v25 }
 0x6ca   :  { %v9513_v56 = vadd.f32 %v11283_v0, %v9207_v35 }
 0x6cb   :  { %v9512_v46 = vadd.f32 %v11280_v2, %v9206_v22 }
 0x6d3   :  { %v11328_v19 = vpop.f32.mrf.mxu1 }
 0x6d5   :  { %v11329_v15 = vpop.f32.mrf.mxu1 }
 0x6d6   :  { %v11330_v7 = vadd.f32 %v11329_v15, %v11328_v19  ;;  %v11309_v19 = vpop.f32.mrf.mxu0 }
 0x6d7   :  { %v11331_v61 = vpop.f32.mrf.mxu1 }
 0x6d8   :  { %v9871_v8 = vadd.f32 %v11330_v7, %v11302_v10  ;;  %v11310_v58 = vpop.f32.mrf.mxu0 }
 0x6d9   :  { %v11332_v23 = vpop.f32.mrf.mxu1  ;;  %v11311_v18 = vadd.f32 %v11310_v58, %v11309_v19  ;;  %v9932_v19 = vmul.f32 0.2, %v9928_v28 }
 0x6da   :  { %v11333_v36 = vadd.f32 %v11332_v23, %v11331_v61  ;;  %v9885_v12 = vadd.f32 %v9871_v8, %v9510_v20 }
 0x6db   :  { %v11334_v31 = vpop.f32.mrf.mxu1 }
 0x6dc   :  { %v9874_v32 = vadd.f32 %v11333_v36, %v11305_v51  ;;  %v9899_v15 = vmul.f32 %v9885_v12, %v9885_v12 }
 0x6dd   :  { %v11335_v24 = vpop.f32.mrf.mxu1 }
 0x6de   :  { %v9886_v44 = vadd.f32 %v9874_v32, %v9511_v1  ;;  %v11336_v38 = vadd.f32 %v11335_v24, %v11334_v31  ;;  %v9933_v31 = vmul.f32 0.2, %v9929_v41 }
 0x6df   :  { %v11337_v27 = vpop.f32.mrf.mxu1 }
 0x6e0   :  { %v9879_v40 = vadd.f32 %v11336_v38, %v11308_v60  ;;  %v9900_v37 = vmul.f32 %v9886_v44, %v9886_v44  ;;  %v9889_v63 = vadd.f32 %v9886_v44, %v9885_v12 }
 0x6e1   :  { %v11338_v52 = vpop.f32.mrf.mxu1 }
 0x6e2   :  { %v9887_v48 = vadd.f32 %v9879_v40, %v9512_v46  ;;  %v11339_v33 = vadd.f32 %v11338_v52, %v11337_v27  ;;  %v9903_v45 = vadd.f32 %v9900_v37, %v9899_v15 }
 0x6e4   :  { %v9901_v49 = vmul.f32 %v9887_v48, %v9887_v48  ;;  %v9882_v14 = vadd.f32 %v11339_v33, %v11311_v18  ;;  %v9890_v30 = vadd.f32 %v9889_v63, %v9887_v48 }
 0x6e6   :  { %v9888_v4 = vadd.f32 %v9882_v14, %v9513_v56  ;;  %v9904_v21 = vadd.f32 %v9903_v45, %v9901_v49 }
 0x6e8   :  { %v9891_v42 = vadd.f32 %v9890_v30, %v9888_v4  ;;  %v9902_v39 = vmul.f32 %v9888_v4, %v9888_v4 }
 0x6ea   :  { %v9892_v29 = vrot.slane %v9891_v42, 4  ;;  %v9905_v61 = vadd.f32 %v9904_v21, %v9902_v39 }
 0x6ec   :  { %v9893_v16 = vadd.f32 %v9892_v29, %v9891_v42  ;;  %v9906_v34 = vrot.slane %v9905_v61, 4 }
 0x6ee   :  { %v9894_v13 = vrot.slane %v9893_v16, 2  ;;  %v9907_v7 = vadd.f32 %v9906_v34, %v9905_v61 }
 0x6f0   :  { %v9895_v9 = vadd.f32 %v9894_v13, %v9893_v16  ;;  %v9908_v26 = vrot.slane %v9907_v7, 2 }
 0x6f2   :  { %v9896_v50 = vrot.slane %v9895_v9, 1  ;;  %v9909_v54 = vadd.f32 %v9908_v26, %v9907_v7 }
 0x6f4   :  { %v9897_v55 = vadd.f32 %v9896_v50, %v9895_v9  ;;  %v9910_v53 = vrot.slane %v9909_v54, 1 }
 0x6f6   :  { %v9898_v23 = vmul.f32 0.03125, %v9897_v55  ;;  %v9911_v62 = vadd.f32 %v9910_v53, %v9909_v54 }
 0x6f8   :  { %v9912_v10 = vmul.f32 0.03125, %v9911_v62  ;;  %v9913_v51 = vmul.f32 %v9898_v23, %v9898_v23  ;;  %v9919_v1 = vsub.f32 %v9888_v4, %v9898_v23  ;;  %v9916_v2 = vsub.f32 %v9885_v12, %v9898_v23 }
 0x6f9   :  { %v9917_v8 = vsub.f32 %v9886_v44, %v9898_v23  ;;  %v9918_v32 = vsub.f32 %v9887_v48, %v9898_v23 }
 0x6fa   :  { %v9914_v36 = vsub.f32 %v9912_v10, %v9913_v51 }
 0x6fc   :  { %v9915_v25 = vmax.f32 %v9914_v36, 0.0 }
 0x6fe   :  { %v9920_v3 = vadd.f32 1e-05, %v9915_v25 }
 0x700   :  { %12733 = vrsqrt.f32 %v9920_v3 }
 0x70d   :  { %v12734_v47 = vpop.eup %12733 }
 0x70e   :  { %v9925_v6 = vmul.f32 %v12734_v47, %v9919_v1  ;;  %v9922_v22 = vmul.f32 %v12734_v47, %v9916_v2  ;;  %v9923_v24 = vmul.f32 %v12734_v47, %v9917_v8  ;;  %v9924_v20 = vmul.f32 %v12734_v47, %v9918_v32 }
 0x710   :  { %v9934_v60 = vadd.f32 %v9930_v17, %v9922_v22  ;;  %v9935_v38 = vadd.f32 %v9931_v59, %v9923_v24  ;;  %v9936_v43 = vadd.f32 %v9932_v19, %v9924_v20  ;;  %v9937_v57 = vadd.f32 %v9933_v31, %v9925_v6 }
 0x712   :  { %v9938_v0 = vmax.f32 %v9934_v60, 0.0  ;;  %v9939_v58 = vmax.f32 %v9935_v38, 0.0  ;;  %v9940_v27 = vmax.f32 %v9936_v43, 0.0  ;;  %v9941_v46 = vmax.f32 %v9937_v57, 0.0 }
 0x714   :  { %9942 = vst [vmem:[#allocation16] sm:$0xff] %v9938_v0  ;;  %9943 = vst [vmem:[#allocation16 + $0x8] sm:$0xff] %v9939_v58 }
 0x715   :  { %9944 = vst [vmem:[#allocation16 + $0x10] sm:$0xff] %v9940_v27  ;;  %9945 = vst [vmem:[#allocation16 + $0x18] sm:$0xff] %v9941_v46 }
 0x716   :  { %12910 = shalt.err (!%p12907_p11)
}
 0x717   :  { %9957 = dma.vmem_to_hbm [thread:$0]  %s9952_s6, 512, %s14376_s7, [#allocation6], %s12931_s29, %s12931_s29, %s12932_s30  }
 0x718   :  { %12927 = dma.done.wait [#allocation6], 512  }
 0x719   :  { %12928 = vsyncadd [#allocation6], 4294966784 }
 0x71a   :  { %9961 = vsyncpa [#allocation5], 1 }
 0x71b   :  { %9962 = vsyncpa [#allocation8], 1 }
 0x71c   :  { %9963 = vsyncpa [#allocation11], 1 }
 0x71d   :  { %9964 = vsyncpa [#allocation14], 1 }
 0x71e   :  { %9965 = vsyncpa [#allocation6], 1 }

</bundles_post_ra>
